<compile_context>
chip_gen: v5e
topology: v5e:2x2
jax: 0.10.0
libtpu: 0.0.40
codegen_flags: <defaults>
</compile_context>

<pallas_src>
import functools

import numpy as np

import jax
import jax.numpy as jnp
from jax.experimental import pallas as pl
from jax.experimental.pallas import tpu as pltpu


def _round_up(x, m):
    return ((x + m - 1) // m) * m


def _row_block(n, target):
    """Row block: multiple of 8, <= target, aiming for >= 4 grid steps
    (2 TensorCores on v7x x >=2 pipeline stages)."""
    n8 = _round_up(n, 8)
    quarter = _round_up(max(1, -(-n // 4)), 8)
    return max(8, min(target, n8, quarter))


def _cparams():
    return pltpu.CompilerParams(
        dimension_semantics=("parallel",),
        vmem_limit_bytes=64 * 1024 * 1024,
    )


# ----------------------------- Pallas kernels ------------------------------

def _norm1_v_attn_kernel(x_ref, g_ref, b_ref, vw_ref, aw_ref, ab_ref,
                         v_out_ref, a_out_ref, *, eps):
    # Fused LayerNorm + two linears; x is read from HBM exactly once.
    x = x_ref[...].astype(jnp.float32)
    mu = jnp.mean(x, axis=-1, keepdims=True)
    var = jnp.mean(jnp.square(x - mu), axis=-1, keepdims=True)
    xn = (x - mu) * jax.lax.rsqrt(var + eps) * g_ref[...] + b_ref[...]
    xn_b = xn.astype(jnp.bfloat16)                       # bf16 operands for the MXU
    v_out_ref[...] = jnp.dot(
        xn_b, vw_ref[...], preferred_element_type=jnp.float32).astype(v_out_ref.dtype)
    a_out_ref[...] = (jnp.dot(xn_b, aw_ref[...], preferred_element_type=jnp.float32)
                      + ab_ref[...]).astype(a_out_ref.dtype)


def norm1_v_attn(x2d, gamma, beta, v_w, attn_w, attn_b, *, eps=1e-5, block_rows=512):
    n, c = x2d.shape
    a_dim = attn_w.shape[1]          # k2 * G, multiple of 128 -> lane-dense store
    br = _row_block(n, block_rows)
    return pl.pallas_call(
        functools.partial(_norm1_v_attn_kernel, eps=eps),
        out_shape=(jax.ShapeDtypeStruct((n, c), x2d.dtype),
                   jax.ShapeDtypeStruct((n, a_dim), x2d.dtype)),
        grid=(pl.cdiv(n, br),),
        in_specs=[
            pl.BlockSpec((br, c), lambda i: (i, 0)),
            pl.BlockSpec((1, c), lambda i: (0, 0)),
            pl.BlockSpec((1, c), lambda i: (0, 0)),
            pl.BlockSpec((c, c), lambda i: (0, 0)),
            pl.BlockSpec((c, a_dim), lambda i: (0, 0)),
            pl.BlockSpec((1, a_dim), lambda i: (0, 0)),
        ],
        out_specs=[
            pl.BlockSpec((br, c), lambda i: (i, 0)),
            pl.BlockSpec((br, a_dim), lambda i: (i, 0)),
        ],
        compiler_params=_cparams(),
    )(x2d, gamma.reshape(1, c), beta.reshape(1, c), v_w, attn_w,
      attn_b.reshape(1, a_dim))


def _outlook_core_kernel(a_ref, v_ref, e_ref, o_ref, *, scale, k2, cdim):
    # a_ref: (br, k2, G)   attention logits, j on sublanes, lane order g = h*k2 + i
    # v_ref: (k2, br, C)   unfolded v, patch index j on the leading (untiled) axis
    # e_ref: (G, k2*C)     0/1 head->channel expansion matrix (bf16)
    # o_ref: (k2, br, C)   output cols, patch index i on the leading axis
    logits = a_ref[...].astype(jnp.float32) * scale
    m = jnp.max(logits, axis=1, keepdims=True)           # softmax over j (axis=1)
    ex = jnp.exp(logits - m)
    denom = jnp.sum(ex, axis=1, keepdims=True)
    p = (ex * pl.reciprocal(denom, approx=False)).astype(jnp.bfloat16)
    emat = e_ref[...]
    acc = [None] * k2
    for j in range(k2):                                  # static, unrolled (9)
        # Head->channel expansion on the (otherwise idle) MXU.  Each E column has
        # exactly one 1, so pe[n, i*C + c] == p[n, j, head(c)*k2 + i] exactly.
        pe = jnp.dot(p[:, j, :], emat, preferred_element_type=jnp.float32)
        vj = v_ref[j].astype(jnp.float32)                # (br, C) dense slab
        for i in range(k2):                              # 9 full-lane FMAs per j
            contrib = pe[:, i * cdim:(i + 1) * cdim] * vj
            acc[i] = contrib if acc[i] is None else acc[i] + contrib
    for i in range(k2):
        o_ref[i] = acc[i].astype(o_ref.dtype)            # dense (br, C) stores


def outlook_core(attn3d, v_unf, expand, scale, *, block_rows=128):
    # block_rows=128 keeps the per-step VMEM ~16-18 MiB at production VOLO sizes,
    # which fits the v7x 64 MiB VMEM (and v5e's smaller scoped default) comfortably.
    n, k2, g = attn3d.shape
    c = v_unf.shape[-1]
    kc = expand.shape[1]
    br = _row_block(n, block_rows)
    return pl.pallas_call(
        functools.partial(_outlook_core_kernel, scale=scale, k2=k2, cdim=c),
        out_shape=jax.ShapeDtypeStruct((k2, n, c), v_unf.dtype),
        grid=(pl.cdiv(n, br),),
        in_specs=[
            pl.BlockSpec((br, k2, g), lambda i: (i, 0, 0)),
            pl.BlockSpec((k2, br, c), lambda i: (0, i, 0)),
            pl.BlockSpec((g, kc), lambda i: (0, 0)),
        ],
        out_specs=pl.BlockSpec((k2, br, c), lambda i: (0, i, 0)),
        compiler_params=_cparams(),
    )(attn3d, v_unf, expand)


def _proj_residual_kernel(f_ref, x_ref, w_ref, b_ref, o_ref):
    y = jnp.dot(f_ref[...].astype(jnp.bfloat16), w_ref[...],
                preferred_element_type=jnp.float32)
    o_ref[...] = (x_ref[...].astype(jnp.float32) + y + b_ref[...]).astype(o_ref.dtype)


def proj_residual(folded2d, x2d, w, b, *, block_rows=512):
    n, c = x2d.shape
    br = _row_block(n, block_rows)
    return pl.pallas_call(
        _proj_residual_kernel,
        out_shape=jax.ShapeDtypeStruct((n, c), x2d.dtype),
        grid=(pl.cdiv(n, br),),
        in_specs=[
            pl.BlockSpec((br, c), lambda i: (i, 0)),
            pl.BlockSpec((br, c), lambda i: (i, 0)),
            pl.BlockSpec((c, c), lambda i: (0, 0)),
            pl.BlockSpec((1, c), lambda i: (0, 0)),
        ],
        out_specs=pl.BlockSpec((br, c), lambda i: (i, 0)),
        compiler_params=_cparams(),
    )(folded2d, x2d, w, b.reshape(1, c))


def _norm2_mlp_residual_kernel(x_ref, g_ref, b_ref, w1_ref, b1_ref, w2_ref, b2_ref,
                               o_ref, *, eps):
    x = x_ref[...].astype(jnp.float32)
    mu = jnp.mean(x, axis=-1, keepdims=True)
    var = jnp.mean(jnp.square(x - mu), axis=-1, keepdims=True)
    xn = ((x - mu) * jax.lax.rsqrt(var + eps) * g_ref[...] + b_ref[...]).astype(jnp.bfloat16)
    h = jnp.dot(xn, w1_ref[...], preferred_element_type=jnp.float32) + b1_ref[...]
    # TODO(synk): PyTorch nn.GELU() default is the exact erf form; erf is not
    # guaranteed to lower in Mosaic, so we use the tanh approximation here.
    h = jax.nn.gelu(h, approximate=True).astype(jnp.bfloat16)
    y = jnp.dot(h, w2_ref[...], preferred_element_type=jnp.float32) + b2_ref[...]
    o_ref[...] = (x + y).astype(o_ref.dtype)


def norm2_mlp_residual(x2d, gamma, beta, w1, b1, w2, b2, *, eps=1e-5, block_rows=512):
    n, c = x2d.shape
    hidden = w1.shape[1]
    br = _row_block(n, block_rows)
    return pl.pallas_call(
        functools.partial(_norm2_mlp_residual_kernel, eps=eps),
        out_shape=jax.ShapeDtypeStruct((n, c), x2d.dtype),
        grid=(pl.cdiv(n, br),),
        in_specs=[
            pl.BlockSpec((br, c), lambda i: (i, 0)),
            pl.BlockSpec((1, c), lambda i: (0, 0)),
            pl.BlockSpec((1, c), lambda i: (0, 0)),
            pl.BlockSpec((c, hidden), lambda i: (0, 0)),
            pl.BlockSpec((1, hidden), lambda i: (0, 0)),
            pl.BlockSpec((hidden, c), lambda i: (0, 0)),
            pl.BlockSpec((1, c), lambda i: (0, 0)),
        ],
        out_specs=pl.BlockSpec((br, c), lambda i: (i, 0)),
        compiler_params=_cparams(),
    )(x2d, gamma.reshape(1, c), beta.reshape(1, c), w1, b1.reshape(1, hidden),
      w2, b2.reshape(1, c))


# ------------------------------- JAX glue -----------------------------------
# TODO(synk): the unfold/fold pair is the remaining 9x HBM traffic; fuse it into
# the core kernel via halo DMA over image row strips.

def unfold_nhwc(v, k, pad, stride):
    """v: (B,H,W,C) -> (k*k, B*h*w, C); patch index kk = ki*k + kj (matches nn.Unfold)."""
    B, H, W, C = v.shape
    h = (H + 2 * pad - k) // stride + 1
    w = (W + 2 * pad - k) // stride + 1
    vp = jnp.pad(v, ((0, 0), (pad, pad), (pad, pad), (0, 0)))
    patches = []
    for ki in range(k):
        for kj in range(k):
            patches.append(jax.lax.slice(
                vp, (0, ki, kj, 0),
                (B, ki + (h - 1) * stride + 1, kj + (w - 1) * stride + 1, C),
                (1, stride, stride, 1)))
    return jnp.stack(patches, axis=0).reshape(k * k, B * h * w, C), h, w


def _shift_into(a, dy, dx, H, W):
    """a: (B,h,w,C) -> (B,H,W,C) with out[y,x] = a[y-dy, x-dx], zeros outside."""
    Bdim, h, w, C = a.shape
    top, bot = max(dy, 0), max(H - (h + dy), 0)
    lft, rgt = max(dx, 0), max(W - (w + dx), 0)
    ap = jnp.pad(a, ((0, 0), (top, bot), (lft, rgt), (0, 0)))
    y0, x0 = max(-dy, 0), max(-dx, 0)
    return jax.lax.slice(ap, (0, y0, x0, 0), (Bdim, y0 + H, x0 + W, C))


def fold_nhwc(cols, H, W, k, pad, stride):
    """cols: (k*k, B, h, w, C) -> (B, H, W, C) overlap-add (matches F.fold, stride=1).

    Functional zero-padded-shift sum: XLA fuses it into ~9 reads + 1 write instead
    of nine scatter-add round-trips."""
    out = None
    for ki in range(k):
        for kj in range(k):
            c = _shift_into(cols[ki * k + kj], ki - pad, kj - pad, H, W)
            out = c if out is None else out + c
    return out


# ------------------------------ Outlooker -----------------------------------

def init_params(key, dim, num_heads, kernel_size, mlp_ratio):
    """PyTorch-layout parameters (attn columns ordered (h, i, j), f32 weights)."""
    k2 = kernel_size ** 2
    hidden = int(dim * mlp_ratio)
    keys = jax.random.split(key, 13)

    def lin(kk, cin, cout):
        return 0.02 * jax.random.normal(kk, (cin, cout), jnp.float32)

    return {
        "norm1_g": 1.0 + 0.1 * jax.random.normal(keys[0], (dim,), jnp.float32),
        "norm1_b": 0.1 * jax.random.normal(keys[1], (dim,), jnp.float32),
        "v_w": lin(keys[2], dim, dim),                             # qkv_bias=False
        "attn_w": lin(keys[3], dim, k2 * k2 * num_heads),
        "attn_b": 0.02 * jax.random.normal(keys[4], (k2 * k2 * num_heads,), jnp.float32),
        "proj_w": lin(keys[5], dim, dim),
        "proj_b": 0.02 * jax.random.normal(keys[6], (dim,), jnp.float32),
        "norm2_g": 1.0 + 0.1 * jax.random.normal(keys[7], (dim,), jnp.float32),
        "norm2_b": 0.1 * jax.random.normal(keys[8], (dim,), jnp.float32),
        "fc1_w": lin(keys[9], dim, hidden),
        "fc1_b": 0.02 * jax.random.normal(keys[10], (hidden,), jnp.float32),
        "fc2_w": lin(keys[11], hidden, dim),
        "fc2_b": 0.02 * jax.random.normal(keys[12], (dim,), jnp.float32),
    }


def prepare_params(p, dim, num_heads, kernel_size):
    """One-time (offline, free) layout transform to the kernel-friendly format:
      * attn_w / attn_b columns permuted from PyTorch order (h, i, j) to j-major
        (j, h*k2+i), each j-group zero-padded to a multiple of 128 lanes.
      * 0/1 head->channel expansion matrix for the outlook core's MXU expansion.
      * matmul weights cast to bf16 (accumulation stays f32 in-kernel)."""
    k2 = kernel_size ** 2
    hd = dim // num_heads
    g = _round_up(num_heads * k2, 128)

    aw = p["attn_w"].reshape(dim, num_heads, k2, k2)               # (dim, h, i, j)
    aw = jnp.transpose(aw, (0, 3, 1, 2)).reshape(dim, k2, num_heads * k2)
    aw = jnp.pad(aw, ((0, 0), (0, 0), (0, g - num_heads * k2))).reshape(dim, k2 * g)
    ab = p["attn_b"].reshape(num_heads, k2, k2)
    ab = jnp.transpose(ab, (2, 0, 1)).reshape(k2, num_heads * k2)
    ab = jnp.pad(ab, ((0, 0), (0, g - num_heads * k2))).reshape(k2 * g)

    expand = np.zeros((g, k2 * dim), np.float32)
    for h in range(num_heads):
        for i in range(k2):
            expand[h * k2 + i, i * dim + h * hd: i * dim + (h + 1) * hd] = 1.0

    q = dict(p)
    q["attn_w"] = aw.astype(jnp.bfloat16)
    q["attn_b"] = ab
    q["v_w"] = p["v_w"].astype(jnp.bfloat16)
    q["proj_w"] = p["proj_w"].astype(jnp.bfloat16)
    q["fc1_w"] = p["fc1_w"].astype(jnp.bfloat16)
    q["fc2_w"] = p["fc2_w"].astype(jnp.bfloat16)
    q["expand"] = jnp.asarray(expand, jnp.bfloat16)
    return q


def outlooker_forward(x, params, *, num_heads, kernel_size, padding, stride=1):
    # TODO(synk): stride > 1 (AvgPool on the attention logits + strided unfold/fold)
    # not implemented; the Outlooker default stride=1 makes the pool an identity.
    assert stride == 1
    B, H, W, C = x.shape
    k = kernel_size
    k2 = k * k
    hd = C // num_heads
    scale = hd ** -0.5
    N = B * H * W
    G = params["attn_w"].shape[1] // k2        # padded per-j group width (x128)

    x2d = x.reshape(N, C)

    # --- x + OutlookAttention(norm1(x)) ---
    v2d, attn2d = norm1_v_attn(x2d, params["norm1_g"], params["norm1_b"],
                               params["v_w"], params["attn_w"], params["attn_b"])

    v_unf, h_o, w_o = unfold_nhwc(v2d.reshape(B, H, W, C), k, padding, stride)  # (k2,N,C)
    attn3d = attn2d.reshape(N, k2, G)          # free view: j-major, lane-dense groups

    cols = outlook_core(attn3d, v_unf, params["expand"], scale)     # (k2, N, C)
    folded = fold_nhwc(cols.reshape(k2, B, h_o, w_o, C), H, W, k, padding, stride)

    x2d = proj_residual(folded.reshape(N, C), x2d,
                        params["proj_w"], params["proj_b"])          # x + proj(folded)

    # --- x + Mlp(norm2(x)) ---
    out2d = norm2_mlp_residual(x2d, params["norm2_g"], params["norm2_b"],
                               params["fc1_w"], params["fc1_b"],
                               params["fc2_w"], params["fc2_b"])
    return out2d.reshape(B, H, W, C)


if __name__ == "__main__":
    B, H, W, C = 2, 8, 8, 32
    num_heads, kernel_size, padding, stride = 2, 3, 1, 1
    mlp_ratio = 3.0

    key = jax.random.PRNGKey(0)
    kx, kp = jax.random.split(key)
    x = jax.random.normal(kx, (B, H, W, C), jnp.float32)
    raw_params = init_params(kp, C, num_heads, kernel_size, mlp_ratio)
    params = prepare_params(raw_params, C, num_heads, kernel_size)

    fwd = jax.jit(functools.partial(
        outlooker_forward, num_heads=num_heads, kernel_size=kernel_size,
        padding=padding, stride=stride))
    y = fwd(x, params)
    jax.block_until_ready(y)
    assert y.shape == (B, H, W, C) and y.dtype == jnp.float32
    assert bool(jnp.all(jnp.isfinite(y)))
    print("KERNEL_OK")
</pallas_src>

<mosaic_0001>
module attributes {stable_mosaic.version = 11 : i64} {
  func.func @_norm1_v_attn_kernel(%arg0: i32, %arg1: memref<32x32xf32, #tpu.memory_space<vmem>>, %arg2: memref<1x32xf32, #tpu.memory_space<vmem>>, %arg3: memref<1x32xf32, #tpu.memory_space<vmem>>, %arg4: memref<32x32xbf16, #tpu.memory_space<vmem>>, %arg5: memref<32x1152xbf16, #tpu.memory_space<vmem>>, %arg6: memref<1x1152xf32, #tpu.memory_space<vmem>>, %arg7: memref<32x32xf32, #tpu.memory_space<vmem>>, %arg8: memref<32x1152xf32, #tpu.memory_space<vmem>>) attributes {dimension_semantics = [#tpu.dimension_semantics<parallel>], iteration_bounds = array<i64: 4>, scalar_prefetch = 0 : i64, scratch_operands = 0 : i64, tpu.core_type = #tpu.core_type<tc>, window_params = [{transform_indices = @transform_0, window_bounds = array<i64: 32, 32>}, {pipeline_mode = #tpu.pipeline_mode<synchronous>, transform_indices = @transform_1, window_bounds = array<i64: 1, 32>}, {pipeline_mode = #tpu.pipeline_mode<synchronous>, transform_indices = @transform_2, window_bounds = array<i64: 1, 32>}, {pipeline_mode = #tpu.pipeline_mode<synchronous>, transform_indices = @transform_3, window_bounds = array<i64: 32, 32>}, {pipeline_mode = #tpu.pipeline_mode<synchronous>, transform_indices = @transform_4, window_bounds = array<i64: 32, 1152>}, {pipeline_mode = #tpu.pipeline_mode<synchronous>, transform_indices = @transform_5, window_bounds = array<i64: 1, 1152>}, {transform_indices = @transform_6, window_bounds = array<i64: 32, 32>}, {transform_indices = @transform_7, window_bounds = array<i64: 32, 1152>}]} {
    %c0 = arith.constant 0 : index
    %c0_0 = arith.constant 0 : index
    %0 = vector.load %arg1[%c0, %c0_0] : memref<32x32xf32, #tpu.memory_space<vmem>>, vector<32x32xf32>
    %cst = arith.constant dense<0.000000e+00> : vector<32xf32>
    %1 = vector.multi_reduction <add>, %0, %cst [1] : vector<32x32xf32> to vector<32xf32>
    %2 = vector.shape_cast %1 : vector<32xf32> to vector<32x1xf32>
    %cst_1 = arith.constant 3.200000e+01 : f32
    %3 = vector.broadcast %cst_1 : f32 to vector<32x1xf32>
    %4 = arith.divf %2, %3 : vector<32x1xf32>
    %5 = vector.broadcast %4 : vector<32x1xf32> to vector<32x32xf32>
    %6 = arith.subf %0, %5 : vector<32x32xf32>
    %7 = arith.mulf %6, %6 : vector<32x32xf32>
    %cst_2 = arith.constant dense<0.000000e+00> : vector<32xf32>
    %8 = vector.multi_reduction <add>, %7, %cst_2 [1] : vector<32x32xf32> to vector<32xf32>
    %9 = vector.shape_cast %8 : vector<32xf32> to vector<32x1xf32>
    %cst_3 = arith.constant 3.200000e+01 : f32
    %10 = vector.broadcast %cst_3 : f32 to vector<32x1xf32>
    %11 = arith.divf %9, %10 : vector<32x1xf32>
    %12 = vector.broadcast %4 : vector<32x1xf32> to vector<32x32xf32>
    %13 = arith.subf %0, %12 : vector<32x32xf32>
    %cst_4 = arith.constant 9.99999974E-6 : f32
    %14 = vector.broadcast %cst_4 : f32 to vector<32x1xf32>
    %15 = arith.addf %11, %14 : vector<32x1xf32>
    %16 = math.rsqrt %15 : vector<32x1xf32>
    %17 = vector.broadcast %16 : vector<32x1xf32> to vector<32x32xf32>
    %18 = arith.mulf %13, %17 : vector<32x32xf32>
    %c0_5 = arith.constant 0 : index
    %c0_6 = arith.constant 0 : index
    %19 = vector.load %arg2[%c0_5, %c0_6] : memref<1x32xf32, #tpu.memory_space<vmem>>, vector<1x32xf32>
    %20 = vector.broadcast %19 : vector<1x32xf32> to vector<32x32xf32>
    %21 = arith.mulf %18, %20 : vector<32x32xf32>
    %c0_7 = arith.constant 0 : index
    %c0_8 = arith.constant 0 : index
    %22 = vector.load %arg3[%c0_7, %c0_8] : memref<1x32xf32, #tpu.memory_space<vmem>>, vector<1x32xf32>
    %23 = vector.broadcast %22 : vector<1x32xf32> to vector<32x32xf32>
    %24 = arith.addf %21, %23 : vector<32x32xf32>
    %25 = arith.truncf %24 : vector<32x32xf32> to vector<32x32xbf16>
    %c0_9 = arith.constant 0 : index
    %c0_10 = arith.constant 0 : index
    %26 = vector.load %arg4[%c0_9, %c0_10] : memref<32x32xbf16, #tpu.memory_space<vmem>>, vector<32x32xbf16>
    %cst_11 = arith.constant dense<0.000000e+00> : vector<32x32xf32>
    %27 = tpu.matmul %25, %26, %cst_11 {dimension_numbers = #tpu.dot_dimension_numbers<[1], [0], [0], [1], [0, 0, 1, 1], [], []>} : vector<32x32xbf16>, vector<32x32xbf16>, vector<32x32xf32> -> vector<32x32xf32>
    %c0_12 = arith.constant 0 : index
    %c0_13 = arith.constant 0 : index
    %28 = vector.load %arg7[%c0_12, %c0_13] : memref<32x32xf32, #tpu.memory_space<vmem>>, vector<32x32xf32>
    tpu.vector_store %arg7[%c0_12, %c0_13], %27 {strides = array<i32>} : memref<32x32xf32, #tpu.memory_space<vmem>>, vector<32x32xf32>,
    %c0_14 = arith.constant 0 : index
    %c0_15 = arith.constant 0 : index
    %29 = vector.load %arg5[%c0_14, %c0_15] : memref<32x1152xbf16, #tpu.memory_space<vmem>>, vector<32x1152xbf16>
    %cst_16 = arith.constant dense<0.000000e+00> : vector<32x1152xf32>
    %30 = tpu.matmul %25, %29, %cst_16 {dimension_numbers = #tpu.dot_dimension_numbers<[1], [0], [0], [1], [0, 0, 1, 1], [], []>} : vector<32x32xbf16>, vector<32x1152xbf16>, vector<32x1152xf32> -> vector<32x1152xf32>
    %c0_17 = arith.constant 0 : index
    %c0_18 = arith.constant 0 : index
    %31 = vector.load %arg6[%c0_17, %c0_18] : memref<1x1152xf32, #tpu.memory_space<vmem>>, vector<1x1152xf32>
    %32 = vector.broadcast %31 : vector<1x1152xf32> to vector<32x1152xf32>
    %33 = arith.addf %30, %32 : vector<32x1152xf32>
    %c0_19 = arith.constant 0 : index
    %c0_20 = arith.constant 0 : index
    %34 = vector.load %arg8[%c0_19, %c0_20] : memref<32x1152xf32, #tpu.memory_space<vmem>>, vector<32x1152xf32>
    tpu.vector_store %arg8[%c0_19, %c0_20], %33 {strides = array<i32>} : memref<32x1152xf32, #tpu.memory_space<vmem>>, vector<32x1152xf32>,
    return
  }
  func.func @transform_0(%arg0: i32) -> (i32, i32) {
    %c0_i32 = arith.constant 0 : i32
    %c0_i32_0 = arith.constant 0 : i32
    return %arg0, %c0_i32 : i32, i32
  }
  func.func @transform_1(%arg0: i32) -> (i32, i32) {
    %c0_i32 = arith.constant 0 : i32
    %c0_i32_0 = arith.constant 0 : i32
    %c0_i32_1 = arith.constant 0 : i32
    return %c0_i32, %c0_i32_0 : i32, i32
  }
  func.func @transform_2(%arg0: i32) -> (i32, i32) {
    %c0_i32 = arith.constant 0 : i32
    %c0_i32_0 = arith.constant 0 : i32
    %c0_i32_1 = arith.constant 0 : i32
    return %c0_i32, %c0_i32_0 : i32, i32
  }
  func.func @transform_3(%arg0: i32) -> (i32, i32) {
    %c0_i32 = arith.constant 0 : i32
    %c0_i32_0 = arith.constant 0 : i32
    %c0_i32_1 = arith.constant 0 : i32
    return %c0_i32, %c0_i32_0 : i32, i32
  }
  func.func @transform_4(%arg0: i32) -> (i32, i32) {
    %c0_i32 = arith.constant 0 : i32
    %c0_i32_0 = arith.constant 0 : i32
    %c0_i32_1 = arith.constant 0 : i32
    return %c0_i32, %c0_i32_0 : i32, i32
  }
  func.func @transform_5(%arg0: i32) -> (i32, i32) {
    %c0_i32 = arith.constant 0 : i32
    %c0_i32_0 = arith.constant 0 : i32
    %c0_i32_1 = arith.constant 0 : i32
    return %c0_i32, %c0_i32_0 : i32, i32
  }
  func.func @transform_6(%arg0: i32) -> (i32, i32) {
    %c0_i32 = arith.constant 0 : i32
    %c0_i32_0 = arith.constant 0 : i32
    return %arg0, %c0_i32 : i32, i32
  }
  func.func @transform_7(%arg0: i32) -> (i32, i32) {
    %c0_i32 = arith.constant 0 : i32
    %c0_i32_0 = arith.constant 0 : i32
    return %arg0, %c0_i32 : i32, i32
  }
}

module attributes {stable_mosaic.version = 11 : i64} {
  func.func @_outlook_core_kernel(%arg0: i32, %arg1: memref<32x9x128xf32, #tpu.memory_space<vmem>>, %arg2: memref<9x32x32xf32, #tpu.memory_space<vmem>>, %arg3: memref<128x288xbf16, #tpu.memory_space<vmem>>, %arg4: memref<9x32x32xf32, #tpu.memory_space<vmem>>) attributes {dimension_semantics = [#tpu.dimension_semantics<parallel>], iteration_bounds = array<i64: 4>, scalar_prefetch = 0 : i64, scratch_operands = 0 : i64, tpu.core_type = #tpu.core_type<tc>, window_params = [{transform_indices = @transform_0, window_bounds = array<i64: 32, 9, 128>}, {transform_indices = @transform_1, window_bounds = array<i64: 9, 32, 32>}, {pipeline_mode = #tpu.pipeline_mode<synchronous>, transform_indices = @transform_2, window_bounds = array<i64: 128, 288>}, {transform_indices = @transform_3, window_bounds = array<i64: 9, 32, 32>}]} {
    %c0 = arith.constant 0 : index
    %c0_0 = arith.constant 0 : index
    %c0_1 = arith.constant 0 : index
    %0 = vector.load %arg1[%c0, %c0_0, %c0_1] : memref<32x9x128xf32, #tpu.memory_space<vmem>>, vector<32x9x128xf32>
    %cst = arith.constant 2.500000e-01 : f32
    %1 = vector.broadcast %cst : f32 to vector<32x9x128xf32>
    %2 = arith.mulf %0, %1 : vector<32x9x128xf32>
    %cst_2 = arith.constant dense<0xFF800000> : vector<32x128xf32>
    %3 = vector.multi_reduction <maximumf>, %2, %cst_2 [1] : vector<32x9x128xf32> to vector<32x128xf32>
    %4 = vector.shape_cast %3 : vector<32x128xf32> to vector<32x1x128xf32>
    %5 = vector.broadcast %4 : vector<32x1x128xf32> to vector<32x9x128xf32>
    %6 = arith.subf %2, %5 : vector<32x9x128xf32>
    %7 = math.exp %6 : vector<32x9x128xf32>
    %cst_3 = arith.constant dense<0.000000e+00> : vector<32x128xf32>
    %8 = vector.multi_reduction <add>, %7, %cst_3 [1] : vector<32x9x128xf32> to vector<32x128xf32>
    %9 = vector.shape_cast %8 : vector<32x128xf32> to vector<32x1x128xf32>
    %10 = tpu.reciprocal %9 : vector<32x1x128xf32> -> vector<32x1x128xf32>
    %11 = vector.broadcast %10 : vector<32x1x128xf32> to vector<32x9x128xf32>
    %12 = arith.mulf %7, %11 : vector<32x9x128xf32>
    %13 = arith.truncf %12 : vector<32x9x128xf32> to vector<32x9x128xbf16>
    %c0_4 = arith.constant 0 : index
    %c0_5 = arith.constant 0 : index
    %14 = vector.load %arg3[%c0_4, %c0_5] : memref<128x288xbf16, #tpu.memory_space<vmem>>, vector<128x288xbf16>
    %15 = vector.extract_strided_slice %13 {offsets = [0, 0, 0], sizes = [32, 1, 128], strides = [1, 1, 1]} : vector<32x9x128xbf16> to vector<32x1x128xbf16>
    %16 = vector.shape_cast %15 : vector<32x1x128xbf16> to vector<32x128xbf16>
    %cst_6 = arith.constant dense<0.000000e+00> : vector<32x288xf32>
    %17 = tpu.matmul %16, %14, %cst_6 {dimension_numbers = #tpu.dot_dimension_numbers<[1], [0], [0], [1], [0, 0, 1, 1], [], []>} : vector<32x128xbf16>, vector<128x288xbf16>, vector<32x288xf32> -> vector<32x288xf32>
    %c0_7 = arith.constant 0 : index
    %c0_8 = arith.constant 0 : index
    %c0_9 = arith.constant 0 : index
    %18 = vector.load %arg2[%c0_7, %c0_8, %c0_9] : memref<9x32x32xf32, #tpu.memory_space<vmem>>, vector<1x32x32xf32>
    %19 = vector.shape_cast %18 : vector<1x32x32xf32> to vector<32x32xf32>
    %20 = vector.extract_strided_slice %17 {offsets = [0, 0], sizes = [32, 32], strides = [1, 1]} : vector<32x288xf32> to vector<32x32xf32>
    %21 = arith.mulf %20, %19 : vector<32x32xf32>
    %22 = vector.extract_strided_slice %17 {offsets = [0, 32], sizes = [32, 32], strides = [1, 1]} : vector<32x288xf32> to vector<32x32xf32>
    %23 = arith.mulf %22, %19 : vector<32x32xf32>
    %24 = vector.extract_strided_slice %17 {offsets = [0, 64], sizes = [32, 32], strides = [1, 1]} : vector<32x288xf32> to vector<32x32xf32>
    %25 = arith.mulf %24, %19 : vector<32x32xf32>
    %26 = vector.extract_strided_slice %17 {offsets = [0, 96], sizes = [32, 32], strides = [1, 1]} : vector<32x288xf32> to vector<32x32xf32>
    %27 = arith.mulf %26, %19 : vector<32x32xf32>
    %28 = vector.extract_strided_slice %17 {offsets = [0, 128], sizes = [32, 32], strides = [1, 1]} : vector<32x288xf32> to vector<32x32xf32>
    %29 = arith.mulf %28, %19 : vector<32x32xf32>
    %30 = vector.extract_strided_slice %17 {offsets = [0, 160], sizes = [32, 32], strides = [1, 1]} : vector<32x288xf32> to vector<32x32xf32>
    %31 = arith.mulf %30, %19 : vector<32x32xf32>
    %32 = vector.extract_strided_slice %17 {offsets = [0, 192], sizes = [32, 32], strides = [1, 1]} : vector<32x288xf32> to vector<32x32xf32>
    %33 = arith.mulf %32, %19 : vector<32x32xf32>
    %34 = vector.extract_strided_slice %17 {offsets = [0, 224], sizes = [32, 32], strides = [1, 1]} : vector<32x288xf32> to vector<32x32xf32>
    %35 = arith.mulf %34, %19 : vector<32x32xf32>
    %36 = vector.extract_strided_slice %17 {offsets = [0, 256], sizes = [32, 32], strides = [1, 1]} : vector<32x288xf32> to vector<32x32xf32>
    %37 = arith.mulf %36, %19 : vector<32x32xf32>
    %38 = vector.extract_strided_slice %13 {offsets = [0, 1, 0], sizes = [32, 1, 128], strides = [1, 1, 1]} : vector<32x9x128xbf16> to vector<32x1x128xbf16>
    %39 = vector.shape_cast %38 : vector<32x1x128xbf16> to vector<32x128xbf16>
    %cst_10 = arith.constant dense<0.000000e+00> : vector<32x288xf32>
    %40 = tpu.matmul %39, %14, %cst_10 {dimension_numbers = #tpu.dot_dimension_numbers<[1], [0], [0], [1], [0, 0, 1, 1], [], []>} : vector<32x128xbf16>, vector<128x288xbf16>, vector<32x288xf32> -> vector<32x288xf32>
    %c1 = arith.constant 1 : index
    %c0_11 = arith.constant 0 : index
    %c0_12 = arith.constant 0 : index
    %41 = vector.load %arg2[%c1, %c0_11, %c0_12] : memref<9x32x32xf32, #tpu.memory_space<vmem>>, vector<1x32x32xf32>
    %42 = vector.shape_cast %41 : vector<1x32x32xf32> to vector<32x32xf32>
    %43 = vector.extract_strided_slice %40 {offsets = [0, 0], sizes = [32, 32], strides = [1, 1]} : vector<32x288xf32> to vector<32x32xf32>
    %44 = arith.mulf %43, %42 : vector<32x32xf32>
    %45 = arith.addf %21, %44 : vector<32x32xf32>
    %46 = vector.extract_strided_slice %40 {offsets = [0, 32], sizes = [32, 32], strides = [1, 1]} : vector<32x288xf32> to vector<32x32xf32>
    %47 = arith.mulf %46, %42 : vector<32x32xf32>
    %48 = arith.addf %23, %47 : vector<32x32xf32>
    %49 = vector.extract_strided_slice %40 {offsets = [0, 64], sizes = [32, 32], strides = [1, 1]} : vector<32x288xf32> to vector<32x32xf32>
    %50 = arith.mulf %49, %42 : vector<32x32xf32>
    %51 = arith.addf %25, %50 : vector<32x32xf32>
    %52 = vector.extract_strided_slice %40 {offsets = [0, 96], sizes = [32, 32], strides = [1, 1]} : vector<32x288xf32> to vector<32x32xf32>
    %53 = arith.mulf %52, %42 : vector<32x32xf32>
    %54 = arith.addf %27, %53 : vector<32x32xf32>
    %55 = vector.extract_strided_slice %40 {offsets = [0, 128], sizes = [32, 32], strides = [1, 1]} : vector<32x288xf32> to vector<32x32xf32>
    %56 = arith.mulf %55, %42 : vector<32x32xf32>
    %57 = arith.addf %29, %56 : vector<32x32xf32>
    %58 = vector.extract_strided_slice %40 {offsets = [0, 160], sizes = [32, 32], strides = [1, 1]} : vector<32x288xf32> to vector<32x32xf32>
    %59 = arith.mulf %58, %42 : vector<32x32xf32>
    %60 = arith.addf %31, %59 : vector<32x32xf32>
    %61 = vector.extract_strided_slice %40 {offsets = [0, 192], sizes = [32, 32], strides = [1, 1]} : vector<32x288xf32> to vector<32x32xf32>
    %62 = arith.mulf %61, %42 : vector<32x32xf32>
    %63 = arith.addf %33, %62 : vector<32x32xf32>
    %64 = vector.extract_strided_slice %40 {offsets = [0, 224], sizes = [32, 32], strides = [1, 1]} : vector<32x288xf32> to vector<32x32xf32>
    %65 = arith.mulf %64, %42 : vector<32x32xf32>
    %66 = arith.addf %35, %65 : vector<32x32xf32>
    %67 = vector.extract_strided_slice %40 {offsets = [0, 256], sizes = [32, 32], strides = [1, 1]} : vector<32x288xf32> to vector<32x32xf32>
    %68 = arith.mulf %67, %42 : vector<32x32xf32>
    %69 = arith.addf %37, %68 : vector<32x32xf32>
    %70 = vector.extract_strided_slice %13 {offsets = [0, 2, 0], sizes = [32, 1, 128], strides = [1, 1, 1]} : vector<32x9x128xbf16> to vector<32x1x128xbf16>
    %71 = vector.shape_cast %70 : vector<32x1x128xbf16> to vector<32x128xbf16>
    %cst_13 = arith.constant dense<0.000000e+00> : vector<32x288xf32>
    %72 = tpu.matmul %71, %14, %cst_13 {dimension_numbers = #tpu.dot_dimension_numbers<[1], [0], [0], [1], [0, 0, 1, 1], [], []>} : vector<32x128xbf16>, vector<128x288xbf16>, vector<32x288xf32> -> vector<32x288xf32>
    %c2 = arith.constant 2 : index
    %c0_14 = arith.constant 0 : index
    %c0_15 = arith.constant 0 : index
    %73 = vector.load %arg2[%c2, %c0_14, %c0_15] : memref<9x32x32xf32, #tpu.memory_space<vmem>>, vector<1x32x32xf32>
    %74 = vector.shape_cast %73 : vector<1x32x32xf32> to vector<32x32xf32>
    %75 = vector.extract_strided_slice %72 {offsets = [0, 0], sizes = [32, 32], strides = [1, 1]} : vector<32x288xf32> to vector<32x32xf32>
    %76 = arith.mulf %75, %74 : vector<32x32xf32>
    %77 = arith.addf %45, %76 : vector<32x32xf32>
    %78 = vector.extract_strided_slice %72 {offsets = [0, 32], sizes = [32, 32], strides = [1, 1]} : vector<32x288xf32> to vector<32x32xf32>
    %79 = arith.mulf %78, %74 : vector<32x32xf32>
    %80 = arith.addf %48, %79 : vector<32x32xf32>
    %81 = vector.extract_strided_slice %72 {offsets = [0, 64], sizes = [32, 32], strides = [1, 1]} : vector<32x288xf32> to vector<32x32xf32>
    %82 = arith.mulf %81, %74 : vector<32x32xf32>
    %83 = arith.addf %51, %82 : vector<32x32xf32>
    %84 = vector.extract_strided_slice %72 {offsets = [0, 96], sizes = [32, 32], strides = [1, 1]} : vector<32x288xf32> to vector<32x32xf32>
    %85 = arith.mulf %84, %74 : vector<32x32xf32>
    %86 = arith.addf %54, %85 : vector<32x32xf32>
    %87 = vector.extract_strided_slice %72 {offsets = [0, 128], sizes = [32, 32], strides = [1, 1]} : vector<32x288xf32> to vector<32x32xf32>
    %88 = arith.mulf %87, %74 : vector<32x32xf32>
    %89 = arith.addf %57, %88 : vector<32x32xf32>
    %90 = vector.extract_strided_slice %72 {offsets = [0, 160], sizes = [32, 32], strides = [1, 1]} : vector<32x288xf32> to vector<32x32xf32>
    %91 = arith.mulf %90, %74 : vector<32x32xf32>
    %92 = arith.addf %60, %91 : vector<32x32xf32>
    %93 = vector.extract_strided_slice %72 {offsets = [0, 192], sizes = [32, 32], strides = [1, 1]} : vector<32x288xf32> to vector<32x32xf32>
    %94 = arith.mulf %93, %74 : vector<32x32xf32>
    %95 = arith.addf %63, %94 : vector<32x32xf32>
    %96 = vector.extract_strided_slice %72 {offsets = [0, 224], sizes = [32, 32], strides = [1, 1]} : vector<32x288xf32> to vector<32x32xf32>
    %97 = arith.mulf %96, %74 : vector<32x32xf32>
    %98 = arith.addf %66, %97 : vector<32x32xf32>
    %99 = vector.extract_strided_slice %72 {offsets = [0, 256], sizes = [32, 32], strides = [1, 1]} : vector<32x288xf32> to vector<32x32xf32>
    %100 = arith.mulf %99, %74 : vector<32x32xf32>
    %101 = arith.addf %69, %100 : vector<32x32xf32>
    %102 = vector.extract_strided_slice %13 {offsets = [0, 3, 0], sizes = [32, 1, 128], strides = [1, 1, 1]} : vector<32x9x128xbf16> to vector<32x1x128xbf16>
    %103 = vector.shape_cast %102 : vector<32x1x128xbf16> to vector<32x128xbf16>
    %cst_16 = arith.constant dense<0.000000e+00> : vector<32x288xf32>
    %104 = tpu.matmul %103, %14, %cst_16 {dimension_numbers = #tpu.dot_dimension_numbers<[1], [0], [0], [1], [0, 0, 1, 1], [], []>} : vector<32x128xbf16>, vector<128x288xbf16>, vector<32x288xf32> -> vector<32x288xf32>
    %c3 = arith.constant 3 : index
    %c0_17 = arith.constant 0 : index
    %c0_18 = arith.constant 0 : index
    %105 = vector.load %arg2[%c3, %c0_17, %c0_18] : memref<9x32x32xf32, #tpu.memory_space<vmem>>, vector<1x32x32xf32>
    %106 = vector.shape_cast %105 : vector<1x32x32xf32> to vector<32x32xf32>
    %107 = vector.extract_strided_slice %104 {offsets = [0, 0], sizes = [32, 32], strides = [1, 1]} : vector<32x288xf32> to vector<32x32xf32>
    %108 = arith.mulf %107, %106 : vector<32x32xf32>
    %109 = arith.addf %77, %108 : vector<32x32xf32>
    %110 = vector.extract_strided_slice %104 {offsets = [0, 32], sizes = [32, 32], strides = [1, 1]} : vector<32x288xf32> to vector<32x32xf32>
    %111 = arith.mulf %110, %106 : vector<32x32xf32>
    %112 = arith.addf %80, %111 : vector<32x32xf32>
    %113 = vector.extract_strided_slice %104 {offsets = [0, 64], sizes = [32, 32], strides = [1, 1]} : vector<32x288xf32> to vector<32x32xf32>
    %114 = arith.mulf %113, %106 : vector<32x32xf32>
    %115 = arith.addf %83, %114 : vector<32x32xf32>
    %116 = vector.extract_strided_slice %104 {offsets = [0, 96], sizes = [32, 32], strides = [1, 1]} : vector<32x288xf32> to vector<32x32xf32>
    %117 = arith.mulf %116, %106 : vector<32x32xf32>
    %118 = arith.addf %86, %117 : vector<32x32xf32>
    %119 = vector.extract_strided_slice %104 {offsets = [0, 128], sizes = [32, 32], strides = [1, 1]} : vector<32x288xf32> to vector<32x32xf32>
    %120 = arith.mulf %119, %106 : vector<32x32xf32>
    %121 = arith.addf %89, %120 : vector<32x32xf32>
    %122 = vector.extract_strided_slice %104 {offsets = [0, 160], sizes = [32, 32], strides = [1, 1]} : vector<32x288xf32> to vector<32x32xf32>
    %123 = arith.mulf %122, %106 : vector<32x32xf32>
    %124 = arith.addf %92, %123 : vector<32x32xf32>
    %125 = vector.extract_strided_slice %104 {offsets = [0, 192], sizes = [32, 32], strides = [1, 1]} : vector<32x288xf32> to vector<32x32xf32>
    %126 = arith.mulf %125, %106 : vector<32x32xf32>
    %127 = arith.addf %95, %126 : vector<32x32xf32>
    %128 = vector.extract_strided_slice %104 {offsets = [0, 224], sizes = [32, 32], strides = [1, 1]} : vector<32x288xf32> to vector<32x32xf32>
    %129 = arith.mulf %128, %106 : vector<32x32xf32>
    %130 = arith.addf %98, %129 : vector<32x32xf32>
    %131 = vector.extract_strided_slice %104 {offsets = [0, 256], sizes = [32, 32], strides = [1, 1]} : vector<32x288xf32> to vector<32x32xf32>
    %132 = arith.mulf %131, %106 : vector<32x32xf32>
    %133 = arith.addf %101, %132 : vector<32x32xf32>
    %134 = vector.extract_strided_slice %13 {offsets = [0, 4, 0], sizes = [32, 1, 128], strides = [1, 1, 1]} : vector<32x9x128xbf16> to vector<32x1x128xbf16>
    %135 = vector.shape_cast %134 : vector<32x1x128xbf16> to vector<32x128xbf16>
    %cst_19 = arith.constant dense<0.000000e+00> : vector<32x288xf32>
    %136 = tpu.matmul %135, %14, %cst_19 {dimension_numbers = #tpu.dot_dimension_numbers<[1], [0], [0], [1], [0, 0, 1, 1], [], []>} : vector<32x128xbf16>, vector<128x288xbf16>, vector<32x288xf32> -> vector<32x288xf32>
    %c4 = arith.constant 4 : index
    %c0_20 = arith.constant 0 : index
    %c0_21 = arith.constant 0 : index
    %137 = vector.load %arg2[%c4, %c0_20, %c0_21] : memref<9x32x32xf32, #tpu.memory_space<vmem>>, vector<1x32x32xf32>
    %138 = vector.shape_cast %137 : vector<1x32x32xf32> to vector<32x32xf32>
    %139 = vector.extract_strided_slice %136 {offsets = [0, 0], sizes = [32, 32], strides = [1, 1]} : vector<32x288xf32> to vector<32x32xf32>
    %140 = arith.mulf %139, %138 : vector<32x32xf32>
    %141 = arith.addf %109, %140 : vector<32x32xf32>
    %142 = vector.extract_strided_slice %136 {offsets = [0, 32], sizes = [32, 32], strides = [1, 1]} : vector<32x288xf32> to vector<32x32xf32>
    %143 = arith.mulf %142, %138 : vector<32x32xf32>
    %144 = arith.addf %112, %143 : vector<32x32xf32>
    %145 = vector.extract_strided_slice %136 {offsets = [0, 64], sizes = [32, 32], strides = [1, 1]} : vector<32x288xf32> to vector<32x32xf32>
    %146 = arith.mulf %145, %138 : vector<32x32xf32>
    %147 = arith.addf %115, %146 : vector<32x32xf32>
    %148 = vector.extract_strided_slice %136 {offsets = [0, 96], sizes = [32, 32], strides = [1, 1]} : vector<32x288xf32> to vector<32x32xf32>
    %149 = arith.mulf %148, %138 : vector<32x32xf32>
    %150 = arith.addf %118, %149 : vector<32x32xf32>
    %151 = vector.extract_strided_slice %136 {offsets = [0, 128], sizes = [32, 32], strides = [1, 1]} : vector<32x288xf32> to vector<32x32xf32>
    %152 = arith.mulf %151, %138 : vector<32x32xf32>
    %153 = arith.addf %121, %152 : vector<32x32xf32>
    %154 = vector.extract_strided_slice %136 {offsets = [0, 160], sizes = [32, 32], strides = [1, 1]} : vector<32x288xf32> to vector<32x32xf32>
    %155 = arith.mulf %154, %138 : vector<32x32xf32>
    %156 = arith.addf %124, %155 : vector<32x32xf32>
    %157 = vector.extract_strided_slice %136 {offsets = [0, 192], sizes = [32, 32], strides = [1, 1]} : vector<32x288xf32> to vector<32x32xf32>
    %158 = arith.mulf %157, %138 : vector<32x32xf32>
    %159 = arith.addf %127, %158 : vector<32x32xf32>
    %160 = vector.extract_strided_slice %136 {offsets = [0, 224], sizes = [32, 32], strides = [1, 1]} : vector<32x288xf32> to vector<32x32xf32>
    %161 = arith.mulf %160, %138 : vector<32x32xf32>
    %162 = arith.addf %130, %161 : vector<32x32xf32>
    %163 = vector.extract_strided_slice %136 {offsets = [0, 256], sizes = [32, 32], strides = [1, 1]} : vector<32x288xf32> to vector<32x32xf32>
    %164 = arith.mulf %163, %138 : vector<32x32xf32>
    %165 = arith.addf %133, %164 : vector<32x32xf32>
    %166 = vector.extract_strided_slice %13 {offsets = [0, 5, 0], sizes = [32, 1, 128], strides = [1, 1, 1]} : vector<32x9x128xbf16> to vector<32x1x128xbf16>
    %167 = vector.shape_cast %166 : vector<32x1x128xbf16> to vector<32x128xbf16>
    %cst_22 = arith.constant dense<0.000000e+00> : vector<32x288xf32>
    %168 = tpu.matmul %167, %14, %cst_22 {dimension_numbers = #tpu.dot_dimension_numbers<[1], [0], [0], [1], [0, 0, 1, 1], [], []>} : vector<32x128xbf16>, vector<128x288xbf16>, vector<32x288xf32> -> vector<32x288xf32>
    %c5 = arith.constant 5 : index
    %c0_23 = arith.constant 0 : index
    %c0_24 = arith.constant 0 : index
    %169 = vector.load %arg2[%c5, %c0_23, %c0_24] : memref<9x32x32xf32, #tpu.memory_space<vmem>>, vector<1x32x32xf32>
    %170 = vector.shape_cast %169 : vector<1x32x32xf32> to vector<32x32xf32>
    %171 = vector.extract_strided_slice %168 {offsets = [0, 0], sizes = [32, 32], strides = [1, 1]} : vector<32x288xf32> to vector<32x32xf32>
    %172 = arith.mulf %171, %170 : vector<32x32xf32>
    %173 = arith.addf %141, %172 : vector<32x32xf32>
    %174 = vector.extract_strided_slice %168 {offsets = [0, 32], sizes = [32, 32], strides = [1, 1]} : vector<32x288xf32> to vector<32x32xf32>
    %175 = arith.mulf %174, %170 : vector<32x32xf32>
    %176 = arith.addf %144, %175 : vector<32x32xf32>
    %177 = vector.extract_strided_slice %168 {offsets = [0, 64], sizes = [32, 32], strides = [1, 1]} : vector<32x288xf32> to vector<32x32xf32>
    %178 = arith.mulf %177, %170 : vector<32x32xf32>
    %179 = arith.addf %147, %178 : vector<32x32xf32>
    %180 = vector.extract_strided_slice %168 {offsets = [0, 96], sizes = [32, 32], strides = [1, 1]} : vector<32x288xf32> to vector<32x32xf32>
    %181 = arith.mulf %180, %170 : vector<32x32xf32>
    %182 = arith.addf %150, %181 : vector<32x32xf32>
    %183 = vector.extract_strided_slice %168 {offsets = [0, 128], sizes = [32, 32], strides = [1, 1]} : vector<32x288xf32> to vector<32x32xf32>
    %184 = arith.mulf %183, %170 : vector<32x32xf32>
    %185 = arith.addf %153, %184 : vector<32x32xf32>
    %186 = vector.extract_strided_slice %168 {offsets = [0, 160], sizes = [32, 32], strides = [1, 1]} : vector<32x288xf32> to vector<32x32xf32>
    %187 = arith.mulf %186, %170 : vector<32x32xf32>
    %188 = arith.addf %156, %187 : vector<32x32xf32>
    %189 = vector.extract_strided_slice %168 {offsets = [0, 192], sizes = [32, 32], strides = [1, 1]} : vector<32x288xf32> to vector<32x32xf32>
    %190 = arith.mulf %189, %170 : vector<32x32xf32>
    %191 = arith.addf %159, %190 : vector<32x32xf32>
    %192 = vector.extract_strided_slice %168 {offsets = [0, 224], sizes = [32, 32], strides = [1, 1]} : vector<32x288xf32> to vector<32x32xf32>
    %193 = arith.mulf %192, %170 : vector<32x32xf32>
    %194 = arith.addf %162, %193 : vector<32x32xf32>
    %195 = vector.extract_strided_slice %168 {offsets = [0, 256], sizes = [32, 32], strides = [1, 1]} : vector<32x288xf32> to vector<32x32xf32>
    %196 = arith.mulf %195, %170 : vector<32x32xf32>
    %197 = arith.addf %165, %196 : vector<32x32xf32>
    %198 = vector.extract_strided_slice %13 {offsets = [0, 6, 0], sizes = [32, 1, 128], strides = [1, 1, 1]} : vector<32x9x128xbf16> to vector<32x1x128xbf16>
    %199 = vector.shape_cast %198 : vector<32x1x128xbf16> to vector<32x128xbf16>
    %cst_25 = arith.constant dense<0.000000e+00> : vector<32x288xf32>
    %200 = tpu.matmul %199, %14, %cst_25 {dimension_numbers = #tpu.dot_dimension_numbers<[1], [0], [0], [1], [0, 0, 1, 1], [], []>} : vector<32x128xbf16>, vector<128x288xbf16>, vector<32x288xf32> -> vector<32x288xf32>
    %c6 = arith.constant 6 : index
    %c0_26 = arith.constant 0 : index
    %c0_27 = arith.constant 0 : index
    %201 = vector.load %arg2[%c6, %c0_26, %c0_27] : memref<9x32x32xf32, #tpu.memory_space<vmem>>, vector<1x32x32xf32>
    %202 = vector.shape_cast %201 : vector<1x32x32xf32> to vector<32x32xf32>
    %203 = vector.extract_strided_slice %200 {offsets = [0, 0], sizes = [32, 32], strides = [1, 1]} : vector<32x288xf32> to vector<32x32xf32>
    %204 = arith.mulf %203, %202 : vector<32x32xf32>
    %205 = arith.addf %173, %204 : vector<32x32xf32>
    %206 = vector.extract_strided_slice %200 {offsets = [0, 32], sizes = [32, 32], strides = [1, 1]} : vector<32x288xf32> to vector<32x32xf32>
    %207 = arith.mulf %206, %202 : vector<32x32xf32>
    %208 = arith.addf %176, %207 : vector<32x32xf32>
    %209 = vector.extract_strided_slice %200 {offsets = [0, 64], sizes = [32, 32], strides = [1, 1]} : vector<32x288xf32> to vector<32x32xf32>
    %210 = arith.mulf %209, %202 : vector<32x32xf32>
    %211 = arith.addf %179, %210 : vector<32x32xf32>
    %212 = vector.extract_strided_slice %200 {offsets = [0, 96], sizes = [32, 32], strides = [1, 1]} : vector<32x288xf32> to vector<32x32xf32>
    %213 = arith.mulf %212, %202 : vector<32x32xf32>
    %214 = arith.addf %182, %213 : vector<32x32xf32>
    %215 = vector.extract_strided_slice %200 {offsets = [0, 128], sizes = [32, 32], strides = [1, 1]} : vector<32x288xf32> to vector<32x32xf32>
    %216 = arith.mulf %215, %202 : vector<32x32xf32>
    %217 = arith.addf %185, %216 : vector<32x32xf32>
    %218 = vector.extract_strided_slice %200 {offsets = [0, 160], sizes = [32, 32], strides = [1, 1]} : vector<32x288xf32> to vector<32x32xf32>
    %219 = arith.mulf %218, %202 : vector<32x32xf32>
    %220 = arith.addf %188, %219 : vector<32x32xf32>
    %221 = vector.extract_strided_slice %200 {offsets = [0, 192], sizes = [32, 32], strides = [1, 1]} : vector<32x288xf32> to vector<32x32xf32>
    %222 = arith.mulf %221, %202 : vector<32x32xf32>
    %223 = arith.addf %191, %222 : vector<32x32xf32>
    %224 = vector.extract_strided_slice %200 {offsets = [0, 224], sizes = [32, 32], strides = [1, 1]} : vector<32x288xf32> to vector<32x32xf32>
    %225 = arith.mulf %224, %202 : vector<32x32xf32>
    %226 = arith.addf %194, %225 : vector<32x32xf32>
    %227 = vector.extract_strided_slice %200 {offsets = [0, 256], sizes = [32, 32], strides = [1, 1]} : vector<32x288xf32> to vector<32x32xf32>
    %228 = arith.mulf %227, %202 : vector<32x32xf32>
    %229 = arith.addf %197, %228 : vector<32x32xf32>
    %230 = vector.extract_strided_slice %13 {offsets = [0, 7, 0], sizes = [32, 1, 128], strides = [1, 1, 1]} : vector<32x9x128xbf16> to vector<32x1x128xbf16>
    %231 = vector.shape_cast %230 : vector<32x1x128xbf16> to vector<32x128xbf16>
    %cst_28 = arith.constant dense<0.000000e+00> : vector<32x288xf32>
    %232 = tpu.matmul %231, %14, %cst_28 {dimension_numbers = #tpu.dot_dimension_numbers<[1], [0], [0], [1], [0, 0, 1, 1], [], []>} : vector<32x128xbf16>, vector<128x288xbf16>, vector<32x288xf32> -> vector<32x288xf32>
    %c7 = arith.constant 7 : index
    %c0_29 = arith.constant 0 : index
    %c0_30 = arith.constant 0 : index
    %233 = vector.load %arg2[%c7, %c0_29, %c0_30] : memref<9x32x32xf32, #tpu.memory_space<vmem>>, vector<1x32x32xf32>
    %234 = vector.shape_cast %233 : vector<1x32x32xf32> to vector<32x32xf32>
    %235 = vector.extract_strided_slice %232 {offsets = [0, 0], sizes = [32, 32], strides = [1, 1]} : vector<32x288xf32> to vector<32x32xf32>
    %236 = arith.mulf %235, %234 : vector<32x32xf32>
    %237 = arith.addf %205, %236 : vector<32x32xf32>
    %238 = vector.extract_strided_slice %232 {offsets = [0, 32], sizes = [32, 32], strides = [1, 1]} : vector<32x288xf32> to vector<32x32xf32>
    %239 = arith.mulf %238, %234 : vector<32x32xf32>
    %240 = arith.addf %208, %239 : vector<32x32xf32>
    %241 = vector.extract_strided_slice %232 {offsets = [0, 64], sizes = [32, 32], strides = [1, 1]} : vector<32x288xf32> to vector<32x32xf32>
    %242 = arith.mulf %241, %234 : vector<32x32xf32>
    %243 = arith.addf %211, %242 : vector<32x32xf32>
    %244 = vector.extract_strided_slice %232 {offsets = [0, 96], sizes = [32, 32], strides = [1, 1]} : vector<32x288xf32> to vector<32x32xf32>
    %245 = arith.mulf %244, %234 : vector<32x32xf32>
    %246 = arith.addf %214, %245 : vector<32x32xf32>
    %247 = vector.extract_strided_slice %232 {offsets = [0, 128], sizes = [32, 32], strides = [1, 1]} : vector<32x288xf32> to vector<32x32xf32>
    %248 = arith.mulf %247, %234 : vector<32x32xf32>
    %249 = arith.addf %217, %248 : vector<32x32xf32>
    %250 = vector.extract_strided_slice %232 {offsets = [0, 160], sizes = [32, 32], strides = [1, 1]} : vector<32x288xf32> to vector<32x32xf32>
    %251 = arith.mulf %250, %234 : vector<32x32xf32>
    %252 = arith.addf %220, %251 : vector<32x32xf32>
    %253 = vector.extract_strided_slice %232 {offsets = [0, 192], sizes = [32, 32], strides = [1, 1]} : vector<32x288xf32> to vector<32x32xf32>
    %254 = arith.mulf %253, %234 : vector<32x32xf32>
    %255 = arith.addf %223, %254 : vector<32x32xf32>
    %256 = vector.extract_strided_slice %232 {offsets = [0, 224], sizes = [32, 32], strides = [1, 1]} : vector<32x288xf32> to vector<32x32xf32>
    %257 = arith.mulf %256, %234 : vector<32x32xf32>
    %258 = arith.addf %226, %257 : vector<32x32xf32>
    %259 = vector.extract_strided_slice %232 {offsets = [0, 256], sizes = [32, 32], strides = [1, 1]} : vector<32x288xf32> to vector<32x32xf32>
    %260 = arith.mulf %259, %234 : vector<32x32xf32>
    %261 = arith.addf %229, %260 : vector<32x32xf32>
    %262 = vector.extract_strided_slice %13 {offsets = [0, 8, 0], sizes = [32, 1, 128], strides = [1, 1, 1]} : vector<32x9x128xbf16> to vector<32x1x128xbf16>
    %263 = vector.shape_cast %262 : vector<32x1x128xbf16> to vector<32x128xbf16>
    %cst_31 = arith.constant dense<0.000000e+00> : vector<32x288xf32>
    %264 = tpu.matmul %263, %14, %cst_31 {dimension_numbers = #tpu.dot_dimension_numbers<[1], [0], [0], [1], [0, 0, 1, 1], [], []>} : vector<32x128xbf16>, vector<128x288xbf16>, vector<32x288xf32> -> vector<32x288xf32>
    %c8 = arith.constant 8 : index
    %c0_32 = arith.constant 0 : index
    %c0_33 = arith.constant 0 : index
    %265 = vector.load %arg2[%c8, %c0_32, %c0_33] : memref<9x32x32xf32, #tpu.memory_space<vmem>>, vector<1x32x32xf32>
    %266 = vector.shape_cast %265 : vector<1x32x32xf32> to vector<32x32xf32>
    %267 = vector.extract_strided_slice %264 {offsets = [0, 0], sizes = [32, 32], strides = [1, 1]} : vector<32x288xf32> to vector<32x32xf32>
    %268 = arith.mulf %267, %266 : vector<32x32xf32>
    %269 = arith.addf %237, %268 : vector<32x32xf32>
    %270 = vector.extract_strided_slice %264 {offsets = [0, 32], sizes = [32, 32], strides = [1, 1]} : vector<32x288xf32> to vector<32x32xf32>
    %271 = arith.mulf %270, %266 : vector<32x32xf32>
    %272 = arith.addf %240, %271 : vector<32x32xf32>
    %273 = vector.extract_strided_slice %264 {offsets = [0, 64], sizes = [32, 32], strides = [1, 1]} : vector<32x288xf32> to vector<32x32xf32>
    %274 = arith.mulf %273, %266 : vector<32x32xf32>
    %275 = arith.addf %243, %274 : vector<32x32xf32>
    %276 = vector.extract_strided_slice %264 {offsets = [0, 96], sizes = [32, 32], strides = [1, 1]} : vector<32x288xf32> to vector<32x32xf32>
    %277 = arith.mulf %276, %266 : vector<32x32xf32>
    %278 = arith.addf %246, %277 : vector<32x32xf32>
    %279 = vector.extract_strided_slice %264 {offsets = [0, 128], sizes = [32, 32], strides = [1, 1]} : vector<32x288xf32> to vector<32x32xf32>
    %280 = arith.mulf %279, %266 : vector<32x32xf32>
    %281 = arith.addf %249, %280 : vector<32x32xf32>
    %282 = vector.extract_strided_slice %264 {offsets = [0, 160], sizes = [32, 32], strides = [1, 1]} : vector<32x288xf32> to vector<32x32xf32>
    %283 = arith.mulf %282, %266 : vector<32x32xf32>
    %284 = arith.addf %252, %283 : vector<32x32xf32>
    %285 = vector.extract_strided_slice %264 {offsets = [0, 192], sizes = [32, 32], strides = [1, 1]} : vector<32x288xf32> to vector<32x32xf32>
    %286 = arith.mulf %285, %266 : vector<32x32xf32>
    %287 = arith.addf %255, %286 : vector<32x32xf32>
    %288 = vector.extract_strided_slice %264 {offsets = [0, 224], sizes = [32, 32], strides = [1, 1]} : vector<32x288xf32> to vector<32x32xf32>
    %289 = arith.mulf %288, %266 : vector<32x32xf32>
    %290 = arith.addf %258, %289 : vector<32x32xf32>
    %291 = vector.extract_strided_slice %264 {offsets = [0, 256], sizes = [32, 32], strides = [1, 1]} : vector<32x288xf32> to vector<32x32xf32>
    %292 = arith.mulf %291, %266 : vector<32x32xf32>
    %293 = arith.addf %261, %292 : vector<32x32xf32>
    %c0_34 = arith.constant 0 : index
    %c0_35 = arith.constant 0 : index
    %c0_36 = arith.constant 0 : index
    %294 = vector.load %arg4[%c0_34, %c0_35, %c0_36] : memref<9x32x32xf32, #tpu.memory_space<vmem>>, vector<1x32x32xf32>
    %295 = vector.shape_cast %294 : vector<1x32x32xf32> to vector<32x32xf32>
    %296 = vector.shape_cast %269 : vector<32x32xf32> to vector<1x32x32xf32>
    tpu.vector_store %arg4[%c0_34, %c0_35, %c0_36], %296 {strides = array<i32>} : memref<9x32x32xf32, #tpu.memory_space<vmem>>, vector<1x32x32xf32>,
    %c1_37 = arith.constant 1 : index
    %c0_38 = arith.constant 0 : index
    %c0_39 = arith.constant 0 : index
    %297 = vector.load %arg4[%c1_37, %c0_38, %c0_39] : memref<9x32x32xf32, #tpu.memory_space<vmem>>, vector<1x32x32xf32>
    %298 = vector.shape_cast %297 : vector<1x32x32xf32> to vector<32x32xf32>
    %299 = vector.shape_cast %272 : vector<32x32xf32> to vector<1x32x32xf32>
    tpu.vector_store %arg4[%c1_37, %c0_38, %c0_39], %299 {strides = array<i32>} : memref<9x32x32xf32, #tpu.memory_space<vmem>>, vector<1x32x32xf32>,
    %c2_40 = arith.constant 2 : index
    %c0_41 = arith.constant 0 : index
    %c0_42 = arith.constant 0 : index
    %300 = vector.load %arg4[%c2_40, %c0_41, %c0_42] : memref<9x32x32xf32, #tpu.memory_space<vmem>>, vector<1x32x32xf32>
    %301 = vector.shape_cast %300 : vector<1x32x32xf32> to vector<32x32xf32>
    %302 = vector.shape_cast %275 : vector<32x32xf32> to vector<1x32x32xf32>
    tpu.vector_store %arg4[%c2_40, %c0_41, %c0_42], %302 {strides = array<i32>} : memref<9x32x32xf32, #tpu.memory_space<vmem>>, vector<1x32x32xf32>,
    %c3_43 = arith.constant 3 : index
    %c0_44 = arith.constant 0 : index
    %c0_45 = arith.constant 0 : index
    %303 = vector.load %arg4[%c3_43, %c0_44, %c0_45] : memref<9x32x32xf32, #tpu.memory_space<vmem>>, vector<1x32x32xf32>
    %304 = vector.shape_cast %303 : vector<1x32x32xf32> to vector<32x32xf32>
    %305 = vector.shape_cast %278 : vector<32x32xf32> to vector<1x32x32xf32>
    tpu.vector_store %arg4[%c3_43, %c0_44, %c0_45], %305 {strides = array<i32>} : memref<9x32x32xf32, #tpu.memory_space<vmem>>, vector<1x32x32xf32>,
    %c4_46 = arith.constant 4 : index
    %c0_47 = arith.constant 0 : index
    %c0_48 = arith.constant 0 : index
    %306 = vector.load %arg4[%c4_46, %c0_47, %c0_48] : memref<9x32x32xf32, #tpu.memory_space<vmem>>, vector<1x32x32xf32>
    %307 = vector.shape_cast %306 : vector<1x32x32xf32> to vector<32x32xf32>
    %308 = vector.shape_cast %281 : vector<32x32xf32> to vector<1x32x32xf32>
    tpu.vector_store %arg4[%c4_46, %c0_47, %c0_48], %308 {strides = array<i32>} : memref<9x32x32xf32, #tpu.memory_space<vmem>>, vector<1x32x32xf32>,
    %c5_49 = arith.constant 5 : index
    %c0_50 = arith.constant 0 : index
    %c0_51 = arith.constant 0 : index
    %309 = vector.load %arg4[%c5_49, %c0_50, %c0_51] : memref<9x32x32xf32, #tpu.memory_space<vmem>>, vector<1x32x32xf32>
    %310 = vector.shape_cast %309 : vector<1x32x32xf32> to vector<32x32xf32>
    %311 = vector.shape_cast %284 : vector<32x32xf32> to vector<1x32x32xf32>
    tpu.vector_store %arg4[%c5_49, %c0_50, %c0_51], %311 {strides = array<i32>} : memref<9x32x32xf32, #tpu.memory_space<vmem>>, vector<1x32x32xf32>,
    %c6_52 = arith.constant 6 : index
    %c0_53 = arith.constant 0 : index
    %c0_54 = arith.constant 0 : index
    %312 = vector.load %arg4[%c6_52, %c0_53, %c0_54] : memref<9x32x32xf32, #tpu.memory_space<vmem>>, vector<1x32x32xf32>
    %313 = vector.shape_cast %312 : vector<1x32x32xf32> to vector<32x32xf32>
    %314 = vector.shape_cast %287 : vector<32x32xf32> to vector<1x32x32xf32>
    tpu.vector_store %arg4[%c6_52, %c0_53, %c0_54], %314 {strides = array<i32>} : memref<9x32x32xf32, #tpu.memory_space<vmem>>, vector<1x32x32xf32>,
    %c7_55 = arith.constant 7 : index
    %c0_56 = arith.constant 0 : index
    %c0_57 = arith.constant 0 : index
    %315 = vector.load %arg4[%c7_55, %c0_56, %c0_57] : memref<9x32x32xf32, #tpu.memory_space<vmem>>, vector<1x32x32xf32>
    %316 = vector.shape_cast %315 : vector<1x32x32xf32> to vector<32x32xf32>
    %317 = vector.shape_cast %290 : vector<32x32xf32> to vector<1x32x32xf32>
    tpu.vector_store %arg4[%c7_55, %c0_56, %c0_57], %317 {strides = array<i32>} : memref<9x32x32xf32, #tpu.memory_space<vmem>>, vector<1x32x32xf32>,
    %c8_58 = arith.constant 8 : index
    %c0_59 = arith.constant 0 : index
    %c0_60 = arith.constant 0 : index
    %318 = vector.load %arg4[%c8_58, %c0_59, %c0_60] : memref<9x32x32xf32, #tpu.memory_space<vmem>>, vector<1x32x32xf32>
    %319 = vector.shape_cast %318 : vector<1x32x32xf32> to vector<32x32xf32>
    %320 = vector.shape_cast %293 : vector<32x32xf32> to vector<1x32x32xf32>
    tpu.vector_store %arg4[%c8_58, %c0_59, %c0_60], %320 {strides = array<i32>} : memref<9x32x32xf32, #tpu.memory_space<vmem>>, vector<1x32x32xf32>,
    return
  }
  func.func @transform_0(%arg0: i32) -> (i32, i32, i32) {
    %c0_i32 = arith.constant 0 : i32
    %c0_i32_0 = arith.constant 0 : i32
    %c0_i32_1 = arith.constant 0 : i32
    return %arg0, %c0_i32, %c0_i32_0 : i32, i32, i32
  }
  func.func @transform_1(%arg0: i32) -> (i32, i32, i32) {
    %c0_i32 = arith.constant 0 : i32
    %c0_i32_0 = arith.constant 0 : i32
    %c0_i32_1 = arith.constant 0 : i32
    return %c0_i32, %arg0, %c0_i32_0 : i32, i32, i32
  }
  func.func @transform_2(%arg0: i32) -> (i32, i32) {
    %c0_i32 = arith.constant 0 : i32
    %c0_i32_0 = arith.constant 0 : i32
    %c0_i32_1 = arith.constant 0 : i32
    return %c0_i32, %c0_i32_0 : i32, i32
  }
  func.func @transform_3(%arg0: i32) -> (i32, i32, i32) {
    %c0_i32 = arith.constant 0 : i32
    %c0_i32_0 = arith.constant 0 : i32
    %c0_i32_1 = arith.constant 0 : i32
    return %c0_i32, %arg0, %c0_i32_0 : i32, i32, i32
  }
}

module attributes {stable_mosaic.version = 11 : i64} {
  func.func @_proj_residual_kernel(%arg0: i32, %arg1: memref<32x32xf32, #tpu.memory_space<vmem>>, %arg2: memref<32x32xf32, #tpu.memory_space<vmem>>, %arg3: memref<32x32xbf16, #tpu.memory_space<vmem>>, %arg4: memref<1x32xf32, #tpu.memory_space<vmem>>, %arg5: memref<32x32xf32, #tpu.memory_space<vmem>>) attributes {dimension_semantics = [#tpu.dimension_semantics<parallel>], iteration_bounds = array<i64: 4>, scalar_prefetch = 0 : i64, scratch_operands = 0 : i64, tpu.core_type = #tpu.core_type<tc>, window_params = [{transform_indices = @transform_0, window_bounds = array<i64: 32, 32>}, {transform_indices = @transform_1, window_bounds = array<i64: 32, 32>}, {pipeline_mode = #tpu.pipeline_mode<synchronous>, transform_indices = @transform_2, window_bounds = array<i64: 32, 32>}, {pipeline_mode = #tpu.pipeline_mode<synchronous>, transform_indices = @transform_3, window_bounds = array<i64: 1, 32>}, {transform_indices = @transform_4, window_bounds = array<i64: 32, 32>}]} {
    %c0 = arith.constant 0 : index
    %c0_0 = arith.constant 0 : index
    %0 = vector.load %arg1[%c0, %c0_0] : memref<32x32xf32, #tpu.memory_space<vmem>>, vector<32x32xf32>
    %1 = arith.truncf %0 : vector<32x32xf32> to vector<32x32xbf16>
    %c0_1 = arith.constant 0 : index
    %c0_2 = arith.constant 0 : index
    %2 = vector.load %arg3[%c0_1, %c0_2] : memref<32x32xbf16, #tpu.memory_space<vmem>>, vector<32x32xbf16>
    %cst = arith.constant dense<0.000000e+00> : vector<32x32xf32>
    %3 = tpu.matmul %1, %2, %cst {dimension_numbers = #tpu.dot_dimension_numbers<[1], [0], [0], [1], [0, 0, 1, 1], [], []>} : vector<32x32xbf16>, vector<32x32xbf16>, vector<32x32xf32> -> vector<32x32xf32>
    %c0_3 = arith.constant 0 : index
    %c0_4 = arith.constant 0 : index
    %4 = vector.load %arg2[%c0_3, %c0_4] : memref<32x32xf32, #tpu.memory_space<vmem>>, vector<32x32xf32>
    %5 = arith.addf %4, %3 : vector<32x32xf32>
    %c0_5 = arith.constant 0 : index
    %c0_6 = arith.constant 0 : index
    %6 = vector.load %arg4[%c0_5, %c0_6] : memref<1x32xf32, #tpu.memory_space<vmem>>, vector<1x32xf32>
    %7 = vector.broadcast %6 : vector<1x32xf32> to vector<32x32xf32>
    %8 = arith.addf %5, %7 : vector<32x32xf32>
    %c0_7 = arith.constant 0 : index
    %c0_8 = arith.constant 0 : index
    %9 = vector.load %arg5[%c0_7, %c0_8] : memref<32x32xf32, #tpu.memory_space<vmem>>, vector<32x32xf32>
    tpu.vector_store %arg5[%c0_7, %c0_8], %8 {strides = array<i32>} : memref<32x32xf32, #tpu.memory_space<vmem>>, vector<32x32xf32>,
    return
  }
  func.func @transform_0(%arg0: i32) -> (i32, i32) {
    %c0_i32 = arith.constant 0 : i32
    %c0_i32_0 = arith.constant 0 : i32
    return %arg0, %c0_i32 : i32, i32
  }
  func.func @transform_1(%arg0: i32) -> (i32, i32) {
    %c0_i32 = arith.constant 0 : i32
    %c0_i32_0 = arith.constant 0 : i32
    return %arg0, %c0_i32 : i32, i32
  }
  func.func @transform_2(%arg0: i32) -> (i32, i32) {
    %c0_i32 = arith.constant 0 : i32
    %c0_i32_0 = arith.constant 0 : i32
    %c0_i32_1 = arith.constant 0 : i32
    return %c0_i32, %c0_i32_0 : i32, i32
  }
  func.func @transform_3(%arg0: i32) -> (i32, i32) {
    %c0_i32 = arith.constant 0 : i32
    %c0_i32_0 = arith.constant 0 : i32
    %c0_i32_1 = arith.constant 0 : i32
    return %c0_i32, %c0_i32_0 : i32, i32
  }
  func.func @transform_4(%arg0: i32) -> (i32, i32) {
    %c0_i32 = arith.constant 0 : i32
    %c0_i32_0 = arith.constant 0 : i32
    return %arg0, %c0_i32 : i32, i32
  }
}

module attributes {stable_mosaic.version = 11 : i64} {
  func.func @_norm2_mlp_residual_kernel(%arg0: i32, %arg1: memref<32x32xf32, #tpu.memory_space<vmem>>, %arg2: memref<1x32xf32, #tpu.memory_space<vmem>>, %arg3: memref<1x32xf32, #tpu.memory_space<vmem>>, %arg4: memref<32x96xbf16, #tpu.memory_space<vmem>>, %arg5: memref<1x96xf32, #tpu.memory_space<vmem>>, %arg6: memref<96x32xbf16, #tpu.memory_space<vmem>>, %arg7: memref<1x32xf32, #tpu.memory_space<vmem>>, %arg8: memref<32x32xf32, #tpu.memory_space<vmem>>) attributes {dimension_semantics = [#tpu.dimension_semantics<parallel>], iteration_bounds = array<i64: 4>, scalar_prefetch = 0 : i64, scratch_operands = 0 : i64, tpu.core_type = #tpu.core_type<tc>, window_params = [{transform_indices = @transform_0, window_bounds = array<i64: 32, 32>}, {pipeline_mode = #tpu.pipeline_mode<synchronous>, transform_indices = @transform_1, window_bounds = array<i64: 1, 32>}, {pipeline_mode = #tpu.pipeline_mode<synchronous>, transform_indices = @transform_2, window_bounds = array<i64: 1, 32>}, {pipeline_mode = #tpu.pipeline_mode<synchronous>, transform_indices = @transform_3, window_bounds = array<i64: 32, 96>}, {pipeline_mode = #tpu.pipeline_mode<synchronous>, transform_indices = @transform_4, window_bounds = array<i64: 1, 96>}, {pipeline_mode = #tpu.pipeline_mode<synchronous>, transform_indices = @transform_5, window_bounds = array<i64: 96, 32>}, {pipeline_mode = #tpu.pipeline_mode<synchronous>, transform_indices = @transform_6, window_bounds = array<i64: 1, 32>}, {transform_indices = @transform_7, window_bounds = array<i64: 32, 32>}]} {
    %c0 = arith.constant 0 : index
    %c0_0 = arith.constant 0 : index
    %0 = vector.load %arg1[%c0, %c0_0] : memref<32x32xf32, #tpu.memory_space<vmem>>, vector<32x32xf32>
    %cst = arith.constant dense<0.000000e+00> : vector<32xf32>
    %1 = vector.multi_reduction <add>, %0, %cst [1] : vector<32x32xf32> to vector<32xf32>
    %2 = vector.shape_cast %1 : vector<32xf32> to vector<32x1xf32>
    %cst_1 = arith.constant 3.200000e+01 : f32
    %3 = vector.broadcast %cst_1 : f32 to vector<32x1xf32>
    %4 = arith.divf %2, %3 : vector<32x1xf32>
    %5 = vector.broadcast %4 : vector<32x1xf32> to vector<32x32xf32>
    %6 = arith.subf %0, %5 : vector<32x32xf32>
    %7 = arith.mulf %6, %6 : vector<32x32xf32>
    %cst_2 = arith.constant dense<0.000000e+00> : vector<32xf32>
    %8 = vector.multi_reduction <add>, %7, %cst_2 [1] : vector<32x32xf32> to vector<32xf32>
    %9 = vector.shape_cast %8 : vector<32xf32> to vector<32x1xf32>
    %cst_3 = arith.constant 3.200000e+01 : f32
    %10 = vector.broadcast %cst_3 : f32 to vector<32x1xf32>
    %11 = arith.divf %9, %10 : vector<32x1xf32>
    %12 = vector.broadcast %4 : vector<32x1xf32> to vector<32x32xf32>
    %13 = arith.subf %0, %12 : vector<32x32xf32>
    %cst_4 = arith.constant 9.99999974E-6 : f32
    %14 = vector.broadcast %cst_4 : f32 to vector<32x1xf32>
    %15 = arith.addf %11, %14 : vector<32x1xf32>
    %16 = math.rsqrt %15 : vector<32x1xf32>
    %17 = vector.broadcast %16 : vector<32x1xf32> to vector<32x32xf32>
    %18 = arith.mulf %13, %17 : vector<32x32xf32>
    %c0_5 = arith.constant 0 : index
    %c0_6 = arith.constant 0 : index
    %19 = vector.load %arg2[%c0_5, %c0_6] : memref<1x32xf32, #tpu.memory_space<vmem>>, vector<1x32xf32>
    %20 = vector.broadcast %19 : vector<1x32xf32> to vector<32x32xf32>
    %21 = arith.mulf %18, %20 : vector<32x32xf32>
    %c0_7 = arith.constant 0 : index
    %c0_8 = arith.constant 0 : index
    %22 = vector.load %arg3[%c0_7, %c0_8] : memref<1x32xf32, #tpu.memory_space<vmem>>, vector<1x32xf32>
    %23 = vector.broadcast %22 : vector<1x32xf32> to vector<32x32xf32>
    %24 = arith.addf %21, %23 : vector<32x32xf32>
    %25 = arith.truncf %24 : vector<32x32xf32> to vector<32x32xbf16>
    %c0_9 = arith.constant 0 : index
    %c0_10 = arith.constant 0 : index
    %26 = vector.load %arg4[%c0_9, %c0_10] : memref<32x96xbf16, #tpu.memory_space<vmem>>, vector<32x96xbf16>
    %cst_11 = arith.constant dense<0.000000e+00> : vector<32x96xf32>
    %27 = tpu.matmul %25, %26, %cst_11 {dimension_numbers = #tpu.dot_dimension_numbers<[1], [0], [0], [1], [0, 0, 1, 1], [], []>} : vector<32x32xbf16>, vector<32x96xbf16>, vector<32x96xf32> -> vector<32x96xf32>
    %c0_12 = arith.constant 0 : index
    %c0_13 = arith.constant 0 : index
    %28 = vector.load %arg5[%c0_12, %c0_13] : memref<1x96xf32, #tpu.memory_space<vmem>>, vector<1x96xf32>
    %29 = vector.broadcast %28 : vector<1x96xf32> to vector<32x96xf32>
    %30 = arith.addf %27, %29 : vector<32x96xf32>
    %31 = arith.mulf %30, %30 : vector<32x96xf32>
    %32 = arith.mulf %30, %31 : vector<32x96xf32>
    %cst_14 = arith.constant 4.471500e-02 : f32
    %33 = vector.broadcast %cst_14 : f32 to vector<32x96xf32>
    %34 = arith.mulf %33, %32 : vector<32x96xf32>
    %35 = arith.addf %30, %34 : vector<32x96xf32>
    %cst_15 = arith.constant 0.797884583 : f32
    %36 = vector.broadcast %cst_15 : f32 to vector<32x96xf32>
    %37 = arith.mulf %36, %35 : vector<32x96xf32>
    %38 = math.tanh %37 : vector<32x96xf32>
    %cst_16 = arith.constant 1.000000e+00 : f32
    %39 = vector.broadcast %cst_16 : f32 to vector<32x96xf32>
    %40 = arith.addf %39, %38 : vector<32x96xf32>
    %cst_17 = arith.constant 5.000000e-01 : f32
    %41 = vector.broadcast %cst_17 : f32 to vector<32x96xf32>
    %42 = arith.mulf %41, %40 : vector<32x96xf32>
    %43 = arith.mulf %30, %42 : vector<32x96xf32>
    %44 = arith.truncf %43 : vector<32x96xf32> to vector<32x96xbf16>
    %c0_18 = arith.constant 0 : index
    %c0_19 = arith.constant 0 : index
    %45 = vector.load %arg6[%c0_18, %c0_19] : memref<96x32xbf16, #tpu.memory_space<vmem>>, vector<96x32xbf16>
    %cst_20 = arith.constant dense<0.000000e+00> : vector<32x32xf32>
    %46 = tpu.matmul %44, %45, %cst_20 {dimension_numbers = #tpu.dot_dimension_numbers<[1], [0], [0], [1], [0, 0, 1, 1], [], []>} : vector<32x96xbf16>, vector<96x32xbf16>, vector<32x32xf32> -> vector<32x32xf32>
    %c0_21 = arith.constant 0 : index
    %c0_22 = arith.constant 0 : index
    %47 = vector.load %arg7[%c0_21, %c0_22] : memref<1x32xf32, #tpu.memory_space<vmem>>, vector<1x32xf32>
    %48 = vector.broadcast %47 : vector<1x32xf32> to vector<32x32xf32>
    %49 = arith.addf %46, %48 : vector<32x32xf32>
    %50 = arith.addf %0, %49 : vector<32x32xf32>
    %c0_23 = arith.constant 0 : index
    %c0_24 = arith.constant 0 : index
    %51 = vector.load %arg8[%c0_23, %c0_24] : memref<32x32xf32, #tpu.memory_space<vmem>>, vector<32x32xf32>
    tpu.vector_store %arg8[%c0_23, %c0_24], %50 {strides = array<i32>} : memref<32x32xf32, #tpu.memory_space<vmem>>, vector<32x32xf32>,
    return
  }
  func.func @transform_0(%arg0: i32) -> (i32, i32) {
    %c0_i32 = arith.constant 0 : i32
    %c0_i32_0 = arith.constant 0 : i32
    return %arg0, %c0_i32 : i32, i32
  }
  func.func @transform_1(%arg0: i32) -> (i32, i32) {
    %c0_i32 = arith.constant 0 : i32
    %c0_i32_0 = arith.constant 0 : i32
    %c0_i32_1 = arith.constant 0 : i32
    return %c0_i32, %c0_i32_0 : i32, i32
  }
  func.func @transform_2(%arg0: i32) -> (i32, i32) {
    %c0_i32 = arith.constant 0 : i32
    %c0_i32_0 = arith.constant 0 : i32
    %c0_i32_1 = arith.constant 0 : i32
    return %c0_i32, %c0_i32_0 : i32, i32
  }
  func.func @transform_3(%arg0: i32) -> (i32, i32) {
    %c0_i32 = arith.constant 0 : i32
    %c0_i32_0 = arith.constant 0 : i32
    %c0_i32_1 = arith.constant 0 : i32
    return %c0_i32, %c0_i32_0 : i32, i32
  }
  func.func @transform_4(%arg0: i32) -> (i32, i32) {
    %c0_i32 = arith.constant 0 : i32
    %c0_i32_0 = arith.constant 0 : i32
    %c0_i32_1 = arith.constant 0 : i32
    return %c0_i32, %c0_i32_0 : i32, i32
  }
  func.func @transform_5(%arg0: i32) -> (i32, i32) {
    %c0_i32 = arith.constant 0 : i32
    %c0_i32_0 = arith.constant 0 : i32
    %c0_i32_1 = arith.constant 0 : i32
    return %c0_i32, %c0_i32_0 : i32, i32
  }
  func.func @transform_6(%arg0: i32) -> (i32, i32) {
    %c0_i32 = arith.constant 0 : i32
    %c0_i32_0 = arith.constant 0 : i32
    %c0_i32_1 = arith.constant 0 : i32
    return %c0_i32, %c0_i32_0 : i32, i32
  }
  func.func @transform_7(%arg0: i32) -> (i32, i32) {
    %c0_i32 = arith.constant 0 : i32
    %c0_i32_0 = arith.constant 0 : i32
    return %arg0, %c0_i32 : i32, i32
  }
}

</mosaic_0001>

<bundles_post_ra>
// kernel: outlooker_forward.4
= control target key start
LH: loop header
LB: loop body
LE: loop exit
PB: predicated region body
PF: predicated region fallthrough
CT: control target
= control target key end

     0   :  { %13 = vsyncpa [#allocation3], 0  ;;  %s1553_s0 = inlined_call_operand.hbm [shape: f32[128,32], index: 0, kind: input, shape index: {}]   ;;  %s1554_s1 = inlined_call_operand.vmem [shape: f32[1,32], index: 1, kind: input, shape index: {}]   ;;  %s1555_s2 = inlined_call_operand.vmem [shape: f32[1,32], index: 2, kind: input, shape index: {}]   ;;  %s1556_s3 = inlined_call_operand.vmem [shape: bf16[32,32], index: 3, kind: input, shape index: {}]   ;;  %s1557_s4 = inlined_call_operand.hbm [shape: bf16[32,1152], index: 4, kind: input, shape index: {}]   ;;  %s1558_s5 = inlined_call_operand.vmem [shape: f32[1,1152], index: 5, kind: input, shape index: {}]   ;;  %s1559_s6 = inlined_call_operand.vmem [shape: f32[128,32], index: 6, kind: output, shape index: {0}]   ;;  %s1560_s7 = inlined_call_operand.vmem [shape: f32[128,1152], index: 7, kind: output, shape index: {1}]  }
   0x1   :  { %15 = vsyncpa [#allocation3 + $0x1], 0 }
   0x2   :  { %16 = vsyncpa [#allocation5], 0  ;;  %s1311_s24 = smov 0   ;;  %s1313_s25 = smov 0  }
   0x3   :  { %s1315_s26 = smov 0   ;;  %s1317_s27 = smov 0  }
   0x4 LB: > { %s1561_s28 = sadd.s32 4294967295, %s1263_s27   ;;  %p42_p0 = scmp.ne.s32.totalorder %s1255_s25, %s1251_s24  ;;  %s1263_s27 = sphi %s1317_s27, %s1570_s27   ;;  %s1259_s26 = sphi %s1315_s26, %s1569_s26   ;;  %s1255_s25 = sphi %s1313_s25, %s1568_s25   ;;  %s1251_s24 = sphi %s1311_s24, %s1567_s24  }
   0x5   : > { %p1333_p1 = scmp.eq.s32.totalorder %s1561_s28, 0  ;;  %p956_p2 = scmp.ge.s32.totalorder %s1263_s27, 1 }
   0x6   : > { %p210_p3 = scmp.lt.s32.totalorder %s1263_s27, 5  ;;  %s230_s10 = sshll.u32 %s1557_s4, 4  ;;  %s231_s10 = int_to_ptr.hbm [resolvable:$true] %s230_s10 }
   0x7   : > { %p1341_p4 = por %p1333_p1, %p42_p0  ;;  %s1265_s12 = smov [#allocation4]  }
   0x8   : > { %p1348_p5 = pnand %p956_p2, %p210_p3  ;;  %s232_s13 = sshll.u32 %s1265_s12, 4  ;;  %s233_s13 = int_to_ptr.vmem [resolvable:$true] %s232_s13 }
   0x9   : > { %s1357_s14 = sadd.s32 1, %s1263_s27   ;;  %s1266_s15 = smov 576  }
   0xa   : > { %p1103_p6 = pneg %p1348_p5  ;;  %s1267_s16 = smov 36  }
   0xb   : > { %s26_s17 = ssub.s32 %s1263_s27, %s1357_s14  ;;  %s29_s18 = sadd.s32 1, %s1259_s26 }
   0xc   : > { %p1104_p7 = pnand %p1103_p6, %p1333_p1  ;;  %p27_p8 = scmp.eq.s32.totalorder %s26_s17, 0 }
   0xd   : > { %p36_p9 = scmp.ne.s32.totalorder %s1259_s26, %s1255_s25  ;;  %p37_p10 = scmp.eq.s32.totalorder %s1263_s27, 0 }
   0xe   : > { %1106 = dma.hbm_to_vmem [thread:$0]  (!%p1104_p7), %s231_s10, 2304, %s233_s13, [#allocation5], %s1266_s15, %s1266_s15, %s1267_s16  }
   0xf   : > { %p1112_p11 = scmp.lt.s32.totalorder %s1263_s27, 4  ;;  %p38_p12 = por %p37_p10, %p36_p9 }
  0x10   : > { %s1367_s19 = scalar_select %p27_p8, %s1259_s26, %s29_s18  }
  0x11   : > { %s249_s20 = sand.u32 1, %s1259_s26   ;;  %s1071_s22 = sshll.u32 %s1263_s27, 5 }
  0x12   : > { %s959_s21 = sshll.u32 %s249_s20, 5  ;;  %s258_s8 = scalar_lea.hbm %s1553_s0, %s1071_s22 }
  0x13   : > { %s253_s9 = scalar_lea.vmem [#allocation2], %s959_s21  ;;  %s259_s28 = sshll.u32 %s258_s8, 4  ;;  %s260_s28 = int_to_ptr.hbm [resolvable:$true] %s259_s28 }
  0x14   : > { %s261_s12 = sshll.u32 %s253_s9, 4  ;;  %p1374_p13 = pnand %p1112_p11, %p38_p12  ;;  %s262_s12 = int_to_ptr.vmem [resolvable:$true] %s261_s12 }
  0x15   : > { %s250_s13 = scalar_lea.sflag [#allocation3], %s249_s20  ;;  %s1195_s15 = sshra.s32 %s260_s28, 4  ;;  %s1196_s15 = int_to_ptr.hbm [resolvable:$true] %s1195_s15 }
  0x16   : > { %s1197_s16 = scalar_lea.hbm %s1196_s15, 32  ;;  %p1199_p2 = pneg %p1374_p13 }
  0x17   : > { %p1198_p0 = scmp.ne.s32.totalorder %s1196_s15, %s1197_s16  ;;  %s1202_s21 = scalar_lea.hbm %s1553_s0, 128 }
  0x18   : > { %p1203_p7 = scmp.lt.s32.totalorder %s1196_s15, %s1553_s0  ;;  %p1204_p8 = scmp.lt.s32.totalorder %s1202_s21, %s1197_s16 }
  0x19   : > { %p1200_p3 = pnand %p1199_p2, %p1198_p0 }
  0x1a   : > { %p1205_p9 = por %p1204_p8, %p1203_p7 }
  0x1b   : > { %p1201_p6 = pneg %p1200_p3 }
  0x1d   : > { %p1206_p10 = pnand %p1205_p9, %p1201_p6 }
  0x1f   : > { %1209 = shalt.err (!%p1206_p10)
}
  0x20   : > { %s1268_s20 = smov 128   ;;  %s1269_s24 = smov 8  }
  0x21   : > { %1110 = dma.hbm_to_vmem [thread:$0]  (!%p1374_p13), %s260_s28, 512, %s262_s12, %s250_s13, %s1268_s20, %s1268_s20, %s1269_s24  }
  0x22   : > { %273 = sbr.rel (%p1348_p5) target bundleno = 529 (0x211), region = 44  ;;  %s275_s8 = sand.u32 (!%p1348_p5), 1, %s1255_s25  }
  0x23   : > { %s963_s9 = sshll.u32 (!%p1348_p5), %s275_s8, 5  ;;  %s276_s17 = scalar_lea.sflag (!%p1348_p5), [#allocation3], %s275_s8 }
  0x24   : > { %s279_s18 = scalar_lea.vmem (!%p1348_p5), [#allocation2], %s963_s9 }
  0x27   : > { %1242 = dma.done.wait (%p1341_p4), %s276_s17, 512  }
  0x28   : > { %1244 = vsyncadd (%p1341_p4), %s276_s17, 4294966784 }
  0x29   : > { %1246 = dma.done.wait (%p1333_p1), [#allocation5], 2304  }
  0x2a   : > { %1248 = vsyncadd (%p1333_p1), [#allocation5], 4294964992  ;;  %vm341_vm0 = vcmask 261120   ;;  %v339_v0 = vld [vmem:[%s279_s18 + $0x10] sm:$0xff]  ;;  %v337_v1 = vld [vmem:[%s279_s18] sm:$0xff]  ;;  %v1270_v8 = vmov 32.0  }
  0x2b   : > { %v348_v2 = vsel %vm341_vm0, %v339_v0, 0.0  ;;  %v342_v3 = vsel %vm341_vm0, %v337_v1, 0.0  ;;  %v340_v4 = vld [vmem:[%s279_s18 + $0x18] sm:$0xff]  ;;  %v338_v5 = vld [vmem:[%s279_s18 + $0x8] sm:$0xff]  ;;  %1155 = vrcp.f32 %v1270_v8  ;;  %v981_v43 = vld [vmem:[#allocation4] sm:$0xf] }
  0x2c   : > { %349 = vadd.xlane.f32.xlu0 %v348_v2  ;;  %343 = vadd.xlane.f32.xlu1 %v342_v3  ;;  %v351_v6 = vsel %vm341_vm0, %v340_v4, 0.0  ;;  %v345_v7 = vsel %vm341_vm0, %v338_v5, 0.0  ;;  %v1017_v35 = vld [vmem:[#allocation4 + $0x48] sm:$0xf]  ;;  %v1087_v36 = vld [vmem:[#allocation4 + $0x68] sm:$0xf0] }
  0x2d   : > { %v1073_v37 = vld [vmem:[%s1556_s3 + $0x8] sm:$0xff]  ;;  %v1018_v38 = vor.u32 %v1087_v36, %v1017_v35  ;;  %v1078_v44 = vld [vmem:[#allocation4 + $0x20] sm:$0xf0]  ;;  %v1019_v52 = vld [vmem:[#allocation4 + $0x6c] sm:$0xf0]  ;;  %s1566_s16 = sadd.s32 4294967295, %s1263_s27  }
  0x2e   : > { %483 = vmatpush.bf16.msra.mxu0 %v1073_v37  ;;  %1092 = vmatpush.bf16.msra.mxu2 %v1073_v37  ;;  %v1072_v47 = vld [vmem:[%s1556_s3] sm:$0xff]  ;;  %v982_v48 = vor.u32 %v1078_v44, %v981_v43  ;;  %v1083_v51 = vld [vmem:[#allocation4 + $0x4c] sm:$0xf]  ;;  %v1025_v53 = vld [vmem:[#allocation4 + $0x50] sm:$0xf]  ;;  %s965_s21 = sshll.u32 %s1566_s16, 2 }
  0x2f   : > { %640 = vmatpush.bf16.msra.mxu1 %v1018_v38  ;;  %1094 = vmatpush.bf16.msra.mxu3 %v1018_v38  ;;  %v1022_v56 = vor.u32 %v1083_v51, %v1019_v52  ;;  %v1088_v57 = vld [vmem:[#allocation4 + $0x70] sm:$0xf0]  ;;  %v1027_v59 = vld [vmem:[#allocation4 + $0x74] sm:$0xf0]  ;;  %v1089_v63 = vld [vmem:[#allocation4 + $0x78] sm:$0xf0] }
  0x30   : > { %v1084_v58 = vld [vmem:[#allocation4 + $0x54] sm:$0xf]  ;;  %v1026_v60 = vor.u32 %v1088_v57, %v1025_v53  ;;  %v1033_v62 = vld [vmem:[#allocation4 + $0x58] sm:$0xf]  ;;  %v1041_v57 = vld [vmem:[#allocation4 + $0x60] sm:$0xf] }
  0x31   : > { %v1156_v9 = vpop.eup %1155  ;;  %v1030_v61 = vor.u32 %v1084_v58, %v1027_v59  ;;  %v1090_v58 = vld [vmem:[#allocation4 + $0x80] sm:$0xf0]  ;;  %p324_p1 = scmp.lt.s32.totalorder %s965_s21, 15 }
  0x32   : > { %v355_v10 = vmul.f32 32.0, %v1156_v9  ;;  %vm359_vm1 = vweird.f32 %v1156_v9  ;;  %484 = vmatpush.bf16.msra.mxu0 %v1072_v47  ;;  %1093 = vmatpush.bf16.msra.mxu2 %v1072_v47  ;;  %v1086_v59 = vld [vmem:[#allocation4 + $0x64] sm:$0xf] }
  0x33   : > { %641 = vmatpush.bf16.msra.mxu1 %v982_v48  ;;  %1095 = vmatpush.bf16.msra.mxu3 %v982_v48  ;;  %s1572_s21 = smov (!%p324_p1, %s965_s21), 15 }
  0x34   : > { %352 = vadd.xlane.f32.xlu0 %v351_v6  ;;  %346 = vadd.xlane.f32.xlu1 %v345_v7  ;;  %v356_v11 = vsub.f32 1.0, %v355_v10  ;;  %v1079_v10 = vld [vmem:[#allocation4 + $0x28] sm:$0xf0]  ;;  %s966_s20 = sshll.u32 %s1572_s21, 3  ;;  %s1096_s24 = smul.u32 72, %s1572_s21 }
  0x35   : > { %s327_s17 = scalar_lea.vmem %s1559_s6, %s966_s20 }
  0x36   : > { %v357_v12 = vmul.f32 %v1156_v9, %v356_v11  ;;  %659 = vmatpush.bf16.msrb.mxu2 %v1022_v56  ;;  %697 = vmatpush.bf16.msrb.mxu0 %v1030_v61  ;;  %v1075_v11 = vld [vmem:[#allocation4 + $0xc] sm:$0xf]  ;;  %s1488_s27 = scalar_lea.vmem %s1560_s7, %s1096_s24 }
  0x37   : > { %678 = vmatpush.bf16.msrb.mxu3 %v1026_v60 }
  0x38   : > { %v358_v13 = vadd.f32 %v1156_v9, %v357_v12 }
  0x3a   : > { %v360_v14 = vsel %vm359_vm1, %v1156_v9, %v358_v13  ;;  %v989_v9 = vld [vmem:[#allocation4 + $0x8] sm:$0xf]  ;;  %v991_v13 = vld [vmem:[#allocation4 + $0x2c] sm:$0xf0] }
  0x9f   : > { %v350_v15 = vpop.xlane.xlu0 %349  ;;  %v344_v16 = vpop.xlane.xlu1 %343 }
  0xa0   : > { %v363_v17 = vmul.f32 %v360_v14, %v350_v15  ;;  %v361_v18 = vmul.f32 %v360_v14, %v344_v16  ;;  %v990_v16 = vor.u32 %v1079_v10, %v989_v9  ;;  %v1005_v9 = vld [vmem:[#allocation4 + $0x18] sm:$0xf] }
  0xa2   : > { %v1403_v19 = vsub.f32 %v339_v0, %v363_v17  ;;  %v1405_v20 = vsub.f32 %v337_v1, %v361_v18  ;;  %v1074_v0 = vld [vmem:[#allocation4 + $0x4] sm:$0xf]  ;;  %v1080_v17 = vld [vmem:[#allocation4 + $0x30] sm:$0xf0]  ;;  %679 = vmatpush.bf16.msrb.mxu3 %v990_v16  ;;  %v1013_v16 = vld [vmem:[#allocation4 + $0x20] sm:$0xf] }
  0xa4   : > { %v371_v21 = vmul.f32 %v1403_v19, %v1403_v19  ;;  %v369_v22 = vmul.f32 %v1405_v20, %v1405_v20 }
  0xa6   : > { %v379_v23 = vsel %vm341_vm0, %v371_v21, 0.0  ;;  %v373_v24 = vsel %vm341_vm0, %v369_v22, 0.0  ;;  %v994_v21 = vor.u32 %v1075_v11, %v991_v13  ;;  %v1081_v11 = vld [vmem:[#allocation4 + $0x38] sm:$0xf0]  ;;  %v1007_v13 = vld [vmem:[#allocation4 + $0x3c] sm:$0xf0] }
  0xa7   : > { %380 = vadd.xlane.f32.xlu2 %v379_v23  ;;  %v353_v25 = vpop.xlane.xlu0 %352  ;;  %374 = vadd.xlane.f32.xlu0 %v373_v24  ;;  %v347_v26 = vpop.xlane.xlu1 %346 }
  0xa8   : > { %v364_v27 = vmul.f32 %v360_v14, %v353_v25  ;;  %v362_v28 = vmul.f32 %v360_v14, %v347_v26  ;;  %698 = vmatpush.bf16.msrb.mxu0 %v994_v21  ;;  %v1479_v21 = vld [vmem:[%s1558_s5] sm:$0xff] }
  0xaa   : > { %v1413_v29 = vsub.f32 %v340_v4, %v364_v27  ;;  %v1415_v30 = vsub.f32 %v338_v5, %v362_v28  ;;  %v1034_v4 = vor.u32 %v1089_v63, %v1033_v62  ;;  %v983_v5 = vld [vmem:[#allocation4 + $0x24] sm:$0xf0] }
  0xab   : > { %v986_v8 = vor.u32 %v1074_v0, %v983_v5  ;;  %v1043_v62 = vld [vmem:[#allocation4 + $0x84] sm:$0xf0]  ;;  %v1091_v0 = vld [vmem:[#allocation4 + $0x88] sm:$0xf0] }
  0xac   : > { %v372_v31 = vmul.f32 %v1413_v29, %v1413_v29  ;;  %v370_v32 = vmul.f32 %v1415_v30, %v1415_v30  ;;  %716 = vmatpush.bf16.msrb.mxu1 %v1034_v4  ;;  %v1049_v63 = vld [vmem:[#allocation4 + $0x68] sm:$0xf]  ;;  %v1042_v4 = vor.u32 %v1090_v58, %v1041_v57 }
  0xad   : > { %660 = vmatpush.bf16.msrb.mxu2 %v986_v8  ;;  %v999_v8 = vld [vmem:[#allocation4 + $0x34] sm:$0xf0] }
  0xae   : > { %v382_v33 = vsel %vm341_vm0, %v372_v31, 0.0  ;;  %v376_v34 = vsel %vm341_vm0, %v370_v32, 0.0 }
  0xaf   : > { %383 = vadd.xlane.f32.xlu2 %v382_v33  ;;  %377 = vadd.xlane.f32.xlu1 %v376_v34 }
 0x11a   : > { %v381_v39 = vpop.xlane.xlu2 %380  ;;  %v375_v40 = vpop.xlane.xlu0 %374 }
 0x11b   : > { %v387_v41 = vmul.f32 %v381_v39, %v360_v14  ;;  %v385_v42 = vmul.f32 %v375_v40, %v360_v14 }
 0x11d   : > { %v1426_v45 = vadd.f32 1e-05, %v387_v41  ;;  %v1428_v46 = vadd.f32 1e-05, %v385_v42  ;;  %v1152_v42 = vld [vmem:[%s1554_s1] ss:$0 sm:$0xff] }
 0x11f   : > { %1157 = vrsqrt.f32 %v1426_v45  ;;  %vm399_vm3 = vweird.f32 %v1428_v46  ;;  %vm419_vm5 = vweird.f32 %v1426_v45 }
 0x120   : > { %1159 = vrsqrt.f32 %v1428_v46 }
 0x122   : > { %v384_v49 = vpop.xlane.xlu2 %383  ;;  %v378_v50 = vpop.xlane.xlu1 %377 }
 0x123   : > { %v388_v54 = vmul.f32 %v384_v49, %v360_v14  ;;  %v386_v55 = vmul.f32 %v378_v50, %v360_v14  ;;  %v997_v14 = vld [vmem:[#allocation4 + $0x10] sm:$0xf]  ;;  %v1153_v49 = vld [vmem:[%s1555_s2] ss:$0 sm:$0xff] }
 0x124   : > { %v998_v22 = vor.u32 %v1080_v17, %v997_v14  ;;  %v1006_v14 = vor.u32 %v1081_v11, %v1005_v9  ;;  %v1082_v17 = vld [vmem:[#allocation4 + $0x40] sm:$0xf0]  ;;  %v529_v11 = vperm.slane %v1479_v21, 5 }
 0x125   : > { %v1158_v1 = vpop.eup %1157  ;;  %v392_v2 = vadd.f32 1e-05, %v388_v54  ;;  %v1435_v3 = vadd.f32 1e-05, %v386_v55  ;;  %v1085_v55 = vld [vmem:[#allocation4 + $0x5c] sm:$0xf] }
 0x126   : > { %v1160_v6 = vpop.eup %1159  ;;  %v414_v7 = vmul.f32 %v1158_v1, %v1426_v45  ;;  %717 = vmatpush.bf16.msrb.mxu1 %v998_v22  ;;  %vm420_vm2 = vweird.f32 %v1158_v1  ;;  %v524_v22 = vperm.slane %v1479_v21, 0 }
 0x127   : > { %v394_v12 = vmul.f32 %v1160_v6, %v1428_v46  ;;  %1161 = vrsqrt.f32 %v392_v2  ;;  %vm400_vm4 = vweird.f32 %v1160_v6  ;;  %vm421_vm6 = vmor %vm419_vm5, %vm420_vm2  ;;  %vm409_vm9 = vweird.f32 %v1435_v3 }
 0x128   : > { %v415_v15 = vmul.f32 %v1158_v1, %v414_v7  ;;  %1163 = vrsqrt.f32 %v1435_v3  ;;  %vm401_vm7 = vmor %vm399_vm3, %vm400_vm4  ;;  %vm429_vm11 = vweird.f32 %v392_v2  ;;  %v1076_v7 = vld [vmem:[#allocation4 + $0x14] sm:$0xf] }
 0x129   : > { %v395_v18 = vmul.f32 %v1160_v6, %v394_v12  ;;  %v1002_v10 = vor.u32 %v1076_v7, %v999_v8  ;;  %v1077_v12 = vld [vmem:[#allocation4 + $0x1c] sm:$0xf] }
 0x12a   : > { %v416_v23 = vmul.f32 0.5, %v415_v15  ;;  %v1010_v15 = vor.u32 %v1077_v12, %v1007_v13  ;;  %v530_v12 = vperm.slane %v1479_v21, 6 }
 0x12b   : > { %v396_v24 = vmul.f32 0.5, %v395_v18  ;;  %v1014_v18 = vor.u32 %v1082_v17, %v1013_v16 }
 0x12c   : > { %v417_v25 = vsub.f32 1.5, %v416_v23 }
 0x12d   : > { %v1162_v26 = vpop.eup %1161  ;;  %v397_v27 = vsub.f32 1.5, %v396_v24 }
 0x12e   : > { %v1164_v28 = vpop.eup %1163  ;;  %v418_v31 = vmul.f32 %v1158_v1, %v417_v25  ;;  %v424_v32 = vmul.f32 %v1162_v26, %v392_v2  ;;  %vm430_vm8 = vweird.f32 %v1162_v26 }
 0x12f   : > { %v398_v33 = vmul.f32 %v1160_v6, %v397_v27  ;;  %v404_v34 = vmul.f32 %v1164_v28, %v1435_v3  ;;  %vm410_vm10 = vweird.f32 %v1164_v28  ;;  %vm431_vm12 = vmor %vm429_vm11, %vm430_vm8 }
 0x130   : > { %v425_v35 = vmul.f32 %v1162_v26, %v424_v32  ;;  %v422_v37 = vsel %vm421_vm6, %v1158_v1, %v418_v31  ;;  %vm411_vm13 = vmor %vm409_vm9, %vm410_vm10 }
 0x131   : > { %v405_v36 = vmul.f32 %v1164_v28, %v404_v34  ;;  %v402_v39 = vsel %vm401_vm7, %v1160_v6, %v398_v33  ;;  %v435_v43 = vmul.f32 %v422_v37, %v1403_v19  ;;  %v1046_v6 = vor.u32 %v1086_v59, %v1043_v62 }
 0x132   : > { %v426_v38 = vmul.f32 0.5, %v425_v35  ;;  %v433_v45 = vmul.f32 %v402_v39, %v1405_v20  ;;  %v1035_v20 = vld [vmem:[#allocation4 + $0x7c] sm:$0xf0]  ;;  %v528_v37 = vperm.slane %v1479_v21, 4 }
 0x133   : > { %v406_v40 = vmul.f32 0.5, %v405_v36  ;;  %v443_v50 = vmul.f32 %v1152_v42, %v435_v43  ;;  %v527_v36 = vperm.slane %v1479_v21, 3  ;;  %v525_v43 = vperm.slane %v1479_v21, 1 }
 0x134   : > { %v427_v41 = vsub.f32 1.5, %v426_v38  ;;  %v441_v52 = vmul.f32 %v1152_v42, %v433_v45 }
 0x135   : > { %v407_v44 = vsub.f32 1.5, %v406_v40  ;;  %v451_v60 = vadd.f32 %v1153_v49, %v443_v50 }
 0x136   : > { %v428_v46 = vmul.f32 %v1162_v26, %v427_v41  ;;  %v449_v1 = vadd.f32 %v1153_v49, %v441_v52 }
 0x137   : > { %v408_v47 = vmul.f32 %v1164_v28, %v407_v44  ;;  %v526_v44 = vperm.slane %v1479_v21, 2 }
 0x138   : > { %v432_v48 = vsel %vm431_vm12, %v1162_v26, %v428_v46 }
 0x139   : > { %v436_v51 = vmul.f32 %v432_v48, %v1413_v29  ;;  %v412_v19 = vsel %vm411_vm13, %v1164_v28, %v408_v47  ;;  %v1038_v29 = vor.u32 %v1085_v55, %v1035_v20 }
 0x13a   : > { %v434_v53 = vmul.f32 %v412_v19, %v1415_v30  ;;  %v1050_v30 = vor.u32 %v1091_v0, %v1049_v63 }
 0x13b   : > { %v444_v54 = vmul.f32 %v1152_v42, %v436_v51 }
 0x13c   : > { %v442_v56 = vmul.f32 %v1152_v42, %v434_v53 }
 0x13d   : > { %v452_v61 = vadd.f32 %v1153_v49, %v444_v54 }
 0x13e   : > { %v450_v2 = vadd.f32 %v1153_v49, %v442_v56 }
 0x13f   : > { %v454_v3 = vpack.c.bf16 %v452_v61, %v451_v60 }
 0x140   : > { %v453_v5 = vpack.c.bf16 %v450_v2, %v449_v1 }
 0x141   : > { %978 = vmatmul.msk.bf16.vlgmr.msra.gmra.mxu2 %vm341_vm0, %v454_v3  ;;  %1052 = vmatmul.msk.bf16.vlgmr.msra.gmra.mxu3 %vm341_vm0, %v454_v3 }
 0x142   : > { %977 = vmatmul.msk.bf16.vlgmr.msra.gmra.mxu0 %vm341_vm0, %v453_v5  ;;  %1051 = vmatmul.msk.bf16.vlgmr.msra.gmra.mxu1 %vm341_vm0, %v453_v5 }
 0x143   : > { %735 = vmatpush.bf16.msra.mxu2 %v1038_v29  ;;  %754 = vmatpush.bf16.msra.mxu3 %v1042_v4  ;;  %v531_v4 = vperm.slane %v1479_v21, 7 }
 0x144   : > { %773 = vmatpush.bf16.msra.mxu0 %v1046_v6  ;;  %792 = vmatpush.bf16.msra.mxu1 %v1050_v30 }
 0x147   : > { %736 = vmatpush.bf16.msra.mxu2 %v1002_v10  ;;  %755 = vmatpush.bf16.msra.mxu3 %v1006_v14 }
 0x148   : > { %774 = vmatpush.bf16.msra.mxu0 %v1010_v15  ;;  %793 = vmatpush.bf16.msra.mxu1 %v1014_v18 }
 0x151   : > { %1053 = vmatmul.msk.bf16.vlgmr.msrb.gmra.mxu2 %vm341_vm0, %v453_v5  ;;  %1055 = vmatmul.msk.bf16.vlgmr.msrb.gmra.mxu3 %vm341_vm0, %v453_v5 }
 0x152   : > { %1057 = vmatmul.msk.bf16.vlgmr.msrb.gmra.mxu0 %vm341_vm0, %v453_v5  ;;  %1059 = vmatmul.msk.bf16.vlgmr.msrb.gmra.mxu1 %vm341_vm0, %v453_v5 }
 0x161   : > { %1054 = vmatmul.msk.bf16.gmra.mxu2 %vm341_vm0, %v454_v3  ;;  %1056 = vmatmul.msk.bf16.gmra.mxu3 %vm341_vm0, %v454_v3 }
 0x162   : > { %1058 = vmatmul.msk.bf16.gmra.mxu0 %vm341_vm0, %v454_v3  ;;  %1060 = vmatmul.msk.bf16.gmra.mxu1 %vm341_vm0, %v454_v3 }
 0x171   : > { %1061 = vmatmul.msk.bf16.vlgmr.msra.gmra.mxu2 %vm341_vm0, %v453_v5  ;;  %1063 = vmatmul.msk.bf16.vlgmr.msra.gmra.mxu3 %vm341_vm0, %v453_v5 }
 0x172   : > { %1065 = vmatmul.msk.bf16.vlgmr.msra.gmra.mxu0 %vm341_vm0, %v453_v5  ;;  %1067 = vmatmul.msk.bf16.vlgmr.msra.gmra.mxu1 %vm341_vm0, %v453_v5  ;;  %v1154_v5 = vld [vmem:[%s1558_s5 + $0x8] ss:$0 sm:$0xff] }
 0x181   : > { %1062 = vmatmul.msk.bf16.gmra.mxu2 %vm341_vm0, %v454_v3  ;;  %1064 = vmatmul.msk.bf16.gmra.mxu3 %vm341_vm0, %v454_v3 }
 0x182   : > { %1066 = vmatmul.msk.bf16.gmra.mxu0 %vm341_vm0, %v454_v3  ;;  %1068 = vmatmul.msk.bf16.gmra.mxu1 %vm341_vm0, %v454_v3 }
 0x1bf   : > { %v486_v23 = vpop.f32.mrf.mxu0  ;;  %v643_v24 = vpop.f32.mrf.mxu1 }
 0x1c0   : > { %496 = vst.msk [vmem:[%s327_s17] sm:$0xff] %vm341_vm0, %v486_v23  ;;  %v644_v25 = vadd.f32 %v643_v24, %v524_v22 }
 0x1c2   : > { %805 = vst [vmem:[%s1488_s27] sm:$0xff] %v644_v25 }
 0x1c4   : > { %v491_v26 = vpop.f32.mrf.mxu2  ;;  %v648_v27 = vpop.f32.mrf.mxu3 }
 0x1c5   : > { %498 = vst.msk [vmem:[%s327_s17 + $0x10] sm:$0xff] %vm341_vm0, %v491_v26  ;;  %v649_v28 = vadd.f32 %v648_v27, %v524_v22 }
 0x1c7   : > { %823 = vst [vmem:[%s1488_s27 + $0x90] sm:$0xff] %v649_v28  ;;  %v488_v31 = vpop.f32.mrf.mxu0  ;;  %v645_v32 = vpop.f32.mrf.mxu1 }
 0x1c8   : > { %497 = vst.msk [vmem:[%s327_s17 + $0x8] sm:$0xff] %vm341_vm0, %v488_v31  ;;  %v646_v33 = vadd.f32 %v645_v32, %v524_v22 }
 0x1ca   : > { %814 = vst [vmem:[%s1488_s27 + $0x48] sm:$0xff] %v646_v33 }
 0x1cc   : > { %v493_v34 = vpop.f32.mrf.mxu2  ;;  %v650_v35 = vpop.f32.mrf.mxu3 }
 0x1cd   : > { %499 = vst.msk [vmem:[%s327_s17 + $0x18] sm:$0xff] %vm341_vm0, %v493_v34  ;;  %v651_v38 = vadd.f32 %v650_v35, %v524_v22 }
 0x1cf   : > { %832 = vst [vmem:[%s1488_s27 + $0xd8] sm:$0xff] %v651_v38  ;;  %v700_v39 = vpop.f32.mrf.mxu0  ;;  %v719_v40 = vpop.f32.mrf.mxu1 }
 0x1d0   : > { %v701_v41 = vadd.f32 %v700_v39, %v527_v36  ;;  %v720_v42 = vadd.f32 %v719_v40, %v528_v37 }
 0x1d2   : > { %808 = vst [vmem:[%s1488_s27 + $0x18] sm:$0xff] %v701_v41 }
 0x1d3   : > { %809 = vst [vmem:[%s1488_s27 + $0x20] sm:$0xff] %v720_v42 }
 0x1d4   : > { %v662_v45 = vpop.f32.mrf.mxu2  ;;  %v681_v46 = vpop.f32.mrf.mxu3 }
 0x1d5   : > { %v663_v47 = vadd.f32 %v662_v45, %v525_v43  ;;  %v682_v48 = vadd.f32 %v681_v46, %v526_v44 }
 0x1d7   : > { %806 = vst [vmem:[%s1488_s27 + $0x8] sm:$0xff] %v663_v47  ;;  %v702_v49 = vpop.f32.mrf.mxu0  ;;  %v721_v50 = vpop.f32.mrf.mxu1 }
 0x1d8   : > { %807 = vst [vmem:[%s1488_s27 + $0x10] sm:$0xff] %v682_v48  ;;  %v703_v51 = vadd.f32 %v702_v49, %v527_v36  ;;  %v722_v19 = vadd.f32 %v721_v50, %v528_v37 }
 0x1da   : > { %817 = vst [vmem:[%s1488_s27 + $0x60] sm:$0xff] %v703_v51 }
 0x1db   : > { %818 = vst [vmem:[%s1488_s27 + $0x68] sm:$0xff] %v722_v19 }
 0x1dc   : > { %v664_v52 = vpop.f32.mrf.mxu2  ;;  %v683_v53 = vpop.f32.mrf.mxu3 }
 0x1dd   : > { %v665_v54 = vadd.f32 %v664_v52, %v525_v43  ;;  %v684_v55 = vadd.f32 %v683_v53, %v526_v44 }
 0x1df   : > { %815 = vst [vmem:[%s1488_s27 + $0x50] sm:$0xff] %v665_v54  ;;  %v705_v20 = vpop.f32.mrf.mxu0  ;;  %v724_v56 = vpop.f32.mrf.mxu1 }
 0x1e0   : > { %816 = vst [vmem:[%s1488_s27 + $0x58] sm:$0xff] %v684_v55  ;;  %v706_v57 = vadd.f32 %v705_v20, %v527_v36  ;;  %v725_v58 = vadd.f32 %v724_v56, %v528_v37 }
 0x1e2   : > { %826 = vst [vmem:[%s1488_s27 + $0xa8] sm:$0xff] %v706_v57 }
 0x1e3   : > { %827 = vst [vmem:[%s1488_s27 + $0xb0] sm:$0xff] %v725_v58 }
 0x1e4   : > { %v667_v59 = vpop.f32.mrf.mxu2  ;;  %v686_v60 = vpop.f32.mrf.mxu3 }
 0x1e5   : > { %v668_v61 = vadd.f32 %v667_v59, %v525_v43  ;;  %v687_v62 = vadd.f32 %v686_v60, %v526_v44 }
 0x1e7   : > { %824 = vst [vmem:[%s1488_s27 + $0x98] sm:$0xff] %v668_v61  ;;  %v707_v63 = vpop.f32.mrf.mxu0  ;;  %v726_v0 = vpop.f32.mrf.mxu1 }
 0x1e8   : > { %825 = vst [vmem:[%s1488_s27 + $0xa0] sm:$0xff] %v687_v62  ;;  %v708_v1 = vadd.f32 %v707_v63, %v527_v36  ;;  %v727_v2 = vadd.f32 %v726_v0, %v528_v37 }
 0x1ea   : > { %835 = vst [vmem:[%s1488_s27 + $0xf0] sm:$0xff] %v708_v1 }
 0x1eb   : > { %836 = vst [vmem:[%s1488_s27 + $0xf8] sm:$0xff] %v727_v2 }
 0x1ec   : > { %v669_v3 = vpop.f32.mrf.mxu2  ;;  %v688_v29 = vpop.f32.mrf.mxu3 }
 0x1ed   : > { %v670_v6 = vadd.f32 %v669_v3, %v525_v43  ;;  %v689_v30 = vadd.f32 %v688_v29, %v526_v44 }
 0x1ef   : > { %833 = vst [vmem:[%s1488_s27 + $0xe0] sm:$0xff] %v670_v6  ;;  %v776_v7 = vpop.f32.mrf.mxu0  ;;  %v795_v8 = vpop.f32.mrf.mxu1 }
 0x1f0   : > { %834 = vst [vmem:[%s1488_s27 + $0xe8] sm:$0xff] %v689_v30  ;;  %v777_v9 = vadd.f32 %v776_v7, %v531_v4  ;;  %v796_v10 = vadd.f32 %v1154_v5, %v795_v8 }
 0x1f2   : > { %812 = vst [vmem:[%s1488_s27 + $0x38] sm:$0xff] %v777_v9 }
 0x1f3   : > { %813 = vst [vmem:[%s1488_s27 + $0x40] sm:$0xff] %v796_v10 }
 0x1f4   : > { %v738_v13 = vpop.f32.mrf.mxu2  ;;  %v757_v14 = vpop.f32.mrf.mxu3 }
 0x1f5   : > { %v739_v15 = vadd.f32 %v738_v13, %v529_v11  ;;  %v758_v16 = vadd.f32 %v757_v14, %v530_v12 }
 0x1f7   : > { %810 = vst [vmem:[%s1488_s27 + $0x28] sm:$0xff] %v739_v15  ;;  %v778_v17 = vpop.f32.mrf.mxu0  ;;  %v797_v18 = vpop.f32.mrf.mxu1 }
 0x1f8   : > { %811 = vst [vmem:[%s1488_s27 + $0x30] sm:$0xff] %v758_v16  ;;  %v779_v22 = vadd.f32 %v778_v17, %v531_v4  ;;  %v798_v23 = vadd.f32 %v1154_v5, %v797_v18 }
 0x1fa   : > { %821 = vst [vmem:[%s1488_s27 + $0x80] sm:$0xff] %v779_v22 }
 0x1fb   : > { %822 = vst [vmem:[%s1488_s27 + $0x88] sm:$0xff] %v798_v23 }
 0x1fc   : > { %v740_v24 = vpop.f32.mrf.mxu2  ;;  %v759_v21 = vpop.f32.mrf.mxu3 }
 0x1fd   : > { %v741_v25 = vadd.f32 %v740_v24, %v529_v11  ;;  %v760_v26 = vadd.f32 %v759_v21, %v530_v12 }
 0x1ff   : > { %819 = vst [vmem:[%s1488_s27 + $0x70] sm:$0xff] %v741_v25  ;;  %v781_v27 = vpop.f32.mrf.mxu0  ;;  %v800_v28 = vpop.f32.mrf.mxu1 }
 0x200   : > { %820 = vst [vmem:[%s1488_s27 + $0x78] sm:$0xff] %v760_v26  ;;  %v782_v31 = vadd.f32 %v781_v27, %v531_v4  ;;  %v801_v32 = vadd.f32 %v1154_v5, %v800_v28 }
 0x202   : > { %830 = vst [vmem:[%s1488_s27 + $0xc8] sm:$0xff] %v782_v31 }
 0x203   : > { %831 = vst [vmem:[%s1488_s27 + $0xd0] sm:$0xff] %v801_v32 }
 0x204   : > { %v743_v33 = vpop.f32.mrf.mxu2  ;;  %v762_v34 = vpop.f32.mrf.mxu3 }
 0x205   : > { %v744_v35 = vadd.f32 %v743_v33, %v529_v11  ;;  %v763_v36 = vadd.f32 %v762_v34, %v530_v12 }
 0x207   : > { %828 = vst [vmem:[%s1488_s27 + $0xb8] sm:$0xff] %v744_v35  ;;  %v783_v37 = vpop.f32.mrf.mxu0  ;;  %v802_v38 = vpop.f32.mrf.mxu1 }
 0x208   : > { %829 = vst [vmem:[%s1488_s27 + $0xc0] sm:$0xff] %v763_v36  ;;  %v784_v39 = vadd.f32 %v783_v37, %v531_v4  ;;  %v803_v40 = vadd.f32 %v1154_v5, %v802_v38 }
 0x20a   : > { %839 = vst [vmem:[%s1488_s27 + $0x110] sm:$0xff] %v784_v39 }
 0x20b   : > { %840 = vst [vmem:[%s1488_s27 + $0x118] sm:$0xff] %v803_v40 }
 0x20c   : > { %v745_v41 = vpop.f32.mrf.mxu2  ;;  %v764_v42 = vpop.f32.mrf.mxu3 }
 0x20d   : > { %v746_v43 = vadd.f32 %v745_v41, %v529_v11  ;;  %v765_v44 = vadd.f32 %v764_v42, %v530_v12 }
 0x20f   : > { %837 = vst [vmem:[%s1488_s27 + $0x100] sm:$0xff] %v746_v43 }
 0x210   : > { %838 = vst [vmem:[%s1488_s27 + $0x108] sm:$0xff] %v765_v44 }
 0x211 PF: > { %p19_p4 = scmp.ge.s32.totalorder %s1357_s14, 6   ;;  %s1567_s24 = smov %s1255_s25 }
 0x212   : > { %s1568_s25 = smov %s1259_s26  ;;  %s1569_s26 = smov %s1367_s19 }
 0x213   : > { %s1570_s27 = smov %s1357_s14  ;;  %21 = sbr.rel (!%p19_p4) target bundleno = 4 (0x4), region = 100 }
 0x218   :  { %882 = vsyncpa [#allocation3], 1 }
 0x219   :  { %884 = vsyncpa [#allocation3 + $0x1], 1 }
 0x21a   :  { %885 = vsyncpa [#allocation5], 1 }

// kernel: outlooker_forward.6
= control target key start
LH: loop header
LB: loop body
LE: loop exit
PB: predicated region body
PF: predicated region fallthrough
CT: control target
= control target key end

     0   :  { %s429_s15 = smov 0   ;;  %s464_s0 = inlined_call_operand.vmem [shape: f32[128,32], index: 0, kind: input, shape index: {}]   ;;  %s465_s1 = inlined_call_operand.vmem [shape: f32[128,32], index: 1, kind: input, shape index: {}]   ;;  %s466_s2 = inlined_call_operand.vmem [shape: bf16[32,32], index: 2, kind: input, shape index: {}]   ;;  %s467_s3 = inlined_call_operand.vmem [shape: f32[1,32], index: 3, kind: input, shape index: {}]   ;;  %s468_s4 = inlined_call_operand.vmem [shape: f32[128,32], index: 4, kind: output, shape index: {}]  }
   0x1 LB: > { %s360_s16 = sadd.s32 4294967295, %s402_s15   ;;  %p364_p0 = scmp.ge.s32.totalorder %s402_s15, 1  ;;  %s402_s15 = sphi %s429_s15, %s14_s15  }
   0x2   : > { %p174_p1 = scmp.lt.s32.totalorder %s402_s15, 5 }
   0x4   : > { %p175_p2 = pnand %p364_p0, %p174_p1 }
   0x5   : > { %s365_s19 = sshll.u32 (!%p175_p2), %s360_s16, 2 }
   0x6   : > { %178 = sbr.rel (%p175_p2) target bundleno = 159 (0x9f), region = 36  ;;  %p206_p3 = scmp.lt.s32.totalorder (!%p175_p2), %s365_s19, 15 }
   0xb   : > { %v384_v0 = vld [vmem:[%s466_s2 + $0x8] sm:$0xff]  ;;  %v383_v1 = vld [vmem:[%s466_s2] sm:$0xff]  ;;  %s470_s19 = smov (!%p206_p3, %s365_s19), 15  ;;  %vm246_vm0 = vcmask 261120  }
   0xc   : > { %259 = vmatpush.bf16.msra.mxu0 %v384_v0  ;;  %385 = vmatpush.bf16.msra.mxu1 %v384_v0  ;;  %s366_s22 = sshll.u32 %s470_s19, 3  ;;  %v395_v9 = vld [vmem:[%s467_s3] ss:$0 sm:$0xff] }
   0xd   : > { %s209_s25 = scalar_lea.vmem %s464_s0, %s366_s22  ;;  %s215_s28 = scalar_lea.vmem %s465_s1, %s366_s22 }
   0xe   : > { %v224_v2 = vld [vmem:[%s209_s25] sm:$0xff]  ;;  %v225_v3 = vld [vmem:[%s209_s25 + $0x8] sm:$0xff]  ;;  %v226_v4 = vld [vmem:[%s209_s25 + $0x10] sm:$0xff]  ;;  %s221_s7 = scalar_lea.vmem %s468_s4, %s366_s22 }
   0xf   : > { %v228_v5 = vpack.c.bf16 %v225_v3, %v224_v2  ;;  %v227_v6 = vld [vmem:[%s209_s25 + $0x18] sm:$0xff]  ;;  %v272_v8 = vld [vmem:[%s215_s28] sm:$0xff]  ;;  %v274_v10 = vld [vmem:[%s215_s28 + $0x10] sm:$0xff] }
  0x10   : > { %260 = vmatpush.bf16.msra.mxu0 %v383_v1  ;;  %386 = vmatpush.bf16.msra.mxu1 %v383_v1  ;;  %v229_v7 = vpack.c.bf16 %v227_v6, %v226_v4  ;;  %v273_v17 = vld [vmem:[%s215_s28 + $0x8] sm:$0xff]  ;;  %v275_v18 = vld [vmem:[%s215_s28 + $0x18] sm:$0xff] }
  0x13   : > { %379 = vmatmul.msk.bf16.vlgmr.msra.gmra.mxu0 %vm246_vm0, %v228_v5  ;;  %380 = vmatmul.msk.bf16.vlgmr.msra.gmra.mxu1 %vm246_vm0, %v229_v7 }
  0x90   : > { %v262_v11 = vpop.f32.mrf.mxu0  ;;  %v267_v13 = vpop.f32.mrf.mxu1 }
  0x91   : > { %v276_v12 = vadd.f32 %v272_v8, %v262_v11  ;;  %v278_v14 = vadd.f32 %v274_v10, %v267_v13 }
  0x93   : > { %v284_v15 = vadd.f32 %v395_v9, %v276_v12  ;;  %v286_v16 = vadd.f32 %v395_v9, %v278_v14 }
  0x95   : > { %288 = vst.msk [vmem:[%s221_s7] sm:$0xff] %vm246_vm0, %v284_v15 }
  0x96   : > { %290 = vst.msk [vmem:[%s221_s7 + $0x10] sm:$0xff] %vm246_vm0, %v286_v16 }
  0x98   : > { %v264_v19 = vpop.f32.mrf.mxu0  ;;  %v269_v21 = vpop.f32.mrf.mxu1 }
  0x99   : > { %v277_v20 = vadd.f32 %v273_v17, %v264_v19  ;;  %v279_v22 = vadd.f32 %v275_v18, %v269_v21 }
  0x9b   : > { %v285_v23 = vadd.f32 %v395_v9, %v277_v20  ;;  %v287_v24 = vadd.f32 %v395_v9, %v279_v22 }
  0x9d   : > { %289 = vst.msk [vmem:[%s221_s7 + $0x8] sm:$0xff] %vm246_vm0, %v285_v23 }
  0x9e   : > { %291 = vst.msk [vmem:[%s221_s7 + $0x18] sm:$0xff] %vm246_vm0, %v287_v24 }
  0x9f PF: > { %s14_s15 = sadd.s32 1, %s402_s15  }
  0xa0   : > { %p11_p4 = scmp.ge.s32.totalorder %s14_s15, 6  }
  0xa2   :  { %13 = sbr.rel (!%p11_p4) target bundleno = 1 (0x1), region = 69 }

// kernel: outlooker_forward.7
= control target key start
LH: loop header
LB: loop body
LE: loop exit
PB: predicated region body
PF: predicated region fallthrough
CT: control target
= control target key end

     0   :  { %12 = vsyncpa [#allocation3], 0  ;;  %s1056_s0 = inlined_call_operand.vmem [shape: f32[128,32], index: 0, kind: input, shape index: {}]   ;;  %s1057_s1 = inlined_call_operand.vmem [shape: f32[1,32], index: 1, kind: input, shape index: {}]   ;;  %s1058_s2 = inlined_call_operand.vmem [shape: f32[1,32], index: 2, kind: input, shape index: {}]   ;;  %s1059_s3 = inlined_call_operand.vmem [shape: bf16[32,96], index: 3, kind: input, shape index: {}]   ;;  %s1060_s4 = inlined_call_operand.vmem [shape: f32[1,96], index: 4, kind: input, shape index: {}]   ;;  %s1061_s5 = inlined_call_operand.vmem [shape: bf16[96,32], index: 5, kind: input, shape index: {}]   ;;  %s1062_s6 = inlined_call_operand.vmem [shape: f32[1,32], index: 6, kind: input, shape index: {}]   ;;  %s1063_s7 = inlined_call_operand.hbm [shape: f32[128,32], index: 7, kind: output, shape index: {}]  }
   0x1   :  { %14 = vsyncpa [#allocation3 + $0x1], 0  ;;  %s882_s24 = smov 0   ;;  %s884_s25 = smov 0  }
   0x2   :  { %s886_s26 = smov 0   ;;  %s888_s27 = smov 0  }
   0x3 LB: > { %s903_s28 = sadd.s32 4294967295, %s837_s27   ;;  %s646_s29 = sadd.s32 4294967294, %s837_s27   ;;  %s837_s27 = sphi %s888_s27, %s1069_s27   ;;  %s833_s26 = sphi %s886_s26, %s1068_s26   ;;  %s829_s25 = sphi %s884_s25, %s1067_s25   ;;  %s825_s24 = sphi %s882_s24, %s1066_s24  }
   0x4   : > { %s907_s30 = sadd.s32 1, %s837_s27   ;;  %s179_s8 = sadd.s32 1, %s833_s26 }
   0x5   : > { %s176_s9 = ssub.s32 %s837_s27, %s907_s30  ;;  %p189_p0 = scmp.ne.s32.totalorder %s833_s26, %s829_s25 }
   0x6   : > { %p177_p1 = scmp.eq.s32.totalorder %s176_s9, 0  ;;  %p190_p2 = scmp.eq.s32.totalorder %s903_s28, 3 }
   0x7   : > { %p195_p3 = scmp.ne.s32.totalorder %s829_s25, %s825_s24  ;;  %p196_p4 = scmp.eq.s32.totalorder %s646_s29, 3 }
   0x8   : > { %s918_s10 = scalar_select %p177_p1, %s833_s26, %s179_s8  }
   0x9   : > { %p920_p5 = por %p190_p2, %p189_p0  ;;  %p924_p6 = por %p196_p4, %p195_p3 }
   0xa   : > { %p649_p7 = scmp.ge.s32.totalorder %s837_s27, 1  ;;  %p241_p8 = scmp.lt.s32.totalorder %s837_s27, 5 }
   0xc   : > { %p242_p9 = pnand %p649_p7, %p241_p8 }
   0xd   : > { %s651_s13 = sshll.u32 (!%p242_p9), %s903_s28, 2  ;;  %s270_s9 = sand.u32 (!%p242_p9), 1, %s829_s25  }
   0xe   : > { %245 = sbr.rel (%p242_p9) target bundleno = 616 (0x268), region = 48  ;;  %p274_p10 = scmp.lt.s32.totalorder (!%p242_p9), %s651_s13, 15 }
   0xf   : > { %s650_s15 = sshll.u32 (!%p242_p9), %s270_s9, 5 }
  0x10   : > { %s272_s16 = scalar_lea.vmem (!%p242_p9), [#allocation2], %s650_s15 }
  0x11   : > { %s581_s21 = sshll.u32 (!%p242_p9), %s272_s16, 4  ;;  %s582_s21 = int_to_ptr.vmem [resolvable:$true] %s581_s21 }
  0x13   : > { %s1071_s13 = smov (!%p274_p10, %s651_s13), 15  ;;  %vm285_vm0 = vcmask 261120   ;;  %v839_v8 = vmov 32.0   ;;  %v695_v35 = vld [vmem:[%s1059_s3 + $0x8] sm:$0xff]  ;;  %v694_v40 = vld [vmem:[%s1059_s3] sm:$0xff]  ;;  %vm534_vm14 = vcmask 785408  }
  0x14   : > { %s652_s14 = sshll.u32 %s1071_s13, 3  ;;  %757 = vrcp.f32 %v839_v8  ;;  %431 = vmatpush.bf16.msra.mxu0 %v695_v35  ;;  %703 = vmatpush.bf16.msra.mxu3 %v695_v35  ;;  %v699_v35 = vld [vmem:[%s1061_s5 + $0x18] sm:$0xff] }
  0x15   : > { %s277_s17 = scalar_lea.vmem %s1056_s0, %s652_s14  ;;  %s795_s14 = scalar_lea.hbm %s1063_s7, 128 }
  0x16   : > { %v934_v0 = vld [vmem:[%s277_s17 + $0x10] sm:$0xff]  ;;  %v936_v1 = vld [vmem:[%s277_s17] sm:$0xff]  ;;  %v942_v4 = vld [vmem:[%s277_s17 + $0x18] sm:$0xff] }
  0x17   : > { %v292_v2 = vsel %vm285_vm0, %v934_v0, 0.0  ;;  %v286_v3 = vsel %vm285_vm0, %v936_v1, 0.0  ;;  %v944_v5 = vld [vmem:[%s277_s17 + $0x8] sm:$0xff]  ;;  %v295_v6 = vsel %vm285_vm0, %v942_v4, 0.0  ;;  %s702_s17 = sshll.u32 %s903_s28, 5  ;;  %s569_s28 = scalar_lea.sflag [#allocation3], %s270_s9 }
  0x18   : > { %293 = vadd.xlane.f32.xlu0 %v292_v2  ;;  %287 = vadd.xlane.f32.xlu1 %v286_v3  ;;  %v289_v7 = vsel %vm285_vm0, %v944_v5, 0.0  ;;  %s580_s20 = scalar_lea.hbm %s1063_s7, %s702_s17 }
  0x19   : > { %432 = vmatpush.bf16.msra.mxu0 %v694_v40  ;;  %704 = vmatpush.bf16.msra.mxu3 %v694_v40  ;;  %s583_s22 = sshll.u32 %s580_s20, 4  ;;  %s584_s22 = int_to_ptr.hbm [resolvable:$true] %s583_s22 }
  0x1a   : > { %v758_v9 = vpop.eup %757  ;;  %s789_s23 = sshra.s32 %s584_s22, 4  ;;  %s790_s23 = int_to_ptr.hbm [resolvable:$true] %s789_s23 }
  0x1b   : > { %v299_v10 = vmul.f32 32.0, %v758_v9  ;;  %vm303_vm1 = vweird.f32 %v758_v9  ;;  %s791_s29 = scalar_lea.hbm %s790_s23, 32  ;;  %p796_p0 = scmp.lt.s32.totalorder %s790_s23, %s1063_s7 }
  0x1c   : > { %p792_p11 = scmp.ne.s32.totalorder %s790_s23, %s791_s29  ;;  %p797_p1 = scmp.lt.s32.totalorder %s795_s14, %s791_s29 }
  0x1d   : > { %v300_v11 = vsub.f32 1.0, %v299_v10 }
  0x1e   : > { %p793_p12 = pnand %p792_p11, %p920_p5  ;;  %p798_p2 = por %p797_p1, %p796_p0 }
  0x1f   : > { %v301_v12 = vmul.f32 %v758_v9, %v300_v11 }
  0x20   : > { %296 = vadd.xlane.f32.xlu0 %v295_v6  ;;  %290 = vadd.xlane.f32.xlu1 %v289_v7  ;;  %p794_p13 = pneg %p793_p12 }
  0x21   : > { %v302_v13 = vadd.f32 %v758_v9, %v301_v12 }
  0x22   : > { %p799_p3 = pnand %p798_p2, %p794_p13 }
  0x23   : > { %v304_v14 = vsel %vm303_vm1, %v758_v9, %v302_v13 }
  0x8b   : > { %v294_v15 = vpop.xlane.xlu0 %293  ;;  %v288_v16 = vpop.xlane.xlu1 %287 }
  0x8c   : > { %v307_v17 = vmul.f32 %v304_v14, %v294_v15  ;;  %v305_v18 = vmul.f32 %v304_v14, %v288_v16 }
  0x8e   : > { %v951_v19 = vsub.f32 %v934_v0, %v307_v17  ;;  %v954_v20 = vsub.f32 %v936_v1, %v305_v18 }
  0x90   : > { %v315_v21 = vmul.f32 %v951_v19, %v951_v19  ;;  %v313_v22 = vmul.f32 %v954_v20, %v954_v20 }
  0x92   : > { %v323_v23 = vsel %vm285_vm0, %v315_v21, 0.0  ;;  %v317_v24 = vsel %vm285_vm0, %v313_v22, 0.0 }
  0x93   : > { %324 = vadd.xlane.f32.xlu2 %v323_v23  ;;  %v297_v25 = vpop.xlane.xlu0 %296  ;;  %318 = vadd.xlane.f32.xlu0 %v317_v24  ;;  %v291_v26 = vpop.xlane.xlu1 %290 }
  0x94   : > { %v308_v27 = vmul.f32 %v304_v14, %v297_v25  ;;  %v306_v28 = vmul.f32 %v304_v14, %v291_v26 }
  0x96   : > { %v963_v29 = vsub.f32 %v942_v4, %v308_v27  ;;  %v966_v30 = vsub.f32 %v944_v5, %v306_v28 }
  0x98   : > { %v316_v31 = vmul.f32 %v963_v29, %v963_v29  ;;  %v314_v32 = vmul.f32 %v966_v30, %v966_v30 }
  0x9a   : > { %v326_v33 = vsel %vm285_vm0, %v316_v31, 0.0  ;;  %v320_v34 = vsel %vm285_vm0, %v314_v32, 0.0 }
  0x9b   : > { %327 = vadd.xlane.f32.xlu2 %v326_v33  ;;  %321 = vadd.xlane.f32.xlu1 %v320_v34 }
 0x106   : > { %v325_v36 = vpop.xlane.xlu2 %324  ;;  %v319_v37 = vpop.xlane.xlu0 %318 }
 0x107   : > { %v331_v38 = vmul.f32 %v325_v36, %v304_v14  ;;  %v329_v39 = vmul.f32 %v319_v37, %v304_v14  ;;  %v698_v36 = vld [vmem:[%s1061_s5 + $0x10] sm:$0xff]  ;;  %v697_v37 = vld [vmem:[%s1061_s5 + $0x8] sm:$0xff] }
 0x109   : > { %v335_v41 = vadd.f32 1e-05, %v331_v38  ;;  %v333_v42 = vadd.f32 1e-05, %v329_v39  ;;  %v755_v38 = vld [vmem:[%s1060_s4] ss:$0 sm:$0xff] }
 0x10a   : > { %v696_v39 = vld [vmem:[%s1061_s5] sm:$0xff] }
 0x10b   : > { %759 = vrsqrt.f32 %v335_v41  ;;  %vm343_vm3 = vweird.f32 %v333_v42  ;;  %vm363_vm5 = vweird.f32 %v335_v41 }
 0x10c   : > { %761 = vrsqrt.f32 %v333_v42 }
 0x10e   : > { %v328_v43 = vpop.xlane.xlu2 %327  ;;  %v322_v44 = vpop.xlane.xlu1 %321 }
 0x10f   : > { %v332_v45 = vmul.f32 %v328_v43, %v304_v14  ;;  %v330_v46 = vmul.f32 %v322_v44, %v304_v14  ;;  %v753_v14 = vld [vmem:[%s1057_s1] ss:$0 sm:$0xff] }
 0x111   : > { %v760_v47 = vpop.eup %759  ;;  %v336_v48 = vadd.f32 1e-05, %v332_v45  ;;  %v334_v49 = vadd.f32 1e-05, %v330_v46 }
 0x112   : > { %v762_v50 = vpop.eup %761  ;;  %v358_v51 = vmul.f32 %v760_v47, %v335_v41  ;;  %vm364_vm2 = vweird.f32 %v760_v47 }
 0x113   : > { %v338_v52 = vmul.f32 %v762_v50, %v333_v42  ;;  %763 = vrsqrt.f32 %v336_v48  ;;  %vm344_vm4 = vweird.f32 %v762_v50  ;;  %vm365_vm6 = vmor %vm363_vm5, %vm364_vm2  ;;  %vm353_vm9 = vweird.f32 %v334_v49 }
 0x114   : > { %v359_v53 = vmul.f32 %v760_v47, %v358_v51  ;;  %765 = vrsqrt.f32 %v334_v49  ;;  %vm345_vm7 = vmor %vm343_vm3, %vm344_vm4  ;;  %vm373_vm11 = vweird.f32 %v336_v48 }
 0x115   : > { %v339_v54 = vmul.f32 %v762_v50, %v338_v52 }
 0x116   : > { %v360_v55 = vmul.f32 0.5, %v359_v53 }
 0x117   : > { %v340_v56 = vmul.f32 0.5, %v339_v54 }
 0x118   : > { %v361_v57 = vsub.f32 1.5, %v360_v55 }
 0x119   : > { %v764_v58 = vpop.eup %763  ;;  %v341_v59 = vsub.f32 1.5, %v340_v56 }
 0x11a   : > { %v766_v60 = vpop.eup %765  ;;  %v362_v61 = vmul.f32 %v760_v47, %v361_v57  ;;  %v368_v62 = vmul.f32 %v764_v58, %v336_v48  ;;  %vm374_vm8 = vweird.f32 %v764_v58 }
 0x11b   : > { %v342_v63 = vmul.f32 %v762_v50, %v341_v59  ;;  %v348_v2 = vmul.f32 %v766_v60, %v334_v49  ;;  %vm354_vm10 = vweird.f32 %v766_v60  ;;  %vm375_vm12 = vmor %vm373_vm11, %vm374_vm8 }
 0x11c   : > { %v369_v3 = vmul.f32 %v764_v58, %v368_v62  ;;  %v366_v7 = vsel %vm365_vm6, %v760_v47, %v362_v61  ;;  %vm355_vm13 = vmor %vm353_vm9, %vm354_vm10 }
 0x11d   : > { %v349_v6 = vmul.f32 %v766_v60, %v348_v2  ;;  %v346_v9 = vsel %vm345_vm7, %v762_v50, %v342_v63  ;;  %v379_v12 = vmul.f32 %v366_v7, %v951_v19  ;;  %v754_v19 = vld [vmem:[%s1058_s2] ss:$0 sm:$0xff] }
 0x11e   : > { %v370_v8 = vmul.f32 0.5, %v369_v3  ;;  %v377_v15 = vmul.f32 %v346_v9, %v954_v20 }
 0x11f   : > { %v350_v10 = vmul.f32 0.5, %v349_v6  ;;  %v387_v23 = vmul.f32 %v753_v14, %v379_v12 }
 0x120   : > { %v371_v11 = vsub.f32 1.5, %v370_v8  ;;  %v385_v25 = vmul.f32 %v753_v14, %v377_v15 }
 0x121   : > { %v351_v13 = vsub.f32 1.5, %v350_v10  ;;  %v395_v20 = vadd.f32 %v754_v19, %v387_v23 }
 0x122   : > { %v372_v16 = vmul.f32 %v764_v58, %v371_v11  ;;  %v393_v31 = vadd.f32 %v754_v19, %v385_v25 }
 0x123   : > { %v352_v17 = vmul.f32 %v766_v60, %v351_v13 }
 0x124   : > { %v376_v18 = vsel %vm375_vm12, %v764_v58, %v372_v16 }
 0x125   : > { %v380_v21 = vmul.f32 %v376_v18, %v963_v29  ;;  %v356_v22 = vsel %vm355_vm13, %v766_v60, %v352_v17  ;;  %v701_v29 = vld [vmem:[%s1061_s5 + $0x28] sm:$0xff] }
 0x126   : > { %v378_v24 = vmul.f32 %v356_v22, %v966_v30  ;;  %543 = vmatpush.bf16.msra.mxu1 %v701_v29  ;;  %705 = vmatpush.bf16.msra.mxu2 %v701_v29  ;;  %v700_v30 = vld [vmem:[%s1061_s5 + $0x20] sm:$0xff] }
 0x127   : > { %v388_v26 = vmul.f32 %v753_v14, %v380_v21 }
 0x128   : > { %v386_v27 = vmul.f32 %v753_v14, %v378_v24 }
 0x129   : > { %v396_v28 = vadd.f32 %v754_v19, %v388_v26 }
 0x12a   : > { %v394_v32 = vadd.f32 %v754_v19, %v386_v27  ;;  %544 = vmatpush.bf16.msra.mxu1 %v700_v30  ;;  %706 = vmatpush.bf16.msra.mxu2 %v700_v30  ;;  %v756_v27 = vld [vmem:[%s1062_s6] ss:$0 sm:$0xff] }
 0x12b   : > { %v398_v33 = vpack.c.bf16 %v396_v28, %v395_v20 }
 0x12c   : > { %v397_v34 = vpack.c.bf16 %v394_v32, %v393_v31 }
 0x12d   : > { %662 = vmatmul.msk.bf16.vlgmr.msra.gmra.mxu3 %vm285_vm0, %v398_v33 }
 0x12e   : > { %661 = vmatmul.msk.bf16.vlgmr.msra.gmra.mxu0 %vm285_vm0, %v397_v34  ;;  %545 = vmatpush.bf16.msra.mxu1 %v699_v35 }
 0x12f   : > { %707 = vmatpush.bf16.msra.mxu2 %v699_v35 }
 0x132   : > { %546 = vmatpush.bf16.msra.mxu1 %v698_v36 }
 0x133   : > { %708 = vmatpush.bf16.msra.mxu2 %v698_v36 }
 0x136   : > { %547 = vmatpush.bf16.msra.mxu1 %v697_v37 }
 0x137   : > { %709 = vmatpush.bf16.msra.mxu2 %v697_v37 }
 0x13a   : > { %548 = vmatpush.bf16.msra.mxu1 %v696_v39 }
 0x13b   : > { %710 = vmatpush.bf16.msra.mxu2 %v696_v39 }
 0x1ab   : > { %v434_v40 = vpop.f32.mrf.mxu0 }
 0x1ac   : > { %v435_v41 = vadd.f32 %v755_v38, %v434_v40 }
 0x1ae   : > { %v444_v42 = vmul.f32 %v435_v41, %v435_v41 }
 0x1b0   : > { %v448_v43 = vmul.f32 %v444_v42, %v435_v41  ;;  %v439_v44 = vpop.f32.mrf.mxu3 }
 0x1b1   : > { %v440_v45 = vadd.f32 %v755_v38, %v439_v44 }
 0x1b2   : > { %v452_v46 = vmul.f32 0.044715, %v448_v43 }
 0x1b3   : > { %v446_v47 = vmul.f32 %v440_v45, %v440_v45  ;;  %v436_v48 = vpop.f32.mrf.mxu0 }
 0x1b4   : > { %v456_v49 = vadd.f32 %v452_v46, %v435_v41  ;;  %v437_v50 = vadd.f32 %v755_v38, %v436_v48 }
 0x1b5   : > { %v450_v51 = vmul.f32 %v446_v47, %v440_v45 }
 0x1b6   : > { %v460_v52 = vmul.f32 0.7978846, %v456_v49  ;;  %v445_v53 = vmul.f32 %v437_v50, %v437_v50 }
 0x1b7   : > { %v454_v54 = vmul.f32 0.044715, %v450_v51 }
 0x1b8   : > { %v449_v55 = vmul.f32 %v445_v53, %v437_v50  ;;  %v441_v56 = vpop.f32.mrf.mxu3  ;;  %767 = vtanh.f32 %v460_v52 }
 0x1b9   : > { %v458_v57 = vadd.f32 %v454_v54, %v440_v45  ;;  %v442_v58 = vadd.f32 %v755_v38, %v441_v56 }
 0x1ba   : > { %v453_v59 = vmul.f32 0.044715, %v449_v55 }
 0x1bb   : > { %v462_v60 = vmul.f32 0.7978846, %v458_v57  ;;  %v447_v61 = vmul.f32 %v442_v58, %v442_v58 }
 0x1bc   : > { %v457_v62 = vadd.f32 %v453_v59, %v437_v50 }
 0x1bd   : > { %v451_v63 = vmul.f32 %v447_v61, %v442_v58  ;;  %769 = vtanh.f32 %v462_v60 }
 0x1be   : > { %v461_v2 = vmul.f32 0.7978846, %v457_v62  ;;  %v768_v6 = vpop.eup %767 }
 0x1bf   : > { %v455_v3 = vmul.f32 0.044715, %v451_v63  ;;  %v468_v9 = vadd.f32 1.0, %v768_v6 }
 0x1c0   : > { %771 = vtanh.f32 %v461_v2 }
 0x1c1   : > { %v459_v7 = vadd.f32 %v455_v3, %v442_v58  ;;  %v472_v13 = vmul.f32 0.5, %v468_v9 }
 0x1c3   : > { %v463_v8 = vmul.f32 0.7978846, %v459_v7  ;;  %v770_v10 = vpop.eup %769  ;;  %v476_v17 = vmul.f32 %v472_v13, %v435_v41 }
 0x1c4   : > { %v470_v14 = vadd.f32 1.0, %v770_v10 }
 0x1c5   : > { %773 = vtanh.f32 %v463_v8 }
 0x1c6   : > { %v772_v11 = vpop.eup %771  ;;  %v474_v22 = vmul.f32 0.5, %v470_v14 }
 0x1c7   : > { %v469_v12 = vadd.f32 1.0, %v772_v11 }
 0x1c8   : > { %v478_v24 = vmul.f32 %v474_v22, %v440_v45 }
 0x1c9   : > { %v473_v15 = vmul.f32 0.5, %v469_v12 }
 0x1cb   : > { %v774_v16 = vpop.eup %773  ;;  %v477_v18 = vmul.f32 %v473_v15, %v437_v50 }
 0x1cc   : > { %v471_v21 = vadd.f32 1.0, %v774_v16 }
 0x1cd   : > { %v480_v19 = vpack.c.bf16 %v477_v18, %v476_v17 }
 0x1ce   : > { %v475_v23 = vmul.f32 0.5, %v471_v21 }
 0x1cf   : > { %687 = vmatmul.msk.bf16.vlgmr.msra.gmra.mxu1 %vm534_vm14, %v480_v19 }
 0x1d0   : > { %v479_v25 = vmul.f32 %v475_v23, %v442_v58 }
 0x1d2   : > { %v481_v26 = vpack.c.bf16 %v479_v25, %v478_v24 }
 0x1d4   : > { %688 = vmatmul.msk.bf16.vlgmr.msra.gmra.mxu2 %vm534_vm14, %v481_v26 }
 0x24c   : > { %v550_v20 = vpop.f32.mrf.mxu1 }
 0x24d   : > { %v551_v28 = vadd.f32 %v756_v27, %v550_v20 }
 0x24f   : > { %v560_v31 = vadd.f32 %v551_v28, %v936_v1 }
 0x251   : > { %564 = vst.msk [vmem:[%s272_s16] sm:$0xff] %vm285_vm0, %v560_v31 }
 0x254   : > { %v552_v32 = vpop.f32.mrf.mxu1 }
 0x255   : > { %v553_v33 = vadd.f32 %v756_v27, %v552_v32 }
 0x257   : > { %v561_v34 = vadd.f32 %v553_v33, %v944_v5  ;;  %v555_v29 = vpop.f32.mrf.mxu2 }
 0x258   : > { %v556_v30 = vadd.f32 %v756_v27, %v555_v29 }
 0x259   : > { %565 = vst.msk [vmem:[%s272_s16 + $0x8] sm:$0xff] %vm285_vm0, %v561_v34 }
 0x25a   : > { %v562_v35 = vadd.f32 %v556_v30, %v934_v0 }
 0x25c   : > { %566 = vst.msk [vmem:[%s272_s16 + $0x10] sm:$0xff] %vm285_vm0, %v562_v35 }
 0x25f   : > { %v557_v1 = vpop.f32.mrf.mxu2 }
 0x260   : > { %v558_v36 = vadd.f32 %v756_v27, %v557_v1 }
 0x262   : > { %v563_v5 = vadd.f32 %v558_v36, %v942_v4 }
 0x264   : > { %567 = vst.msk [vmem:[%s272_s16 + $0x18] sm:$0xff] %vm285_vm0, %v563_v5 }
 0x265   : > { %802 = shalt.err (!%p799_p3)
}
 0x266   : > { %s840_s9 = smov 128   ;;  %s841_s16 = smov 8  }
 0x267   : > { %711 = dma.vmem_to_hbm [thread:$0]  (%p920_p5), %s582_s21, 512, %s584_s22, %s569_s28, %s840_s9, %s840_s9, %s841_s16  }
 0x268 PF: > { %p717_p4 = scmp.ge.s32.totalorder %s837_s27, 2  ;;  %s598_s18 = sand.u32 1, %s825_s24  }
 0x269   : > { %s599_s19 = scalar_lea.sflag [#allocation3], %s598_s18 }
 0x26a   : > { %p714_p7 = pnand %p717_p4, %p924_p6 }
 0x26c   : > { %p715_p8 = pneg %p714_p7 }
 0x26e   : > { %820 = dma.done.wait (%p715_p8), %s599_s19, 512  }
 0x26f   : > { %822 = vsyncadd (%p715_p8), %s599_s19, 4294966784  ;;  %p17_p9 = scmp.ge.s32.totalorder %s907_s30, 6   ;;  %s1066_s24 = smov %s829_s25 }
 0x270   : > { %s1067_s25 = smov %s833_s26  ;;  %s1068_s26 = smov %s918_s10 }
 0x271   : > { %s1069_s27 = smov %s907_s30  ;;  %19 = sbr.rel (!%p17_p9) target bundleno = 3 (0x3), region = 83 }
 0x276   :  { %605 = vsyncpa [#allocation3], 1 }
 0x277   :  { %607 = vsyncpa [#allocation3 + $0x1], 1 }

// kernel: outlooker_forward.5
= control target key start
LH: loop header
LB: loop body
LE: loop exit
PB: predicated region body
PF: predicated region fallthrough
CT: control target
= control target key end

     0   :  { %s5240_s12 = smov 0   ;;  %s5242_s13 = smov 0   ;;  %s10123_s0 = inlined_call_operand.vmem [shape: f32[128,9,128], index: 0, kind: input, shape index: {}]   ;;  %s10124_s1 = inlined_call_operand.vmem [shape: f32[9,128,32], index: 1, kind: input, shape index: {}]   ;;  %s10125_s2 = inlined_call_operand.vmem [shape: bf16[128,288], index: 2, kind: input, shape index: {}]   ;;  %s10126_s3 = inlined_call_operand.vmem [shape: f32[9,128,32], index: 3, kind: output, shape index: {}]  }
   0x1   :  { %s5244_s14 = smov 0  }
   0x2 LB: > { %s4661_s15 = sadd.s32 4294967295, %s5215_s14   ;;  %s5257_s16 = sadd.s32 1, %s5215_s14   ;;  %s5215_s14 = sphi %s5244_s14, %s11475_s14   ;;  %s5211_s13 = sphi %s5242_s13, %s11474_s13   ;;  %s5207_s12 = sphi %s5240_s12, %s11473_s12  }
   0x3   : > { %s43_s17 = ssub.s32 %s5215_s14, %s5257_s16  ;;  %s46_s18 = sadd.s32 1, %s5211_s13 }
   0x4   : > { %p44_p0 = scmp.eq.s32.totalorder %s43_s17, 0  ;;  %p53_p1 = scmp.ne.s32.totalorder %s5211_s13, %s5207_s12 }
   0x5   : > { %p54_p2 = scmp.eq.s32.totalorder %s5215_s14, 0  ;;  %p104_p3 = scmp.eq.s32.totalorder %s4661_s15, 3 }
   0x6   : > { %s5268_s19 = scalar_select %p44_p0, %s5211_s13, %s46_s18  }
   0x7   : > { %p55_p4 = por %p54_p2, %p53_p1  ;;  %p5270_p5 = por %p104_p3, %p53_p1 }
   0x8   : > { %p4664_p6 = scmp.ge.s32.totalorder %s5215_s14, 4 }
   0xa   : > { %129 = sbr.rel (%p4664_p6) target bundleno = 55 (0x37), region = 20 }
   0xf   : > { %142 = sbr.rel (!%p55_p4) target bundleno = 55 (0x37), region = 28  ;;  %s144_s21 = sand.u32 (%p55_p4), 1, %s5211_s13  }
  0x10   : > { %s4899_s22 = sshll.u32 (%p55_p4), %s5215_s14, 5  ;;  %s4934_s23 = smul.u32 (%p55_p4), 288, %s144_s21 }
  0x11   : > { %s5280_s26 = scalar_lea.vmem (%p55_p4), %s10124_s1, %s4899_s22 }
  0x12   : > { %v248_v0 = vld [vmem:[%s5280_s26] sm:$0xff] (%p55_p4)  ;;  %v250_v1 = vld [vmem:[%s5280_s26 + $0x8] sm:$0xff] (%p55_p4)  ;;  %v252_v2 = vld [vmem:[%s5280_s26 + $0x10] sm:$0xff] (%p55_p4)  ;;  %s5285_s27 = scalar_lea.vmem (%p55_p4), [#allocation2], %s4934_s23 }
  0x13   : > { %249 = vst [vmem:[%s5285_s27] sm:$0xff] (%p55_p4), %v248_v0  ;;  %v254_v3 = vld [vmem:[%s5280_s26 + $0x18] sm:$0xff] (%p55_p4)  ;;  %v256_v4 = vld [vmem:[%s5280_s26 + $0x80] sm:$0xff] (%p55_p4)  ;;  %v258_v5 = vld [vmem:[%s5280_s26 + $0x88] sm:$0xff] (%p55_p4) }
  0x14   : > { %251 = vst [vmem:[%s5285_s27 + $0x8] sm:$0xff] %v250_v1  ;;  %v260_v6 = vld [vmem:[%s5280_s26 + $0x90] sm:$0xff]  ;;  %v262_v7 = vld [vmem:[%s5280_s26 + $0x98] sm:$0xff]  ;;  %v264_v8 = vld [vmem:[%s5280_s26 + $0x100] sm:$0xff] }
  0x15   : > { %253 = vst [vmem:[%s5285_s27 + $0x10] sm:$0xff] %v252_v2  ;;  %v266_v9 = vld [vmem:[%s5280_s26 + $0x108] sm:$0xff]  ;;  %v268_v10 = vld [vmem:[%s5280_s26 + $0x110] sm:$0xff]  ;;  %v270_v11 = vld [vmem:[%s5280_s26 + $0x118] sm:$0xff] }
  0x16   : > { %255 = vst [vmem:[%s5285_s27 + $0x18] sm:$0xff] %v254_v3  ;;  %v272_v12 = vld [vmem:[%s5280_s26 + $0x180] sm:$0xff]  ;;  %v274_v13 = vld [vmem:[%s5280_s26 + $0x188] sm:$0xff]  ;;  %v276_v14 = vld [vmem:[%s5280_s26 + $0x190] sm:$0xff] }
  0x17   : > { %257 = vst [vmem:[%s5285_s27 + $0x20] sm:$0xff] %v256_v4  ;;  %v278_v15 = vld [vmem:[%s5280_s26 + $0x198] sm:$0xff]  ;;  %v280_v16 = vld [vmem:[%s5280_s26 + $0x200] sm:$0xff]  ;;  %v282_v17 = vld [vmem:[%s5280_s26 + $0x208] sm:$0xff] }
  0x18   : > { %259 = vst [vmem:[%s5285_s27 + $0x28] sm:$0xff] %v258_v5  ;;  %v284_v18 = vld [vmem:[%s5280_s26 + $0x210] sm:$0xff]  ;;  %v286_v19 = vld [vmem:[%s5280_s26 + $0x218] sm:$0xff]  ;;  %v288_v20 = vld [vmem:[%s5280_s26 + $0x280] sm:$0xff] }
  0x19   : > { %261 = vst [vmem:[%s5285_s27 + $0x30] sm:$0xff] %v260_v6  ;;  %v290_v21 = vld [vmem:[%s5280_s26 + $0x288] sm:$0xff]  ;;  %v292_v22 = vld [vmem:[%s5280_s26 + $0x290] sm:$0xff]  ;;  %v294_v23 = vld [vmem:[%s5280_s26 + $0x298] sm:$0xff] }
  0x1a   : > { %263 = vst [vmem:[%s5285_s27 + $0x38] sm:$0xff] %v262_v7  ;;  %v296_v24 = vld [vmem:[%s5280_s26 + $0x300] sm:$0xff]  ;;  %v298_v25 = vld [vmem:[%s5280_s26 + $0x308] sm:$0xff]  ;;  %v300_v26 = vld [vmem:[%s5280_s26 + $0x310] sm:$0xff] }
  0x1b   : > { %265 = vst [vmem:[%s5285_s27 + $0x40] sm:$0xff] %v264_v8  ;;  %v302_v27 = vld [vmem:[%s5280_s26 + $0x318] sm:$0xff]  ;;  %v304_v28 = vld [vmem:[%s5280_s26 + $0x380] sm:$0xff]  ;;  %v306_v29 = vld [vmem:[%s5280_s26 + $0x388] sm:$0xff] }
  0x1c   : > { %267 = vst [vmem:[%s5285_s27 + $0x48] sm:$0xff] %v266_v9  ;;  %v308_v30 = vld [vmem:[%s5280_s26 + $0x390] sm:$0xff]  ;;  %v310_v31 = vld [vmem:[%s5280_s26 + $0x398] sm:$0xff]  ;;  %v312_v32 = vld [vmem:[%s5280_s26 + $0x400] sm:$0xff] }
  0x1d   : > { %269 = vst [vmem:[%s5285_s27 + $0x50] sm:$0xff] %v268_v10  ;;  %v314_v33 = vld [vmem:[%s5280_s26 + $0x408] sm:$0xff]  ;;  %v316_v34 = vld [vmem:[%s5280_s26 + $0x410] sm:$0xff]  ;;  %v318_v35 = vld [vmem:[%s5280_s26 + $0x418] sm:$0xff] }
  0x1e   : > { %271 = vst [vmem:[%s5285_s27 + $0x58] sm:$0xff] %v270_v11 }
  0x1f   : > { %273 = vst [vmem:[%s5285_s27 + $0x60] sm:$0xff] %v272_v12 }
  0x20   : > { %275 = vst [vmem:[%s5285_s27 + $0x68] sm:$0xff] %v274_v13 }
  0x21   : > { %277 = vst [vmem:[%s5285_s27 + $0x70] sm:$0xff] %v276_v14 }
  0x22   : > { %279 = vst [vmem:[%s5285_s27 + $0x78] sm:$0xff] %v278_v15 }
  0x23   : > { %281 = vst [vmem:[%s5285_s27 + $0x80] sm:$0xff] %v280_v16 }
  0x24   : > { %283 = vst [vmem:[%s5285_s27 + $0x88] sm:$0xff] %v282_v17 }
  0x25   : > { %285 = vst [vmem:[%s5285_s27 + $0x90] sm:$0xff] %v284_v18 }
  0x26   : > { %287 = vst [vmem:[%s5285_s27 + $0x98] sm:$0xff] %v286_v19 }
  0x27   : > { %289 = vst [vmem:[%s5285_s27 + $0xa0] sm:$0xff] %v288_v20 }
  0x28   : > { %291 = vst [vmem:[%s5285_s27 + $0xa8] sm:$0xff] %v290_v21 }
  0x29   : > { %293 = vst [vmem:[%s5285_s27 + $0xb0] sm:$0xff] %v292_v22 }
  0x2a   : > { %295 = vst [vmem:[%s5285_s27 + $0xb8] sm:$0xff] %v294_v23 }
  0x2b   : > { %297 = vst [vmem:[%s5285_s27 + $0xc0] sm:$0xff] %v296_v24 }
  0x2c   : > { %299 = vst [vmem:[%s5285_s27 + $0xc8] sm:$0xff] %v298_v25 }
  0x2d   : > { %301 = vst [vmem:[%s5285_s27 + $0xd0] sm:$0xff] %v300_v26 }
  0x2e   : > { %303 = vst [vmem:[%s5285_s27 + $0xd8] sm:$0xff] %v302_v27 }
  0x2f   : > { %305 = vst [vmem:[%s5285_s27 + $0xe0] sm:$0xff] %v304_v28 }
  0x30   : > { %307 = vst [vmem:[%s5285_s27 + $0xe8] sm:$0xff] %v306_v29 }
  0x31   : > { %309 = vst [vmem:[%s5285_s27 + $0xf0] sm:$0xff] %v308_v30 }
  0x32   : > { %311 = vst [vmem:[%s5285_s27 + $0xf8] sm:$0xff] %v310_v31 }
  0x33   : > { %313 = vst [vmem:[%s5285_s27 + $0x100] sm:$0xff] %v312_v32 }
  0x34   : > { %315 = vst [vmem:[%s5285_s27 + $0x108] sm:$0xff] %v314_v33 }
  0x35   : > { %317 = vst [vmem:[%s5285_s27 + $0x110] sm:$0xff] %v316_v34 }
  0x36   : > { %319 = vst [vmem:[%s5285_s27 + $0x118] sm:$0xff] %v318_v35 }
  0x37 PF: > { %p4667_p7 = scmp.ge.s32.totalorder %s5215_s14, 1  ;;  %p324_p8 = scmp.lt.s32.totalorder %s5215_s14, 5 }
  0x39   : > { %p325_p9 = pnand %p4667_p7, %p324_p8 }
  0x3b   : > { %328 = sbr.rel (%p325_p9) target bundleno = 989 (0x3dd), region = 66 }
  0x40   : > { %s331_s28 = sand.u32 1, %s5207_s12   ;;  %s5363_s30 = sshll.u32 %s4661_s15, 5  ;;  %v4789_v38 = vld [vmem:[%s10125_s2 + $0xa8] sm:$0xf]  ;;  %v4923_v39 = vld [vmem:[%s10125_s2 + $0xb0] sm:$0xf0] }
  0x41   : > { %s5359_s29 = smul.u32 288, %s331_s28  ;;  %s5217_s5 = smov 32   ;;  %v5383_v40 = vor.u32 %v4923_v39, %v4789_v38  ;;  %v4922_v41 = vld [vmem:[%s10125_s2 + $0xac] sm:$0xf]  ;;  %v4791_v42 = vld [vmem:[%s10125_s2 + $0xb4] sm:$0xf0] }
  0x42   : > { %p360_p10 = scmp.lt.s32.totalorder %s5363_s30, 127  ;;  %s5218_s6 = smov 64   ;;  %v4797_v43 = vld [vmem:[%s10125_s2 + $0xb0] sm:$0xf]  ;;  %v5394_v44 = vor.u32 %v4922_v41, %v4791_v42  ;;  %v4924_v45 = vld [vmem:[%s10125_s2 + $0xb8] sm:$0xf0] }
  0x43   : > { %s5366_s4 = scalar_lea.vmem [#allocation2], %s5359_s29  ;;  %10474 = vst [vmem:[#allocation4_spill] sm:$0xff] %v5383_v40  ;;  %2132 = vmatpush.bf16.msra.mxu0 %v5383_v40  ;;  %v5400_v46 = vor.u32 %v4924_v45, %v4797_v43  ;;  %2329 = vmatpush.bf16.msra.mxu3 %v5383_v40  ;;  %v4777_v49 = vld [vmem:[%s10125_s2 + $0x90] sm:$0xf]  ;;  %v4920_v50 = vld [vmem:[%s10125_s2 + $0x98] sm:$0xf0] }
  0x44   : > { %v5369_v36 = vld [vmem:[%s5366_s4 + $0x10] sm:$0xff]  ;;  %v2189_v37 = vld [vmem:[%s5366_s4] sm:$0xff]  ;;  %10475 = vst [vmem:[#allocation5_spill] sm:$0xff] %v5394_v44  ;;  %s5406_s23 = scalar_select %p360_p10, %s5363_s30, 127  ;;  %v5409_v47 = vld [vmem:[%s5366_s4 + $0x18] sm:$0xff]  ;;  %2151 = vmatpush.bf16.msra.mxu1 %v5394_v44  ;;  %v5435_v53 = vor.u32 %v4920_v50, %v4777_v49  ;;  %vm496_vm0 = vcmask 1040384  }
  0x45   : > { %2205 = vrot.lane.b32.xlu1 %v5369_v36, %s5217_s5  ;;  %2201 = vrot.lane.b32.xlu0 %v2189_v37, %s5217_s5  ;;  %10476 = vst [vmem:[#allocation6_spill] sm:$0xff] %v5400_v46  ;;  %v5412_v48 = vld [vmem:[%s5366_s4 + $0x8] sm:$0xff]  ;;  %v4919_v51 = vld [vmem:[%s10125_s2 + $0x94] sm:$0xf] }
  0x46   : > { %2217 = vrot.lane.b32.xlu2 %v2189_v37, %s5218_s6  ;;  %2170 = vmatpush.bf16.msra.mxu2 %v5400_v46  ;;  %s4900_s26 = sshll.u32 %s5406_s23, 4  ;;  %v4779_v52 = vld [vmem:[%s10125_s2 + $0x9c] sm:$0xf0]  ;;  %10477 = vst [vmem:[#allocation7_spill] sm:$0xff] %v5435_v53  ;;  %v4785_v55 = vld [vmem:[%s10125_s2 + $0x98] sm:$0xf] }
  0x47   : > { %v5437_v54 = vor.u32 %v4919_v51, %v4779_v52  ;;  %v4921_v56 = vld [vmem:[%s10125_s2 + $0xa0] sm:$0xf0]  ;;  %v4765_v57 = vld [vmem:[%s10125_s2 + $0x78] sm:$0xf]  ;;  %v4916_v60 = vld [vmem:[%s10125_s2 + $0x7c] sm:$0xf]  ;;  %2133 = vmatpush.bf16.msra.mxu0 %v5435_v53  ;;  %2330 = vmatpush.bf16.msra.mxu3 %v5435_v53  ;;  %s5474_s12 = scalar_lea.vmem %s10123_s0, %s4900_s26 }
  0x48   : > { %v5448_v58 = vor.u32 %v4921_v56, %v4785_v55  ;;  %v4917_v59 = vld [vmem:[%s10125_s2 + $0x80] sm:$0xf0]  ;;  %v4767_v61 = vld [vmem:[%s10125_s2 + $0x84] sm:$0xf0]  ;;  %v4773_v62 = vld [vmem:[%s10125_s2 + $0x80] sm:$0xf] }
  0x49   : > { %10478 = vst [vmem:[#allocation8_spill] sm:$0xff] %v5437_v54  ;;  %2152 = vmatpush.bf16.msra.mxu1 %v5437_v54  ;;  %v4918_v63 = vld [vmem:[%s10125_s2 + $0x88] sm:$0xf0]  ;;  %v5469_v0 = vor.u32 %v4917_v59, %v4765_v57  ;;  %v5476_v1 = vor.u32 %v4916_v60, %v4767_v61  ;;  %v4753_v3 = vld [vmem:[%s10125_s2 + $0x60] sm:$0xf]  ;;  %s5219_s26 = smov 96  }
  0x4a   : > { %10479 = vst [vmem:[#allocation9_spill] sm:$0xff] %v5448_v58  ;;  %2171 = vmatpush.bf16.msra.mxu2 %v5448_v58  ;;  %v5478_v2 = vor.u32 %v4918_v63, %v4773_v62  ;;  %v368_v4 = vld [vmem:[%s5474_s12] sm:$0xff]  ;;  %v4914_v5 = vld [vmem:[%s10125_s2 + $0x68] sm:$0xf0]  ;;  %v4755_v7 = vld [vmem:[%s10125_s2 + $0x6c] sm:$0xf0] }
  0x4b   : > { %10480 = vst [vmem:[#allocation10_spill] sm:$0xff] %v5469_v0  ;;  %2134 = vmatpush.bf16.msra.mxu0 %v5469_v0  ;;  %v4913_v6 = vld [vmem:[%s10125_s2 + $0x64] sm:$0xf]  ;;  %v369_v8 = vld [vmem:[%s5474_s12 + $0x8] sm:$0x1]  ;;  %v370_v9 = vld [vmem:[%s5474_s12 + $0x10] sm:$0xff]  ;;  %v5503_v10 = vor.u32 %v4914_v5, %v4753_v3  ;;  %2331 = vmatpush.bf16.msra.mxu3 %v5469_v0 }
  0x4c   : > { %10481 = vst [vmem:[#allocation11_spill] sm:$0xff] %v5476_v1  ;;  %v5505_v11 = vor.u32 %v4913_v6, %v4755_v7  ;;  %v4761_v12 = vld [vmem:[%s10125_s2 + $0x68] sm:$0xf]  ;;  %v4915_v13 = vld [vmem:[%s10125_s2 + $0x70] sm:$0xf0]  ;;  %v372_v16 = vld [vmem:[%s5474_s12 + $0x20] sm:$0xff] }
  0x4d   : > { %2207 = vrot.lane.b32.xlu1 %v5409_v47, %s5217_s5  ;;  %2203 = vrot.lane.b32.xlu0 %v5412_v48, %s5217_s5  ;;  %10482 = vst [vmem:[#allocation12_spill] sm:$0xff] %v5478_v2  ;;  %v4741_v14 = vld [vmem:[%s10125_s2 + $0x48] sm:$0xf]  ;;  %v371_v15 = vld [vmem:[%s5474_s12 + $0x18] sm:$0x1]  ;;  %v5520_v18 = vor.u32 %v4915_v13, %v4761_v12  ;;  %v5543_v28 = vmul.f32 0.25, %v368_v4 }
  0x4e   : > { %2219 = vrot.lane.b32.xlu2 %v5412_v48, %s5218_s6  ;;  %2153 = vmatpush.bf16.msra.mxu1 %v5476_v1  ;;  %10483 = vst [vmem:[#allocation13_spill] sm:$0xff] %v5503_v10  ;;  %v373_v17 = vld [vmem:[%s5474_s12 + $0x28] sm:$0x1]  ;;  %v4911_v19 = vld [vmem:[%s10125_s2 + $0x50] sm:$0xf0]  ;;  %v376_v27 = vld [vmem:[%s5474_s12 + $0x40] sm:$0xff] }
  0x4f   : > { %2172 = vmatpush.bf16.msra.mxu2 %v5478_v2  ;;  %10484 = vst [vmem:[#allocation14_spill] sm:$0xff] %v5505_v11  ;;  %v4910_v20 = vld [vmem:[%s10125_s2 + $0x4c] sm:$0xf]  ;;  %v4743_v21 = vld [vmem:[%s10125_s2 + $0x54] sm:$0xf0]  ;;  %v374_v24 = vld [vmem:[%s5474_s12 + $0x30] sm:$0xff]  ;;  %2135 = vmatpush.bf16.msra.mxu0 %v5503_v10  ;;  %v5539_v25 = vor.u32 %v4911_v19, %v4741_v14 }
  0x50   : > { %10485 = vst [vmem:[#allocation15_spill] sm:$0xff] %v5520_v18  ;;  %v4749_v22 = vld [vmem:[%s10125_s2 + $0x50] sm:$0xf]  ;;  %v4912_v23 = vld [vmem:[%s10125_s2 + $0x58] sm:$0xf0]  ;;  %v5547_v29 = vor.u32 %v4910_v20, %v4743_v21  ;;  %v5551_v31 = vmul.f32 0.25, %v369_v8  ;;  %2332 = vmatpush.bf16.msra.mxu3 %v5503_v10 }
  0x51   : > { %10486 = vst [vmem:[#allocation16_spill] sm:$0xff] %v5539_v25  ;;  %v375_v26 = vld [vmem:[%s5474_s12 + $0x38] sm:$0x1]  ;;  %v5549_v30 = vor.u32 %v4912_v23, %v4749_v22  ;;  %v5553_v32 = vmul.f32 0.25, %v370_v9  ;;  %v377_v33 = vld [vmem:[%s5474_s12 + $0x48] sm:$0x1] }
  0x52   : > { %2154 = vmatpush.bf16.msra.mxu1 %v5505_v11  ;;  %10487 = vst [vmem:[#allocation17_spill] sm:$0xff] %v5547_v29  ;;  %v5557_v34 = vmul.f32 0.25, %v371_v15  ;;  %v5559_v35 = vmul.f32 0.25, %v372_v16  ;;  %v5563_v38 = vmul.f32 0.25, %v374_v24  ;;  %v4729_v39 = vld [vmem:[%s10125_s2 + $0x30] sm:$0xf] }
  0x53   : > { %2173 = vmatpush.bf16.msra.mxu2 %v5520_v18  ;;  %10488 = vst [vmem:[#allocation18_spill] sm:$0xff] %v5549_v30  ;;  %v4908_v41 = vld [vmem:[%s10125_s2 + $0x38] sm:$0xf0]  ;;  %v378_v42 = vld [vmem:[%s5474_s12 + $0x50] sm:$0xff]  ;;  %v379_v43 = vld [vmem:[%s5474_s12 + $0x58] sm:$0x1]  ;;  %2136 = vmatpush.bf16.msra.mxu0 %v5539_v25 }
  0x54   : > { %10489 = vst [vmem:[#allocation19_spill] sm:$0xff] %v5551_v31  ;;  %v380_v45 = vld [vmem:[%s5474_s12 + $0x60] sm:$0xff]  ;;  %v5578_v49 = vmul.f32 0.25, %v375_v26  ;;  %v5580_v50 = vmul.f32 0.25, %v376_v27  ;;  %v4737_v52 = vld [vmem:[%s10125_s2 + $0x38] sm:$0xf]  ;;  %2333 = vmatpush.bf16.msra.mxu3 %v5539_v25 }
  0x55   : > { %2223 = vrot.lane.b32.xlu1 %v5409_v47, %s5218_s6  ;;  %2221 = vrot.lane.b32.xlu0 %v5369_v36, %s5218_s6  ;;  %10490 = vst [vmem:[#allocation20_spill] sm:$0xff] %v5553_v32  ;;  %v4731_v51 = vld [vmem:[%s10125_s2 + $0x3c] sm:$0xf0]  ;;  %v381_v55 = vld [vmem:[%s5474_s12 + $0x68] sm:$0x1]  ;;  %v5629_v8 = vmul.f32 0.25, %v377_v33 }
  0x56   : > { %2233 = vrot.lane.b32.xlu2 %v2189_v37, %s5219_s26  ;;  %10491 = vst [vmem:[#allocation21_spill] sm:$0xff] %v5557_v34  ;;  %v5561_v37 = vmul.f32 0.25, %v373_v17  ;;  %2155 = vmatpush.bf16.msra.mxu1 %v5547_v29  ;;  %v4909_v57 = vld [vmem:[%s10125_s2 + $0x40] sm:$0xf0]  ;;  %v4717_v59 = vld [vmem:[%s10125_s2 + $0x18] sm:$0xf] }
  0x57   : > { %10492 = vst [vmem:[#allocation22_spill] sm:$0xff] %v5559_v35  ;;  %2174 = vmatpush.bf16.msra.mxu2 %v5549_v30  ;;  %v4905_v60 = vld [vmem:[%s10125_s2 + $0x20] sm:$0xf0]  ;;  %v383_v61 = vld [vmem:[%s5474_s12 + $0x78] sm:$0x1]  ;;  %v5613_v62 = vor.u32 %v4909_v57, %v4737_v52  ;;  %v5632_v9 = vld [vmem:[%s5366_s4 + $0x28] sm:$0xff] }
  0x58   : > { %10493 = vst [vmem:[#allocation23_spill] sm:$0xff] %v5561_v37  ;;  %v4904_v63 = vld [vmem:[%s10125_s2 + $0x1c] sm:$0xf]  ;;  %v4719_v3 = vld [vmem:[%s10125_s2 + $0x24] sm:$0xf0]  ;;  %v384_v6 = vld [vmem:[%s5474_s12 + $0x80] sm:$0xff]  ;;  %v5638_v13 = vor.u32 %v4905_v60, %v4717_v59 }
  0x59   : > { %10494 = vst [vmem:[#allocation24_spill] sm:$0xff] %v5563_v38  ;;  %v4725_v4 = vld [vmem:[%s10125_s2 + $0x20] sm:$0xf]  ;;  %v4906_v5 = vld [vmem:[%s10125_s2 + $0x28] sm:$0xf0]  ;;  %v5640_v14 = vmul.f32 0.25, %v378_v42  ;;  %v5648_v17 = vor.u32 %v4904_v63, %v4719_v3 }
  0x5a   : > { %10495 = vst [vmem:[#allocation25_spill] sm:$0xff] %v5578_v49  ;;  %v385_v7 = vld [vmem:[%s5474_s12 + $0x88] sm:$0x1]  ;;  %v5635_v12 = vld [vmem:[%s5366_s4 + $0x20] sm:$0xff]  ;;  %v5642_v15 = vmul.f32 0.25, %v379_v43  ;;  %v5644_v16 = vmul.f32 0.25, %v380_v45  ;;  %v5650_v19 = vor.u32 %v4906_v5, %v4725_v4 }
  0x5b   : > { %10496 = vst [vmem:[#allocation26_spill] sm:$0xff] %v5580_v50  ;;  %2175 = vmatpush.bf16.msra.mxu2 %v5613_v62  ;;  %v5652_v20 = vmul.f32 0.25, %v381_v55  ;;  %v5657_v22 = vmul.f32 0.25, %v383_v61  ;;  %v5659_v23 = vmul.f32 0.25, %v384_v6  ;;  %v5661_v24 = vmul.f32 0.25, %v385_v7  ;;  %v5670_v27 = vld [vmem:[%s5366_s4 + $0x30] sm:$0xff] }
  0x5c   : > { %10499 = vst [vmem:[#allocation29_spill] sm:$0xff] %v5613_v62  ;;  %v497_v26 = vsel %vm496_vm0, %v5551_v31, -inf  ;;  %v4705_v33 = vld [vmem:[%s10125_s2] sm:$0xf]  ;;  %v513_v42 = vsel %vm496_vm0, %v5561_v37, -inf  ;;  %v521_v43 = vsel %vm496_vm0, %v5578_v49, -inf }
  0x5d   : > { %2237 = vrot.lane.b32.xlu1 %v5369_v36, %s5219_s26  ;;  %2235 = vrot.lane.b32.xlu0 %v5412_v48, %s5219_s26  ;;  %v5585_v36 = vor.u32 %v4908_v41, %v4729_v39  ;;  %v4907_v48 = vld [vmem:[%s10125_s2 + $0x34] sm:$0xf]  ;;  %10500 = vst [vmem:[#allocation30_spill] sm:$0xff] %v5629_v8  ;;  %v498_v39 = vmax.f32 %v5543_v28, %v497_v26  ;;  %v505_v41 = vsel %vm496_vm0, %v5557_v34, -inf  ;;  %v4902_v45 = vld [vmem:[%s10125_s2 + $0x8] sm:$0xf0] }
  0x5e   : > { %2239 = vrot.lane.b32.xlu2 %v5409_v47, %s5219_s26  ;;  %v382_v47 = vld [vmem:[%s5474_s12 + $0x70] sm:$0xff]  ;;  %v5600_v56 = vor.u32 %v4907_v48, %v4731_v51  ;;  %10501 = vst [vmem:[#allocation31_spill] sm:$0xff] %v5638_v13  ;;  %v4901_v48 = vld [vmem:[%s10125_s2 + $0x4] sm:$0xf]  ;;  %v506_v52 = vmax.f32 %v5553_v32, %v505_v41  ;;  %v514_v55 = vmax.f32 %v5559_v35, %v513_v42  ;;  %v4713_v60 = vld [vmem:[%s10125_s2 + $0x8] sm:$0xf] }
  0x5f   : > { %10497 = vst [vmem:[#allocation27_spill] sm:$0xff] %v5585_v36  ;;  %2137 = vmatpush.bf16.msra.mxu0 %v5585_v36  ;;  %v5654_v21 = vmul.f32 0.25, %v382_v47  ;;  %2334 = vmatpush.bf16.msra.mxu3 %v5585_v36  ;;  %v4707_v51 = vld [vmem:[%s10125_s2 + $0xc] sm:$0xf0]  ;;  %v522_v47 = vmax.f32 %v5563_v38, %v521_v43  ;;  %v5699_v57 = vor.u32 %v4902_v45, %v4705_v33  ;;  %v4903_v61 = vld [vmem:[%s10125_s2 + $0x10] sm:$0xf0] }
  0x60   : > { %10498 = vst [vmem:[#allocation28_spill] sm:$0xff] %v5600_v56  ;;  %2156 = vmatpush.bf16.msra.mxu1 %v5600_v56  ;;  %2176 = vmatpush.bf16.msra.mxu2 %v5650_v19  ;;  %v5701_v59 = vor.u32 %v4901_v48, %v4707_v51  ;;  %v499_v63 = vrot.slane %v498_v39, 4  ;;  %v529_v3 = vsel %vm496_vm0, %v5629_v8, -inf  ;;  %v5712_v4 = vor.u32 %v4903_v61, %v4713_v60  ;;  %v5715_v26 = vld [vmem:[%s5366_s4 + $0x38] sm:$0xff]  ;;  %v386_v33 = vld [vmem:[%s5474_s12 + $0x90] sm:$0xff]  ;;  %v388_v51 = vld [vmem:[%s5474_s12 + $0xa0] sm:$0xff] }
  0x61   : > { %10502 = vst [vmem:[#allocation32_spill] sm:$0xff] %v5640_v14  ;;  %v507_v5 = vrot.slane %v506_v52, 4  ;;  %v515_v6 = vrot.slane %v514_v55, 4  ;;  %v523_v7 = vrot.slane %v522_v47, 4  ;;  %v387_v41 = vld [vmem:[%s5474_s12 + $0x98] sm:$0x1]  ;;  %v530_v43 = vmax.f32 %v5580_v50, %v529_v3 }
  0x62   : > { %10503 = vst [vmem:[#allocation33_spill] sm:$0xff] %v5642_v15  ;;  %v500_v42 = vmax.f32 %v498_v39, %v499_v63  ;;  %v537_v45 = vsel %vm496_vm0, %v5642_v15, -inf  ;;  %v545_v48 = vsel %vm496_vm0, %v5652_v20, -inf  ;;  %v389_v60 = vld [vmem:[%s5474_s12 + $0xa8] sm:$0x1]  ;;  %v390_v61 = vld [vmem:[%s5474_s12 + $0xb0] sm:$0xff] }
  0x63   : > { %10504 = vst [vmem:[#allocation34_spill] sm:$0xff] %v5644_v16  ;;  %2138 = vmatpush.bf16.msra.mxu0 %v5638_v13  ;;  %2335 = vmatpush.bf16.msra.mxu3 %v5638_v13  ;;  %v508_v8 = vmax.f32 %v506_v52, %v507_v5  ;;  %v516_v49 = vmax.f32 %v514_v55, %v515_v6  ;;  %v391_v39 = vld [vmem:[%s5474_s12 + $0xb8] sm:$0x1]  ;;  %v392_v63 = vld [vmem:[%s5474_s12 + $0xc0] sm:$0xff]  ;;  %v553_v50 = vsel %vm496_vm0, %v5657_v22, -inf  ;;  %v5738_v55 = vmul.f32 0.25, %v386_v33 }
  0x64   : > { %10505 = vst [vmem:[#allocation35_spill] sm:$0xff] %v5648_v17  ;;  %2157 = vmatpush.bf16.msra.mxu1 %v5648_v17  ;;  %v524_v38 = vmax.f32 %v522_v47, %v523_v7  ;;  %v538_v37 = vmax.f32 %v5640_v14, %v537_v45  ;;  %2177 = vmatpush.bf16.msra.mxu2 %v5712_v4  ;;  %v501_v3 = vrot.slane %v500_v42, 2  ;;  %v393_v52 = vld [vmem:[%s5474_s12 + $0xc8] sm:$0x1]  ;;  %v5740_v47 = vmul.f32 0.25, %v387_v41  ;;  %v394_v7 = vld [vmem:[%s5474_s12 + $0xd0] sm:$0xff] }
  0x65   : > { %10506 = vst [vmem:[#allocation36_spill] sm:$0xff] %v5650_v19  ;;  %2405 = vrot.lane.b32.xlu1 %v5632_v9, %s5217_s5  ;;  %2403 = vrot.lane.b32.xlu0 %v5635_v12, %s5217_s5  ;;  %v546_v15 = vmax.f32 %v5644_v16, %v545_v48  ;;  %v509_v5 = vrot.slane %v508_v8, 2  ;;  %v517_v6 = vrot.slane %v516_v49, 2  ;;  %v395_v45 = vld [vmem:[%s5474_s12 + $0xd8] sm:$0x1]  ;;  %v5749_v48 = vmul.f32 0.25, %v388_v51 }
  0x66   : > { %10507 = vst [vmem:[#allocation37_spill] sm:$0xff] %v5652_v20  ;;  %2407 = vrot.lane.b32.xlu2 %v5670_v27, %s5217_s5  ;;  %v531_v20 = vrot.slane %v530_v43, 4  ;;  %v525_v33 = vrot.slane %v524_v38, 2  ;;  %v554_v41 = vmax.f32 %v5654_v21, %v553_v50  ;;  %v397_v16 = vld [vmem:[%s5474_s12 + $0xe8] sm:$0x1]  ;;  %v5758_v14 = vmul.f32 0.25, %v390_v61 }
  0x67   : > { %10508 = vst [vmem:[#allocation38_spill] sm:$0xff] %v5654_v21  ;;  %2139 = vmatpush.bf16.msra.mxu0 %v5699_v57  ;;  %2336 = vmatpush.bf16.msra.mxu3 %v5699_v57  ;;  %v502_v35 = vmax.f32 %v500_v42, %v501_v3  ;;  %v398_v34 = vld [vmem:[%s5474_s12 + $0xf0] sm:$0xff]  ;;  %v399_v13 = vld [vmem:[%s5474_s12 + $0xf8] sm:$0x1]  ;;  %v5764_v51 = vmul.f32 0.25, %v392_v63  ;;  %v5766_v32 = vmax.f32 %v508_v8, %v509_v5  ;;  %v547_v50 = vrot.slane %v546_v15, 4 }
  0x68   : > { %10509 = vst [vmem:[#allocation39_spill] sm:$0xff] %v5657_v22  ;;  %2158 = vmatpush.bf16.msra.mxu1 %v5701_v59  ;;  %v539_v22 = vrot.slane %v538_v37, 4  ;;  %v532_v31 = vmax.f32 %v530_v43, %v531_v20  ;;  %2563 = vmatpush.bf16.msrb.mxu2 %v5383_v40  ;;  %v5770_v21 = vmul.f32 0.25, %v393_v52  ;;  %v5774_v61 = vmul.f32 0.25, %v395_v45 }
  0x69   : > { %10510 = vst [vmem:[#allocation40_spill] sm:$0xff] %v5699_v57  ;;  %v396_v57 = vld [vmem:[%s5474_s12 + $0xe0] sm:$0xff]  ;;  %v5782_v20 = vmax.f32 %v524_v38, %v525_v33  ;;  %v555_v43 = vrot.slane %v554_v41, 4  ;;  %v5784_v63 = vmul.f32 0.25, %v397_v16  ;;  %v5786_v3 = vmul.f32 0.25, %v398_v34 }
  0x6a   : > { %10511 = vst [vmem:[#allocation41_spill] sm:$0xff] %v5701_v59  ;;  %v5760_v59 = vmul.f32 0.25, %v391_v39  ;;  %v5776_v39 = vmax.f32 %v516_v49, %v517_v6  ;;  %v5780_v8 = vmul.f32 0.25, %v396_v57  ;;  %v540_v42 = vmax.f32 %v538_v37, %v539_v22 }
  0x6b   : > { %10512 = vst [vmem:[#allocation42_spill] sm:$0xff] %v5712_v4  ;;  %2348 = vmatpush.bf16.msrb.mxu0 %v5394_v44  ;;  %v5756_v4 = vmul.f32 0.25, %v389_v60  ;;  %v5772_v60 = vmul.f32 0.25, %v394_v7  ;;  %2582 = vmatpush.bf16.msrb.mxu3 %v5394_v44  ;;  %v5788_v52 = vmul.f32 0.25, %v399_v13  ;;  %v503_v5 = vrot.slane %v502_v35, 1 }
  0x6c   : > { %2367 = vmatpush.bf16.msrb.mxu1 %v5400_v46  ;;  %v533_v6 = vrot.slane %v532_v31, 2  ;;  %v548_v7 = vmax.f32 %v546_v15, %v547_v50  ;;  %v561_v45 = vsel %vm496_vm0, %v5661_v24, -inf  ;;  %2564 = vmatpush.bf16.msrb.mxu2 %v5435_v53  ;;  %v569_v34 = vsel %vm496_vm0, %v5740_v47, -inf }
  0x6d   : > { %2423 = vrot.lane.b32.xlu1 %v5635_v12, %s5218_s6  ;;  %2409 = vrot.lane.b32.xlu0 %v5715_v26, %s5217_s5  ;;  %v562_v38 = vmax.f32 %v5659_v23, %v561_v45  ;;  %v577_v13 = vsel %vm496_vm0, %v5756_v4, -inf  ;;  %v541_v16 = vrot.slane %v540_v42, 2  ;;  %v556_v22 = vmax.f32 %v554_v41, %v555_v43 }
  0x6e   : > { %2425 = vrot.lane.b32.xlu2 %v5632_v9, %s5218_s6  ;;  %v570_v57 = vmax.f32 %v5738_v55, %v569_v34  ;;  %v5809_v33 = vmax.f32 %v502_v35, %v503_v5  ;;  %v578_v45 = vmax.f32 %v5749_v48, %v577_v13  ;;  %v585_v37 = vsel %vm496_vm0, %v5760_v59, -inf }
  0x6f   : > { %2349 = vmatpush.bf16.msrb.mxu0 %v5437_v54  ;;  %2583 = vmatpush.bf16.msrb.mxu3 %v5437_v54  ;;  %v563_v50 = vrot.slane %v562_v38, 4  ;;  %v5816_v49 = vmax.f32 %v532_v31, %v533_v6  ;;  %v549_v54 = vrot.slane %v548_v7, 2  ;;  %v586_v15 = vmax.f32 %v5758_v14, %v585_v37 }
  0x70   : > { %2368 = vmatpush.bf16.msrb.mxu1 %v5448_v58  ;;  %v571_v53 = vrot.slane %v570_v57, 4  ;;  %2565 = vmatpush.bf16.msrb.mxu2 %v5469_v0  ;;  %v579_v41 = vrot.slane %v578_v45, 4  ;;  %v593_v43 = vsel %vm496_vm0, %v5770_v21, -inf  ;;  %v601_v5 = vsel %vm496_vm0, %v5774_v61, -inf }
  0x71   : > { %v564_v35 = vmax.f32 %v562_v38, %v563_v50  ;;  %v557_v31 = vrot.slane %v556_v22, 2  ;;  %v587_v6 = vrot.slane %v586_v15, 4  ;;  %v594_v37 = vmax.f32 %v5764_v51, %v593_v43 }
  0x72   : > { %v580_v13 = vmax.f32 %v578_v45, %v579_v41  ;;  %v602_v38 = vmax.f32 %v5772_v60, %v601_v5  ;;  %v609_v50 = vsel %vm496_vm0, %v5784_v63, -inf  ;;  %v617_v45 = vsel %vm496_vm0, %v5788_v52, -inf }
  0x73   : > { %2350 = vmatpush.bf16.msrb.mxu0 %v5476_v1  ;;  %2584 = vmatpush.bf16.msrb.mxu3 %v5476_v1  ;;  %v565_v34 = vrot.slane %v564_v35, 2  ;;  %v595_v58 = vrot.slane %v594_v37, 4  ;;  %v610_v44 = vmax.f32 %v5780_v8, %v609_v50  ;;  %v618_v50 = vmax.f32 %v5786_v3, %v617_v45 }
  0x74   : > { %2369 = vmatpush.bf16.msrb.mxu1 %v5478_v2  ;;  %v588_v2 = vmax.f32 %v586_v15, %v587_v6  ;;  %2566 = vmatpush.bf16.msrb.mxu2 %v5503_v10  ;;  %v603_v1 = vrot.slane %v602_v38, 4  ;;  %v550_v15 = vmax.f32 %v548_v7, %v549_v54  ;;  %v535_v54 = vrot.slane %v5816_v49, 1 }
  0x75   : > { %2429 = vrot.lane.b32.xlu1 %v5715_v26, %s5218_s6  ;;  %2427 = vrot.lane.b32.xlu0 %v5670_v27, %s5218_s6  ;;  %v596_v43 = vmax.f32 %v594_v37, %v595_v58  ;;  %v611_v5 = vrot.slane %v610_v44, 4 }
  0x76   : > { %2443 = vrot.lane.b32.xlu2 %v5635_v12, %s5219_s26  ;;  %v572_v12 = vmax.f32 %v570_v57, %v571_v53  ;;  %v542_v53 = vmax.f32 %v540_v42, %v541_v16  ;;  %v581_v57 = vrot.slane %v580_v13, 2  ;;  %v589_v41 = vrot.slane %v588_v2, 2 }
  0x77   : > { %2351 = vmatpush.bf16.msrb.mxu0 %v5505_v11  ;;  %2585 = vmatpush.bf16.msrb.mxu3 %v5505_v11  ;;  %v558_v42 = vmax.f32 %v556_v22, %v557_v31  ;;  %v566_v16 = vmax.f32 %v564_v35, %v565_v34  ;;  %v604_v6 = vmax.f32 %v602_v38, %v603_v1  ;;  %v619_v1 = vrot.slane %v618_v50, 4  ;;  %v4804_v35 = vld [vmem:[%s5366_s4 + $0x48] sm:$0xff]  ;;  %v4803_v31 = vld [vmem:[%s5366_s4 + $0x40] sm:$0xff] }
  0x78   : > { %v573_v0 = vrot.slane %v572_v12, 2  ;;  %2370 = vmatpush.bf16.msrb.mxu1 %v5520_v18  ;;  %v582_v10 = vmax.f32 %v580_v13, %v581_v57  ;;  %v612_v18 = vmax.f32 %v610_v44, %v611_v5  ;;  %2567 = vmatpush.bf16.msrb.mxu2 %v5539_v25  ;;  %v590_v58 = vmax.f32 %v588_v2, %v589_v41 }
  0x79   : > { %v559_v44 = vrot.slane %v558_v42, 1  ;;  %v620_v34 = vmax.f32 %v618_v50, %v619_v1  ;;  %v10513_v13 = vrot.slane %v5766_v32, 1  ;;  %v10514_v41 = vrot.slane %v5776_v39, 1 }
  0x7a   : > { %v574_v11 = vmax.f32 %v572_v12, %v573_v0  ;;  %v551_v0 = vrot.slane %v550_v15, 1  ;;  %v613_v22 = vrot.slane %v612_v18, 2  ;;  %v567_v12 = vrot.slane %v566_v16, 1 }
  0x7b   : > { %2352 = vmatpush.bf16.msrb.mxu0 %v5547_v29  ;;  %2586 = vmatpush.bf16.msrb.mxu3 %v5547_v29  ;;  %v512_v2 = vmax.f32 %v5766_v32, %v10513_v13  ;;  %v583_v57 = vrot.slane %v582_v10, 1  ;;  %v10515_v5 = vrot.slane %v5782_v20, 1  ;;  %v591_v50 = vrot.slane %v590_v58, 1 }
  0x7c   : > { %2371 = vmatpush.bf16.msrb.mxu1 %v5549_v30  ;;  %v575_v38 = vrot.slane %v574_v11, 1  ;;  %v614_v45 = vmax.f32 %v612_v18, %v613_v22  ;;  %2568 = vmatpush.bf16.msrb.mxu2 %v5585_v36  ;;  %v5870_v18 = vmax.f32 %v5816_v49, %v535_v54  ;;  %v5878_v1 = vmax.f32 %v566_v16, %v567_v12  ;;  %v10517_v54 = vld [vmem:[#allocation20_spill] sm:$0xff] }
  0x7d   : > { %2447 = vrot.lane.b32.xlu1 %v5670_v27, %s5219_s26  ;;  %2445 = vrot.lane.b32.xlu0 %v5632_v9, %s5219_s26  ;;  %v597_v27 = vrot.slane %v596_v43, 2  ;;  %v605_v9 = vrot.slane %v604_v6, 2  ;;  %v753_v49 = vsub.f32 %v5543_v28, %v5809_v33  ;;  %v755_v16 = vsub.f32 %v10517_v54, %v512_v2  ;;  %v10521_v28 = vld [vmem:[#allocation23_spill] sm:$0xff] }
  0x7e   : > { %2449 = vrot.lane.b32.xlu2 %v5715_v26, %s5219_s26  ;;  %v543_v26 = vrot.slane %v542_v53, 1 }
  0x7f   : > { %2353 = vmatpush.bf16.msrb.mxu0 %v5600_v56  ;;  %v598_v7 = vmax.f32 %v596_v43, %v597_v27  ;;  %v606_v37 = vmax.f32 %v604_v6, %v605_v9  ;;  %v520_v43 = vmax.f32 %v5776_v39, %v10514_v41  ;;  %v5863_v6 = vmax.f32 %v5782_v20, %v10515_v5 }
  0x80   : > { %2372 = vmatpush.bf16.msrb.mxu1 %v5613_v62  ;;  %v621_v27 = vrot.slane %v620_v34, 2  ;;  %2587 = vmatpush.bf16.msrb.mxu3 %v5600_v56  ;;  %v5872_v32 = vmax.f32 %v542_v53, %v543_v26  ;;  %v5874_v39 = vmax.f32 %v550_v15, %v551_v0  ;;  %v5876_v20 = vmax.f32 %v558_v42, %v559_v44  ;;  %v10516_v15 = vld [vmem:[#allocation19_spill] sm:$0xff]  ;;  %v10520_v44 = vld [vmem:[#allocation22_spill] sm:$0xff] }
  0x81   : > { %v599_v9 = vrot.slane %v598_v7, 1  ;;  %v607_v22 = vrot.slane %v606_v37, 1  ;;  %v5880_v41 = vmax.f32 %v574_v11, %v575_v38  ;;  %v5882_v5 = vmax.f32 %v582_v10, %v583_v57  ;;  %v10518_v26 = vld [vmem:[#allocation31_spill] sm:$0xff]  ;;  %v10519_v10 = vld [vmem:[#allocation21_spill] sm:$0xff] }
  0x82   : > { %v622_v13 = vmax.f32 %v620_v34, %v621_v27  ;;  %v5887_v53 = vmax.f32 %v590_v58, %v591_v50  ;;  %v754_v42 = vsub.f32 %v10516_v15, %v5809_v33  ;;  %2569 = vmatpush.bf16.msrb.mxu2 %v10518_v26  ;;  %v756_v0 = vsub.f32 %v10519_v10, %v512_v2  ;;  %v10522_v38 = vld [vmem:[#allocation41_spill] sm:$0xff]  ;;  %v10523_v33 = vld [vmem:[#allocation24_spill] sm:$0xff] }
  0x83   : > { %2354 = vmatpush.bf16.msrb.mxu0 %v5648_v17  ;;  %v5894_v11 = vmax.f32 %v598_v7, %v599_v9  ;;  %v757_v12 = vsub.f32 %v10520_v44, %v520_v43  ;;  %v758_v34 = vsub.f32 %v10521_v28, %v520_v43  ;;  %v5900_v58 = vmax.f32 %v606_v37, %v607_v22  ;;  %v10524_v27 = vld [vmem:[#allocation25_spill] sm:$0xff]  ;;  %v10525_v7 = vld [vmem:[#allocation26_spill] sm:$0xff]  ;;  %v10527_v43 = vld [vmem:[#allocation32_spill] sm:$0xff] }
  0x84   : > { %2373 = vmatpush.bf16.msrb.mxu1 %v5650_v19  ;;  %2588 = vmatpush.bf16.msrb.mxu3 %v5648_v17  ;;  %v623_v57 = vrot.slane %v622_v13, 1  ;;  %v759_v50 = vsub.f32 %v10523_v33, %v5863_v6  ;;  %v760_v15 = vsub.f32 %v10524_v27, %v5863_v6  ;;  %v761_v2 = vsub.f32 %v10525_v7, %v5870_v18  ;;  %v10526_v9 = vld [vmem:[#allocation30_spill] sm:$0xff]  ;;  %v10529_v22 = vld [vmem:[#allocation33_spill] sm:$0xff]  ;;  %v10533_v7 = vld [vmem:[#allocation40_spill] sm:$0xff] }
  0x85   : > { %2639 = vrot.lane.b32.xlu1 %v4804_v35, %s5217_s5  ;;  %2637 = vrot.lane.b32.xlu0 %v4803_v31, %s5217_s5  ;;  %v615_v35 = vrot.slane %v614_v45, 1  ;;  %v762_v10 = vsub.f32 %v10526_v9, %v5870_v18  ;;  %v763_v44 = vsub.f32 %v10527_v43, %v5872_v32  ;;  %v10528_v37 = vld [vmem:[#allocation42_spill] sm:$0xff]  ;;  %v764_v28 = vsub.f32 %v10529_v22, %v5872_v32  ;;  %v10534_v18 = vld [vmem:[#allocation39_spill] sm:$0xff] }
  0x86   : > { %v10530_v33 = vld [vmem:[#allocation34_spill] sm:$0xff]  ;;  %2570 = vmatpush.bf16.msrb.mxu2 %v10533_v7  ;;  %v768_v9 = vsub.f32 %v10534_v18, %v5876_v20  ;;  %v769_v43 = vsub.f32 %v5659_v23, %v5878_v1  ;;  %v770_v32 = vsub.f32 %v5661_v24, %v5878_v1  ;;  %v817_v22 = vmul.f32 1.442695, %v753_v49 }
  0x87   : > { %2355 = vmatpush.bf16.msrb.mxu0 %v10522_v38  ;;  %v5906_v54 = vmax.f32 %v614_v45, %v615_v35  ;;  %v765_v17 = vsub.f32 %v10530_v33, %v5874_v39  ;;  %v10531_v45 = vld [vmem:[#allocation37_spill] sm:$0xff]  ;;  %v10532_v35 = vld [vmem:[#allocation38_spill] sm:$0xff]  ;;  %v819_v33 = vmul.f32 1.442695, %v754_v42  ;;  %v771_v7 = vsub.f32 %v5738_v55, %v5880_v41 }
  0x88   : > { %2374 = vmatpush.bf16.msrb.mxu1 %v10528_v37  ;;  %v766_v6 = vsub.f32 %v10531_v45, %v5874_v39  ;;  %v767_v27 = vsub.f32 %v10532_v35, %v5876_v20  ;;  %2589 = vmatpush.bf16.msrb.mxu3 %v10522_v38  ;;  %v5932_v39 = vmax.f32 %v622_v13, %v623_v57  ;;  %v821_v45 = vmul.f32 1.442695, %v755_v16 }
  0x89   : > { %v823_v35 = vmul.f32 1.442695, %v756_v0  ;;  %v772_v20 = vsub.f32 %v5740_v47, %v5880_v41  ;;  %4963 = vpow2.f32 %v817_v22  ;;  %v825_v23 = vmul.f32 1.442695, %v757_v12 }
  0x8a   : > { %v773_v24 = vsub.f32 %v5749_v48, %v5882_v5  ;;  %4965 = vpow2.f32 %v819_v33  ;;  %v827_v1 = vmul.f32 1.442695, %v758_v34  ;;  %v775_v13 = vsub.f32 %v5758_v14, %v5887_v53 }
  0x8b   : > { %v776_v49 = vsub.f32 %v5760_v59, %v5887_v53  ;;  %4967 = vpow2.f32 %v821_v45  ;;  %v829_v55 = vmul.f32 1.442695, %v759_v50  ;;  %v777_v47 = vsub.f32 %v5764_v51, %v5894_v11 }
  0x8c   : > { %v778_v41 = vsub.f32 %v5770_v21, %v5894_v11  ;;  %4969 = vpow2.f32 %v823_v35  ;;  %v831_v48 = vmul.f32 1.442695, %v760_v15  ;;  %v833_v14 = vmul.f32 1.442695, %v761_v2 }
  0x8d   : > { %2657 = vrot.lane.b32.xlu1 %v4803_v31, %s5218_s6  ;;  %v774_v31 = vsub.f32 %v5756_v4, %v5882_v5  ;;  %v779_v4 = vsub.f32 %v5772_v60, %v5900_v58  ;;  %v780_v5 = vsub.f32 %v5774_v61, %v5900_v58  ;;  %4971 = vpow2.f32 %v825_v23 }
  0x8e   : > { %v781_v59 = vsub.f32 %v5780_v8, %v5906_v54  ;;  %4973 = vpow2.f32 %v827_v1  ;;  %v835_v51 = vmul.f32 1.442695, %v762_v10  ;;  %v837_v11 = vmul.f32 1.442695, %v763_v44 }
  0x8f   : > { %v5958_v42 = vpop.eup %4963  ;;  %4975 = vpow2.f32 %v829_v55  ;;  %v839_v12 = vmul.f32 1.442695, %v764_v28  ;;  %v841_v34 = vmul.f32 1.442695, %v765_v17  ;;  %v843_v57 = vmul.f32 1.442695, %v766_v6 }
  0x90   : > { %v5964_v0 = vpop.eup %4965  ;;  %4977 = vpow2.f32 %v831_v48  ;;  %v845_v15 = vmul.f32 1.442695, %v767_v27  ;;  %v847_v2 = vmul.f32 1.442695, %v768_v9  ;;  %v849_v10 = vmul.f32 1.442695, %v769_v43 }
  0x91   : > { %10535 = vst [vmem:[#allocation19_spill] sm:$0xff] %v5964_v0  ;;  %v5966_v50 = vpop.eup %4967  ;;  %4979 = vpow2.f32 %v833_v14  ;;  %v851_v22 = vmul.f32 1.442695, %v770_v32  ;;  %v853_v33 = vmul.f32 1.442695, %v771_v7  ;;  %v945_v44 = vsel %vm496_vm0, %v5964_v0, 0.0 }
  0x92   : > { %v5968_v18 = vpop.eup %4969  ;;  %4981 = vpow2.f32 %v835_v51  ;;  %v855_v28 = vmul.f32 1.442695, %v772_v20  ;;  %v946_v17 = vadd.f32 %v5958_v42, %v945_v44  ;;  %v857_v9 = vmul.f32 1.442695, %v773_v24 }
  0x93   : > { %10536 = vst [vmem:[#allocation20_spill] sm:$0xff] %v5968_v18  ;;  %v5972_v45 = vpop.eup %4971  ;;  %4983 = vpow2.f32 %v837_v11  ;;  %v953_v6 = vsel %vm496_vm0, %v5968_v18, 0.0  ;;  %v859_v43 = vmul.f32 1.442695, %v774_v31  ;;  %v861_v35 = vmul.f32 1.442695, %v775_v13 }
  0x94   : > { %v5977_v27 = vpop.eup %4973  ;;  %4985 = vpow2.f32 %v839_v12  ;;  %v954_v32 = vadd.f32 %v5966_v50, %v953_v6  ;;  %v947_v23 = vrot.slane %v946_v17, 4  ;;  %v863_v55 = vmul.f32 1.442695, %v776_v49 }
  0x95   : > { %10537 = vst [vmem:[#allocation21_spill] sm:$0xff] %v5977_v27  ;;  %v5980_v7 = vpop.eup %4975  ;;  %4987 = vpow2.f32 %v841_v34  ;;  %v961_v20 = vsel %vm496_vm0, %v5977_v27, 0.0  ;;  %v865_v24 = vmul.f32 1.442695, %v777_v47  ;;  %v867_v49 = vmul.f32 1.442695, %v778_v41 }
  0x96   : > { %v5984_v1 = vpop.eup %4977  ;;  %4989 = vpow2.f32 %v843_v57  ;;  %v955_v48 = vrot.slane %v954_v32, 4  ;;  %v962_v14 = vadd.f32 %v5972_v45, %v961_v20  ;;  %v948_v31 = vadd.f32 %v947_v23, %v946_v17 }
  0x97   : > { %10538 = vst [vmem:[#allocation22_spill] sm:$0xff] %v5984_v1  ;;  %v5987_v51 = vpop.eup %4979  ;;  %4991 = vpow2.f32 %v845_v15  ;;  %v969_v11 = vsel %vm496_vm0, %v5984_v1, 0.0 }
  0x98   : > { %v5991_v13 = vpop.eup %4981  ;;  %4993 = vpow2.f32 %v847_v2  ;;  %v956_v12 = vadd.f32 %v955_v48, %v954_v32  ;;  %v963_v34 = vrot.slane %v962_v14, 4  ;;  %v970_v44 = vadd.f32 %v5980_v7, %v969_v11 }
  0x99   : > { %10539 = vst [vmem:[#allocation23_spill] sm:$0xff] %v5991_v13  ;;  %v5994_v57 = vpop.eup %4983  ;;  %4995 = vpow2.f32 %v849_v10  ;;  %v949_v6 = vrot.slane %v948_v31, 2  ;;  %v977_v15 = vsel %vm496_vm0, %v5991_v13, 0.0  ;;  %v869_v2 = vmul.f32 1.442695, %v779_v4 }
  0x9a   : > { %v5998_v47 = vpop.eup %4985  ;;  %4997 = vpow2.f32 %v851_v22  ;;  %v957_v17 = vrot.slane %v956_v12, 2  ;;  %v964_v23 = vadd.f32 %v963_v34, %v962_v14  ;;  %v971_v20 = vrot.slane %v970_v44, 4 }
  0x9b   : > { %10540 = vst [vmem:[#allocation24_spill] sm:$0xff] %v5998_v47  ;;  %v6000_v16 = vpop.eup %4987  ;;  %4999 = vpow2.f32 %v853_v33  ;;  %v978_v10 = vadd.f32 %v5987_v51, %v977_v15  ;;  %v985_v41 = vsel %vm496_vm0, %v5998_v47, 0.0  ;;  %v950_v48 = vadd.f32 %v949_v6, %v948_v31 }
  0x9c   : > { %v6008_v32 = vpop.eup %4989  ;;  %5001 = vpow2.f32 %v855_v28  ;;  %v965_v22 = vrot.slane %v964_v23, 2  ;;  %v972_v11 = vadd.f32 %v971_v20, %v970_v44  ;;  %v958_v34 = vadd.f32 %v957_v17, %v956_v12 }
  0x9d   : > { %10541 = vst [vmem:[#allocation25_spill] sm:$0xff] %v6008_v32  ;;  %v6010_v14 = vpop.eup %4991  ;;  %5003 = vpow2.f32 %v857_v9  ;;  %v979_v33 = vrot.slane %v978_v10, 4  ;;  %v986_v21 = vadd.f32 %v5994_v57, %v985_v41  ;;  %v871_v4 = vmul.f32 1.442695, %v780_v5 }
  0x9e   : > { %v6013_v60 = vpop.eup %4993  ;;  %5005 = vpow2.f32 %v859_v43  ;;  %v966_v15 = vadd.f32 %v965_v22, %v964_v23  ;;  %v973_v53 = vrot.slane %v972_v11, 2  ;;  %v873_v9 = vmul.f32 1.442695, %v781_v59 }
  0x9f   : > { %10542 = vst [vmem:[#allocation26_spill] sm:$0xff] %v6013_v60  ;;  %v6018_v28 = vpop.eup %4995  ;;  %5007 = vpow2.f32 %v861_v35  ;;  %v980_v31 = vadd.f32 %v979_v33, %v978_v10  ;;  %v987_v12 = vrot.slane %v986_v21, 4  ;;  %v10544_v43 = vsub.f32 %v5784_v63, %v5906_v54 }
  0xa0   : > { %v6023_v44 = vpop.eup %4997  ;;  %5009 = vpow2.f32 %v863_v55  ;;  %v951_v61 = vrot.slane %v950_v48, 1  ;;  %v974_v58 = vadd.f32 %v973_v53, %v972_v11  ;;  %v959_v17 = vrot.slane %v958_v34, 1 }
  0xa1   : > { %10543 = vst [vmem:[#allocation30_spill] sm:$0xff] %v6023_v44  ;;  %v875_v6 = vmul.f32 1.442695, %v10544_v43  ;;  %v6028_v5 = vpop.eup %4999  ;;  %5011 = vpow2.f32 %v865_v24  ;;  %v967_v35 = vrot.slane %v966_v15, 1  ;;  %v993_v8 = vsel %vm496_vm0, %v6008_v32, 0.0 }
  0xa2   : > { %v6032_v59 = vpop.eup %5001  ;;  %5013 = vpow2.f32 %v867_v49  ;;  %v10546_v55 = vsub.f32 %v5786_v3, %v5932_v39  ;;  %v981_v20 = vrot.slane %v980_v31, 2  ;;  %v994_v63 = vadd.f32 %v6000_v16, %v993_v8 }
  0xa3   : > { %10545 = vst [vmem:[#allocation32_spill] sm:$0xff] %v6032_v59  ;;  %v6038_v54 = vpop.eup %5003  ;;  %5015 = vpow2.f32 %v869_v2  ;;  %v975_v53 = vrot.slane %v974_v58, 1  ;;  %v988_v24 = vadd.f32 %v987_v12, %v986_v21  ;;  %v1001_v10 = vsel %vm496_vm0, %v6013_v60, 0.0 }
  0xa4   : > { %v877_v23 = vmul.f32 1.442695, %v10546_v55  ;;  %v6042_v41 = vpop.eup %5005  ;;  %5017 = vpow2.f32 %v871_v4  ;;  %v10548_v49 = vsub.f32 %v5788_v52, %v5932_v39  ;;  %v995_v3 = vrot.slane %v994_v63, 4 }
  0xa5   : > { %10547 = vst [vmem:[#allocation33_spill] sm:$0xff] %v6042_v41  ;;  %v1002_v11 = vadd.f32 %v6010_v14, %v1001_v10  ;;  %v6048_v33 = vpop.eup %5007  ;;  %v6050_v43 = vadd.f32 %v951_v61, %v950_v48  ;;  %v6052_v2 = vadd.f32 %v959_v17, %v958_v34  ;;  %v6054_v21 = vadd.f32 %v967_v35, %v966_v15 }
  0xa6   : > { %v879_v22 = vmul.f32 1.442695, %v10548_v49  ;;  %v1009_v12 = vsel %vm496_vm0, %v6023_v44, 0.0  ;;  %v6058_v8 = vpop.eup %5009  ;;  %v6060_v4 = vadd.f32 %v981_v20, %v980_v31  ;;  %v996_v52 = vadd.f32 %v995_v3, %v994_v63 }
  0xa7   : > { %10549 = vst [vmem:[#allocation34_spill] sm:$0xff] %v6058_v8  ;;  %v1003_v39 = vrot.slane %v1002_v11, 4  ;;  %v1010_v55 = vadd.f32 %v6018_v28, %v1009_v12  ;;  %v6063_v10 = vpop.eup %5011  ;;  %5019 = vpow2.f32 %v875_v6  ;;  %v6065_v48 = vadd.f32 %v975_v53, %v974_v58 }
  0xa8   : > { %v989_v34 = vrot.slane %v988_v24, 2  ;;  %v1017_v15 = vsel %vm496_vm0, %v6032_v59, 0.0  ;;  %v6069_v61 = vpop.eup %5013  ;;  %5021 = vpow2.f32 %v873_v9  ;;  %v997_v17 = vrot.slane %v996_v52, 2 }
  0xa9   : > { %10550 = vst [vmem:[#allocation37_spill] sm:$0xff] %v6069_v61  ;;  %v1004_v35 = vadd.f32 %v1003_v39, %v1002_v11  ;;  %v1011_v31 = vrot.slane %v1010_v55, 4  ;;  %v6071_v20 = vpop.eup %5015  ;;  %5023 = vpow2.f32 %v879_v22  ;;  %v1018_v63 = vadd.f32 %v6028_v5, %v1017_v15 }
  0xaa   : > { %v1025_v6 = vsel %vm496_vm0, %v6042_v41, 0.0  ;;  %v1033_v58 = vsel %vm496_vm0, %v6058_v8, 0.0  ;;  %v6078_v53 = vpop.eup %5017  ;;  %5025 = vpow2.f32 %v877_v23  ;;  %v1041_v22 = vsel %vm496_vm0, %v6069_v61, 0.0 }
  0xab   : > { %10551 = vst [vmem:[#allocation38_spill] sm:$0xff] %v6078_v53  ;;  %v1005_v49 = vrot.slane %v1004_v35, 2  ;;  %v1012_v3 = vadd.f32 %v1011_v31, %v1010_v55  ;;  %v1026_v9 = vadd.f32 %v6038_v54, %v1025_v6  ;;  %v1019_v11 = vrot.slane %v1018_v63, 4 }
  0xac   : > { %v1034_v12 = vadd.f32 %v6048_v33, %v1033_v58  ;;  %v1049_v39 = vsel %vm496_vm0, %v6078_v53, 0.0  ;;  %v990_v15 = vadd.f32 %v989_v34, %v988_v24  ;;  %v998_v41 = vadd.f32 %v997_v17, %v996_v52 }
  0xad   : > { %v1013_v59 = vrot.slane %v1012_v3, 2  ;;  %v1027_v8 = vrot.slane %v1026_v9, 4  ;;  %v6086_v44 = vpop.eup %5019  ;;  %v1020_v23 = vadd.f32 %v1019_v11, %v1018_v63  ;;  %v1042_v55 = vadd.f32 %v6063_v10, %v1041_v22 }
  0xae   : > { %10552 = vst [vmem:[#allocation39_spill] sm:$0xff] %v6086_v44  ;;  %v1035_v60 = vrot.slane %v1034_v12, 4  ;;  %v1050_v31 = vadd.f32 %v6071_v20, %v1049_v39  ;;  %v6090_v6 = vpop.eup %5021  ;;  %v983_v58 = vrot.slane %v6060_v4, 1  ;;  %v1006_v61 = vadd.f32 %v1005_v49, %v1004_v35 }
  0xaf   : > { %v1014_v32 = vadd.f32 %v1013_v59, %v1012_v3  ;;  %v1028_v47 = vadd.f32 %v1027_v8, %v1026_v9  ;;  %v6093_v53 = vpop.eup %5023  ;;  %v1021_v24 = vrot.slane %v1020_v23, 2  ;;  %v1043_v34 = vrot.slane %v1042_v55, 4 }
  0xb0   : > { %10553 = vst [vmem:[#allocation43_spill] sm:$0xff] %v6093_v53  ;;  %v1036_v52 = vadd.f32 %v1035_v60, %v1034_v12  ;;  %v1051_v17 = vrot.slane %v1050_v31, 4  ;;  %v6095_v13 = vpop.eup %5025  ;;  %v991_v63 = vrot.slane %v990_v15, 1  ;;  %v999_v11 = vrot.slane %v998_v41, 1 }
  0xb1   : > { %v1029_v22 = vrot.slane %v1028_v47, 2  ;;  %v1057_v39 = vsel %vm496_vm0, %v6086_v44, 0.0  ;;  %v1022_v1 = vadd.f32 %v1021_v24, %v1020_v23  ;;  %v1044_v0 = vadd.f32 %v1043_v34, %v1042_v55 }
  0xb2   : > { %v1037_v27 = vrot.slane %v1036_v52, 2  ;;  %v1052_v35 = vadd.f32 %v1051_v17, %v1050_v31  ;;  %v1007_v59 = vrot.slane %v1006_v61, 1  ;;  %v1058_v49 = vadd.f32 %v6090_v6, %v1057_v39 }
  0xb3   : > { %v1030_v8 = vadd.f32 %v1029_v22, %v1028_v47  ;;  %v1065_v60 = vsel %vm496_vm0, %v6093_v53, 0.0  ;;  %v1015_v3 = vrot.slane %v1014_v32, 1  ;;  %v1045_v12 = vrot.slane %v1044_v0, 2 }
  0xb4   : > { %v1038_v9 = vadd.f32 %v1037_v27, %v1036_v52  ;;  %v1053_v18 = vrot.slane %v1052_v35, 2  ;;  %v6103_v38 = vadd.f32 %v983_v58, %v6060_v4  ;;  %v1059_v37 = vrot.slane %v1058_v49, 4 }
  0xb5   : > { %v1066_v23 = vadd.f32 %v6095_v13, %v1065_v60  ;;  %5027 = vrcp.f32 %v6050_v43  ;;  %v1023_v55 = vrot.slane %v1022_v1, 1  ;;  %v1031_v31 = vrot.slane %v1030_v8, 1 }
  0xb6   : > { %v1046_v47 = vadd.f32 %v1045_v12, %v1044_v0  ;;  %v1054_v24 = vadd.f32 %v1053_v18, %v1052_v35  ;;  %v6107_v34 = vadd.f32 %v991_v63, %v990_v15  ;;  %v6109_v17 = vadd.f32 %v999_v11, %v998_v41 }
  0xb7   : > { %v1060_v22 = vadd.f32 %v1059_v37, %v1058_v49  ;;  %v1067_v27 = vrot.slane %v1066_v23, 4  ;;  %v6111_v52 = vadd.f32 %v1007_v59, %v1006_v61  ;;  %v6113_v39 = vadd.f32 %v1015_v3, %v1014_v32 }
  0xb8   : > { %v1039_v4 = vrot.slane %v1038_v9, 1  ;;  %v1047_v58 = vrot.slane %v1046_v47, 1  ;;  %v1055_v53 = vrot.slane %v1054_v24, 1  ;;  %5029 = vrcp.f32 %v6052_v2 }
  0xb9   : > { %v1061_v60 = vrot.slane %v1060_v22, 2  ;;  %v1068_v44 = vadd.f32 %v1067_v27, %v1066_v23  ;;  %v6116_v26 = vadd.f32 %v1023_v55, %v1022_v1  ;;  %v6118_v0 = vadd.f32 %v1031_v31, %v1030_v8 }
  0xba   : > { %vm1206_vm1 = vweird.f32 %v6050_v43  ;;  %v1210_v37 = vand.u32 2147483647, %v6050_v43  ;;  %v1212_v32 = vand.u32 2147483648, %v6050_v43  ;;  %v1224_v15 = vand.u32 2147483647, %v6052_v2 }
  0xbb   : > { %v5028_v18 = vpop.eup %5027  ;;  %v1062_v41 = vadd.f32 %v1061_v60, %v1060_v22  ;;  %v1069_v61 = vrot.slane %v1068_v44, 2  ;;  %v6124_v63 = vadd.f32 %v1039_v4, %v1038_v9  ;;  %v6126_v11 = vadd.f32 %v1047_v58, %v1046_v47 }
  0xbc   : > { %v1202_v1 = vmul.f32 %v5028_v18, %v6050_v43  ;;  %5031 = vrcp.f32 %v6054_v21  ;;  %v6130_v35 = vadd.f32 %v1055_v53, %v1054_v24  ;;  %v1226_v49 = vand.u32 2147483648, %v6052_v2 }
  0xbd   : > { %v1063_v59 = vrot.slane %v1062_v41, 1  ;;  %v1070_v8 = vadd.f32 %v1069_v61, %v1068_v44  ;;  %vm1207_vm2 = vweird.f32 %v5028_v18  ;;  %vm6133_vm3 = vcmp.eq.f32.partialorder %v1210_v37, 8.507059e+37 }
  0xbe   : > { %v1203_v3 = vsub.f32 1.0, %v1202_v1  ;;  %vm1220_vm4 = vweird.f32 %v6052_v2  ;;  %v5030_v9 = vpop.eup %5029  ;;  %v1213_v23 = vor.u32 1.1754944e-38, %v1212_v32  ;;  %vm6138_vm5 = vcmp.eq.f32.partialorder %v1224_v15, 8.507059e+37  ;;  %vm6150_vm6 = vmor %vm1206_vm1, %vm1207_vm2 }
  0xbf   : > { %v1238_v53 = vand.u32 2147483647, %v6054_v21  ;;  %5033 = vrcp.f32 %v6065_v48  ;;  %v1071_v44 = vrot.slane %v1070_v8, 1  ;;  %v1216_v47 = vmul.f32 %v5030_v9, %v6052_v2 }
  0xc0   : > { %v1204_v31 = vmul.f32 %v5028_v18, %v1203_v3  ;;  %v1240_v24 = vand.u32 2147483648, %v6054_v21  ;;  %v6146_v22 = vadd.f32 %v1063_v59, %v1062_v41  ;;  %vm1221_vm7 = vweird.f32 %v5030_v9 }
  0xc1   : > { %v1227_v4 = vor.u32 1.1754944e-38, %v1226_v49  ;;  %vm1234_vm8 = vweird.f32 %v6054_v21  ;;  %v1217_v37 = vsub.f32 1.0, %v1216_v47  ;;  %v1252_v61 = vand.u32 2147483647, %v6065_v48  ;;  %vm6171_vm11 = vmor %vm1220_vm4, %vm1221_vm7 }
  0xc2   : > { %v5032_v58 = vpop.eup %5031  ;;  %v1205_v60 = vadd.f32 %v5028_v18, %v1204_v31  ;;  %5035 = vrcp.f32 %v6103_v38  ;;  %vm6158_vm9 = vcmp.eq.f32.partialorder %v1238_v53, 8.507059e+37  ;;  %vm1248_vm10 = vweird.f32 %v6065_v48 }
  0xc3   : > { %v1230_v41 = vmul.f32 %v5032_v58, %v6054_v21  ;;  %v1254_v43 = vand.u32 2147483648, %v6065_v48  ;;  %v6164_v15 = vadd.f32 %v1071_v44, %v1070_v8  ;;  %v1218_v59 = vmul.f32 %v5030_v9, %v1217_v37 }
  0xc4   : > { %v1209_v1 = vsel %vm6150_vm6, %v5028_v18, %v1205_v60  ;;  %v1241_v49 = vor.u32 1.1754944e-38, %v1240_v24  ;;  %vm1235_vm12 = vweird.f32 %v5032_v58  ;;  %vm1262_vm13 = vweird.f32 %v6103_v38 }
  0xc5   : > { %v5034_v3 = vpop.eup %5033  ;;  %v1231_v31 = vsub.f32 1.0, %v1230_v41  ;;  %5037 = vrcp.f32 %v6107_v34  ;;  %v1219_v8 = vadd.f32 %v5030_v9, %v1218_v59  ;;  %vm6178_vm14 = vcmp.eq.f32.partialorder %v1252_v61, 8.507059e+37  ;;  %vm6195_vm1 = vmor %vm1234_vm8, %vm1235_vm12 }
  0xc6   : > { %v1244_v44 = vmul.f32 %v5034_v3, %v6065_v48  ;;  %v1266_v47 = vand.u32 2147483647, %v6103_v38  ;;  %v1268_v2 = vand.u32 2147483648, %v6103_v38  ;;  %v6186_v24 = vsel %vm6133_vm3, %v1213_v23, %v1209_v1 }
  0xc7   : > { %10566 = vst [vmem:[#allocation44_spill] sm:$0xff] %v6186_v24  ;;  %v1232_v27 = vmul.f32 %v5032_v58, %v1231_v31  ;;  %v1255_v60 = vor.u32 1.1754944e-38, %v1254_v43  ;;  %vm1276_vm15 = vweird.f32 %v6107_v34  ;;  %v1223_v61 = vsel %vm6171_vm11, %v5030_v9, %v1219_v8 }
  0xc8   : > { %v6189_v37 = vpop.eup %5035  ;;  %v1245_v59 = vsub.f32 1.0, %v1244_v44  ;;  %vm1249_vm2 = vweird.f32 %v5034_v3  ;;  %5039 = vrcp.f32 %v6109_v17  ;;  %v1280_v43 = vand.u32 2147483647, %v6107_v34 }
  0xc9   : > { %v1233_v12 = vadd.f32 %v5032_v58, %v1232_v27  ;;  %v1258_v23 = vmul.f32 %v6189_v37, %v6103_v38  ;;  %v1282_v1 = vand.u32 2147483648, %v6107_v34  ;;  %v6206_v9 = vsel %vm6138_vm5, %v1227_v4, %v1223_v61  ;;  %vm6217_vm6 = vmor %vm1248_vm10, %vm1249_vm2 }
  0xca   : > { %10569 = vst [vmem:[#allocation45_spill] sm:$0xff] %v6206_v9  ;;  %v1246_v21 = vmul.f32 %v5034_v3, %v1245_v59  ;;  %vm6208_vm3 = vcmp.eq.f32.partialorder %v1266_v47, 8.507059e+37  ;;  %v1269_v31 = vor.u32 1.1754944e-38, %v1268_v2  ;;  %vm1290_vm4 = vweird.f32 %v6109_v17 }
  0xcb   : > { %v5038_v8 = vpop.eup %5037  ;;  %v1237_v44 = vsel %vm6195_vm1, %v5032_v58, %v1233_v12  ;;  %v1259_v55 = vsub.f32 1.0, %v1258_v23  ;;  %v1294_v4 = vand.u32 2147483647, %v6109_v17  ;;  %5041 = vrcp.f32 %v6111_v52 }
  0xcc   : > { %v1247_v47 = vadd.f32 %v5034_v3, %v1246_v21  ;;  %vm1263_vm5 = vweird.f32 %v6189_v37  ;;  %v1272_v2 = vmul.f32 %v5038_v8, %v6107_v34  ;;  %v1296_v61 = vand.u32 2147483648, %v6109_v17 }
  0xcd   : > { %v6228_v58 = vsel %vm6158_vm9, %v1241_v49, %v1237_v44  ;;  %v1260_v48 = vmul.f32 %v6189_v37, %v1259_v55  ;;  %vm6231_vm7 = vcmp.eq.f32.partialorder %v1280_v43, 8.507059e+37  ;;  %v1283_v59 = vor.u32 1.1754944e-38, %v1282_v1  ;;  %vm6241_vm9 = vmor %vm1262_vm13, %vm1263_vm5 }
  0xce   : > { %10574 = vst [vmem:[#allocation46_spill] sm:$0xff] %v6228_v58  ;;  %v5040_v12 = vpop.eup %5039  ;;  %v1251_v23 = vsel %vm6217_vm6, %v5034_v3, %v1247_v47  ;;  %v1273_v21 = vsub.f32 1.0, %v1272_v2  ;;  %vm1277_vm8 = vweird.f32 %v5038_v8  ;;  %v1308_v19 = vand.u32 2147483647, %v6111_v52 }
  0xcf   : > { %v1261_v56 = vadd.f32 %v6189_v37, %v1260_v48  ;;  %v1286_v49 = vmul.f32 %v5040_v12, %v6109_v17  ;;  %vm6246_vm10 = vcmp.eq.f32.partialorder %v1294_v4, 8.507059e+37  ;;  %v1310_v3 = vand.u32 2147483648, %v6111_v52  ;;  %vm6259_vm12 = vmor %vm1276_vm15, %vm1277_vm8 }
  0xd0   : > { %v1274_v1 = vmul.f32 %v5038_v8, %v1273_v21  ;;  %v1297_v44 = vor.u32 1.1754944e-38, %v1296_v61  ;;  %vm1304_vm11 = vweird.f32 %v6111_v52  ;;  %5043 = vrcp.f32 %v6113_v39 }
  0xd1   : > { %v5042_v27 = vpop.eup %5041  ;;  %v6255_v38 = vsel %vm6178_vm14, %v1255_v60, %v1251_v23  ;;  %v1287_v4 = vsub.f32 1.0, %v1286_v49  ;;  %vm1291_vm13 = vweird.f32 %v5040_v12  ;;  %vm6263_vm1 = vcmp.eq.f32.partialorder %v1308_v19, 8.507059e+37 }
  0xd2   : > { %10581 = vst [vmem:[#allocation47_spill] sm:$0xff] %v6255_v38  ;;  %v1265_v2 = vsel %vm6241_vm9, %v6189_v37, %v1261_v56  ;;  %v1275_v61 = vadd.f32 %v5038_v8, %v1274_v1  ;;  %v1300_v18 = vmul.f32 %v5042_v27, %v6111_v52  ;;  %v1322_v60 = vand.u32 2147483647, %v6113_v39  ;;  %vm6278_vm14 = vmor %vm1290_vm4, %vm1291_vm13 }
  0xd3   : > { %v1288_v34 = vmul.f32 %v5040_v12, %v1287_v4  ;;  %v1311_v48 = vor.u32 1.1754944e-38, %v1310_v3  ;;  %v1324_v23 = vand.u32 2147483648, %v6113_v39  ;;  %5045 = vrcp.f32 %v6116_v26 }
  0xd4   : > { %v1279_v19 = vsel %vm6259_vm12, %v5038_v8, %v1275_v61  ;;  %v1301_v56 = vsub.f32 1.0, %v1300_v18  ;;  %vm1305_vm15 = vweird.f32 %v5042_v27  ;;  %v1336_v37 = vand.u32 2147483647, %v6116_v26 }
  0xd5   : > { %v6285_v32 = vsel %vm6208_vm3, %v1269_v31, %v1265_v2  ;;  %v1289_v49 = vadd.f32 %v5040_v12, %v1288_v34  ;;  %vm1318_vm2 = vweird.f32 %v6113_v39  ;;  %v1338_v3 = vand.u32 2147483648, %v6116_v26  ;;  %vm6303_vm3 = vmor %vm1304_vm11, %vm1305_vm15 }
  0xd6   : > { %10588 = vst [vmem:[#allocation48_spill] sm:$0xff] %v6285_v32  ;;  %v5044_v8 = vpop.eup %5043  ;;  %v1302_v1 = vmul.f32 %v5042_v27, %v1301_v56  ;;  %vm6289_vm6 = vcmp.eq.f32.partialorder %v1322_v60, 8.507059e+37  ;;  %vm1332_vm4 = vweird.f32 %v6116_v26  ;;  %5047 = vrcp.f32 %v6118_v0 }
  0xd7   : > { %v6297_v53 = vsel %vm6231_vm7, %v1283_v59, %v1279_v19  ;;  %v1293_v31 = vsel %vm6278_vm14, %v5040_v12, %v1289_v49  ;;  %v1314_v4 = vmul.f32 %v5044_v8, %v6113_v39  ;;  %v1325_v2 = vor.u32 1.1754944e-38, %v1324_v23 }
  0xd8   : > { %10591 = vst [vmem:[#allocation49_spill] sm:$0xff] %v6297_v53  ;;  %v1303_v61 = vadd.f32 %v5042_v27, %v1302_v1  ;;  %vm1319_vm5 = vweird.f32 %v5044_v8  ;;  %vm6308_vm8 = vcmp.eq.f32.partialorder %v1336_v37, 8.507059e+37  ;;  %vm1346_vm7 = vweird.f32 %v6118_v0 }
  0xd9   : > { %v1350_v41 = vand.u32 2147483647, %v6118_v0  ;;  %v5046_v59 = vpop.eup %5045  ;;  %v1315_v12 = vsub.f32 1.0, %v1314_v4  ;;  %v1339_v52 = vor.u32 1.1754944e-38, %v1338_v3  ;;  %v1352_v60 = vand.u32 2147483648, %v6118_v0 }
  0xda   : > { %5049 = vrcp.f32 %v6124_v63  ;;  %v6318_v34 = vsel %vm6246_vm10, %v1297_v44, %v1293_v31  ;;  %v1307_v23 = vsel %vm6303_vm3, %v5042_v27, %v1303_v61  ;;  %v1328_v19 = vmul.f32 %v5046_v59, %v6116_v26  ;;  %vm6336_vm10 = vmor %vm1318_vm2, %vm1319_vm5 }
  0xdb   : > { %10596 = vst [vmem:[#allocation50_spill] sm:$0xff] %v6318_v34  ;;  %vm1360_vm9 = vweird.f32 %v6124_v63  ;;  %v1316_v21 = vmul.f32 %v5044_v8, %v1315_v12  ;;  %vm1333_vm11 = vweird.f32 %v5046_v59  ;;  %vm6324_vm12 = vcmp.eq.f32.partialorder %v1350_v41, 8.507059e+37 }
  0xdc   : > { %v1364_v37 = vand.u32 2147483647, %v6124_v63  ;;  %v5048_v49 = vpop.eup %5047  ;;  %v6331_v43 = vsel %vm6263_vm1, %v1311_v48, %v1307_v23  ;;  %v1329_v27 = vsub.f32 1.0, %v1328_v19  ;;  %v1366_v3 = vand.u32 2147483648, %v6124_v63  ;;  %vm6352_vm1 = vmor %vm1332_vm4, %vm1333_vm11 }
  0xdd   : > { %10599 = vst [vmem:[#allocation51_spill] sm:$0xff] %v6331_v43  ;;  %5051 = vrcp.f32 %v6126_v11  ;;  %v1317_v1 = vadd.f32 %v5044_v8, %v1316_v21  ;;  %v1342_v31 = vmul.f32 %v5048_v49, %v6118_v0  ;;  %v1353_v55 = vor.u32 1.1754944e-38, %v1352_v60 }
  0xde   : > { %v1378_v47 = vand.u32 2147483647, %v6126_v11  ;;  %v1330_v48 = vmul.f32 %v5046_v59, %v1329_v27  ;;  %vm1374_vm13 = vweird.f32 %v6126_v11  ;;  %v1380_v39 = vand.u32 2147483648, %v6126_v11 }
  0xdf   : > { %5053 = vrcp.f32 %v6130_v35  ;;  %v1321_v61 = vsel %vm6336_vm10, %v5044_v8, %v1317_v1  ;;  %v1343_v12 = vsub.f32 1.0, %v1342_v31  ;;  %vm1347_vm14 = vweird.f32 %v5048_v49 }
  0xe0   : > { %v5050_v4 = vpop.eup %5049  ;;  %vm6356_vm15 = vcmp.eq.f32.partialorder %v1364_v37, 8.507059e+37  ;;  %v1367_v23 = vor.u32 1.1754944e-38, %v1366_v3  ;;  %v6362_v19 = vsel %vm6289_vm6, %v1325_v2, %v1321_v61  ;;  %v1331_v21 = vadd.f32 %v5046_v59, %v1330_v48  ;;  %vm6376_vm6 = vmor %vm1346_vm7, %vm1347_vm14 }
  0xe1   : > { %10606 = vst [vmem:[#allocation52_spill] sm:$0xff] %v6362_v19  ;;  %v1356_v8 = vmul.f32 %v5050_v4, %v6124_v63  ;;  %vm1388_vm2 = vweird.f32 %v6130_v35  ;;  %v1344_v26 = vmul.f32 %v5048_v49, %v1343_v12  ;;  %vm1361_vm4 = vweird.f32 %v5050_v4 }
  0xe2   : > { %vm6366_vm3 = vcmp.eq.f32.partialorder %v1378_v47, 8.507059e+37  ;;  %v1392_v37 = vand.u32 2147483647, %v6130_v35  ;;  %v1394_v27 = vand.u32 2147483648, %v6130_v35  ;;  %v1335_v17 = vsel %vm6352_vm1, %v5046_v59, %v1331_v21 }
  0xe3   : > { %v5052_v3 = vpop.eup %5051  ;;  %v1357_v1 = vsub.f32 1.0, %v1356_v8  ;;  %v1381_v31 = vor.u32 1.1754944e-38, %v1380_v39  ;;  %5055 = vrcp.f32 %v6146_v22  ;;  %v6383_v47 = vsel %vm6308_vm8, %v1339_v52, %v1335_v17  ;;  %vm6397_vm8 = vmor %vm1360_vm9, %vm1361_vm4 }
  0xe4   : > { %10611 = vst [vmem:[#allocation53_spill] sm:$0xff] %v6383_v47  ;;  %v1345_v48 = vadd.f32 %v5048_v49, %v1344_v26  ;;  %v1370_v61 = vmul.f32 %v5052_v3, %v6126_v11  ;;  %vm1402_vm5 = vweird.f32 %v6146_v22  ;;  %vm1375_vm11 = vweird.f32 %v5052_v3 }
  0xe5   : > { %v5054_v59 = vpop.eup %5053  ;;  %v1358_v41 = vmul.f32 %v5050_v4, %v1357_v1  ;;  %vm6387_vm7 = vcmp.eq.f32.partialorder %v1392_v37, 8.507059e+37  ;;  %v1406_v39 = vand.u32 2147483647, %v6146_v22  ;;  %v1395_v8 = vor.u32 1.1754944e-38, %v1394_v27  ;;  %vm6417_vm9 = vmor %vm1374_vm13, %vm1375_vm11 }
  0xe6   : > { %v1349_v12 = vsel %vm6376_vm6, %v5048_v49, %v1345_v48  ;;  %v1371_v52 = vsub.f32 1.0, %v1370_v61  ;;  %v1384_v21 = vmul.f32 %v5054_v59, %v6130_v35  ;;  %vm1389_vm10 = vweird.f32 %v5054_v59 }
  0xe7   : > { %v6404_v26 = vsel %vm6324_vm12, %v1353_v55, %v1349_v12  ;;  %v1359_v37 = vadd.f32 %v5050_v4, %v1358_v41  ;;  %v1408_v17 = vand.u32 2147483648, %v6146_v22  ;;  %vm6407_vm1 = vcmp.eq.f32.partialorder %v1406_v39, 8.507059e+37  ;;  %vm6432_vm13 = vmor %vm1388_vm2, %vm1389_vm10 }
  0xe8   : > { %10616 = vst [vmem:[#allocation54_spill] sm:$0xff] %v6404_v26  ;;  %v1372_v49 = vmul.f32 %v5052_v3, %v1371_v52  ;;  %v1385_v2 = vsub.f32 1.0, %v1384_v21  ;;  %5057 = vrcp.f32 %v6164_v15  ;;  %vm1416_vm12 = vweird.f32 %v6164_v15 }
  0xe9   : > { %v5056_v1 = vpop.eup %5055  ;;  %v1363_v27 = vsel %vm6397_vm8, %v5050_v4, %v1359_v37  ;;  %v1420_v55 = vand.u32 2147483647, %v6164_v15  ;;  %v1422_v48 = vand.u32 2147483648, %v6164_v15  ;;  %v1409_v12 = vor.u32 1.1754944e-38, %v1408_v17 }
  0xea   : > { %v1373_v61 = vadd.f32 %v5052_v3, %v1372_v49  ;;  %v1386_v41 = vmul.f32 %v5054_v59, %v1385_v2  ;;  %v1398_v39 = vmul.f32 %v5056_v1, %v6146_v22  ;;  %v6427_v4 = vsel %vm6356_vm15, %v1367_v23, %v1363_v27 }
  0xeb   : > { %10621 = vst [vmem:[#allocation55_spill] sm:$0xff] %v6427_v4  ;;  %vm1403_vm14 = vweird.f32 %v5056_v1  ;;  %v1423_v18 = vor.u32 1.1754944e-38, %v1422_v48  ;;  %v1649_v52 = vmul.f32 %v5958_v42, %v6186_v24  ;;  %v1651_v60 = vmul.f32 %v5966_v50, %v6206_v9 }
  0xec   : > { %v1377_v21 = vsel %vm6417_vm9, %v5052_v3, %v1373_v61  ;;  %v1387_v37 = vadd.f32 %v5054_v59, %v1386_v41  ;;  %v1399_v17 = vsub.f32 1.0, %v1398_v39  ;;  %vm6446_vm15 = vcmp.eq.f32.partialorder %v1420_v55, 8.507059e+37  ;;  %vm6469_vm2 = vmor %vm1402_vm5, %vm1403_vm14 }
  0xed   : > { %v6444_v35 = vsel %vm6366_vm3, %v1381_v31, %v1377_v21  ;;  %v1653_v49 = vmul.f32 %v5972_v45, %v6228_v58  ;;  %v1655_v42 = vmul.f32 %v5980_v7, %v6255_v38  ;;  %v1657_v3 = vmul.f32 %v5987_v51, %v6285_v32  ;;  %v417_v32 = vld [vmem:[%s5474_s12 + $0x188] sm:$0x1]  ;;  %v418_v38 = vld [vmem:[%s5474_s12 + $0x190] sm:$0xff] }
  0xee   : > { %10624 = vst [vmem:[#allocation56_spill] sm:$0xff] %v6444_v35  ;;  %v5058_v2 = vpop.eup %5057  ;;  %v1391_v50 = vsel %vm6432_vm13, %v5054_v59, %v1387_v37  ;;  %v1400_v44 = vmul.f32 %v5056_v1, %v1399_v17  ;;  %v1659_v31 = vmul.f32 %v5994_v57, %v6297_v53  ;;  %v1661_v27 = vmul.f32 %v6000_v16, %v6318_v34  ;;  %v6504_v17 = vld [vmem:[%s5366_s4 + $0x58] sm:$0xff]  ;;  %v416_v53 = vld [vmem:[%s5474_s12 + $0x180] sm:$0xff] }
  0xef   : > { %v6464_v45 = vsel %vm6387_vm7, %v1395_v8, %v1391_v50  ;;  %v1412_v51 = vmul.f32 %v5058_v2, %v6164_v15  ;;  %vm1417_vm4 = vweird.f32 %v5058_v2  ;;  %v1663_v57 = vmul.f32 %v6010_v14, %v6331_v43  ;;  %2643 = vrot.lane.b32.xlu0 %v6504_v17, %s5217_s5  ;;  %2663 = vrot.lane.b32.xlu1 %v6504_v17, %s5218_s6 }
  0xf0   : > { %10627 = vst [vmem:[#allocation57_spill] sm:$0xff] %v6464_v45  ;;  %v1401_v59 = vadd.f32 %v5056_v1, %v1400_v44  ;;  %v1665_v16 = vmul.f32 %v6018_v28, %v6362_v19  ;;  %v1667_v0 = vmul.f32 %v6028_v5, %v6383_v47  ;;  %v1669_v22 = vmul.f32 %v6038_v54, %v6404_v26  ;;  %vm6497_vm3 = vmor %vm1416_vm12, %vm1417_vm4 }
  0xf1   : > { %v1413_v8 = vsub.f32 1.0, %v1412_v51  ;;  %v1671_v56 = vmul.f32 %v6048_v33, %v6427_v4  ;;  %v1673_v55 = vmul.f32 %v6063_v10, %v6444_v35  ;;  %v1675_v14 = vmul.f32 %v6071_v20, %v6464_v45  ;;  %v10655_v4 = vld [vmem:[#allocation12_spill] sm:$0xff] }
  0xf2   : > { %v1405_v48 = vsel %vm6469_vm2, %v5056_v1, %v1401_v59  ;;  %v1713_v28 = vpack.c.bf16 %v1649_v52, %v1649_v52  ;;  %v1715_v61 = vpack.c.bf16 %v1651_v60, %v1651_v60  ;;  %v1717_v5 = vpack.c.bf16 %v1653_v49, %v1653_v49 }
  0xf3   : > { %v6492_v54 = vsel %vm6407_vm1, %v1409_v12, %v1405_v48  ;;  %v1414_v41 = vmul.f32 %v5058_v2, %v1413_v8  ;;  %v1719_v39 = vpack.c.bf16 %v1655_v42, %v1655_v42  ;;  %v1721_v33 = vpack.c.bf16 %v1657_v3, %v1657_v3  ;;  %v4805_v3 = vld [vmem:[%s5366_s4 + $0x50] sm:$0xff] }
  0xf4   : > { %10630 = vst [vmem:[#allocation58_spill] sm:$0xff] %v6492_v54  ;;  %v1677_v20 = vmul.f32 %v6090_v6, %v6492_v54  ;;  %v1723_v1 = vpack.c.bf16 %v1659_v31, %v1659_v31  ;;  %v1725_v11 = vpack.c.bf16 %v1661_v27, %v1661_v27  ;;  %v1727_v52 = vpack.c.bf16 %v1663_v57, %v1663_v57  ;;  %v10653_v54 = vld [vmem:[#allocation7_spill] sm:$0xff] }
  0xf5   : > { %v1415_v63 = vadd.f32 %v5058_v2, %v1414_v41  ;;  %v1729_v12 = vpack.c.bf16 %v1665_v16, %v1665_v16  ;;  %v1731_v21 = vpack.c.bf16 %v1667_v0, %v1667_v0  ;;  %v1733_v37 = vpack.c.bf16 %v1669_v22, %v1669_v22  ;;  %2641 = vrot.lane.b32.xlu2 %v4805_v3, %s5217_s5 }
  0xf6   : > { %v1735_v60 = vpack.c.bf16 %v1671_v56, %v1671_v56  ;;  %v1737_v49 = vpack.c.bf16 %v1673_v55, %v1673_v55  ;;  %v1739_v15 = vpack.c.bf16 %v1675_v14, %v1675_v14  ;;  %v1741_v42 = vpack.c.bf16 %v1677_v20, %v1677_v20 }
  0xf7   : > { %v1419_v6 = vsel %vm6497_vm3, %v5058_v2, %v1415_v63  ;;  %v1841_v50 = vunpack.c.l.b16 %v1713_v28  ;;  %v1842_v44 = vunpack.c.l.b16 %v1715_v61  ;;  %v1843_v31 = vunpack.c.l.b16 %v1717_v5  ;;  %2661 = vrot.lane.b32.xlu0 %v4805_v3, %s5218_s6  ;;  %2681 = vrot.lane.b32.xlu1 %v4805_v3, %s5219_s26 }
  0xf8   : > { %v6516_v27 = vsel %vm6446_vm15, %v1423_v18, %v1419_v6  ;;  %v1844_v7 = vunpack.c.l.b16 %v1719_v39  ;;  %v1845_v51 = vunpack.c.l.b16 %v1721_v33  ;;  %v1846_v57 = vunpack.c.l.b16 %v1723_v1 }
  0xf9   : > { %10633 = vst [vmem:[#allocation59_spill] sm:$0xff] %v6516_v27  ;;  %v1679_v59 = vmul.f32 %v6095_v13, %v6516_v27  ;;  %v1847_v16 = vunpack.c.l.b16 %v1725_v11  ;;  %v1848_v2 = vunpack.c.l.b16 %v1727_v52  ;;  %v1849_v0 = vunpack.c.l.b16 %v1729_v12 }
  0xfa   : > { %v1850_v22 = vunpack.c.l.b16 %v1731_v21  ;;  %v1851_v8 = vunpack.c.l.b16 %v1733_v37  ;;  %v1852_v56 = vunpack.c.l.b16 %v1735_v60  ;;  %v1853_v55 = vunpack.c.l.b16 %v1737_v49  ;;  %v5155_v60 = vld [vmem:[%s5366_s4 + $0x48] sm:$0xff] }
  0xfb   : > { %v1743_v14 = vpack.c.bf16 %v1679_v59, %v1679_v59  ;;  %v1854_v48 = vunpack.c.l.b16 %v1739_v15  ;;  %v1855_v28 = vunpack.c.l.b16 %v1741_v42  ;;  %v6520_v61 = vunpack.i.l.s16 %v1841_v50 }
  0xfc   : > { %v6522_v18 = vunpack.i.l.s16 %v1842_v44  ;;  %v6524_v23 = vunpack.i.l.s16 %v1843_v31  ;;  %v6526_v5 = vunpack.i.l.s16 %v1844_v7  ;;  %v6528_v13 = vunpack.i.l.s16 %v1845_v51 }
  0xfd   : > { %10634 = vst [vmem:[#allocation60_spill] sm:$0xff] %v6520_v61  ;;  %v1856_v41 = vunpack.c.l.b16 %v1743_v14  ;;  %v6530_v39 = vunpack.i.l.s16 %v1846_v57  ;;  %v6532_v33 = vunpack.i.l.s16 %v1847_v16  ;;  %v6534_v10 = vunpack.i.l.s16 %v1848_v2  ;;  %2659 = vrot.lane.b32.xlu2 %v5155_v60, %s5218_s6 }
  0xfe   : > { %10635 = vst [vmem:[#allocation61_spill] sm:$0xff] %v6522_v18  ;;  %v6536_v20 = vunpack.i.l.s16 %v1849_v0  ;;  %v6538_v1 = vunpack.i.l.s16 %v1850_v22  ;;  %v6540_v11 = vunpack.i.l.s16 %v1851_v8  ;;  %v6542_v52 = vunpack.i.l.s16 %v1852_v56 }
  0xff   : > { %10636 = vst [vmem:[#allocation62_spill] sm:$0xff] %v6524_v23  ;;  %v6545_v63 = vunpack.i.l.s16 %v1853_v55  ;;  %v6547_v12 = vunpack.i.l.s16 %v1854_v48  ;;  %v6549_v21 = vunpack.i.l.s16 %v1855_v28  ;;  %v6551_v37 = vunpack.i.l.s16 %v1856_v41  ;;  %2679 = vrot.lane.b32.xlu0 %v5155_v60, %s5219_s26 }
 0x100   : > { %10637 = vst [vmem:[#allocation63_spill] sm:$0xff] %v6526_v5  ;;  %v1937_v49 = vrot.slane %v6522_v18, 7  ;;  %vm1938_vm6 = vcmask 1041409   ;;  %v1940_v15 = vrot.slane %v6524_v23, 6  ;;  %vm1941_vm5 = vcmask 1042434  }
 0x101   : > { %10638 = vst [vmem:[#allocation64_spill] sm:$0xff] %v6528_v13  ;;  %v1943_v42 = vrot.slane %v6526_v5, 5  ;;  %vm1944_vm11 = vcmask 1043459   ;;  %v1946_v6 = vrot.slane %v6528_v13, 4  ;;  %vm10288_vm7 = vcmask 1044484  }
 0x102   : > { %10639 = vst [vmem:[#allocation65_spill] sm:$0xff] %v6530_v39  ;;  %v1939_v50 = vsel %vm1938_vm6, %v1937_v49, %v6520_v61  ;;  %v1949_v3 = vrot.slane %v6530_v39, 3  ;;  %vm10285_vm8 = vcmask 1045509   ;;  %v1952_v44 = vrot.slane %v6532_v33, 2 }
 0x103   : > { %10640 = vst [vmem:[#allocation66_spill] sm:$0xff] %v6532_v33  ;;  %v1942_v31 = vsel %vm1941_vm5, %v1940_v15, %v1939_v50  ;;  %vm10284_vm10 = vcmask 1046534   ;;  %v1955_v7 = vrot.slane %v6534_v10, 1  ;;  %vm10283_vm1 = vcmask 1047559  }
 0x104   : > { %10641 = vst [vmem:[#allocation67_spill] sm:$0xff] %v6534_v10  ;;  %v1945_v51 = vsel %vm1944_vm11, %v1943_v42, %v1942_v31  ;;  %v1958_v57 = vrot.slane %v6538_v1, 7  ;;  %v1960_v59 = vrot.slane %v6540_v11, 6  ;;  %v1962_v16 = vrot.slane %v6542_v52, 5  ;;  %v5156_v42 = vld [vmem:[%s5366_s4 + $0x40] sm:$0xff] }
 0x105   : > { %10642 = vst [vmem:[#allocation68_spill] sm:$0xff] %v6536_v20  ;;  %v1948_v2 = vsel %vm10288_vm7, %v1946_v6, %v1945_v51  ;;  %v1964_v0 = vrot.slane %v6545_v63, 4  ;;  %v1966_v22 = vrot.slane %v6547_v12, 3  ;;  %v1968_v8 = vrot.slane %v6549_v21, 2  ;;  %2677 = vrot.lane.b32.xlu2 %v5156_v42, %s5219_s26 }
 0x106   : > { %10643 = vst [vmem:[#allocation69_spill] sm:$0xff] %v6538_v1  ;;  %v1951_v56 = vsel %vm10285_vm8, %v1949_v3, %v1948_v2  ;;  %v1959_v55 = vsel %vm1938_vm6, %v1958_v57, %v6536_v20  ;;  %v1970_v14 = vrot.slane %v6551_v37, 1  ;;  %v2269_v48 = vrot.slane %v6520_v61, 1  ;;  %v10675_v61 = vld [vmem:[#allocation40_spill] sm:$0xff] }
 0x107   : > { %10644 = vst [vmem:[#allocation70_spill] sm:$0xff] %v6540_v11  ;;  %v1954_v28 = vsel %vm10284_vm10, %v1952_v44, %v1951_v56  ;;  %v1961_v41 = vsel %vm1941_vm5, %v1960_v59, %v1959_v55  ;;  %v2271_v49 = vrot.slane %v6524_v23, 7  ;;  %v2273_v15 = vrot.slane %v6526_v5, 6  ;;  %v431_v23 = vld [vmem:[%s5474_s12 + $0x1f8] sm:$0x1] }
 0x108   : > { %10645 = vst [vmem:[#allocation71_spill] sm:$0xff] %v6542_v52  ;;  %v1957_v6 = vsel %vm10283_vm1, %v1955_v7, %v1954_v28  ;;  %v1963_v50 = vsel %vm1944_vm11, %v1962_v16, %v1961_v41  ;;  %v2270_v3 = vsel %vm1938_vm6, %v6522_v18, %v2269_v48  ;;  %v2275_v60 = vrot.slane %v6528_v13, 5 }
 0x109   : > { %10646 = vst [vmem:[#allocation72_spill] sm:$0xff] %v6545_v63  ;;  %v1965_v44 = vsel %vm10288_vm7, %v1964_v0, %v1963_v50  ;;  %v2272_v31 = vsel %vm1941_vm5, %v2271_v49, %v2270_v3  ;;  %v2277_v51 = vrot.slane %v6530_v39, 4  ;;  %v2279_v57 = vrot.slane %v6532_v33, 3 }
 0x10a   : > { %10647 = vst [vmem:[#allocation73_spill] sm:$0xff] %v6547_v12  ;;  %v1967_v59 = vsel %vm10285_vm8, %v1966_v22, %v1965_v44  ;;  %v2274_v2 = vsel %vm1944_vm11, %v2273_v15, %v2272_v31  ;;  %v2281_v7 = vrot.slane %v6534_v10, 2  ;;  %v2283_v16 = vrot.slane %v6536_v20, 1  ;;  %v10660_v10 = vld [vmem:[#allocation14_spill] sm:$0xff] }
 0x10b   : > { %10648 = vst [vmem:[#allocation74_spill] sm:$0xff] %v6549_v21  ;;  %v1969_v56 = vsel %vm10284_vm10, %v1968_v8, %v1967_v59  ;;  %v2276_v55 = vsel %vm10288_vm7, %v2275_v60, %v2274_v2  ;;  %v2285_v0 = vrot.slane %v6540_v11, 7  ;;  %v2287_v48 = vrot.slane %v6542_v52, 6  ;;  %v402_v59 = vld [vmem:[%s5474_s12 + $0x110] sm:$0xff] }
 0x10c   : > { %10649 = vst [vmem:[#allocation75_spill] sm:$0xff] %v6551_v37  ;;  %v1971_v28 = vsel %vm10283_vm1, %v1970_v14, %v1969_v56  ;;  %v2278_v41 = vsel %vm10285_vm8, %v2277_v51, %v2276_v55  ;;  %v2284_v22 = vsel %vm1938_vm6, %v6538_v1, %v2283_v16  ;;  %v2289_v49 = vrot.slane %v6545_v63, 5  ;;  %v400_v51 = vld [vmem:[%s5474_s12 + $0x100] sm:$0xff]  ;;  %v403_v16 = vld [vmem:[%s5474_s12 + $0x118] sm:$0x1]  ;;  %v430_v1 = vld [vmem:[%s5474_s12 + $0x1f0] sm:$0xff] }
 0x10d   : > { %v2000_v15 = vpack.c.b16 %v1971_v28, %v1957_v6  ;;  %v2280_v8 = vsel %vm10284_vm10, %v2279_v57, %v2278_v41  ;;  %v2286_v42 = vsel %vm1941_vm5, %v2285_v0, %v2284_v22  ;;  %v2291_v50 = vrot.slane %v6547_v12, 4  ;;  %v401_v57 = vld [vmem:[%s5474_s12 + $0x108] sm:$0x1]  ;;  %v404_v56 = vld [vmem:[%s5474_s12 + $0x120] sm:$0xff]  ;;  %v407_v28 = vld [vmem:[%s5474_s12 + $0x138] sm:$0x1]  ;;  %2683 = vrot.lane.b32.xlu2 %v6504_v17, %s5219_s26 }
 0x10e   : > { %v2288_v14 = vsel %vm1944_vm11, %v2287_v48, %v2286_v42  ;;  %v2293_v3 = vrot.slane %v6549_v21, 3  ;;  %v2295_v60 = vrot.slane %v6551_v37, 2  ;;  %v2282_v44 = vsel %vm10283_vm1, %v2281_v7, %v2280_v8  ;;  %v405_v55 = vld [vmem:[%s5474_s12 + $0x128] sm:$0x1]  ;;  %v406_v48 = vld [vmem:[%s5474_s12 + $0x130] sm:$0xff]  ;;  %v424_v37 = vld [vmem:[%s5474_s12 + $0x1c0] sm:$0xff] }
 0x10f   : > { %2140 = vmatmul.bf16.vlgmr.msra.gmra.mxu0 %v2000_v15  ;;  %2159 = vmatmul.bf16.vlgmr.msra.gmra.mxu1 %v2000_v15  ;;  %v2290_v6 = vsel %vm10288_vm7, %v2289_v49, %v2288_v14  ;;  %v10650_v7 = vld [vmem:[#allocation5_spill] sm:$0xff]  ;;  %v408_v49 = vld [vmem:[%s5474_s12 + $0x140] sm:$0xff]  ;;  %v410_v42 = vld [vmem:[%s5474_s12 + $0x150] sm:$0xff]  ;;  %v6650_v17 = vmul.f32 0.25, %v400_v51  ;;  %v6656_v27 = vmul.f32 0.25, %v407_v28 }
 0x110   : > { %2178 = vmatmul.bf16.vlgmr.msra.gmra.mxu2 %v2000_v15  ;;  %v2292_v31 = vsel %vm10285_vm8, %v2291_v50, %v2290_v6  ;;  %2601 = vmatpush.bf16.msra.mxu0 %v5400_v46  ;;  %v409_v41 = vld [vmem:[%s5474_s12 + $0x148] sm:$0x1]  ;;  %v411_v15 = vld [vmem:[%s5474_s12 + $0x158] sm:$0x1]  ;;  %v412_v50 = vld [vmem:[%s5474_s12 + $0x160] sm:$0xff]  ;;  %v6643_v6 = vmul.f32 0.25, %v403_v16 }
 0x111   : > { %v2294_v2 = vsel %vm10284_vm10, %v2293_v3, %v2292_v31  ;;  %2797 = vmatpush.bf16.msra.mxu1 %v5383_v40  ;;  %2816 = vmatpush.bf16.msra.mxu2 %v10650_v7  ;;  %v413_v8 = vld [vmem:[%s5474_s12 + $0x168] sm:$0x1]  ;;  %v414_v14 = vld [vmem:[%s5474_s12 + $0x170] sm:$0xff]  ;;  %v6641_v3 = vmul.f32 0.25, %v401_v57  ;;  %v6659_v57 = vmul.f32 0.25, %v406_v48  ;;  %v6661_v16 = vmul.f32 0.25, %v409_v41 }
 0x112   : > { %v2296_v0 = vsel %vm10283_vm1, %v2295_v60, %v2294_v2  ;;  %v6645_v60 = vmul.f32 0.25, %v405_v55  ;;  %v10652_v31 = vld [vmem:[#allocation9_spill] sm:$0xff]  ;;  %v415_v2 = vld [vmem:[%s5474_s12 + $0x178] sm:$0x1]  ;;  %v6663_v55 = vmul.f32 0.25, %v411_v15  ;;  %v6665_v45 = vmul.f32 0.25, %v413_v8 }
 0x113   : > { %v6633_v22 = vpack.c.b16 %v2296_v0, %v2282_v44  ;;  %v6652_v44 = vmul.f32 0.25, %v402_v59  ;;  %v6654_v0 = vmul.f32 0.25, %v404_v56  ;;  %v10654_v51 = vld [vmem:[#allocation8_spill] sm:$0xff]  ;;  %v6669_v59 = vmul.f32 0.25, %v408_v49  ;;  %v10659_v40 = vld [vmem:[#allocation13_spill] sm:$0xff] }
 0x114   : > { %2602 = vmatpush.bf16.msra.mxu0 %v10652_v31  ;;  %v6671_v56 = vmul.f32 0.25, %v410_v42  ;;  %v6673_v28 = vmul.f32 0.25, %v412_v50  ;;  %v6675_v35 = vmul.f32 0.25, %v414_v14  ;;  %v6677_v48 = vmul.f32 0.25, %v415_v2  ;;  %v10656_v2 = vld [vmem:[#allocation10_spill] sm:$0xff] }
 0x115   : > { %10651 = vst [vmem:[#allocation76_spill] sm:$0xff] %v6633_v22  ;;  %2337 = vmatmul.bf16.vlgmr.msra.gmra.mxu3 %v6633_v22  ;;  %2798 = vmatpush.bf16.msra.mxu1 %v10653_v54  ;;  %v625_v41 = vsel %vm496_vm0, %v6641_v3, -inf  ;;  %v633_v15 = vsel %vm496_vm0, %v6643_v6, -inf  ;;  %v641_v8 = vsel %vm496_vm0, %v6645_v60, -inf  ;;  %v649_v14 = vsel %vm496_vm0, %v6656_v27, -inf }
 0x116   : > { %2835 = vmatpush.bf16.msra.mxu3 %v5400_v46  ;;  %2817 = vmatpush.bf16.msra.mxu2 %v10654_v51  ;;  %v626_v49 = vmax.f32 %v6650_v17, %v625_v41  ;;  %v634_v42 = vmax.f32 %v6652_v44, %v633_v15  ;;  %v642_v50 = vmax.f32 %v6654_v0, %v641_v8  ;;  %v657_v47 = vsel %vm496_vm0, %v6661_v16, -inf  ;;  %v10657_v15 = vld [vmem:[#allocation11_spill] sm:$0xff]  ;;  %v420_v51 = vld [vmem:[%s5474_s12 + $0x1a0] sm:$0xff]  ;;  %v421_v22 = vld [vmem:[%s5474_s12 + $0x1a8] sm:$0x1] }
 0x117   : > { %v650_v26 = vmax.f32 %v6659_v57, %v649_v14  ;;  %v665_v19 = vsel %vm496_vm0, %v6663_v55, -inf  ;;  %v673_v41 = vsel %vm496_vm0, %v6665_v45, -inf  ;;  %v658_v14 = vmax.f32 %v6669_v59, %v657_v47  ;;  %v422_v47 = vld [vmem:[%s5474_s12 + $0x1b0] sm:$0xff] }
 0x118   : > { %2603 = vmatpush.bf16.msra.mxu0 %v10655_v4  ;;  %v627_v8 = vrot.slane %v626_v49, 4  ;;  %v635_v43 = vrot.slane %v634_v42, 4  ;;  %v643_v34 = vrot.slane %v642_v50, 4  ;;  %v666_v24 = vmax.f32 %v6671_v56, %v665_v19  ;;  %v423_v19 = vld [vmem:[%s5474_s12 + $0x1b8] sm:$0x1] }
 0x119   : > { %2799 = vmatpush.bf16.msra.mxu1 %v10656_v2  ;;  %v651_v58 = vrot.slane %v650_v26, 4  ;;  %v674_v9 = vmax.f32 %v6673_v28, %v673_v41  ;;  %v10658_v2 = vld [vmem:[#allocation15_spill] sm:$0xff]  ;;  %v659_v7 = vrot.slane %v658_v14, 4  ;;  %v426_v41 = vld [vmem:[%s5474_s12 + $0x1d0] sm:$0xff] }
 0x11a   : > { %2836 = vmatpush.bf16.msra.mxu3 %v10652_v31  ;;  %2818 = vmatpush.bf16.msra.mxu2 %v10657_v15  ;;  %v681_v15 = vsel %vm496_vm0, %v6677_v48, -inf  ;;  %v419_v31 = vld [vmem:[%s5474_s12 + $0x198] sm:$0x1]  ;;  %v628_v54 = vmax.f32 %v626_v49, %v627_v8  ;;  %v636_v46 = vmax.f32 %v634_v42, %v635_v43  ;;  %v644_v21 = vmax.f32 %v642_v50, %v643_v34  ;;  %v425_v43 = vld [vmem:[%s5474_s12 + $0x1c8] sm:$0x1] }
 0x11b   : > { %v652_v11 = vmax.f32 %v650_v26, %v651_v58  ;;  %v667_v12 = vrot.slane %v666_v24, 4  ;;  %v682_v63 = vmax.f32 %v6675_v35, %v681_v15  ;;  %v6722_v49 = vmul.f32 0.25, %v416_v53  ;;  %v427_v34 = vld [vmem:[%s5474_s12 + $0x1d8] sm:$0x1]  ;;  %v428_v58 = vld [vmem:[%s5474_s12 + $0x1e0] sm:$0xff] }
 0x11c   : > { %2604 = vmatpush.bf16.msra.mxu0 %v10658_v2  ;;  %v6724_v42 = vmul.f32 0.25, %v417_v32  ;;  %v6726_v8 = vmul.f32 0.25, %v418_v38  ;;  %v6730_v26 = vmul.f32 0.25, %v419_v31  ;;  %v629_v50 = vrot.slane %v628_v54, 2 }
 0x11d   : > { %2800 = vmatpush.bf16.msra.mxu1 %v10659_v40  ;;  %v675_v40 = vrot.slane %v674_v9, 4  ;;  %v637_v15 = vrot.slane %v636_v46, 2  ;;  %v660_v52 = vmax.f32 %v658_v14, %v659_v7  ;;  %v6736_v53 = vmul.f32 0.25, %v421_v22 }
 0x11e   : > { %2837 = vmatpush.bf16.msra.mxu3 %v10655_v4  ;;  %2819 = vmatpush.bf16.msra.mxu2 %v10660_v10  ;;  %v429_v10 = vld [vmem:[%s5474_s12 + $0x1e8] sm:$0x1]  ;;  %v6734_v4 = vmul.f32 0.25, %v420_v51  ;;  %v6738_v32 = vmul.f32 0.25, %v422_v47  ;;  %v6740_v38 = vmul.f32 0.25, %v423_v19  ;;  %v645_v31 = vrot.slane %v644_v21, 2 }
 0x11f   : > { %v653_v20 = vrot.slane %v652_v11, 2  ;;  %v6745_v33 = vmax.f32 %v666_v24, %v667_v12  ;;  %v683_v7 = vrot.slane %v682_v63, 4  ;;  %v6749_v51 = vmul.f32 0.25, %v424_v37  ;;  %s9786_s12 = scalar_lea.vmem [#allocation3], %s5359_s29 }
 0x120   : > { %2605 = vmatpush.bf16.msra.mxu0 %v5549_v30  ;;  %10661 = vst [vmem:[#allocation77_spill] sm:$0xff] %v6738_v32  ;;  %v6751_v22 = vmul.f32 0.25, %v425_v43  ;;  %v6753_v14 = vmul.f32 0.25, %v426_v41  ;;  %v6755_v47 = vmax.f32 %v674_v9, %v675_v40  ;;  %v6757_v19 = vmul.f32 0.25, %v427_v34  ;;  %v10670_v41 = vld [vmem:[#allocation28_spill] sm:$0xff] }
 0x121   : > { %10662 = vst [vmem:[#allocation78_spill] sm:$0xff] %v6740_v38  ;;  %2801 = vmatpush.bf16.msra.mxu1 %v5539_v25  ;;  %v6759_v25 = vmax.f32 %v628_v54, %v629_v50  ;;  %v6761_v39 = vmax.f32 %v636_v46, %v637_v15  ;;  %v661_v24 = vrot.slane %v660_v52, 2  ;;  %v6764_v12 = vmul.f32 0.25, %v428_v58  ;;  %v10671_v58 = vld [vmem:[#allocation36_spill] sm:$0xff] }
 0x122   : > { %2838 = vmatpush.bf16.msra.mxu3 %v10658_v2  ;;  %2820 = vmatpush.bf16.msra.mxu2 %v5547_v29  ;;  %10663 = vst [vmem:[#allocation79_spill] sm:$0xff] %v6749_v51  ;;  %v6766_v29 = vmul.f32 0.25, %v429_v10  ;;  %v6768_v37 = vmul.f32 0.25, %v430_v1  ;;  %v6770_v43 = vmul.f32 0.25, %v431_v23  ;;  %v6773_v40 = vmax.f32 %v644_v21, %v645_v31 }
 0x123   : > { %10664 = vst [vmem:[#allocation80_spill] sm:$0xff] %v6751_v22  ;;  %v6775_v9 = vmax.f32 %v652_v11, %v653_v20  ;;  %v669_v46 = vrot.slane %v6745_v33, 2  ;;  %v684_v54 = vmax.f32 %v682_v63, %v683_v7  ;;  %v677_v10 = vrot.slane %v6755_v47, 2 }
 0x124   : > { %10665 = vst [vmem:[#allocation81_spill] sm:$0xff] %v6753_v14  ;;  %2606 = vmatpush.bf16.msra.mxu0 %v5613_v62  ;;  %v689_v1 = vsel %vm496_vm0, %v6724_v42, -inf  ;;  %v697_v23 = vsel %vm496_vm0, %v6730_v26, -inf  ;;  %v705_v21 = vsel %vm496_vm0, %v6736_v53, -inf  ;;  %v6789_v63 = vmax.f32 %v660_v52, %v661_v24 }
 0x125   : > { %10666 = vst [vmem:[#allocation82_spill] sm:$0xff] %v6757_v19  ;;  %2802 = vmatpush.bf16.msra.mxu1 %v5585_v36  ;;  %v690_v34 = vmax.f32 %v6722_v49, %v689_v1  ;;  %v698_v50 = vmax.f32 %v6726_v8, %v697_v23  ;;  %v706_v15 = vmax.f32 %v6734_v4, %v705_v21  ;;  %v713_v31 = vsel %vm496_vm0, %v6740_v38, -inf  ;;  %v10673_v1 = vld [vmem:[#allocation35_spill] sm:$0xff] }
 0x126   : > { %10667 = vst [vmem:[#allocation83_spill] sm:$0xff] %v6764_v12  ;;  %2839 = vmatpush.bf16.msra.mxu3 %v5549_v30  ;;  %2821 = vmatpush.bf16.msra.mxu2 %v10670_v41  ;;  %v721_v7 = vsel %vm496_vm0, %v6751_v22, -inf  ;;  %v10672_v41 = vld [vmem:[#allocation31_spill] sm:$0xff]  ;;  %v685_v20 = vrot.slane %v684_v54, 2  ;;  %v714_v52 = vmax.f32 %v6738_v32, %v713_v31  ;;  %v729_v36 = vsel %vm496_vm0, %v6757_v19, -inf  ;;  %v10674_v31 = vld [vmem:[#allocation42_spill] sm:$0xff] }
 0x127   : > { %10668 = vst [vmem:[#allocation84_spill] sm:$0xff] %v6766_v29  ;;  %v691_v11 = vrot.slane %v690_v34, 4  ;;  %v722_v24 = vmax.f32 %v6749_v51, %v721_v7  ;;  %v699_v23 = vrot.slane %v698_v50, 4  ;;  %v707_v21 = vrot.slane %v706_v15, 4 }
 0x128   : > { %10669 = vst [vmem:[#allocation85_spill] sm:$0xff] %v6770_v43  ;;  %2607 = vmatpush.bf16.msra.mxu0 %v10671_v58  ;;  %v737_v30 = vsel %vm496_vm0, %v6766_v29, -inf  ;;  %v730_v5 = vmax.f32 %v6753_v14, %v729_v36 }
 0x129   : > { %2803 = vmatpush.bf16.msra.mxu1 %v10672_v41  ;;  %v692_v2 = vmax.f32 %v690_v34, %v691_v11  ;;  %v715_v41 = vrot.slane %v714_v52, 4  ;;  %v723_v13 = vrot.slane %v722_v24, 4  ;;  %v700_v7 = vmax.f32 %v698_v50, %v699_v23  ;;  %v10676_v11 = vld [vmem:[#allocation41_spill] sm:$0xff] }
 0x12a   : > { %2840 = vmatpush.bf16.msra.mxu3 %v5613_v62  ;;  %2822 = vmatpush.bf16.msra.mxu2 %v10673_v1  ;;  %v708_v18 = vmax.f32 %v706_v15, %v707_v21  ;;  %v738_v62 = vmax.f32 %v6764_v12, %v737_v30  ;;  %v745_v1 = vsel %vm496_vm0, %v6770_v43, -inf  ;;  %v731_v29 = vrot.slane %v730_v5, 4 }
 0x12b   : > { %v693_v19 = vrot.slane %v692_v2, 2  ;;  %v716_v22 = vmax.f32 %v714_v52, %v715_v41  ;;  %v724_v51 = vmax.f32 %v722_v24, %v723_v13  ;;  %v701_v36 = vrot.slane %v700_v7, 2 }
 0x12c   : > { %2608 = vmatpush.bf16.msra.mxu0 %v10674_v31  ;;  %v709_v34 = vrot.slane %v708_v18, 2  ;;  %v739_v14 = vrot.slane %v738_v62, 4  ;;  %v746_v50 = vmax.f32 %v6768_v37, %v745_v1  ;;  %v670_v30 = vmax.f32 %v6745_v33, %v669_v46 }
 0x12d   : > { %2804 = vmatpush.bf16.msra.mxu1 %v10675_v61  ;;  %v717_v15 = vrot.slane %v716_v22, 2  ;;  %v725_v23 = vrot.slane %v724_v51, 2  ;;  %v732_v21 = vmax.f32 %v730_v5, %v731_v29  ;;  %v678_v61 = vmax.f32 %v6755_v47, %v677_v10 }
 0x12e   : > { %2841 = vmatpush.bf16.msra.mxu3 %v10671_v58  ;;  %2823 = vmatpush.bf16.msra.mxu2 %v10676_v11  ;;  %v686_v43 = vmax.f32 %v684_v54, %v685_v20  ;;  %v740_v41 = vmax.f32 %v738_v62, %v739_v14  ;;  %v747_v13 = vrot.slane %v746_v50, 4  ;;  %v694_v52 = vmax.f32 %v692_v2, %v693_v19 }
 0x12f   : > { %v702_v24 = vmax.f32 %v700_v7, %v701_v36  ;;  %v710_v58 = vmax.f32 %v708_v18, %v709_v34  ;;  %v733_v12 = vrot.slane %v732_v21, 2  ;;  %v718_v11 = vmax.f32 %v716_v22, %v717_v15 }
 0x130   : > { %v726_v38 = vmax.f32 %v724_v51, %v725_v23  ;;  %v741_v32 = vrot.slane %v740_v41, 2  ;;  %v748_v1 = vmax.f32 %v746_v50, %v747_v13  ;;  %v647_v33 = vrot.slane %v6773_v40, 1 }
 0x131   : > { %v655_v46 = vrot.slane %v6775_v9, 1  ;;  %v663_v29 = vrot.slane %v6789_v63, 1  ;;  %v734_v5 = vmax.f32 %v732_v21, %v733_v12  ;;  %v671_v47 = vrot.slane %v670_v30, 1 }
 0x132   : > { %2842 = vmatpush.bf16.msra.mxu3 %v10674_v31  ;;  %v679_v62 = vrot.slane %v678_v61, 1  ;;  %v742_v14 = vmax.f32 %v740_v41, %v741_v32  ;;  %v749_v2 = vrot.slane %v748_v1, 2  ;;  %v687_v19 = vrot.slane %v686_v43, 1 }
 0x133   : > { %v695_v18 = vrot.slane %v694_v52, 1  ;;  %v703_v54 = vrot.slane %v702_v24, 1  ;;  %v711_v10 = vrot.slane %v710_v58, 1  ;;  %v10677_v22 = vrot.slane %v6759_v25, 1 }
 0x134   : > { %v719_v20 = vrot.slane %v718_v11, 1  ;;  %v727_v7 = vrot.slane %v726_v38, 1  ;;  %v750_v36 = vmax.f32 %v748_v1, %v749_v2  ;;  %v10678_v34 = vrot.slane %v6761_v39, 1 }
 0x135   : > { %v632_v51 = vmax.f32 %v6759_v25, %v10677_v22  ;;  %v648_v12 = vmax.f32 %v6773_v40, %v647_v33  ;;  %v656_v32 = vmax.f32 %v6775_v9, %v655_v46  ;;  %v735_v15 = vrot.slane %v734_v5, 1 }
 0x136   : > { %v640_v50 = vmax.f32 %v6761_v39, %v10678_v34  ;;  %v664_v23 = vmax.f32 %v6789_v63, %v663_v29  ;;  %v6832_v21 = vmax.f32 %v670_v30, %v671_v47  ;;  %v6834_v41 = vmax.f32 %v678_v61, %v679_v62  ;;  %v10679_v62 = vld [vmem:[#allocation77_spill] sm:$0xff]  ;;  %v10685_v34 = vld [vmem:[#allocation83_spill] sm:$0xff] }
 0x137   : > { %v743_v13 = vrot.slane %v742_v14, 1  ;;  %v6836_v25 = vmax.f32 %v686_v43, %v687_v19  ;;  %v6838_v22 = vmax.f32 %v694_v52, %v695_v18  ;;  %v6840_v1 = vmax.f32 %v702_v24, %v703_v54  ;;  %v10682_v54 = vld [vmem:[#allocation80_spill] sm:$0xff] }
 0x138   : > { %v6842_v2 = vmax.f32 %v710_v58, %v711_v10  ;;  %v6844_v39 = vmax.f32 %v718_v11, %v719_v20  ;;  %v6846_v40 = vmax.f32 %v726_v38, %v727_v7  ;;  %v751_v9 = vrot.slane %v750_v36, 1  ;;  %v10684_v20 = vld [vmem:[#allocation82_spill] sm:$0xff] }
 0x139   : > { %v785_v63 = vsub.f32 %v6650_v17, %v632_v51  ;;  %v6849_v30 = vmax.f32 %v734_v5, %v735_v15  ;;  %v786_v61 = vsub.f32 %v6641_v3, %v632_v51  ;;  %v787_v43 = vsub.f32 %v6652_v44, %v640_v50 }
 0x13a   : > { %v788_v52 = vsub.f32 %v6643_v6, %v640_v50  ;;  %v6854_v33 = vmax.f32 %v742_v14, %v743_v13  ;;  %v789_v58 = vsub.f32 %v6654_v0, %v648_v12  ;;  %v790_v11 = vsub.f32 %v6645_v60, %v648_v12  ;;  %v10680_v14 = vld [vmem:[#allocation78_spill] sm:$0xff]  ;;  %v10686_v12 = vld [vmem:[#allocation84_spill] sm:$0xff] }
 0x13b   : > { %v791_v38 = vsub.f32 %v6659_v57, %v656_v32  ;;  %v792_v24 = vsub.f32 %v6656_v27, %v656_v32  ;;  %v793_v17 = vsub.f32 %v6669_v59, %v664_v23  ;;  %v794_v46 = vsub.f32 %v6661_v16, %v664_v23 }
 0x13c   : > { %v795_v3 = vsub.f32 %v6671_v56, %v6832_v21  ;;  %v6864_v44 = vmax.f32 %v750_v36, %v751_v9  ;;  %v796_v6 = vsub.f32 %v6663_v55, %v6832_v21  ;;  %v797_v0 = vsub.f32 %v6673_v28, %v6834_v41 }
 0x13d   : > { %v798_v60 = vsub.f32 %v6665_v45, %v6834_v41  ;;  %v799_v27 = vsub.f32 %v6675_v35, %v6836_v25  ;;  %v881_v57 = vmul.f32 1.442695, %v785_v63  ;;  %v883_v59 = vmul.f32 1.442695, %v786_v61  ;;  %v10687_v41 = vld [vmem:[#allocation85_spill] sm:$0xff] }
 0x13e   : > { %v885_v16 = vmul.f32 1.442695, %v787_v43  ;;  %v800_v56 = vsub.f32 %v6677_v48, %v6836_v25  ;;  %v801_v29 = vsub.f32 %v6722_v49, %v6838_v22  ;;  %v802_v55 = vsub.f32 %v6724_v42, %v6838_v22 }
 0x13f   : > { %v887_v5 = vmul.f32 1.442695, %v788_v52  ;;  %v803_v28 = vsub.f32 %v6726_v8, %v6840_v1  ;;  %v804_v45 = vsub.f32 %v6730_v26, %v6840_v1  ;;  %5059 = vpow2.f32 %v881_v57  ;;  %v10681_v26 = vld [vmem:[#allocation79_spill] sm:$0xff] }
 0x140   : > { %v889_v35 = vmul.f32 1.442695, %v789_v58  ;;  %v805_v47 = vsub.f32 %v6734_v4, %v6842_v2  ;;  %v806_v48 = vsub.f32 %v6736_v53, %v6842_v2  ;;  %5061 = vpow2.f32 %v883_v59  ;;  %v10683_v53 = vld [vmem:[#allocation81_spill] sm:$0xff] }
 0x141   : > { %v891_v49 = vmul.f32 1.442695, %v790_v11  ;;  %v807_v42 = vsub.f32 %v10679_v62, %v6844_v39  ;;  %v808_v19 = vsub.f32 %v10680_v14, %v6844_v39  ;;  %5063 = vpow2.f32 %v885_v16 }
 0x142   : > { %v893_v8 = vmul.f32 1.442695, %v791_v38  ;;  %v809_v18 = vsub.f32 %v10681_v26, %v6846_v40  ;;  %v810_v10 = vsub.f32 %v10682_v54, %v6846_v40  ;;  %5065 = vpow2.f32 %v887_v5 }
 0x143   : > { %v895_v4 = vmul.f32 1.442695, %v792_v24  ;;  %v811_v51 = vsub.f32 %v10683_v53, %v6849_v30  ;;  %v812_v7 = vsub.f32 %v10684_v20, %v6849_v30  ;;  %5067 = vpow2.f32 %v889_v35 }
 0x144   : > { %v897_v36 = vmul.f32 1.442695, %v793_v17  ;;  %v813_v50 = vsub.f32 %v10685_v34, %v6854_v33  ;;  %v814_v32 = vsub.f32 %v10686_v12, %v6854_v33  ;;  %5069 = vpow2.f32 %v891_v49 }
 0x145   : > { %v899_v15 = vmul.f32 1.442695, %v794_v46  ;;  %v6904_v23 = vpop.eup %5059  ;;  %v815_v21 = vsub.f32 %v6768_v37, %v6864_v44  ;;  %v816_v13 = vsub.f32 %v10687_v41, %v6864_v44  ;;  %5071 = vpow2.f32 %v893_v8 }
 0x146   : > { %v901_v25 = vmul.f32 1.442695, %v795_v3  ;;  %v6910_v22 = vpop.eup %5061  ;;  %5073 = vpow2.f32 %v895_v4  ;;  %v903_v1 = vmul.f32 1.442695, %v796_v6  ;;  %v905_v2 = vmul.f32 1.442695, %v797_v0 }
 0x147   : > { %10688 = vst [vmem:[#allocation77_spill] sm:$0xff] %v6910_v22  ;;  %v907_v39 = vmul.f32 1.442695, %v798_v60  ;;  %v6912_v40 = vpop.eup %5063  ;;  %5075 = vpow2.f32 %v897_v36  ;;  %v909_v9 = vmul.f32 1.442695, %v799_v27  ;;  %v1073_v61 = vsel %vm496_vm0, %v6910_v22, 0.0 }
 0x148   : > { %v911_v63 = vmul.f32 1.442695, %v800_v56  ;;  %v6916_v43 = vpop.eup %5065  ;;  %5077 = vpow2.f32 %v899_v15  ;;  %v913_v52 = vmul.f32 1.442695, %v801_v29  ;;  %v915_v58 = vmul.f32 1.442695, %v802_v55 }
 0x149   : > { %10689 = vst [vmem:[#allocation78_spill] sm:$0xff] %v6916_v43  ;;  %v1074_v11 = vadd.f32 %v6904_v23, %v1073_v61  ;;  %v6919_v38 = vpop.eup %5067  ;;  %5079 = vpow2.f32 %v901_v25  ;;  %v917_v24 = vmul.f32 1.442695, %v803_v28  ;;  %v919_v17 = vmul.f32 1.442695, %v804_v45 }
 0x14a   : > { %v1081_v46 = vsel %vm496_vm0, %v6916_v43, 0.0  ;;  %v6923_v3 = vpop.eup %5069  ;;  %5081 = vpow2.f32 %v903_v1  ;;  %v921_v6 = vmul.f32 1.442695, %v805_v47  ;;  %v923_v57 = vmul.f32 1.442695, %v806_v48 }
 0x14b   : > { %10690 = vst [vmem:[#allocation79_spill] sm:$0xff] %v6923_v3  ;;  %v1075_v0 = vrot.slane %v1074_v11, 4  ;;  %v1082_v60 = vadd.f32 %v6912_v40, %v1081_v46  ;;  %v6926_v27 = vpop.eup %5071  ;;  %5083 = vpow2.f32 %v905_v2  ;;  %v925_v59 = vmul.f32 1.442695, %v807_v42 }
 0x14c   : > { %v1089_v16 = vsel %vm496_vm0, %v6923_v3, 0.0  ;;  %v6930_v56 = vpop.eup %5073  ;;  %5085 = vpow2.f32 %v907_v39  ;;  %v927_v45 = vmul.f32 1.442695, %v808_v19  ;;  %v929_v35 = vmul.f32 1.442695, %v809_v18 }
 0x14d   : > { %10691 = vst [vmem:[#allocation80_spill] sm:$0xff] %v6930_v56  ;;  %v1076_v29 = vadd.f32 %v1075_v0, %v1074_v11  ;;  %v1083_v55 = vrot.slane %v1082_v60, 4  ;;  %v1090_v5 = vadd.f32 %v6919_v38, %v1089_v16  ;;  %v6933_v28 = vpop.eup %5075  ;;  %5087 = vpow2.f32 %v909_v9 }
 0x14e   : > { %v1097_v47 = vsel %vm496_vm0, %v6930_v56, 0.0  ;;  %v6937_v48 = vpop.eup %5077  ;;  %5089 = vpow2.f32 %v911_v63  ;;  %v931_v8 = vmul.f32 1.442695, %v810_v10  ;;  %v933_v18 = vmul.f32 1.442695, %v811_v51  ;;  %v10827_v56 = vld [vmem:[#allocation70_spill] sm:$0xff] }
 0x14f   : > { %10692 = vst [vmem:[#allocation81_spill] sm:$0xff] %v6937_v48  ;;  %v1077_v49 = vrot.slane %v1076_v29, 2  ;;  %v1084_v62 = vadd.f32 %v1083_v55, %v1082_v60  ;;  %v1091_v42 = vrot.slane %v1090_v5, 4  ;;  %v6939_v14 = vpop.eup %5079  ;;  %5091 = vpow2.f32 %v913_v52 }
 0x150   : > { %v1098_v26 = vadd.f32 %v6926_v27, %v1097_v47  ;;  %v1105_v54 = vsel %vm496_vm0, %v6937_v48, 0.0  ;;  %v6944_v19 = vpop.eup %5081  ;;  %5093 = vpow2.f32 %v915_v58  ;;  %v935_v11 = vmul.f32 1.442695, %v812_v7 }
 0x151   : > { %10693 = vst [vmem:[#allocation82_spill] sm:$0xff] %v6944_v19  ;;  %v1085_v4 = vrot.slane %v1084_v62, 2  ;;  %v1092_v36 = vadd.f32 %v1091_v42, %v1090_v5  ;;  %v6949_v15 = vpop.eup %5083  ;;  %5095 = vpow2.f32 %v917_v24  ;;  %v1106_v10 = vadd.f32 %v6933_v28, %v1105_v54 }
 0x152   : > { %v1099_v25 = vrot.slane %v1098_v26, 4  ;;  %v1113_v1 = vsel %vm496_vm0, %v6944_v19, 0.0  ;;  %v6954_v2 = vpop.eup %5085  ;;  %5097 = vpow2.f32 %v919_v17  ;;  %v1078_v39 = vadd.f32 %v1077_v49, %v1076_v29 }
 0x153   : > { %10694 = vst [vmem:[#allocation83_spill] sm:$0xff] %v6954_v2  ;;  %v1086_v9 = vadd.f32 %v1085_v4, %v1084_v62  ;;  %v1093_v63 = vrot.slane %v1092_v36, 2  ;;  %v6956_v61 = vpop.eup %5087  ;;  %5099 = vpow2.f32 %v921_v6  ;;  %v1107_v51 = vrot.slane %v1106_v10, 4 }
 0x154   : > { %v1100_v53 = vadd.f32 %v1099_v25, %v1098_v26  ;;  %v1114_v52 = vadd.f32 %v6939_v14, %v1113_v1  ;;  %v6959_v58 = vpop.eup %5089  ;;  %5101 = vpow2.f32 %v923_v57  ;;  %v937_v24 = vmul.f32 1.442695, %v813_v50 }
 0x155   : > { %10695 = vst [vmem:[#allocation84_spill] sm:$0xff] %v6959_v58  ;;  %v1094_v17 = vadd.f32 %v1093_v63, %v1092_v36  ;;  %v6967_v46 = vpop.eup %5091  ;;  %5103 = vpow2.f32 %v925_v59  ;;  %v1108_v0 = vadd.f32 %v1107_v51, %v1106_v10  ;;  %v939_v57 = vmul.f32 1.442695, %v814_v32 }
 0x156   : > { %v1101_v6 = vrot.slane %v1100_v53, 2  ;;  %v1115_v60 = vrot.slane %v1114_v52, 4  ;;  %v6969_v16 = vpop.eup %5093  ;;  %5105 = vpow2.f32 %v927_v45  ;;  %v1079_v30 = vrot.slane %v1078_v39, 1 }
 0x157   : > { %10696 = vst [vmem:[#allocation85_spill] sm:$0xff] %v6969_v16  ;;  %v1121_v20 = vsel %vm496_vm0, %v6954_v2, 0.0  ;;  %v6976_v7 = vpop.eup %5095  ;;  %5107 = vpow2.f32 %v929_v35  ;;  %v1087_v34 = vrot.slane %v1086_v9, 1  ;;  %v1095_v50 = vrot.slane %v1094_v17, 1 }
 0x158   : > { %v1102_v59 = vadd.f32 %v1101_v6, %v1100_v53  ;;  %v6978_v29 = vpop.eup %5097  ;;  %5109 = vpow2.f32 %v931_v8  ;;  %v941_v55 = vmul.f32 1.442695, %v815_v21  ;;  %v1122_v33 = vadd.f32 %v6949_v15, %v1121_v20 }
 0x159   : > { %10697 = vst [vmem:[#allocation86_spill] sm:$0xff] %v6978_v29  ;;  %v1129_v12 = vsel %vm496_vm0, %v6959_v58, 0.0  ;;  %v6986_v32 = vpop.eup %5099  ;;  %5111 = vpow2.f32 %v933_v18  ;;  %v1109_v45 = vrot.slane %v1108_v0, 2  ;;  %v1116_v35 = vadd.f32 %v1115_v60, %v1114_v52 }
 0x15a   : > { %v1103_v5 = vrot.slane %v1102_v59, 1  ;;  %v6988_v47 = vpop.eup %5101  ;;  %5113 = vpow2.f32 %v935_v11  ;;  %v1123_v49 = vrot.slane %v1122_v33, 4  ;;  %v1130_v62 = vadd.f32 %v6956_v61, %v1129_v12 }
 0x15b   : > { %10698 = vst [vmem:[#allocation87_spill] sm:$0xff] %v6988_v47  ;;  %v1137_v37 = vsel %vm496_vm0, %v6969_v16, 0.0  ;;  %v6993_v21 = vpop.eup %5103  ;;  %v943_v42 = vmul.f32 1.442695, %v816_v13  ;;  %v6998_v8 = vadd.f32 %v1079_v30, %v1078_v39  ;;  %v7000_v26 = vadd.f32 %v1087_v34, %v1086_v9 }
 0x15c   : > { %v7002_v54 = vadd.f32 %v1095_v50, %v1094_v17  ;;  %v7004_v18 = vpop.eup %5105  ;;  %5115 = vpow2.f32 %v937_v24  ;;  %v1124_v4 = vadd.f32 %v1123_v49, %v1122_v33  ;;  %v1131_v36 = vrot.slane %v1130_v62, 4 }
 0x15d   : > { %10699 = vst [vmem:[#allocation88_spill] sm:$0xff] %v7004_v18  ;;  %v1138_v25 = vadd.f32 %v6967_v46, %v1137_v37  ;;  %v7007_v10 = vpop.eup %5107  ;;  %5117 = vpow2.f32 %v939_v57  ;;  %v1110_v1 = vadd.f32 %v1109_v45, %v1108_v0  ;;  %v1117_v63 = vrot.slane %v1116_v35, 2 }
 0x15e   : > { %v1145_v44 = vsel %vm496_vm0, %v6978_v29, 0.0  ;;  %v7011_v41 = vpop.eup %5109  ;;  %v7013_v13 = vadd.f32 %v1103_v5, %v1102_v59  ;;  %v1125_v39 = vrot.slane %v1124_v4, 2  ;;  %v1132_v9 = vadd.f32 %v1131_v36, %v1130_v62 }
 0x15f   : > { %10700 = vst [vmem:[#allocation89_spill] sm:$0xff] %v7011_v41  ;;  %v1139_v53 = vrot.slane %v1138_v25, 4  ;;  %v7015_v51 = vpop.eup %5111  ;;  %5119 = vpow2.f32 %v943_v42  ;;  %v1146_v52 = vadd.f32 %v6976_v7, %v1145_v44  ;;  %v1153_v11 = vsel %vm496_vm0, %v6988_v47, 0.0 }
 0x160   : > { %v1161_v24 = vsel %vm496_vm0, %v7004_v18, 0.0  ;;  %v7022_v17 = vpop.eup %5113  ;;  %5121 = vpow2.f32 %v941_v55  ;;  %v1133_v6 = vrot.slane %v1132_v9, 2  ;;  %v1154_v60 = vadd.f32 %v6986_v32, %v1153_v11 }
 0x161   : > { %10701 = vst [vmem:[#allocation90_spill] sm:$0xff] %v7022_v17  ;;  %v1140_v0 = vadd.f32 %v1139_v53, %v1138_v25  ;;  %v1147_v57 = vrot.slane %v1146_v52, 4  ;;  %v1162_v30 = vadd.f32 %v6993_v21, %v1161_v24  ;;  %v1169_v20 = vsel %vm496_vm0, %v7011_v41, 0.0 }
 0x162   : > { %v1177_v34 = vsel %vm496_vm0, %v7022_v17, 0.0  ;;  %v7030_v50 = vpop.eup %5115  ;;  %v1118_v59 = vadd.f32 %v1117_v63, %v1116_v35  ;;  %v1126_v33 = vadd.f32 %v1125_v39, %v1124_v4  ;;  %v1155_v5 = vrot.slane %v1154_v60, 4 }
 0x163   : > { %v1141_v12 = vrot.slane %v1140_v0, 2  ;;  %v7032_v55 = vpop.eup %5117  ;;  %v1148_v45 = vadd.f32 %v1147_v57, %v1146_v52  ;;  %v1163_v49 = vrot.slane %v1162_v30, 4  ;;  %v1170_v62 = vadd.f32 %v7007_v10, %v1169_v20 }
 0x164   : > { %10702 = vst [vmem:[#allocation91_spill] sm:$0xff] %v7032_v55  ;;  %v1178_v37 = vadd.f32 %v7015_v51, %v1177_v34  ;;  %v1111_v42 = vrot.slane %v1110_v1, 1  ;;  %v1134_v36 = vadd.f32 %v1133_v6, %v1132_v9  ;;  %v1156_v44 = vadd.f32 %v1155_v5, %v1154_v60 }
 0x165   : > { %v1142_v25 = vadd.f32 %v1141_v12, %v1140_v0  ;;  %v7036_v53 = vpop.eup %5119  ;;  %v1149_v11 = vrot.slane %v1148_v45, 2  ;;  %v1164_v24 = vadd.f32 %v1163_v49, %v1162_v30  ;;  %v1171_v35 = vrot.slane %v1170_v62, 4 }
 0x166   : > { %10703 = vst [vmem:[#allocation92_spill] sm:$0xff] %v7036_v53  ;;  %v1179_v4 = vrot.slane %v1178_v37, 4  ;;  %v7038_v63 = vpop.eup %5121  ;;  %v1119_v39 = vrot.slane %v1118_v59, 1  ;;  %v1127_v17 = vrot.slane %v1126_v33, 1  ;;  %v1157_v52 = vrot.slane %v1156_v44, 2 }
 0x167   : > { %v1185_v57 = vsel %vm496_vm0, %v7032_v55, 0.0  ;;  %v1150_v20 = vadd.f32 %v1149_v11, %v1148_v45  ;;  %v1165_v34 = vrot.slane %v1164_v24, 2  ;;  %v1172_v41 = vadd.f32 %v1171_v35, %v1170_v62 }
 0x168   : > { %v1180_v9 = vadd.f32 %v1179_v4, %v1178_v37  ;;  %v1135_v6 = vrot.slane %v1134_v36, 1  ;;  %v1158_v0 = vadd.f32 %v1157_v52, %v1156_v44  ;;  %v1186_v60 = vadd.f32 %v7030_v50, %v1185_v57 }
 0x169   : > { %v1193_v30 = vsel %vm496_vm0, %v7036_v53, 0.0  ;;  %v1143_v12 = vrot.slane %v1142_v25, 1  ;;  %v1166_v5 = vadd.f32 %v1165_v34, %v1164_v24  ;;  %v1173_v49 = vrot.slane %v1172_v41, 2 }
 0x16a   : > { %v1181_v18 = vrot.slane %v1180_v9, 2  ;;  %v7045_v47 = vadd.f32 %v1111_v42, %v1110_v1  ;;  %v1187_v29 = vrot.slane %v1186_v60, 4  ;;  %v1194_v55 = vadd.f32 %v7038_v63, %v1193_v30 }
 0x16b   : > { %5123 = vrcp.f32 %v6998_v8  ;;  %v1151_v45 = vrot.slane %v1150_v20, 1  ;;  %v1159_v62 = vrot.slane %v1158_v0, 1  ;;  %v1174_v37 = vadd.f32 %v1173_v49, %v1172_v41 }
 0x16c   : > { %v1182_v44 = vadd.f32 %v1181_v18, %v1180_v9  ;;  %v7049_v11 = vadd.f32 %v1119_v39, %v1118_v59  ;;  %v7051_v35 = vadd.f32 %v1127_v17, %v1126_v33  ;;  %v1188_v4 = vadd.f32 %v1187_v29, %v1186_v60 }
 0x16d   : > { %v1195_v52 = vrot.slane %v1194_v55, 4  ;;  %v7053_v24 = vadd.f32 %v1135_v6, %v1134_v36  ;;  %v7055_v57 = vadd.f32 %v1143_v12, %v1142_v25  ;;  %v1167_v1 = vrot.slane %v1166_v5, 1 }
 0x16e   : > { %v1175_v42 = vrot.slane %v1174_v37, 1  ;;  %v1183_v34 = vrot.slane %v1182_v44, 1  ;;  %v1189_v30 = vrot.slane %v1188_v4, 2  ;;  %5125 = vrcp.f32 %v7000_v26 }
 0x16f   : > { %v1196_v53 = vadd.f32 %v1195_v52, %v1194_v55  ;;  %v7058_v16 = vadd.f32 %v1151_v45, %v1150_v20  ;;  %v7060_v18 = vadd.f32 %v1159_v62, %v1158_v0  ;;  %vm1430_vm0 = vweird.f32 %v6998_v8 }
 0x170   : > { %v1434_v29 = vand.u32 2147483647, %v6998_v8  ;;  %v1190_v17 = vadd.f32 %v1189_v30, %v1188_v4  ;;  %v1436_v33 = vand.u32 2147483648, %v6998_v8  ;;  %v1448_v36 = vand.u32 2147483647, %v7000_v26 }
 0x171   : > { %v5124_v41 = vpop.eup %5123  ;;  %v1197_v59 = vrot.slane %v1196_v53, 2  ;;  %v7066_v25 = vadd.f32 %v1167_v1, %v1166_v5  ;;  %v7068_v55 = vadd.f32 %v1175_v42, %v1174_v37  ;;  %5127 = vrcp.f32 %v7002_v54 }
 0x172   : > { %v1426_v39 = vmul.f32 %v5124_v41, %v6998_v8  ;;  %v7072_v20 = vadd.f32 %v1183_v34, %v1182_v44  ;;  %v1191_v9 = vrot.slane %v1190_v17, 1  ;;  %v1450_v0 = vand.u32 2147483648, %v7000_v26 }
 0x173   : > { %v1198_v6 = vadd.f32 %v1197_v59, %v1196_v53  ;;  %vm1431_vm9 = vweird.f32 %v5124_v41  ;;  %vm7075_vm12 = vcmp.eq.f32.partialorder %v1434_v29, 8.507059e+37  ;;  %vm1444_vm13 = vweird.f32 %v7000_v26 }
 0x174   : > { %v1427_v60 = vsub.f32 1.0, %v1426_v39  ;;  %v5126_v5 = vpop.eup %5125  ;;  %v1437_v49 = vor.u32 1.1754944e-38, %v1436_v33  ;;  %vm7080_vm14 = vcmp.eq.f32.partialorder %v1448_v36, 8.507059e+37  ;;  %v1462_v62 = vand.u32 2147483647, %v7002_v54  ;;  %vm7092_vm15 = vmor %vm1430_vm0, %vm1431_vm9 }
 0x175   : > { %5129 = vrcp.f32 %v7013_v13  ;;  %v1199_v53 = vrot.slane %v1198_v6, 1  ;;  %v1440_v44 = vmul.f32 %v5126_v5, %v7000_v26  ;;  %v1464_v4 = vand.u32 2147483648, %v7002_v54 }
 0x176   : > { %v1428_v37 = vmul.f32 %v5124_v41, %v1427_v60  ;;  %v7088_v52 = vadd.f32 %v1191_v9, %v1190_v17  ;;  %vm1445_vm2 = vweird.f32 %v5126_v5  ;;  %v1451_v42 = vor.u32 1.1754944e-38, %v1450_v0 }
 0x177   : > { %vm1458_vm4 = vweird.f32 %v7002_v54  ;;  %v5128_v34 = vpop.eup %5127  ;;  %v1441_v29 = vsub.f32 1.0, %v1440_v44  ;;  %v1476_v59 = vand.u32 2147483647, %v7013_v13  ;;  %5131 = vrcp.f32 %v7045_v47  ;;  %vm7113_vm9 = vmor %vm1444_vm13, %vm1445_vm2 }
 0x178   : > { %v1429_v30 = vadd.f32 %v5124_v41, %v1428_v37  ;;  %v1454_v17 = vmul.f32 %v5128_v34, %v7002_v54  ;;  %vm7100_vm3 = vcmp.eq.f32.partialorder %v1462_v62, 8.507059e+37  ;;  %vm1472_vm0 = vweird.f32 %v7013_v13 }
 0x179   : > { %v1478_v8 = vand.u32 2147483648, %v7013_v13  ;;  %v7106_v36 = vadd.f32 %v1199_v53, %v1198_v6  ;;  %v1442_v9 = vmul.f32 %v5126_v5, %v1441_v29  ;;  %v1465_v0 = vor.u32 1.1754944e-38, %v1464_v4 }
 0x17a   : > { %v1433_v39 = vsel %vm7092_vm15, %v5124_v41, %v1429_v30  ;;  %v1455_v37 = vsub.f32 1.0, %v1454_v17  ;;  %vm1459_vm1 = vweird.f32 %v5128_v34  ;;  %vm1486_vm10 = vweird.f32 %v7045_v47 }
 0x17b   : > { %v5130_v60 = vpop.eup %5129  ;;  %5133 = vrcp.f32 %v7049_v11  ;;  %v1443_v6 = vadd.f32 %v5126_v5, %v1442_v9  ;;  %vm7120_vm15 = vcmp.eq.f32.partialorder %v1476_v59, 8.507059e+37  ;;  %v1490_v44 = vand.u32 2147483647, %v7045_v47  ;;  %vm7137_vm2 = vmor %vm1458_vm4, %vm1459_vm1 }
 0x17c   : > { %v1468_v53 = vmul.f32 %v5130_v60, %v7013_v13  ;;  %v1492_v26 = vand.u32 2147483648, %v7045_v47  ;;  %v7128_v4 = vsel %vm7075_vm12, %v1437_v49, %v1433_v39  ;;  %v1456_v1 = vmul.f32 %v5128_v34, %v1455_v37 }
 0x17d   : > { %10716 = vst [vmem:[#allocation93_spill] sm:$0xff] %v7128_v4  ;;  %v1479_v30 = vor.u32 1.1754944e-38, %v1478_v8  ;;  %vm1500_vm13 = vweird.f32 %v7049_v11  ;;  %v7131_v29 = vpop.eup %5131  ;;  %v1447_v59 = vsel %vm7113_vm9, %v5126_v5, %v1443_v6  ;;  %vm1473_vm8 = vweird.f32 %v5130_v60 }
 0x17e   : > { %v1469_v9 = vsub.f32 1.0, %v1468_v53  ;;  %5135 = vrcp.f32 %v7051_v35  ;;  %v1457_v12 = vadd.f32 %v5128_v34, %v1456_v1  ;;  %v1482_v49 = vmul.f32 %v7131_v29, %v7045_v47  ;;  %vm7159_vm4 = vmor %vm1472_vm0, %vm1473_vm8 }
 0x17f   : > { %v1504_v8 = vand.u32 2147483647, %v7049_v11  ;;  %v1506_v39 = vand.u32 2147483648, %v7049_v11  ;;  %v7148_v5 = vsel %vm7080_vm14, %v1451_v42, %v1447_v59  ;;  %vm7150_vm1 = vcmp.eq.f32.partialorder %v1490_v44, 8.507059e+37 }
 0x180   : > { %10719 = vst [vmem:[#allocation94_spill] sm:$0xff] %v7148_v5  ;;  %v1470_v54 = vmul.f32 %v5130_v60, %v1469_v9  ;;  %v1493_v37 = vor.u32 1.1754944e-38, %v1492_v26  ;;  %vm1514_vm12 = vweird.f32 %v7051_v35  ;;  %v1461_v53 = vsel %vm7137_vm2, %v5128_v34, %v1457_v12 }
 0x181   : > { %v5134_v6 = vpop.eup %5133  ;;  %v1483_v45 = vsub.f32 1.0, %v1482_v49  ;;  %v1518_v42 = vand.u32 2147483647, %v7051_v35  ;;  %5137 = vrcp.f32 %v7053_v24  ;;  %vm1487_vm14 = vweird.f32 %v7131_v29 }
 0x182   : > { %v1471_v44 = vadd.f32 %v5130_v60, %v1470_v54  ;;  %v1496_v26 = vmul.f32 %v5134_v6, %v7049_v11  ;;  %v1520_v59 = vand.u32 2147483648, %v7051_v35  ;;  %v7170_v34 = vsel %vm7100_vm3, %v1465_v0, %v1461_v53  ;;  %vm7183_vm3 = vmor %vm1486_vm10, %vm1487_vm14 }
 0x183   : > { %10724 = vst [vmem:[#allocation95_spill] sm:$0xff] %v7170_v34  ;;  %v1484_v13 = vmul.f32 %v7131_v29, %v1483_v45  ;;  %vm7173_vm8 = vcmp.eq.f32.partialorder %v1504_v8, 8.507059e+37  ;;  %v1507_v9 = vor.u32 1.1754944e-38, %v1506_v39  ;;  %vm1501_vm0 = vweird.f32 %v5134_v6 }
 0x184   : > { %v5136_v12 = vpop.eup %5135  ;;  %v1475_v49 = vsel %vm7159_vm4, %v5130_v60, %v1471_v44  ;;  %v1497_v54 = vsub.f32 1.0, %v1496_v26  ;;  %v1532_v58 = vand.u32 2147483647, %v7053_v24  ;;  %vm7188_vm9 = vcmp.eq.f32.partialorder %v1518_v42, 8.507059e+37  ;;  %vm7201_vm10 = vmor %vm1500_vm13, %vm1501_vm0 }
 0x185   : > { %v1485_v2 = vadd.f32 %v7131_v29, %v1484_v13  ;;  %v1510_v0 = vmul.f32 %v5136_v12, %v7051_v35  ;;  %v1534_v60 = vand.u32 2147483648, %v7053_v24  ;;  %v1521_v53 = vor.u32 1.1754944e-38, %v1520_v59 }
 0x186   : > { %v1498_v39 = vmul.f32 %v5134_v6, %v1497_v54  ;;  %vm1528_vm2 = vweird.f32 %v7053_v24  ;;  %5139 = vrcp.f32 %v7055_v57  ;;  %v7197_v47 = vsel %vm7120_vm15, %v1479_v30, %v1475_v49 }
 0x187   : > { %v5138_v1 = vpop.eup %5137  ;;  %10731 = vst [vmem:[#allocation96_spill] sm:$0xff] %v7197_v47  ;;  %v1511_v42 = vsub.f32 1.0, %v1510_v0  ;;  %vm1515_vm4 = vweird.f32 %v5136_v12  ;;  %vm7205_vm14 = vcmp.eq.f32.partialorder %v1532_v58, 8.507059e+37  ;;  %v1489_v26 = vsel %vm7183_vm3, %v7131_v29, %v1485_v2 }
 0x188   : > { %v1499_v59 = vadd.f32 %v5134_v6, %v1498_v39  ;;  %v1524_v41 = vmul.f32 %v5138_v1, %v7053_v24  ;;  %v1546_v30 = vand.u32 2147483647, %v7055_v57  ;;  %v1535_v13 = vor.u32 1.1754944e-38, %v1534_v60  ;;  %vm7220_vm15 = vmor %vm1514_vm12, %vm1515_vm4 }
 0x189   : > { %v1512_v11 = vmul.f32 %v5136_v12, %v1511_v42  ;;  %v1548_v49 = vand.u32 2147483648, %v7055_v57  ;;  %5141 = vrcp.f32 %v7058_v16  ;;  %vm1529_vm13 = vweird.f32 %v5138_v1 }
 0x18a   : > { %v1503_v58 = vsel %vm7201_vm10, %v5134_v6, %v1499_v59  ;;  %v1525_v2 = vsub.f32 1.0, %v1524_v41  ;;  %v1560_v29 = vand.u32 2147483647, %v7058_v16  ;;  %v7227_v33 = vsel %vm7150_vm1, %v1493_v37, %v1489_v26  ;;  %vm7245_vm1 = vmor %vm1528_vm2, %vm1529_vm13 }
 0x18b   : > { %10738 = vst [vmem:[#allocation97_spill] sm:$0xff] %v7227_v33  ;;  %v1513_v0 = vadd.f32 %v5136_v12, %v1512_v11  ;;  %vm1542_vm0 = vweird.f32 %v7055_v57  ;;  %v1562_v60 = vand.u32 2147483648, %v7058_v16  ;;  %vm7231_vm3 = vcmp.eq.f32.partialorder %v1546_v30, 8.507059e+37 }
 0x18c   : > { %v5140_v6 = vpop.eup %5139  ;;  %v1526_v39 = vmul.f32 %v5138_v1, %v1525_v2  ;;  %vm1556_vm12 = vweird.f32 %v7058_v16  ;;  %5143 = vrcp.f32 %v7060_v18  ;;  %v7239_v62 = vsel %vm7173_vm8, %v1507_v9, %v1503_v58 }
 0x18d   : > { %10741 = vst [vmem:[#allocation98_spill] sm:$0xff] %v7239_v62  ;;  %v1517_v37 = vsel %vm7220_vm15, %v5136_v12, %v1513_v0  ;;  %v1538_v42 = vmul.f32 %v5140_v6, %v7055_v57  ;;  %v1549_v26 = vor.u32 1.1754944e-38, %v1548_v49  ;;  %vm1543_vm10 = vweird.f32 %v5140_v6 }
 0x18e   : > { %v1527_v59 = vadd.f32 %v5138_v1, %v1526_v39  ;;  %vm7250_vm4 = vcmp.eq.f32.partialorder %v1560_v29, 8.507059e+37  ;;  %vm1570_vm8 = vweird.f32 %v7060_v18  ;;  %v1574_v17 = vand.u32 2147483647, %v7060_v18 }
 0x18f   : > { %v5142_v9 = vpop.eup %5141  ;;  %v1539_v12 = vsub.f32 1.0, %v1538_v42  ;;  %v1563_v24 = vor.u32 1.1754944e-38, %v1562_v60  ;;  %v1576_v30 = vand.u32 2147483648, %v7060_v18  ;;  %5145 = vrcp.f32 %v7066_v25 }
 0x190   : > { %v7260_v11 = vsel %vm7188_vm9, %v1521_v53, %v1517_v37  ;;  %v1531_v49 = vsel %vm7245_vm1, %v5138_v1, %v1527_v59  ;;  %v1552_v58 = vmul.f32 %v5142_v9, %v7058_v16  ;;  %vm1584_vm2 = vweird.f32 %v7066_v25  ;;  %vm7278_vm9 = vmor %vm1542_vm0, %vm1543_vm10 }
 0x191   : > { %10746 = vst [vmem:[#allocation99_spill] sm:$0xff] %v7260_v11  ;;  %v1540_v54 = vmul.f32 %v5140_v6, %v1539_v12  ;;  %vm1557_vm15 = vweird.f32 %v5142_v9  ;;  %vm7266_vm13 = vcmp.eq.f32.partialorder %v1574_v17, 8.507059e+37  ;;  %v1588_v29 = vand.u32 2147483647, %v7066_v25 }
 0x192   : > { %v5144_v0 = vpop.eup %5143  ;;  %v7273_v8 = vsel %vm7205_vm14, %v1535_v13, %v1531_v49  ;;  %v1553_v1 = vsub.f32 1.0, %v1552_v58  ;;  %v1590_v60 = vand.u32 2147483648, %v7066_v25  ;;  %5147 = vrcp.f32 %v7068_v55  ;;  %vm7294_vm0 = vmor %vm1556_vm12, %vm1557_vm15 }
 0x193   : > { %10749 = vst [vmem:[#allocation100_spill] sm:$0xff] %v7273_v8  ;;  %v1541_v39 = vadd.f32 %v5140_v6, %v1540_v54  ;;  %v1566_v37 = vmul.f32 %v5144_v0, %v7060_v18  ;;  %v1577_v45 = vor.u32 1.1754944e-38, %v1576_v30  ;;  %v1602_v44 = vand.u32 2147483647, %v7068_v55 }
 0x194   : > { %v1554_v13 = vmul.f32 %v5142_v9, %v1553_v1  ;;  %vm1598_vm14 = vweird.f32 %v7068_v55  ;;  %v1604_v57 = vand.u32 2147483648, %v7068_v55  ;;  %5149 = vrcp.f32 %v7072_v20 }
 0x195   : > { %v5146_v42 = vpop.eup %5145  ;;  %v1545_v59 = vsel %vm7278_vm9, %v5140_v6, %v1541_v39  ;;  %v1567_v12 = vsub.f32 1.0, %v1566_v37  ;;  %vm1571_vm1 = vweird.f32 %v5144_v0  ;;  %vm7298_vm10 = vcmp.eq.f32.partialorder %v1588_v29, 8.507059e+37 }
 0x196   : > { %v1591_v49 = vor.u32 1.1754944e-38, %v1590_v60  ;;  %v7304_v58 = vsel %vm7231_vm3, %v1549_v26, %v1545_v59  ;;  %v1555_v54 = vadd.f32 %v5142_v9, %v1554_v13  ;;  %v1580_v6 = vmul.f32 %v5146_v42, %v7066_v25  ;;  %vm7318_vm3 = vmor %vm1570_vm8, %vm1571_vm1  ;;  %v7449_v25 = vld [vmem:[%s5366_s4 + $0x60] sm:$0xff] }
 0x197   : > { %10756 = vst [vmem:[#allocation101_spill] sm:$0xff] %v7304_v58  ;;  %vm1612_vm9 = vweird.f32 %v7072_v20  ;;  %v1568_v16 = vmul.f32 %v5144_v0, %v1567_v12  ;;  %vm1585_vm12 = vweird.f32 %v5146_v42  ;;  %vm7308_vm15 = vcmp.eq.f32.partialorder %v1602_v44, 8.507059e+37  ;;  %2871 = vrot.lane.b32.xlu0 %v7449_v25, %s5217_s5 }
 0x198   : > { %v1616_v29 = vand.u32 2147483647, %v7072_v20  ;;  %v1618_v1 = vand.u32 2147483648, %v7072_v20  ;;  %v5148_v60 = vpop.eup %5147  ;;  %v1559_v35 = vsel %vm7294_vm0, %v5142_v9, %v1555_v54  ;;  %v1581_v39 = vsub.f32 1.0, %v1580_v6 }
 0x199   : > { %v1605_v37 = vor.u32 1.1754944e-38, %v1604_v57  ;;  %5151 = vrcp.f32 %v7088_v52  ;;  %v7325_v44 = vsel %vm7250_vm4, %v1563_v24, %v1559_v35  ;;  %v1569_v13 = vadd.f32 %v5144_v0, %v1568_v16  ;;  %vm7339_vm4 = vmor %vm1584_vm2, %vm1585_vm12 }
 0x19a   : > { %10761 = vst [vmem:[#allocation102_spill] sm:$0xff] %v7325_v44  ;;  %v1594_v59 = vmul.f32 %v5148_v60, %v7068_v55  ;;  %vm1626_vm7 = vweird.f32 %v7088_v52  ;;  %v5150_v9 = vpop.eup %5149  ;;  %v1582_v17 = vmul.f32 %v5146_v42, %v1581_v39  ;;  %vm1599_vm0 = vweird.f32 %v5148_v60 }
 0x19b   : > { %vm7329_vm8 = vcmp.eq.f32.partialorder %v1616_v29, 8.507059e+37  ;;  %v1630_v57 = vand.u32 2147483647, %v7088_v52  ;;  %v1573_v12 = vsel %vm7318_vm3, %v5144_v0, %v1569_v13  ;;  %v1608_v54 = vmul.f32 %v5150_v9, %v7072_v20  ;;  %vm7359_vm2 = vmor %vm1598_vm14, %vm1599_vm0 }
 0x19c   : > { %v1595_v24 = vsub.f32 1.0, %v1594_v59  ;;  %v1619_v6 = vor.u32 1.1754944e-38, %v1618_v1  ;;  %v7346_v16 = vsel %vm7266_vm13, %v1577_v45, %v1573_v12  ;;  %v1583_v29 = vadd.f32 %v5146_v42, %v1582_v17 }
 0x19d   : > { %10766 = vst [vmem:[#allocation103_spill] sm:$0xff] %v7346_v16  ;;  %vm1613_vm1 = vweird.f32 %v5150_v9  ;;  %v1632_v35 = vand.u32 2147483648, %v7088_v52  ;;  %v1609_v26 = vsub.f32 1.0, %v1608_v54  ;;  %vm7349_vm3 = vcmp.eq.f32.partialorder %v1630_v57, 8.507059e+37 }
 0x19e   : > { %v1596_v0 = vmul.f32 %v5148_v60, %v1595_v24  ;;  %5153 = vrcp.f32 %v7106_v36  ;;  %v1587_v1 = vsel %vm7339_vm4, %v5146_v42, %v1583_v29  ;;  %vm1640_vm13 = vweird.f32 %v7106_v36  ;;  %vm7374_vm14 = vmor %vm1612_vm9, %vm1613_vm1 }
 0x19f   : > { %v5152_v39 = vpop.eup %5151  ;;  %v1644_v45 = vand.u32 2147483647, %v7106_v36  ;;  %v1646_v13 = vand.u32 2147483648, %v7106_v36  ;;  %v1610_v17 = vmul.f32 %v5150_v9, %v1609_v26  ;;  %v1633_v12 = vor.u32 1.1754944e-38, %v1632_v35 }
 0x1a0   : > { %v1597_v59 = vadd.f32 %v5148_v60, %v1596_v0  ;;  %v1622_v57 = vmul.f32 %v5152_v39, %v7088_v52  ;;  %v7369_v42 = vsel %vm7298_vm10, %v1591_v49, %v1587_v1  ;;  %vm1627_vm12 = vweird.f32 %v5152_v39 }
 0x1a1   : > { %10771 = vst [vmem:[#allocation104_spill] sm:$0xff] %v7369_v42  ;;  %v1647_v41 = vor.u32 1.1754944e-38, %v1646_v13  ;;  %v1681_v24 = vmul.f32 %v6904_v23, %v7128_v4  ;;  %v1611_v29 = vadd.f32 %v5150_v9, %v1610_v17  ;;  %v1683_v30 = vmul.f32 %v6912_v40, %v7148_v5  ;;  %vm7411_vm9 = vmor %vm1626_vm7, %vm1627_vm12 }
 0x1a2   : > { %v1601_v54 = vsel %vm7359_vm2, %v5148_v60, %v1597_v59  ;;  %v1623_v35 = vsub.f32 1.0, %v1622_v57  ;;  %vm7388_vm10 = vcmp.eq.f32.partialorder %v1644_v45, 8.507059e+37  ;;  %v1685_v0 = vmul.f32 %v6919_v38, %v7170_v34 }
 0x1a3   : > { %v7386_v20 = vsel %vm7308_vm15, %v1605_v37, %v1601_v54  ;;  %v1687_v23 = vmul.f32 %v6926_v27, %v7197_v47  ;;  %v1689_v60 = vmul.f32 %v6933_v28, %v7227_v33  ;;  %v1615_v40 = vsel %vm7374_vm14, %v5150_v9, %v1611_v29  ;;  %v7446_v54 = vld [vmem:[%s5366_s4 + $0x68] sm:$0xff] }
 0x1a4   : > { %10774 = vst [vmem:[#allocation105_spill] sm:$0xff] %v7386_v20  ;;  %v5154_v26 = vpop.eup %5153  ;;  %v1624_v53 = vmul.f32 %v5152_v39, %v1623_v35  ;;  %v1691_v37 = vmul.f32 %v6939_v14, %v7239_v62  ;;  %v1693_v1 = vmul.f32 %v6949_v15, %v7260_v11  ;;  %v7406_v38 = vsel %vm7329_vm8, %v1619_v6, %v1615_v40 }
 0x1a5   : > { %10777 = vst [vmem:[#allocation106_spill] sm:$0xff] %v7406_v38  ;;  %v1636_v28 = vmul.f32 %v5154_v26, %v7106_v36  ;;  %vm1641_vm15 = vweird.f32 %v5154_v26  ;;  %v1695_v14 = vmul.f32 %v6956_v61, %v7273_v8  ;;  %v1697_v15 = vmul.f32 %v6967_v46, %v7304_v58  ;;  %2873 = vrot.lane.b32.xlu1 %v7446_v54, %s5217_s5  ;;  %v10819_v58 = vld [vmem:[#allocation71_spill] sm:$0xff]  ;;  %v7585_v8 = vpop.permute.xlu0 %2201 }
 0x1a6   : > { %v1625_v9 = vadd.f32 %v5152_v39, %v1624_v53  ;;  %v1699_v18 = vmul.f32 %v6976_v7, %v7325_v44  ;;  %v1701_v52 = vmul.f32 %v6986_v32, %v7346_v16  ;;  %v1703_v2 = vmul.f32 %v6993_v21, %v7369_v42  ;;  %vm7439_vm7 = vmor %vm1640_vm13, %vm1641_vm15  ;;  %v10818_v16 = vld [vmem:[#allocation69_spill] sm:$0xff] }
 0x1a7   : > { %v1637_v6 = vsub.f32 1.0, %v1636_v28  ;;  %v1705_v45 = vmul.f32 %v7007_v10, %v7386_v20  ;;  %v1707_v61 = vmul.f32 %v7015_v51, %v7406_v38  ;;  %v1745_v13 = vpack.c.bf16 %v1681_v24, %v1681_v24  ;;  %v7571_v38 = vpop.permute.xlu2 %2217 }
 0x1a8   : > { %v1629_v46 = vsel %vm7411_vm9, %v5152_v39, %v1625_v9  ;;  %v1747_v7 = vpack.c.bf16 %v1683_v30, %v1683_v30  ;;  %v1749_v59 = vpack.c.bf16 %v1685_v0, %v1685_v0  ;;  %v1751_v21 = vpack.c.bf16 %v1687_v23, %v1687_v23 }
 0x1a9   : > { %v7434_v32 = vsel %vm7349_vm3, %v1633_v12, %v1629_v46  ;;  %v1638_v17 = vmul.f32 %v5154_v26, %v1637_v6  ;;  %v1753_v57 = vpack.c.bf16 %v1689_v60, %v1689_v60  ;;  %v1755_v39 = vpack.c.bf16 %v1691_v37, %v1691_v37 }
 0x1aa   : > { %10780 = vst [vmem:[#allocation107_spill] sm:$0xff] %v7434_v32  ;;  %v1709_v51 = vmul.f32 %v7030_v50, %v7434_v32  ;;  %v1757_v55 = vpack.c.bf16 %v1693_v1, %v1693_v1  ;;  %v1759_v24 = vpack.c.bf16 %v1695_v14, %v1695_v14  ;;  %v1761_v29 = vpack.c.bf16 %v1697_v15, %v1697_v15 }
 0x1ab   : > { %v1639_v12 = vadd.f32 %v5154_v26, %v1638_v17  ;;  %v1763_v35 = vpack.c.bf16 %v1699_v18, %v1699_v18  ;;  %v1765_v30 = vpack.c.bf16 %v1701_v52, %v1701_v52  ;;  %v1767_v36 = vpack.c.bf16 %v1703_v2, %v1703_v2 }
 0x1ac   : > { %v1769_v0 = vpack.c.bf16 %v1705_v45, %v1705_v45  ;;  %v1771_v23 = vpack.c.bf16 %v1707_v61, %v1707_v61  ;;  %v1773_v60 = vpack.c.bf16 %v1709_v51, %v1709_v51  ;;  %v1857_v40 = vunpack.c.l.b16 %v1745_v13 }
 0x1ad   : > { %v1643_v50 = vsel %vm7439_vm7, %v5154_v26, %v1639_v12  ;;  %v1858_v53 = vunpack.c.l.b16 %v1747_v7  ;;  %v1859_v37 = vunpack.c.l.b16 %v1749_v59  ;;  %v1860_v27 = vunpack.c.l.b16 %v1751_v21  ;;  %2891 = vrot.lane.b32.xlu1 %v7449_v25, %s5218_s6 }
 0x1ae   : > { %v7459_v1 = vsel %vm7388_vm10, %v1647_v41, %v1643_v50  ;;  %v1861_v28 = vunpack.c.l.b16 %v1753_v57  ;;  %v1862_v14 = vunpack.c.l.b16 %v1755_v39  ;;  %v1863_v15 = vunpack.c.l.b16 %v1757_v55 }
 0x1af   : > { %10783 = vst [vmem:[#allocation108_spill] sm:$0xff] %v7459_v1  ;;  %v1711_v9 = vmul.f32 %v7038_v63, %v7459_v1  ;;  %v1864_v18 = vunpack.c.l.b16 %v1759_v24  ;;  %v1865_v52 = vunpack.c.l.b16 %v1761_v29  ;;  %v1866_v6 = vunpack.c.l.b16 %v1763_v35  ;;  %v10811_v1 = vld [vmem:[#allocation65_spill] sm:$0xff] }
 0x1b0   : > { %v1867_v2 = vunpack.c.l.b16 %v1765_v30  ;;  %v1868_v45 = vunpack.c.l.b16 %v1767_v36  ;;  %v1869_v26 = vunpack.c.l.b16 %v1769_v0  ;;  %v1870_v46 = vunpack.c.l.b16 %v1771_v23 }
 0x1b1   : > { %v1775_v61 = vpack.c.bf16 %v1711_v9, %v1711_v9  ;;  %v1871_v13 = vunpack.c.l.b16 %v1773_v60  ;;  %v7463_v7 = vunpack.i.l.s16 %v1857_v40  ;;  %v7465_v41 = vunpack.i.l.s16 %v1858_v53 }
 0x1b2   : > { %v7467_v49 = vunpack.i.l.s16 %v1859_v37  ;;  %v7469_v59 = vunpack.i.l.s16 %v1860_v27  ;;  %v7471_v17 = vunpack.i.l.s16 %v1861_v28  ;;  %v7473_v21 = vunpack.i.l.s16 %v1862_v14 }
 0x1b3   : > { %10784 = vst [vmem:[#allocation109_spill] sm:$0xff] %v7465_v41  ;;  %v1872_v63 = vunpack.c.l.b16 %v1775_v61  ;;  %v7475_v57 = vunpack.i.l.s16 %v1863_v15  ;;  %v7477_v10 = vunpack.i.l.s16 %v1864_v18  ;;  %v7481_v51 = vunpack.i.l.s16 %v1865_v52 }
 0x1b4   : > { %10785 = vst [vmem:[#allocation110_spill] sm:$0xff] %v7469_v59  ;;  %v7483_v39 = vunpack.i.l.s16 %v1866_v6  ;;  %v7485_v55 = vunpack.i.l.s16 %v1867_v2  ;;  %v7487_v24 = vunpack.i.l.s16 %v1868_v45  ;;  %v7489_v12 = vunpack.i.l.s16 %v1869_v26 }
 0x1b5   : > { %10786 = vst [vmem:[#allocation111_spill] sm:$0xff] %v7471_v17  ;;  %v7491_v29 = vunpack.i.l.s16 %v1870_v46  ;;  %v7493_v35 = vunpack.i.l.s16 %v1871_v13  ;;  %v7495_v30 = vunpack.i.l.s16 %v1872_v63  ;;  %v1972_v36 = vrot.slane %v7465_v41, 7  ;;  %v7520_v46 = vld [vmem:[%s5366_s4 + $0x78] sm:$0xff] }
 0x1b6   : > { %10787 = vst [vmem:[#allocation112_spill] sm:$0xff] %v7475_v57  ;;  %v1974_v0 = vrot.slane %v7467_v49, 6  ;;  %v1976_v23 = vrot.slane %v7469_v59, 5  ;;  %v1978_v60 = vrot.slane %v7471_v17, 4  ;;  %v1980_v50 = vrot.slane %v7473_v21, 3  ;;  %2877 = vrot.lane.b32.xlu0 %v7520_v46, %s5217_s5  ;;  %2897 = vrot.lane.b32.xlu1 %v7520_v46, %s5218_s6 }
 0x1b7   : > { %10788 = vst [vmem:[#allocation113_spill] sm:$0xff] %v7477_v10  ;;  %v1982_v40 = vrot.slane %v7475_v57, 2  ;;  %v1984_v53 = vrot.slane %v7477_v10, 1  ;;  %v1986_v37 = vrot.slane %v7483_v39, 7  ;;  %v1973_v27 = vsel %vm1938_vm6, %v1972_v36, %v7463_v7 }
 0x1b8   : > { %10789 = vst [vmem:[#allocation114_spill] sm:$0xff] %v7481_v51  ;;  %v1988_v28 = vrot.slane %v7485_v55, 6  ;;  %v1990_v14 = vrot.slane %v7487_v24, 5  ;;  %v1992_v9 = vrot.slane %v7489_v12, 4  ;;  %v1975_v15 = vsel %vm1941_vm5, %v1974_v0, %v1973_v27 }
 0x1b9   : > { %10790 = vst [vmem:[#allocation115_spill] sm:$0xff] %v7483_v39  ;;  %v1987_v18 = vsel %vm1938_vm6, %v1986_v37, %v7481_v51  ;;  %v1994_v52 = vrot.slane %v7491_v29, 3  ;;  %v1996_v6 = vrot.slane %v7493_v35, 2  ;;  %v1977_v2 = vsel %vm1944_vm11, %v1976_v23, %v1975_v15  ;;  %v4809_v23 = vld [vmem:[%s5366_s4 + $0x70] sm:$0xff] }
 0x1ba   : > { %10791 = vst [vmem:[#allocation116_spill] sm:$0xff] %v7489_v12  ;;  %v1989_v45 = vsel %vm1941_vm5, %v1988_v28, %v1987_v18  ;;  %v1998_v26 = vrot.slane %v7495_v30, 1  ;;  %v2297_v61 = vrot.slane %v7463_v7, 1  ;;  %vm10793_vm0 = vcmask 1044484   ;;  %2875 = vrot.lane.b32.xlu2 %v4809_v23, %s5217_s5 }
 0x1bb   : > { %10792 = vst [vmem:[#allocation117_spill] sm:$0xff] %v7493_v35  ;;  %v1979_v13 = vsel %vm10793_vm0, %v1978_v60, %v1977_v2  ;;  %v1991_v63 = vsel %vm1944_vm11, %v1990_v14, %v1989_v45  ;;  %v2299_v36 = vrot.slane %v7467_v49, 7  ;;  %v2301_v0 = vrot.slane %v7469_v59, 6  ;;  %vm10795_vm4 = vmmov %vm10793_vm0 }
 0x1bc   : > { %vm10794_vm8 = vcmask 1045509   ;;  %v1993_v27 = vsel %vm10795_vm4, %v1992_v9, %v1991_v63  ;;  %v2298_v60 = vsel %vm1938_vm6, %v7465_v41, %v2297_v61  ;;  %v2303_v28 = vrot.slane %v7471_v17, 5  ;;  %vm10801_vm12 = vmmov %vm10793_vm0 }
 0x1bd   : > { %v1981_v37 = vsel %vm10794_vm8, %v1980_v50, %v1979_v13  ;;  %vm10796_vm1 = vcmask 1046534   ;;  %vm10797_vm3 = vmmov %vm10794_vm8  ;;  %v2300_v18 = vsel %vm1941_vm5, %v2299_v36, %v2298_v60  ;;  %v2305_v2 = vrot.slane %v7473_v21, 4 }
 0x1be   : > { %v1983_v14 = vsel %vm10796_vm1, %v1982_v40, %v1981_v37  ;;  %v1995_v15 = vsel %vm10797_vm3, %v1994_v52, %v1993_v27  ;;  %vm10798_vm2 = vcmask 1047559   ;;  %vm10799_vm13 = vmmov %vm10796_vm1  ;;  %v2302_v9 = vsel %vm1944_vm11, %v2301_v0, %v2300_v18  ;;  %v7560_v18 = vpop.permute.xlu1 %2205  ;;  %2895 = vrot.lane.b32.xlu0 %v4809_v23, %s5218_s6  ;;  %2915 = vrot.lane.b32.xlu1 %v4809_v23, %s5219_s26 }
 0x1bf   : > { %v1985_v45 = vsel %vm10798_vm2, %v1984_v53, %v1983_v14  ;;  %v1997_v50 = vsel %vm10799_vm13, %v1996_v6, %v1995_v15  ;;  %v2307_v61 = vrot.slane %v7475_v57, 3  ;;  %vm10800_vm14 = vmmov %vm10798_vm2  ;;  %v2304_v63 = vsel %vm10801_vm12, %v2303_v28, %v2302_v9  ;;  %10804 = vst [vmem:[#allocation118_spill] sm:$0xff] %v7560_v18  ;;  %v10806_v9 = vld [vmem:[#allocation61_spill] sm:$0xff] }
 0x1c0   : > { %v1999_v13 = vsel %vm10800_vm14, %v1998_v26, %v1997_v50  ;;  %v2309_v40 = vrot.slane %v7477_v10, 2  ;;  %v2311_v52 = vrot.slane %v7481_v51, 1  ;;  %vm10802_vm10 = vmmov %vm10797_vm3  ;;  %v2313_v27 = vrot.slane %v7485_v55, 7  ;;  %10820 = vst [vmem:[#allocation61_spill] sm:$0xff] %v7585_v8  ;;  %v10852_v18 = vld [vmem:[#allocation9_spill] sm:$0xff]  ;;  %v10864_v8 = vld [vmem:[#allocation15_spill] sm:$0xff] }
 0x1c1   : > { %v2001_v37 = vpack.c.b16 %v1999_v13, %v1985_v45  ;;  %v2306_v36 = vsel %vm10802_vm10, %v2305_v2, %v2304_v63  ;;  %v2315_v53 = vrot.slane %v7487_v24, 6  ;;  %vm10803_vm9 = vmmov %vm10796_vm1  ;;  %v2317_v26 = vrot.slane %v7489_v12, 5  ;;  %v10805_v45 = vld [vmem:[#allocation60_spill] sm:$0xff]  ;;  %v10807_v13 = vld [vmem:[#allocation63_spill] sm:$0xff] }
 0x1c2   : > { %v2308_v6 = vsel %vm10803_vm9, %v2307_v61, %v2306_v36  ;;  %v2312_v0 = vsel %vm1938_vm6, %v7483_v39, %v2311_v52  ;;  %v2319_v60 = vrot.slane %v7491_v29, 4  ;;  %v2321_v14 = vrot.slane %v7493_v35, 3  ;;  %vm10808_vm15 = vmmov %vm10798_vm2  ;;  %10812 = vst [vmem:[#allocation60_spill] sm:$0xff] %v7571_v38  ;;  %2893 = vrot.lane.b32.xlu2 %v7446_v54, %s5218_s6 }
 0x1c3   : > { %2145 = vmatmul.bf16.gmra.mxu0 %v2001_v37  ;;  %2164 = vmatmul.bf16.gmra.mxu1 %v2001_v37  ;;  %v2314_v28 = vsel %vm1941_vm5, %v2313_v27, %v2312_v0  ;;  %v2323_v15 = vrot.slane %v7495_v30, 2  ;;  %v2503_v50 = vrot.slane %v10805_v45, 2  ;;  %v2504_v61 = vrot.slane %v10806_v9, 1  ;;  %vm10809_vm7 = vmmov %vm10793_vm0  ;;  %v10810_v27 = vld [vmem:[#allocation64_spill] sm:$0xff] }
 0x1c4   : > { %2183 = vmatmul.bf16.gmra.mxu2 %v2001_v37  ;;  %v2316_v2 = vsel %vm1944_vm11, %v2315_v53, %v2314_v28  ;;  %v2507_v63 = vrot.slane %v10807_v13, 7  ;;  %v2310_v52 = vsel %vm10808_vm15, %v2309_v40, %v2308_v6  ;;  %v2509_v0 = vrot.slane %v10810_v27, 6  ;;  %vm10813_vm0 = vmmov %vm10797_vm3  ;;  %v10814_v28 = vld [vmem:[#allocation66_spill] sm:$0xff]  ;;  %v10815_v40 = vld [vmem:[#allocation68_spill] sm:$0xff] }
 0x1c5   : > { %v2318_v36 = vsel %vm10809_vm7, %v2317_v26, %v2316_v2  ;;  %v2511_v32 = vrot.slane %v10811_v1, 5  ;;  %v2505_v53 = vsel %vm1938_vm6, %v2504_v61, %v2503_v50  ;;  %v2513_v20 = vrot.slane %v10814_v28, 4  ;;  %vm10816_vm8 = vmmov %vm10796_vm1  ;;  %v10817_v2 = vld [vmem:[#allocation62_spill] sm:$0xff]  ;;  %v10822_v50 = vld [vmem:[#allocation67_spill] sm:$0xff] }
 0x1c6   : > { %v2320_v37 = vsel %vm10813_vm0, %v2319_v60, %v2318_v36  ;;  %v2517_v6 = vrot.slane %v10815_v40, 2  ;;  %v2506_v42 = vsel %vm1941_vm5, %v10817_v2, %v2505_v53  ;;  %v2518_v44 = vrot.slane %v10818_v16, 1  ;;  %vm10821_vm4 = vmmov %vm10798_vm2  ;;  %v10823_v36 = vld [vmem:[#allocation72_spill] sm:$0xff]  ;;  %v10825_v53 = vld [vmem:[#allocation73_spill] sm:$0xff]  ;;  %2913 = vrot.lane.b32.xlu0 %v7446_v54, %s5219_s26 }
 0x1c7   : > { %v2322_v26 = vsel %vm10816_vm8, %v2321_v14, %v2320_v37  ;;  %v2521_v23 = vrot.slane %v10819_v58, 7  ;;  %v2508_v60 = vsel %vm1944_vm11, %v2507_v63, %v2506_v42  ;;  %v2515_v61 = vrot.slane %v10822_v50, 3  ;;  %vm10824_vm1 = vmmov %vm10809_vm7 }
 0x1c8   : > { %v2324_v11 = vsel %vm10821_vm4, %v2323_v15, %v2322_v26  ;;  %v2523_v19 = vrot.slane %v10823_v36, 6  ;;  %v2510_v14 = vsel %vm10824_vm1, %v2509_v0, %v2508_v60  ;;  %v2519_v37 = vsel %vm1938_vm6, %v2518_v44, %v2517_v6  ;;  %vm10826_vm3 = vmmov %vm10813_vm0  ;;  %v10828_v26 = vld [vmem:[#allocation74_spill] sm:$0xff]  ;;  %v10830_v0 = vld [vmem:[#allocation75_spill] sm:$0xff] }
 0x1c9   : > { %v7591_v62 = vpack.c.b16 %v2324_v11, %v2310_v52  ;;  %v2525_v48 = vrot.slane %v10825_v53, 5  ;;  %v2512_v33 = vsel %vm10826_vm3, %v2511_v32, %v2510_v14  ;;  %v2520_v15 = vsel %vm1941_vm5, %v10827_v56, %v2519_v37  ;;  %vm10829_vm2 = vmmov %vm10816_vm8  ;;  %v7607_v6 = vld [vmem:[%s5366_s4 + $0x88] sm:$0xff] }
 0x1ca   : > { %v2527_v42 = vrot.slane %v10828_v26, 4  ;;  %v2531_v63 = vrot.slane %v7463_v7, 2  ;;  %v2514_v11 = vsel %vm10829_vm2, %v2513_v20, %v2512_v33  ;;  %v2522_v52 = vsel %vm1944_vm11, %v2521_v23, %v2520_v15  ;;  %vm10831_vm13 = vmmov %vm10824_vm1  ;;  %v7616_v20 = vpop.permute.xlu1 %2207  ;;  %3107 = vrot.lane.b32.xlu1 %v7607_v6, %s5217_s5  ;;  %2911 = vrot.lane.b32.xlu2 %v7449_v25, %s5219_s26 }
 0x1cb   : > { %2342 = vmatmul.bf16.gmra.mxu3 %v7591_v62  ;;  %v2529_v60 = vrot.slane %v10830_v0, 3  ;;  %v2532_v44 = vrot.slane %v7465_v41, 1  ;;  %v2524_v32 = vsel %vm10831_vm13, %v2523_v19, %v2522_v52  ;;  %vm10832_vm14 = vmmov %vm10821_vm4  ;;  %v2535_v33 = vrot.slane %v7469_v59, 7  ;;  %10834 = vst [vmem:[#allocation63_spill] sm:$0xff] %v7616_v20 }
 0x1cc   : > { %v2516_v14 = vsel %vm10832_vm14, %v2515_v61, %v2514_v11  ;;  %vm10833_vm12 = vmmov %vm10813_vm0  ;;  %v2546_v23 = vrot.slane %v7483_v39, 1  ;;  %v2549_v15 = vrot.slane %v7487_v24, 7  ;;  %v2537_v52 = vrot.slane %v7471_v17, 6 }
 0x1cd   : > { %v2526_v37 = vsel %vm10833_vm12, %v2525_v48, %v2524_v32  ;;  %v2533_v47 = vsel %vm1938_vm6, %v2532_v44, %v2531_v63  ;;  %vm10835_vm10 = vmmov %vm10829_vm2  ;;  %v2545_v48 = vrot.slane %v7481_v51, 2  ;;  %v7629_v63 = vpop.permute.xlu2 %2219  ;;  %v7639_v32 = vpop.permute.xlu0 %2203  ;;  %v2555_v3 = vrot.slane %v7493_v35, 4 }
 0x1ce   : > { %v2528_v19 = vsel %vm10835_vm10, %v2527_v42, %v2526_v37  ;;  %v2534_v54 = vsel %vm1941_vm5, %v7467_v49, %v2533_v47  ;;  %vm10836_vm9 = vmmov %vm10821_vm4  ;;  %10837 = vst [vmem:[#allocation64_spill] sm:$0xff] %v7629_v63  ;;  %v2551_v42 = vrot.slane %v7489_v12, 6  ;;  %v2740_v43 = vrot.slane %v10817_v2, 1 }
 0x1cf   : > { %v2530_v61 = vsel %vm10836_vm9, %v2529_v60, %v2528_v19  ;;  %v2547_v25 = vsel %vm1938_vm6, %v2546_v23, %v2545_v48  ;;  %v2536_v47 = vsel %vm1944_vm11, %v2535_v33, %v2534_v54  ;;  %10838 = vst [vmem:[#allocation65_spill] sm:$0xff] %v7639_v32  ;;  %v7642_v60 = vld [vmem:[%s5366_s4 + $0x80] sm:$0xff]  ;;  %v2553_v48 = vrot.slane %v7491_v29, 5  ;;  %vm10840_vm15 = vmmov %vm10824_vm1  ;;  %v7688_v32 = vld [vmem:[%s5366_s4 + $0x98] sm:$0xff] }
 0x1d0   : > { %v7631_v11 = vpack.c.b16 %v2530_v61, %v2516_v14  ;;  %v2548_v44 = vsel %vm1941_vm5, %v7485_v55, %v2547_v25  ;;  %v10839_v19 = vld [vmem:[#allocation76_spill] sm:$0xff]  ;;  %v2539_v14 = vrot.slane %v7473_v21, 5  ;;  %v2538_v33 = vsel %vm10840_vm15, %v2537_v52, %v2536_v47  ;;  %vm10841_vm7 = vmmov %vm10824_vm1  ;;  %3105 = vrot.lane.b32.xlu0 %v7642_v60, %s5217_s5 }
 0x1d1   : > { %v2550_v37 = vsel %vm1944_vm11, %v2549_v15, %v2548_v44  ;;  %v2737_v23 = vrot.slane %v10805_v45, 3  ;;  %v2738_v61 = vrot.slane %v10806_v9, 2  ;;  %v2751_v15 = vrot.slane %v10815_v40, 3  ;;  %v10842_v25 = vld [vmem:[#allocation4_spill] sm:$0xff]  ;;  %v10843_v44 = vld [vmem:[#allocation5_spill] sm:$0xff]  ;;  %vm10845_vm8 = vmmov %vm10813_vm0 }
 0x1d2   : > { %v2552_v54 = vsel %vm10841_vm7, %v2551_v42, %v2550_v37  ;;  %v2752_v52 = vrot.slane %v10818_v16, 2  ;;  %v10844_v42 = vld [vmem:[#allocation6_spill] sm:$0xff]  ;;  %3125 = vrot.lane.b32.xlu1 %v7642_v60, %s5218_s6  ;;  %v2540_v47 = vsel %vm10813_vm0, %v2539_v14, %v2538_v33  ;;  %v7667_v34 = vpop.permute.xlu1 %2223  ;;  %2917 = vrot.lane.b32.xlu2 %v7520_v46, %s5219_s26  ;;  %v2754_v5 = vrot.slane %v10827_v56, 1  ;;  %v10848_v33 = vld [vmem:[#allocation7_spill] sm:$0xff]  ;;  %vm10850_vm4 = vmmov %vm10829_vm2 }
 0x1d3   : > { %2356 = vmatmul.bf16.vlgmr.msrb.gmra.mxu0 %v10839_v19  ;;  %2375 = vmatmul.bf16.vlgmr.msrb.gmra.mxu1 %v10839_v19  ;;  %v2541_v19 = vrot.slane %v7475_v57, 4  ;;  %v2554_v37 = vsel %vm10845_vm8, %v2553_v48, %v2552_v54  ;;  %10846 = vst [vmem:[#allocation68_spill] sm:$0xff] %v7667_v34  ;;  %v2543_v22 = vrot.slane %v7477_v10, 3  ;;  %v2557_v4 = vrot.slane %v7495_v30, 3  ;;  %v10849_v54 = vld [vmem:[#allocation8_spill] sm:$0xff]  ;;  %vm10851_vm1 = vmmov %vm10829_vm2 }
 0x1d4   : > { %2571 = vmatmul.bf16.vlgmr.msrb.gmra.mxu2 %v7631_v11  ;;  %3031 = vmatpush.bf16.msrb.mxu0 %v10842_v25  ;;  %v2739_v14 = vsel %vm1938_vm6, %v2738_v61, %v2737_v23  ;;  %v2753_v48 = vsel %vm1938_vm6, %v2752_v52, %v2751_v15  ;;  %v2556_v34 = vsel %vm10851_vm1, %v2555_v3, %v2554_v37  ;;  %vm10854_vm3 = vmmov %vm10836_vm9  ;;  %v10857_v52 = vld [vmem:[#allocation11_spill] sm:$0xff]  ;;  %v2757_v37 = vrot.slane %v10823_v36, 7 }
 0x1d5   : > { %3050 = vmatpush.bf16.msrb.mxu1 %v10843_v44  ;;  %3069 = vmatpush.bf16.msrb.mxu2 %v10844_v42  ;;  %v7675_v20 = vpop.permute.xlu2 %2233  ;;  %v2542_v46 = vsel %vm10850_vm4, %v2541_v19, %v2540_v47  ;;  %v7685_v63 = vpop.permute.xlu0 %2221  ;;  %v2741_v23 = vsel %vm1941_vm5, %v2740_v43, %v2739_v14  ;;  %v2755_v61 = vsel %vm1941_vm5, %v2754_v5, %v2753_v48  ;;  %vm10855_vm2 = vmmov %vm10854_vm3  ;;  %v10856_v19 = vld [vmem:[#allocation10_spill] sm:$0xff]  ;;  %v2743_v47 = vrot.slane %v10810_v27, 7  ;;  %v10858_v43 = vld [vmem:[#allocation12_spill] sm:$0xff] }
 0x1d6   : > { %10847 = vst [vmem:[#allocation71_spill] sm:$0xff] %v7675_v20  ;;  %v2544_v3 = vsel %vm10854_vm3, %v2543_v22, %v2542_v46  ;;  %v2558_v15 = vsel %vm10855_vm2, %v2557_v4, %v2556_v34  ;;  %v4813_v5 = vld [vmem:[%s5366_s4 + $0x90] sm:$0xff]  ;;  %v2742_v14 = vsel %vm1944_vm11, %v10807_v13, %v2741_v23  ;;  %v2756_v22 = vsel %vm1944_vm11, %v10819_v58, %v2755_v61  ;;  %v10860_v48 = vld [vmem:[#allocation13_spill] sm:$0xff]  ;;  %vm10862_vm13 = vmmov %vm10841_vm7 }
 0x1d7   : > { %10853 = vst [vmem:[#allocation72_spill] sm:$0xff] %v7685_v63  ;;  %v7710_v4 = vpack.c.b16 %v2558_v15, %v2544_v3  ;;  %v10861_v46 = vld [vmem:[#allocation14_spill] sm:$0xff]  ;;  %v2744_v63 = vsel %vm10862_vm13, %v2743_v47, %v2742_v14  ;;  %v2745_v38 = vrot.slane %v10811_v1, 6  ;;  %vm10863_vm14 = vmmov %vm10841_vm7  ;;  %v2759_v61 = vrot.slane %v10825_v53, 6 }
 0x1d8   : > { %3032 = vmatpush.bf16.msrb.mxu0 %v10848_v33  ;;  %3111 = vrot.lane.b32.xlu0 %v7688_v32, %s5217_s5  ;;  %v2758_v23 = vsel %vm10863_vm14, %v2757_v37, %v2756_v22  ;;  %v2765_v15 = vrot.slane %v7463_v7, 3  ;;  %v2779_v47 = vrot.slane %v7481_v51, 3  ;;  %v2780_v14 = vrot.slane %v7483_v39, 2  ;;  %vm10868_vm12 = vmmov %vm10813_vm0  ;;  %v10870_v51 = vld [vmem:[#allocation17_spill] sm:$0xff] }
 0x1d9   : > { %3051 = vmatpush.bf16.msrb.mxu1 %v10849_v54  ;;  %3070 = vmatpush.bf16.msrb.mxu2 %v10852_v18  ;;  %v2747_v37 = vrot.slane %v10814_v28, 5  ;;  %v2761_v22 = vrot.slane %v10828_v26, 5  ;;  %vm10869_vm10 = vmmov %vm10813_vm0  ;;  %v2782_v39 = vrot.slane %v7485_v55, 1 }
 0x1da   : > { %3131 = vrot.lane.b32.xlu1 %v7688_v32, %s5218_s6  ;;  %3109 = vrot.lane.b32.xlu2 %v4813_v5, %s5217_s5  ;;  %v7713_v34 = vpop.permute.xlu1 %2237  ;;  %vm10872_vm9 = vmmov %vm10851_vm1 }
 0x1db   : > { %2590 = vmatmul.bf16.vlgmr.msrb.gmra.mxu3 %v7631_v11  ;;  %10859 = vst [vmem:[#allocation73_spill] sm:$0xff] %v7713_v34  ;;  %v2766_v34 = vrot.slane %v7465_v41, 2  ;;  %v10871_v41 = vld [vmem:[#allocation18_spill] sm:$0xff]  ;;  %vm10873_vm15 = vmmov %vm10851_vm1 }
 0x1dc   : > { %3265 = vmatpush.bf16.msrb.mxu3 %v10842_v25  ;;  %3033 = vmatpush.bf16.msrb.mxu0 %v10856_v19  ;;  %vm10878_vm7 = vmmov %vm10855_vm2 }
 0x1dd   : > { %3052 = vmatpush.bf16.msrb.mxu1 %v10857_v52  ;;  %3071 = vmatpush.bf16.msrb.mxu2 %v10858_v43  ;;  %v7724_v3 = vpop.permute.xlu2 %2239  ;;  %v7734_v20 = vpop.permute.xlu0 %2235  ;;  %v2767_v26 = vsel %vm1938_vm6, %v2766_v34, %v2765_v15  ;;  %v10875_v15 = vld [vmem:[#allocation28_spill] sm:$0xff]  ;;  %vm10879_vm0 = vmmov %vm10855_vm2 }
 0x1de   : > { %10865 = vst [vmem:[#allocation70_spill] sm:$0xff] %v7724_v3  ;;  %v2746_v3 = vsel %vm10868_vm12, %v2745_v38, %v2744_v63  ;;  %v2749_v38 = vrot.slane %v10822_v50, 4  ;;  %v2763_v63 = vrot.slane %v10830_v0, 4  ;;  %vm10885_vm8 = vmmov %vm10862_vm13 }
 0x1df   : > { %10866 = vst [vmem:[#allocation75_spill] sm:$0xff] %v7734_v20  ;;  %v2781_v20 = vsel %vm1938_vm6, %v2780_v14, %v2779_v47  ;;  %v10876_v47 = vld [vmem:[#allocation29_spill] sm:$0xff]  ;;  %vm10886_vm4 = vmmov %vm10885_vm8 }
 0x1e0   : > { %3266 = vmatpush.bf16.msrb.mxu3 %v10848_v33  ;;  %3034 = vmatpush.bf16.msrb.mxu0 %v10860_v48  ;;  %vm10889_vm1 = vmmov %vm10869_vm10 }
 0x1e1   : > { %3053 = vmatpush.bf16.msrb.mxu1 %v10861_v46  ;;  %3072 = vmatpush.bf16.msrb.mxu2 %v10864_v8  ;;  %v2760_v8 = vsel %vm10869_vm10, %v2759_v61, %v2758_v23  ;;  %v2768_v46 = vrot.slane %v7467_v49, 1  ;;  %v2748_v23 = vsel %vm10872_vm9, %v2747_v37, %v2746_v3  ;;  %v2785_v37 = vrot.slane %v7489_v12, 7  ;;  %v7800_v12 = vld [vmem:[%s5366_s4 + $0xa0] sm:$0xff]  ;;  %vm10890_vm3 = vmmov %vm10889_vm1 }
 0x1e2   : > { %3129 = vrot.lane.b32.xlu0 %v4813_v5, %s5218_s6  ;;  %3149 = vrot.lane.b32.xlu1 %v4813_v5, %s5219_s26  ;;  %v2762_v61 = vsel %vm10873_vm15, %v2761_v22, %v2760_v8  ;;  %v2783_v5 = vsel %vm1941_vm5, %v2782_v39, %v2781_v20  ;;  %v7760_v14 = vpop.permute.xlu1 %2405  ;;  %v2771_v8 = vrot.slane %v7471_v17, 7  ;;  %v10881_v22 = vld [vmem:[#allocation31_spill] sm:$0xff]  ;;  %vm10892_vm2 = vmmov %vm10872_vm9 }
 0x1e3   : > { %2361 = vmatmul.bf16.gmra.mxu0 %v7591_v62  ;;  %2380 = vmatmul.bf16.gmra.mxu1 %v7591_v62  ;;  %v10867_v62 = vld [vmem:[#allocation16_spill] sm:$0xff]  ;;  %v2769_v34 = vsel %vm1941_vm5, %v2768_v46, %v2767_v26  ;;  %10877 = vst [vmem:[#allocation76_spill] sm:$0xff] %v7760_v14  ;;  %v2764_v3 = vsel %vm10879_vm0, %v2763_v63, %v2762_v61  ;;  %v7768_v26 = vld [vmem:[%s5366_s4 + $0xa8] sm:$0xff]  ;;  %v2972_v14 = vrot.slane %v10806_v9, 3  ;;  %vm10893_vm13 = vmmov %vm10892_vm2 }
 0x1e4   : > { %2576 = vmatmul.bf16.gmra.mxu2 %v7710_v4  ;;  %3267 = vmatpush.bf16.msrb.mxu3 %v10856_v19  ;;  %v2770_v20 = vsel %vm1944_vm11, %v7469_v59, %v2769_v34  ;;  %v2784_v46 = vsel %vm1944_vm11, %v7487_v24, %v2783_v5  ;;  %v10883_v63 = vld [vmem:[#allocation36_spill] sm:$0xff]  ;;  %v2787_v34 = vrot.slane %v7491_v29, 6  ;;  %vm10895_vm14 = vmmov %vm10879_vm0 }
 0x1e5   : > { %3035 = vmatpush.bf16.msrb.mxu0 %v10867_v62  ;;  %3054 = vmatpush.bf16.msrb.mxu1 %v10870_v51  ;;  %v2750_v51 = vsel %vm10878_vm7, %v2749_v38, %v2748_v23  ;;  %v7770_v39 = vpop.permute.xlu2 %2407  ;;  %v10882_v38 = vld [vmem:[#allocation35_spill] sm:$0xff]  ;;  %v7781_v61 = vpop.permute.xlu0 %2403  ;;  %v2786_v5 = vsel %vm10886_vm4, %v2785_v37, %v2784_v46  ;;  %v2974_v46 = vrot.slane %v10817_v2, 2  ;;  %vm10896_vm12 = vmmov %vm10879_vm0 }
 0x1e6   : > { %3073 = vmatpush.bf16.msrb.mxu2 %v10871_v41  ;;  %3127 = vrot.lane.b32.xlu2 %v7607_v6, %s5218_s6  ;;  %v10874_v41 = vld [vmem:[#allocation27_spill] sm:$0xff]  ;;  %10880 = vst [vmem:[#allocation11_spill] sm:$0xff] %v7770_v39  ;;  %v2793_v23 = vpack.c.b16 %v2764_v3, %v2750_v51  ;;  %v2773_v39 = vrot.slane %v7473_v21, 6  ;;  %v10887_v51 = vld [vmem:[#allocation40_spill] sm:$0xff]  ;;  %v2971_v3 = vrot.slane %v10805_v45, 4  ;;  %vm10899_vm10 = vmmov %vm10886_vm4 }
 0x1e7   : > { %10884 = vst [vmem:[#allocation119_spill] sm:$0xff] %v7781_v61  ;;  %v2985_v61 = vrot.slane %v10815_v40, 4  ;;  %vm10900_vm9 = vmmov %vm10886_vm4 }
 0x1e8   : > { %3268 = vmatpush.bf16.msrb.mxu3 %v10860_v48  ;;  %vm10908_vm15 = vmmov %vm10889_vm1 }
 0x1e9   : > { %3036 = vmatpush.bf16.msrb.mxu0 %v10874_v41  ;;  %3055 = vmatpush.bf16.msrb.mxu1 %v10875_v15  ;;  %vm10909_vm7 = vmmov %vm10889_vm1 }
 0x1ea   : > { %3074 = vmatpush.bf16.msrb.mxu2 %v10876_v47  ;;  %3147 = vrot.lane.b32.xlu0 %v7607_v6, %s5219_s26  ;;  %v2772_v6 = vsel %vm10885_vm8, %v2771_v8, %v2770_v20  ;;  %v10888_v8 = vld [vmem:[#allocation41_spill] sm:$0xff]  ;;  %v2788_v20 = vsel %vm10890_vm3, %v2787_v34, %v2786_v5  ;;  %v7812_v17 = vpop.permute.xlu1 %2423  ;;  %vm10912_vm0 = vmmov %vm10892_vm2 }
 0x1eb   : > { %2595 = vmatmul.bf16.gmra.mxu3 %v7710_v4  ;;  %3341 = vrot.lane.b32.xlu1 %v7768_v26, %s5217_s5  ;;  %v2774_v37 = vsel %vm10889_vm1, %v2773_v39, %v2772_v6  ;;  %10891 = vst [vmem:[#allocation120_spill] sm:$0xff] %v7812_v17  ;;  %v2976_v17 = vrot.slane %v10807_v13, 1  ;;  %vm10913_vm8 = vmmov %vm10912_vm0 }
 0x1ec   : > { %3269 = vmatpush.bf16.msrb.mxu3 %v10867_v62  ;;  %vm10916_vm4 = vmmov %vm10896_vm12 }
 0x1ed   : > { %3037 = vmatpush.bf16.msrb.mxu0 %v10881_v22  ;;  %3056 = vmatpush.bf16.msrb.mxu1 %v10882_v38  ;;  %v2775_v38 = vrot.slane %v7475_v57, 5  ;;  %v2777_v57 = vrot.slane %v7477_v10, 4  ;;  %v7823_v5 = vpop.permute.xlu2 %2425  ;;  %vm10917_vm1 = vmmov %vm10916_vm4 }
 0x1ee   : > { %3075 = vmatpush.bf16.msrb.mxu2 %v10883_v63  ;;  %3145 = vrot.lane.b32.xlu2 %v7642_v60, %s5219_s26  ;;  %v2986_v63 = vrot.slane %v10818_v16, 3  ;;  %v2789_v60 = vrot.slane %v7493_v35, 5  ;;  %v2988_v35 = vrot.slane %v10827_v56, 2  ;;  %10894 = vst [vmem:[#allocation121_spill] sm:$0xff] %v7823_v5  ;;  %v3222_v5 = vrot.slane %v10827_v56, 3  ;;  %vm10919_vm3 = vmmov %vm10900_vm9 }
 0x1ef   : > { %v2776_v34 = vsel %vm10892_vm2, %v2775_v38, %v2774_v37  ;;  %v7844_v37 = vld [vmem:[%s5366_s4 + $0xb8] sm:$0xff]  ;;  %vm10920_vm2 = vmmov %vm10919_vm3 }
 0x1f0   : > { %3270 = vmatpush.bf16.msrb.mxu3 %v10874_v41  ;;  %v2987_v39 = vsel %vm1938_vm6, %v2986_v63, %v2985_v61  ;;  %v2790_v6 = vsel %vm10893_vm13, %v2789_v60, %v2788_v20  ;;  %v2778_v63 = vsel %vm10895_vm14, %v2777_v57, %v2776_v34  ;;  %10898 = vst [vmem:[#allocation123_spill] sm:$0xff] %v7844_v37  ;;  %v3205_v57 = vrot.slane %v10805_v45, 5  ;;  %vm10923_vm13 = vmmov %vm10920_vm2 }
 0x1f1   : > { %3038 = vmatpush.bf16.msrb.mxu0 %v10887_v51  ;;  %3057 = vmatpush.bf16.msrb.mxu1 %v10888_v8  ;;  %v2791_v8 = vrot.slane %v7495_v30, 4  ;;  %v2989_v38 = vsel %vm1941_vm5, %v2988_v35, %v2987_v39  ;;  %v3219_v20 = vrot.slane %v10815_v40, 5  ;;  %v4817_v39 = vld [vmem:[%s5366_s4 + $0xb0] sm:$0xff]  ;;  %vm10925_vm14 = vmmov %vm10920_vm2 }
 0x1f2   : > { %3076 = vmatpush.bf16.msrb.mxu2 %v10674_v31  ;;  %3339 = vrot.lane.b32.xlu0 %v7800_v12, %s5217_s5  ;;  %v2990_v31 = vrot.slane %v10819_v58, 1  ;;  %v7865_v34 = vpop.permute.xlu1 %2429 }
 0x1f3   : > { %2609 = vmatmul.bf16.vlgmr.msra.gmra.mxu0 %v7631_v11  ;;  %2805 = vmatmul.bf16.vlgmr.msra.gmra.mxu1 %v2793_v23  ;;  %v2973_v11 = vsel %vm1938_vm6, %v2972_v14, %v2971_v3  ;;  %v2792_v61 = vsel %vm10896_vm12, %v2791_v8, %v2790_v6  ;;  %v7836_v3 = vpop.permute.xlu0 %2409  ;;  %v3206_v8 = vrot.slane %v10806_v9, 4  ;;  %10901 = vst [vmem:[#allocation124_spill] sm:$0xff] %v7865_v34  ;;  %v2999_v6 = vrot.slane %v7463_v7, 4  ;;  %vm10926_vm12 = vmmov %vm10909_vm7 }
 0x1f4   : > { %2824 = vmatmul.bf16.vlgmr.msra.gmra.mxu2 %v2793_v23  ;;  %3271 = vmatpush.bf16.msrb.mxu3 %v10881_v22  ;;  %v2975_v14 = vsel %vm1941_vm5, %v2974_v46, %v2973_v11  ;;  %10897 = vst [vmem:[#allocation122_spill] sm:$0xff] %v7836_v3  ;;  %v2991_v60 = vsel %vm1944_vm11, %v2990_v31, %v2989_v38  ;;  %v3220_v46 = vrot.slane %v10818_v16, 4  ;;  %v2993_v11 = vrot.slane %v10825_v53, 7  ;;  %v10910_v16 = vld [vmem:[#allocation15_spill] sm:$0xff] }
 0x1f5   : > { %3284 = vmatpush.bf16.msra.mxu0 %v10843_v44  ;;  %3303 = vmatpush.bf16.msra.mxu1 %v10844_v42  ;;  %v7846_v35 = vpack.c.b16 %v2792_v61, %v2778_v63  ;;  %v10903_v63 = vld [vmem:[#allocation114_spill] sm:$0xff]  ;;  %v3208_v3 = vrot.slane %v10817_v2, 3  ;;  %v7877_v34 = vpop.permute.xlu2 %2443 }
 0x1f6   : > { %3499 = vmatpush.bf16.msra.mxu2 %v10842_v25  ;;  %3359 = vrot.lane.b32.xlu1 %v7800_v12, %s5218_s6  ;;  %v3013_v61 = vrot.slane %v10903_v63, 4 }
 0x1f7   : > { %3151 = vrot.lane.b32.xlu2 %v7688_v32, %s5219_s26  ;;  %v2977_v32 = vsel %vm1944_vm11, %v2976_v17, %v2975_v14  ;;  %v2979_v17 = vrot.slane %v10811_v1, 7  ;;  %v10902_v14 = vld [vmem:[#allocation109_spill] sm:$0xff] }
 0x1f8   : > { %3272 = vmatpush.bf16.msrb.mxu3 %v10887_v51  ;;  %v2978_v31 = vsel %vm10899_vm10, %v10810_v27, %v2977_v32  ;;  %v3000_v38 = vrot.slane %v10902_v14, 3  ;;  %v10904_v32 = vld [vmem:[#allocation115_spill] sm:$0xff]  ;;  %10905 = vst [vmem:[#allocation109_spill] sm:$0xff] %v7877_v34  ;;  %v3002_v34 = vrot.slane %v7467_v49, 2  ;;  %vm10927_vm10 = vmmov %vm10909_vm7 }
 0x1f9   : > { %3285 = vmatpush.bf16.msra.mxu0 %v10849_v54  ;;  %3304 = vmatpush.bf16.msra.mxu1 %v10852_v18  ;;  %v3207_v18 = vsel %vm1938_vm6, %v3206_v8, %v3205_v57  ;;  %v2980_v25 = vsel %vm10908_vm15, %v2979_v17, %v2978_v31  ;;  %v3210_v8 = vrot.slane %v10807_v13, 2  ;;  %v2983_v17 = vrot.slane %v10822_v50, 5  ;;  %vm10936_vm15 = vmmov %vm10909_vm7 }
 0x1fa   : > { %3500 = vmatpush.bf16.msra.mxu2 %v10848_v33  ;;  %3345 = vrot.lane.b32.xlu0 %v7844_v37, %s5217_s5 }
 0x1fb   : > { %2843 = vmatmul.bf16.vlgmr.msra.gmra.mxu3 %v2793_v23  ;;  %v2992_v23 = vsel %vm10900_vm9, %v10823_v36, %v2991_v60  ;;  %v3014_v60 = vrot.slane %v10904_v32, 3  ;;  %v7892_v57 = vpop.permute.xlu0 %2427  ;;  %vm10935_vm9 = vmmov %vm10909_vm7 }
 0x1fc   : > { %3518 = vmatpush.bf16.msra.mxu3 %v10843_v44  ;;  %v10907_v44 = vld [vmem:[#allocation14_spill] sm:$0xff]  ;;  %v2994_v2 = vsel %vm10909_vm7, %v2993_v11, %v2992_v23  ;;  %10911 = vst [vmem:[#allocation114_spill] sm:$0xff] %v7892_v57  ;;  %v2997_v23 = vrot.slane %v10830_v0, 5  ;;  %vm10938_vm7 = vmmov %vm10912_vm0 }
 0x1fd   : > { %3286 = vmatpush.bf16.msra.mxu0 %v10857_v52  ;;  %3305 = vmatpush.bf16.msra.mxu1 %v10858_v43  ;;  %v10906_v43 = vld [vmem:[#allocation74_spill] sm:$0xff]  ;;  %v3015_v31 = vsel %vm1938_vm6, %v3014_v60, %v3013_v61  ;;  %v10914_v61 = vld [vmem:[#allocation17_spill] sm:$0xff]  ;;  %v3212_v60 = vrot.slane %v10810_v27, 1 }
 0x1fe   : > { %3501 = vmatpush.bf16.msra.mxu2 %v10856_v19  ;;  %3365 = vrot.lane.b32.xlu1 %v7844_v37, %s5218_s6  ;;  %v2981_v19 = vrot.slane %v10814_v28, 6  ;;  %v2995_v33 = vrot.slane %v10906_v43, 6  ;;  %v3221_v37 = vsel %vm1938_vm6, %v3220_v46, %v3219_v20  ;;  %v3224_v20 = vrot.slane %v10819_v58, 2 }
 0x1ff   : > { %3343 = vrot.lane.b32.xlu2 %v4817_v39, %s5217_s5  ;;  %v3001_v46 = vsel %vm1938_vm6, %v3000_v38, %v2999_v6  ;;  %v3223_v11 = vsel %vm1941_vm5, %v3222_v5, %v3221_v37  ;;  %v3004_v6 = vrot.slane %v7469_v59, 1  ;;  %v3018_v38 = vrot.slane %v7487_v24, 1  ;;  %v10915_v37 = vld [vmem:[#allocation18_spill] sm:$0xff] }
 0x200   : > { %3519 = vmatpush.bf16.msra.mxu3 %v10849_v54  ;;  %v3016_v54 = vrot.slane %v7485_v55, 2  ;;  %v2982_v57 = vsel %vm10912_vm0, %v2981_v19, %v2980_v25  ;;  %v3003_v5 = vsel %vm1941_vm5, %v3002_v34, %v3001_v46  ;;  %v3225_v25 = vsel %vm1944_vm11, %v3224_v20, %v3223_v11  ;;  %v7926_v46 = vpop.permute.xlu1 %2447 }
 0x201   : > { %3287 = vmatpush.bf16.msra.mxu0 %v10907_v44  ;;  %3306 = vmatpush.bf16.msra.mxu1 %v10910_v16  ;;  %v3234_v34 = vrot.slane %v10902_v14, 4  ;;  %10918 = vst [vmem:[#allocation115_spill] sm:$0xff] %v7926_v46  ;;  %v3021_v11 = vrot.slane %v7491_v29, 7  ;;  %v10931_v46 = vld [vmem:[#allocation112_spill] sm:$0xff] }
 0x202   : > { %3502 = vmatpush.bf16.msra.mxu2 %v10860_v48  ;;  %v2996_v48 = vsel %vm10913_vm8, %v2995_v33, %v2994_v2  ;;  %3363 = vrot.lane.b32.xlu0 %v4817_v39, %s5218_s6  ;;  %v2984_v33 = vsel %vm10916_vm4, %v2983_v17, %v2982_v57  ;;  %v3215_v57 = vrot.slane %v10814_v28, 7  ;;  %vm10940_vm8 = vmmov %vm10912_vm0 }
 0x203   : > { %2614 = vmatmul.bf16.gmra.mxu0 %v7710_v4  ;;  %2810 = vmatmul.bf16.gmra.mxu1 %v7846_v35  ;;  %v3209_v4 = vsel %vm1941_vm5, %v3208_v3, %v3207_v18  ;;  %v3226_v18 = vrot.slane %v10823_v36, 1  ;;  %v3017_v3 = vsel %vm1941_vm5, %v3016_v54, %v3015_v31  ;;  %v2998_v19 = vsel %vm10917_vm1, %v2997_v23, %v2996_v48  ;;  %v7938_v23 = vpop.permute.xlu2 %2449  ;;  %vm10941_vm4 = vmmov %vm10912_vm0 }
 0x204   : > { %2829 = vmatmul.bf16.gmra.mxu2 %v7846_v35  ;;  %3520 = vmatpush.bf16.msra.mxu3 %v10857_v52  ;;  %v3211_v2 = vsel %vm1944_vm11, %v3210_v8, %v3209_v4  ;;  %v3233_v54 = vrot.slane %v7463_v7, 5  ;;  %v3005_v8 = vsel %vm1944_vm11, %v3004_v6, %v3003_v5  ;;  %v3019_v20 = vsel %vm1944_vm11, %v3018_v38, %v3017_v3  ;;  %v10924_v5 = vld [vmem:[#allocation116_spill] sm:$0xff] }
 0x205   : > { %3288 = vmatpush.bf16.msra.mxu0 %v10914_v61  ;;  %3307 = vmatpush.bf16.msra.mxu1 %v10915_v37  ;;  %v3217_v48 = vrot.slane %v10822_v50, 6  ;;  %v3227_v31 = vsel %vm10920_vm2, %v3226_v18, %v3225_v25  ;;  %v3027_v17 = vpack.c.b16 %v2998_v19, %v2984_v33  ;;  %10921 = vst [vmem:[#allocation14_spill] sm:$0xff] %v7938_v23  ;;  %v3007_v4 = vrot.slane %v7473_v21, 7  ;;  %v7953_v25 = vpop.f32.mrf.mxu0  ;;  %v7959_v23 = vpop.permute.xlu0 %2445  ;;  %vm10947_vm2 = vmmov %vm10917_vm1 }
 0x206   : > { %3503 = vmatpush.bf16.msra.mxu2 %v10867_v62  ;;  %3383 = vrot.lane.b32.xlu1 %v4817_v39, %s5219_s26  ;;  %v3213_v39 = vsel %vm10919_vm3, %v3212_v60, %v3211_v2  ;;  %v3236_v6 = vrot.slane %v7467_v49, 3  ;;  %v3229_v38 = vrot.slane %v10906_v43, 7  ;;  %v10922_v60 = vld [vmem:[#allocation111_spill] sm:$0xff]  ;;  %v3020_v3 = vsel %vm10925_vm14, %v10924_v5, %v3019_v20  ;;  %10928 = vst [vmem:[#allocation15_spill] sm:$0xff] %v7959_v23  ;;  %vm10945_vm3 = vmmov %vm10917_vm1 }
 0x207   : > { %3361 = vrot.lane.b32.xlu2 %v7768_v26, %s5218_s6  ;;  %v3006_v18 = vsel %vm10923_vm13, %v10922_v60, %v3005_v8  ;;  %v3235_v2 = vsel %vm1938_vm6, %v3234_v34, %v3233_v54  ;;  %v3214_v33 = vsel %vm10926_vm12, %v10811_v1, %v3213_v39  ;;  %v3228_v19 = vsel %vm10927_vm10, %v10825_v53, %v3227_v31  ;;  %v10929_v54 = vld [vmem:[#allocation35_spill] sm:$0xff]  ;;  %v7966_v34 = vpop.f32.mrf.mxu1  ;;  %v10933_v31 = vld [vmem:[#allocation36_spill] sm:$0xff]  ;;  %vm10948_vm13 = vmmov %vm10917_vm1 }
 0x208   : > { %3521 = vmatpush.bf16.msra.mxu3 %v10907_v44  ;;  %v3247_v8 = vrot.slane %v10903_v63, 5  ;;  %v3248_v20 = vrot.slane %v10904_v32, 4  ;;  %10930 = vst [vmem:[#allocation18_spill] sm:$0xff] %v7966_v34  ;;  %v10934_v23 = vld [vmem:[#allocation71_spill] sm:$0xff]  ;;  %v3022_v43 = vsel %vm10936_vm15, %v3021_v11, %v3020_v3  ;;  %v3237_v28 = vsel %vm1941_vm5, %v3236_v6, %v3235_v2  ;;  %vm10955_vm12 = vmmov %vm10935_vm9 }
 0x209   : > { %3289 = vmatpush.bf16.msra.mxu0 %v10875_v15  ;;  %3308 = vmatpush.bf16.msra.mxu1 %v10876_v47  ;;  %v10932_v47 = vld [vmem:[#allocation117_spill] sm:$0xff]  ;;  %v7975_v62 = vmul.f32 %v10934_v23, %v7953_v25  ;;  %v3231_v50 = vrot.slane %v10830_v0, 6  ;;  %v3011_v11 = vrot.slane %v7477_v10, 5  ;;  %v3025_v6 = vrot.slane %v7495_v30, 5  ;;  %vm10958_vm10 = vmmov %vm10925_vm14 }
 0x20a   : > { %3504 = vmatpush.bf16.msra.mxu2 %v10874_v41  ;;  %3381 = vrot.lane.b32.xlu0 %v7768_v26, %s5219_s26  ;;  %v3009_v41 = vrot.slane %v10931_v46, 6  ;;  %v3023_v39 = vrot.slane %v10932_v47, 6  ;;  %v3008_v26 = vsel %vm10935_vm9, %v3007_v4, %v3006_v18  ;;  %v3250_v4 = vrot.slane %v7485_v55, 3  ;;  %vm10969_vm15 = vmmov %vm10912_vm0 }
 0x20b   : > { %2848 = vmatmul.bf16.gmra.mxu3 %v7846_v35  ;;  %v7951_v35 = vld [vmem:[%s5366_s4 + $0xc8] sm:$0xff]  ;;  %v3249_v18 = vsel %vm1938_vm6, %v3248_v20, %v3247_v8  ;;  %v3252_v8 = vrot.slane %v7487_v24, 2 }
 0x20c   : > { %3522 = vmatpush.bf16.msra.mxu3 %v10914_v61  ;;  %v3238_v61 = vrot.slane %v7469_v59, 2  ;;  %v7984_v59 = vmul.f32 %v10934_v23, %v7966_v34  ;;  %v3240_v23 = vrot.slane %v10922_v60, 1  ;;  %v3024_v3 = vsel %vm10941_vm4, %v3023_v39, %v3022_v43  ;;  %v10966_v34 = vld [vmem:[#allocation120_spill] sm:$0xff]  ;;  %vm10981_vm4 = vmmov %vm10958_vm10 }
 0x20d   : > { %3290 = vmatpush.bf16.msra.mxu0 %v10929_v54  ;;  %3309 = vmatpush.bf16.msra.mxu1 %v10933_v31  ;;  %v3230_v31 = vsel %vm10912_vm0, %v3229_v38, %v3228_v19  ;;  %v3010_v38 = vsel %vm10940_vm8, %v3009_v41, %v3008_v26  ;;  %v10943_v19 = vld [vmem:[#allocation42_spill] sm:$0xff]  ;;  %v3251_v43 = vsel %vm1941_vm5, %v3250_v4, %v3249_v18  ;;  %v10950_v4 = vld [vmem:[#allocation4_spill] sm:$0xff] }
 0x20e   : > { %3505 = vmatpush.bf16.msra.mxu2 %v10881_v22  ;;  %3575 = vrot.lane.b32.xlu1 %v7951_v35, %s5217_s5  ;;  %10937 = vst [vmem:[#allocation111_spill] sm:$0xff] %v7984_v59  ;;  %v3216_v22 = vsel %vm10938_vm7, %v3215_v57, %v3214_v33  ;;  %v10939_v57 = vld [vmem:[#allocation41_spill] sm:$0xff]  ;;  %v3239_v2 = vsel %vm1944_vm11, %v3238_v61, %v3237_v28  ;;  %v8002_v33 = vld [vmem:[%s5366_s4 + $0xc0] sm:$0xff]  ;;  %v8013_v28 = vpop.permute.xlu2 %2641  ;;  %vm10977_vm7 = vmmov %vm10912_vm0 }
 0x20f   : > { %3379 = vrot.lane.b32.xlu2 %v7800_v12, %s5219_s26  ;;  %10942 = vst [vmem:[#allocation116_spill] sm:$0xff] %v8002_v33  ;;  %v8006_v12 = vpop.permute.xlu1 %2639  ;;  %v3218_v20 = vsel %vm10917_vm1, %v3217_v48, %v3216_v22  ;;  %v3232_v41 = vsel %vm10945_vm3, %v3231_v50, %v3230_v31  ;;  %v3012_v61 = vsel %vm10947_vm2, %v3011_v11, %v3010_v38  ;;  %v3439_v50 = vrot.slane %v10805_v45, 6  ;;  %v10951_v11 = vld [vmem:[#allocation5_spill] sm:$0xff]  ;;  %vm10979_vm0 = vmmov %vm10917_vm1 }
 0x210   : > { %3523 = vmatpush.bf16.msra.mxu3 %v10875_v15  ;;  %10944 = vst [vmem:[#allocation71_spill] sm:$0xff] %v8006_v12  ;;  %v3026_v39 = vsel %vm10948_vm13, %v3025_v6, %v3024_v3  ;;  %v3241_v26 = vsel %vm10925_vm14, %v3240_v23, %v3239_v2  ;;  %v3254_v12 = vrot.slane %v10924_v5, 1  ;;  %v3440_v22 = vrot.slane %v10806_v9, 5  ;;  %v8030_v23 = vpop.permute.xlu0 %2637  ;;  %v10954_v2 = vld [vmem:[#allocation123_spill] sm:$0xff]  ;;  %vm10980_vm8 = vmmov %vm10979_vm0 }
 0x211   : > { %3291 = vmatpush.bf16.msra.mxu0 %v10939_v57  ;;  %3310 = vmatpush.bf16.msra.mxu1 %v10943_v19  ;;  %10946 = vst [vmem:[#allocation125_spill] sm:$0xff] %v8013_v28  ;;  %v3453_v48 = vrot.slane %v10815_v40, 6  ;;  %v8028_v6 = vpack.c.b16 %v3232_v41, %v3218_v20  ;;  %v3253_v18 = vsel %vm1944_vm11, %v3252_v8, %v3251_v43  ;;  %v3243_v38 = vrot.slane %v10931_v46, 7  ;;  %v10956_v41 = vld [vmem:[#allocation62_spill] sm:$0xff]  ;;  %v10957_v43 = vld [vmem:[#allocation9_spill] sm:$0xff]  ;;  %vm10982_vm1 = vmmov %vm10981_vm4 }
 0x212   : > { %3506 = vmatpush.bf16.msra.mxu2 %v10887_v51  ;;  %3573 = vrot.lane.b32.xlu0 %v8002_v33, %s5217_s5  ;;  %10953 = vst [vmem:[#allocation126_spill] sm:$0xff] %v8030_v23  ;;  %v3245_v3 = vrot.slane %v7477_v10, 6  ;;  %v3028_v28 = vpack.c.b16 %v3026_v39, %v3012_v61  ;;  %v3242_v20 = vsel %vm10955_vm12, %v7473_v21, %v3241_v26  ;;  %v3442_v23 = vrot.slane %v10956_v41, 4  ;;  %v10959_v61 = vld [vmem:[#allocation7_spill] sm:$0xff]  ;;  %v10960_v39 = vld [vmem:[#allocation8_spill] sm:$0xff]  ;;  %v10968_v19 = vld [vmem:[#allocation109_spill] sm:$0xff] }
 0x213   : > { %3039 = vmatmul.bf16.vlgmr.msrb.gmra.mxu0 %v3027_v17  ;;  %3058 = vmatmul.bf16.vlgmr.msrb.gmra.mxu1 %v3027_v17  ;;  %v3456_v8 = vrot.slane %v10827_v56, 4  ;;  %v3255_v59 = vsel %vm10958_vm10, %v3254_v12, %v3253_v18  ;;  %v3441_v46 = vsel %vm1938_vm6, %v3440_v22, %v3439_v50  ;;  %v8053_v26 = vld [vmem:[%s5366_s4] sm:$0xff]  ;;  %v10962_v12 = vld [vmem:[#allocation61_spill] sm:$0xff]  ;;  %v3444_v50 = vrot.slane %v10807_v13, 3  ;;  %v2338_v22 = vpop.f32.mrf.mxu3  ;;  %vm10984_vm3 = vmmov %vm10935_vm9 }
 0x214   : > { %3077 = vmatmul.bf16.vlgmr.msrb.gmra.mxu2 %v3027_v17  ;;  %3524 = vmatpush.bf16.msra.mxu3 %v10929_v54  ;;  %v10949_v17 = vld [vmem:[#allocation69_spill] sm:$0xff]  ;;  %10961 = vst [vmem:[#allocation123_spill] sm:$0xff] %v8053_v26  ;;  %v2193_v10 = vmul.f32 %v8053_v26, %v7953_v25  ;;  %v2213_v18 = vmul.f32 %v10962_v12, %v7953_v25  ;;  %vm10985_vm2 = vmmov %vm10984_vm3 }
 0x215   : > { %3537 = vmatpush.bf16.msrb.mxu0 %v10844_v42  ;;  %v3454_v31 = vrot.slane %v10949_v17, 5  ;;  %3733 = vmatpush.bf16.msrb.mxu1 %v10950_v4  ;;  %10952 = vst [vmem:[#allocation69_spill] sm:$0xff] %v8028_v6  ;;  %v10965_v4 = vld [vmem:[#allocation119_spill] sm:$0xff]  ;;  %v2435_v12 = vmul.f32 %v10966_v34, %v2338_v22  ;;  %vm10990_vm13 = vmmov %vm10977_vm7 }
 0x216   : > { %3752 = vmatpush.bf16.msrb.mxu2 %v10951_v11  ;;  %3593 = vrot.lane.b32.xlu1 %v8002_v33, %s5218_s6  ;;  %v3257_v33 = vrot.slane %v10932_v47, 7  ;;  %v10963_v47 = vld [vmem:[#allocation60_spill] sm:$0xff]  ;;  %v2415_v26 = vmul.f32 %v10965_v4, %v2338_v22  ;;  %vm10992_vm14 = vmmov %vm10977_vm7 }
 0x217   : > { %3385 = vrot.lane.b32.xlu2 %v10954_v2, %s5219_s26  ;;  %v3455_v2 = vsel %vm1938_vm6, %v3454_v31, %v3453_v48  ;;  %v2229_v11 = vmul.f32 %v10963_v47, %v7953_v25  ;;  %v8063_v48 = vld [vmem:[%s5366_s4 + $0xd8] sm:$0xff]  ;;  %v3458_v31 = vrot.slane %v10819_v58, 3  ;;  %v3256_v25 = vsel %vm10935_vm9, %v7491_v29, %v3255_v59  ;;  %v8075_v47 = vpop.permute.xlu1 %2657  ;;  %v10973_v59 = vld [vmem:[#allocation12_spill] sm:$0xff]  ;;  %vm10998_vm12 = vmmov %vm10979_vm0 }
 0x218   : > { %3525 = vmatpush.bf16.msra.mxu3 %v10939_v57  ;;  %10967 = vst [vmem:[#allocation9_spill] sm:$0xff] %v8075_v47  ;;  %v3443_v57 = vsel %vm1941_vm5, %v3442_v23, %v3441_v46  ;;  %v3457_v51 = vsel %vm1941_vm5, %v3456_v8, %v3455_v2  ;;  %v8085_v34 = vadd.f32 %v2415_v26, %v2213_v18  ;;  %v3259_v46 = vrot.slane %v7495_v30, 6  ;;  %v8091_v23 = vpop.permute.xlu2 %2659  ;;  %v8105_v26 = vpop.permute.xlu0 %2643  ;;  %vm10999_vm10 = vmmov %vm10979_vm0 }
 0x219   : > { %3538 = vmatpush.bf16.msrb.mxu0 %v10957_v43  ;;  %3734 = vmatpush.bf16.msrb.mxu1 %v10959_v61  ;;  %10974 = vst [vmem:[#allocation12_spill] sm:$0xff] %v8091_v23  ;;  %v3446_v8 = vrot.slane %v10810_v27, 2  ;;  %v3460_v2 = vrot.slane %v10823_v36, 2  ;;  %v3467_v18 = vrot.slane %v7463_v7, 6  ;;  %v10993_v23 = vld [vmem:[#allocation16_spill] sm:$0xff]  ;;  %vm11004_vm9 = vmmov %vm10982_vm1  ;;  %v3676_v47 = vrot.slane %v10956_v41, 5  ;;  %v2179_v41 = vpop.f32.mrf.mxu2 }
 0x21a   : > { %3753 = vmatpush.bf16.msrb.mxu2 %v10960_v39  ;;  %v8068_v39 = vld [vmem:[%s5366_s4 + $0x20] sm:$0xff]  ;;  %3579 = vrot.lane.b32.xlu0 %v8063_v48, %s5217_s5  ;;  %10971 = vst [vmem:[#allocation128_spill] sm:$0xff] %v8085_v34  ;;  %v3486_v34 = vrot.slane %v7487_v24, 3 }
 0x21b   : > { %3273 = vmatmul.bf16.vlgmr.msrb.gmra.mxu3 %v8028_v6  ;;  %10964 = vst [vmem:[#allocation62_spill] sm:$0xff] %v8068_v39  ;;  %v2391_v61 = vmul.f32 %v8068_v39, %v2338_v22  ;;  %v2455_v6 = vmul.f32 %v10968_v19, %v2338_v22  ;;  %v3244_v39 = vsel %vm10969_vm15, %v3243_v38, %v3242_v20  ;;  %v10976_v38 = vld [vmem:[#allocation10_spill] sm:$0xff]  ;;  %vm11005_vm15 = vmmov %vm10982_vm1 }
 0x21c   : > { %3771 = vmatpush.bf16.msrb.mxu3 %v10844_v42  ;;  %v8087_v42 = vadd.f32 %v2435_v12, %v2229_v11  ;;  %v3445_v11 = vsel %vm1944_vm11, %v3444_v50, %v3443_v57  ;;  %v3459_v20 = vsel %vm1944_vm11, %v3458_v31, %v3457_v51  ;;  %10978 = vst [vmem:[#allocation10_spill] sm:$0xff] %v8105_v26  ;;  %v3462_v57 = vrot.slane %v10825_v53, 1  ;;  %v10983_v31 = vld [vmem:[#allocation13_spill] sm:$0xff] }
 0x21d   : > { %v8083_v4 = vadd.f32 %v2391_v61, %v2193_v10  ;;  %3539 = vmatpush.bf16.msrb.mxu0 %v10973_v59  ;;  %v8096_v22 = vadd.f32 %v2455_v6, %v7975_v62  ;;  %3735 = vmatpush.bf16.msrb.mxu1 %v10976_v38  ;;  %v3258_v10 = vsel %vm10977_vm7, %v3257_v33, %v3256_v25  ;;  %v4821_v61 = vld [vmem:[%s5366_s4 + $0xd0] sm:$0xff]  ;;  %v3448_v33 = vrot.slane %v10811_v1, 1  ;;  %vm11013_vm7 = vmmov %vm10982_vm1 }
 0x21e   : > { %10972 = vst [vmem:[#allocation129_spill] sm:$0xff] %v8087_v42  ;;  %3754 = vmatpush.bf16.msrb.mxu2 %v10857_v52  ;;  %3599 = vrot.lane.b32.xlu1 %v8063_v48, %s5218_s6  ;;  %v3246_v62 = vsel %vm10979_vm0, %v3245_v3, %v3244_v39  ;;  %v3260_v51 = vsel %vm10980_vm8, %v3259_v46, %v3258_v10  ;;  %v3468_v3 = vrot.slane %v10902_v14, 5  ;;  %v3481_v39 = vrot.slane %v10903_v63, 6  ;;  %vm11014_vm0 = vmmov %vm10982_vm1 }
 0x21f   : > { %10970 = vst [vmem:[#allocation127_spill] sm:$0xff] %v8083_v4  ;;  %3577 = vrot.lane.b32.xlu2 %v4821_v61, %s5217_s5  ;;  %v3447_v6 = vsel %vm10981_vm4, %v3446_v8, %v3445_v11  ;;  %v3461_v12 = vsel %vm10982_vm1, %v3460_v2, %v3459_v20  ;;  %v3482_v50 = vrot.slane %v10904_v32, 5  ;;  %v8130_v8 = vpop.permute.xlu1 %2663  ;;  %v3470_v2 = vrot.slane %v7467_v49, 4  ;;  %v10987_v11 = vld [vmem:[#allocation67_spill] sm:$0xff]  ;;  %v10995_v4 = vld [vmem:[#allocation17_spill] sm:$0xff]  ;;  %vm11015_vm8 = vmmov %vm10985_vm2 }
 0x220   : > { %10975 = vst [vmem:[#allocation130_spill] sm:$0xff] %v8096_v22  ;;  %3772 = vmatpush.bf16.msrb.mxu3 %v10957_v43  ;;  %v3449_v25 = vsel %vm10984_vm3, %v3448_v33, %v3447_v6  ;;  %v3463_v46 = vsel %vm10985_vm2, %v3462_v57, %v3461_v12  ;;  %v3484_v10 = vrot.slane %v7485_v55, 4  ;;  %v3451_v20 = vrot.slane %v10987_v11, 7  ;;  %v8139_v6 = vpop.permute.xlu2 %2677  ;;  %v10991_v12 = vld [vmem:[#allocation74_spill] sm:$0xff]  ;;  %vm11016_vm4 = vmmov %vm10985_vm2 }
 0x221   : > { %3540 = vmatpush.bf16.msrb.mxu0 %v10910_v16  ;;  %3736 = vmatpush.bf16.msrb.mxu1 %v10983_v31  ;;  %10986 = vst [vmem:[#allocation13_spill] sm:$0xff] %v8130_v8  ;;  %v3465_v26 = vrot.slane %v10830_v0, 7  ;;  %v3469_v33 = vsel %vm1938_vm6, %v3468_v3, %v3467_v18  ;;  %v3483_v57 = vsel %vm1938_vm6, %v3482_v50, %v3481_v39  ;;  %v10994_v22 = vld [vmem:[#allocation110_spill] sm:$0xff]  ;;  %v10996_v18 = vld [vmem:[#allocation29_spill] sm:$0xff]  ;;  %v8152_v3 = vpop.permute.xlu0 %2661  ;;  %vm11026_vm1 = vmmov %vm10985_vm2 }
 0x222   : > { %3597 = vrot.lane.b32.xlu0 %v4821_v61, %s5218_s6  ;;  %3755 = vmatpush.bf16.msrb.mxu2 %v10907_v44  ;;  %10988 = vst [vmem:[#allocation67_spill] sm:$0xff] %v8139_v6  ;;  %v3464_v8 = vsel %vm10992_vm14, %v10991_v12, %v3463_v46  ;;  %v3472_v42 = vrot.slane %v10994_v22, 3  ;;  %v3471_v39 = vsel %vm1941_vm5, %v3470_v2, %v3469_v33  ;;  %v3474_v46 = vrot.slane %v10922_v60, 2  ;;  %vm11027_vm3 = vmmov %vm11026_vm1 }
 0x223   : > { %3044 = vmatmul.bf16.gmra.mxu0 %v3028_v28  ;;  %3063 = vmatmul.bf16.gmra.mxu1 %v3028_v28  ;;  %v3485_v50 = vsel %vm1941_vm5, %v3484_v10, %v3483_v57  ;;  %v3488_v6 = vrot.slane %v10924_v5, 2  ;;  %v3490_v33 = vrot.slane %v7491_v29, 1  ;;  %v3674_v57 = vrot.slane %v10806_v9, 6  ;;  %vm11033_vm2 = vmmov %vm10990_vm13 }
 0x224   : > { %3082 = vmatmul.bf16.gmra.mxu2 %v3028_v28  ;;  %3773 = vmatpush.bf16.msrb.mxu3 %v10973_v59  ;;  %v8128_v28 = vpack.c.b16 %v3260_v51, %v3246_v62  ;;  %v10989_v62 = vld [vmem:[#allocation66_spill] sm:$0xff]  ;;  %v3473_v2 = vsel %vm1944_vm11, %v3472_v42, %v3471_v39  ;;  %v3487_v10 = vsel %vm1944_vm11, %v3486_v34, %v3485_v50  ;;  %v3687_v42 = vrot.slane %v10815_v40, 7  ;;  %vm11042_vm14 = vmmov %vm11033_vm2 }
 0x225   : > { %3541 = vmatpush.bf16.msrb.mxu0 %v10915_v37  ;;  %v3450_v51 = vsel %vm10990_vm13, %v10989_v62, %v3449_v25  ;;  %3737 = vmatpush.bf16.msrb.mxu1 %v10993_v23  ;;  %10997 = vst [vmem:[#allocation66_spill] sm:$0xff] %v8152_v3  ;;  %v3466_v25 = vsel %vm10999_vm10, %v3465_v26, %v3464_v8  ;;  %v11000_v3 = vld [vmem:[#allocation27_spill] sm:$0xff]  ;;  %v3476_v8 = vrot.slane %v7473_v21, 1  ;;  %v3688_v34 = vrot.slane %v10949_v17, 6  ;;  %vm11035_vm13 = vmmov %vm11033_vm2 }
 0x226   : > { %3617 = vrot.lane.b32.xlu1 %v4821_v61, %s5219_s26  ;;  %3756 = vmatpush.bf16.msrb.mxu2 %v10995_v4  ;;  %v3452_v61 = vsel %vm10998_vm12, %v3451_v20, %v3450_v51  ;;  %v11001_v20 = vld [vmem:[#allocation36_spill] sm:$0xff]  ;;  %v3475_v39 = vsel %vm11004_vm9, %v3474_v46, %v3473_v2  ;;  %v3489_v50 = vsel %vm11005_vm15, %v3488_v6, %v3487_v10  ;;  %v3678_v40 = vrot.slane %v10807_v13, 4  ;;  %v11007_v46 = vld [vmem:[#allocation69_spill] sm:$0xff]  ;;  %vm11043_vm12 = vmmov %vm11033_vm2 }
 0x227   : > { %3595 = vrot.lane.b32.xlu2 %v7951_v35, %s5218_s6  ;;  %v8170_v26 = vpack.c.b16 %v3466_v25, %v3452_v61  ;;  %v8179_v51 = vpop.permute.xlu1 %2681  ;;  %v11006_v61 = vld [vmem:[#allocation31_spill] sm:$0xff]  ;;  %v8185_v25 = vld [vmem:[%s5366_s4 + $0xe8] sm:$0xff]  ;;  %v3689_v17 = vsel %vm1938_vm6, %v3688_v34, %v3687_v42  ;;  %v3692_v6 = vrot.slane %v10819_v58, 4  ;;  %v3680_v10 = vrot.slane %v10810_v27, 3  ;;  %v11011_v27 = vld [vmem:[#allocation42_spill] sm:$0xff] }
 0x228   : > { %3774 = vmatpush.bf16.msrb.mxu3 %v10910_v16  ;;  %11003 = vst [vmem:[#allocation16_spill] sm:$0xff] %v8179_v51  ;;  %v3694_v13 = vrot.slane %v10823_v36, 3  ;;  %v3696_v34 = vrot.slane %v10825_v53, 2  ;;  %v11017_v53 = vld [vmem:[#allocation41_spill] sm:$0xff]  ;;  %vm11046_vm9 = vmmov %vm10999_vm10 }
 0x229   : > { %3542 = vmatpush.bf16.msrb.mxu0 %v10996_v18  ;;  %3738 = vmatpush.bf16.msrb.mxu1 %v11000_v3  ;;  %11002 = vst [vmem:[#allocation74_spill] sm:$0xff] %v8170_v26  ;;  %v11021_v51 = vld [vmem:[#allocation61_spill] sm:$0xff]  ;;  %vm11052_vm15 = vmmov %vm11046_vm9 }
 0x22a   : > { %3615 = vrot.lane.b32.xlu0 %v7951_v35, %s5219_s26  ;;  %3757 = vmatpush.bf16.msrb.mxu2 %v10875_v15  ;;  %v3673_v35 = vrot.slane %v10805_v45, 7  ;;  %v3690_v45 = vrot.slane %v10827_v56, 5  ;;  %v8198_v56 = vpop.permute.xlu2 %2683 }
 0x22b   : > { %3278 = vmatmul.bf16.gmra.mxu3 %v8128_v28  ;;  %11008 = vst [vmem:[#allocation110_spill] sm:$0xff] %v8198_v56 }
 0x22c   : > { %3775 = vmatpush.bf16.msrb.mxu3 %v10915_v37  ;;  %v3675_v9 = vsel %vm1938_vm6, %v3674_v57, %v3673_v35  ;;  %v3691_v35 = vsel %vm1941_vm5, %v3690_v45, %v3689_v17  ;;  %v3682_v57 = vrot.slane %v10811_v1, 2  ;;  %v11012_v45 = vld [vmem:[#allocation40_spill] sm:$0xff]  ;;  %v2143_v17 = vpop.f32.mrf.mxu0  ;;  %v3477_v1 = vsel %vm11015_vm8, %v3476_v8, %v3475_v39  ;;  %v11024_v39 = vld [vmem:[#allocation5_spill] sm:$0xff]  ;;  %vm11061_vm8 = vmmov %vm11026_vm1 }
 0x22d   : > { %3543 = vmatpush.bf16.msrb.mxu0 %v11001_v20  ;;  %3739 = vmatpush.bf16.msrb.mxu1 %v11006_v61  ;;  %v3677_v2 = vsel %vm1941_vm5, %v3676_v47, %v3675_v9  ;;  %v3693_v42 = vsel %vm1944_vm11, %v3692_v6, %v3691_v35  ;;  %v8213_v47 = vld [vmem:[%s5366_s4 + $0xe0] sm:$0xff]  ;;  %v3491_v6 = vsel %vm11016_vm4, %v3490_v33, %v3489_v50  ;;  %v11019_v35 = vld [vmem:[#allocation123_spill] sm:$0xff]  ;;  %v3698_v8 = vrot.slane %v10991_v12, 1  ;;  %v11025_v50 = vld [vmem:[#allocation113_spill] sm:$0xff] }
 0x22e   : > { %3758 = vmatpush.bf16.msrb.mxu2 %v10929_v54  ;;  %3809 = vrot.lane.b32.xlu1 %v8185_v25, %s5217_s5  ;;  %v3679_v58 = vsel %vm1944_vm11, %v3678_v40, %v3677_v2  ;;  %11010 = vst [vmem:[#allocation27_spill] sm:$0xff] %v8213_v47  ;;  %v3695_v9 = vsel %vm11014_vm0, %v3694_v13, %v3693_v42  ;;  %v2162_v40 = vpop.f32.mrf.mxu1  ;;  %v11018_v2 = vld [vmem:[#allocation18_spill] sm:$0xff]  ;;  %v2340_v13 = vpop.f32.mrf.mxu3  ;;  %v11023_v33 = vld [vmem:[#allocation4_spill] sm:$0xff]  ;;  %v3479_v42 = vrot.slane %v11025_v50, 7  ;;  %vm11062_vm4 = vmmov %vm11014_vm0 }
 0x22f   : > { %v3681_v36 = vsel %vm11013_vm7, %v3680_v10, %v3679_v58  ;;  %v8226_v56 = vmul.f32 %v11019_v35, %v11018_v2  ;;  %v8230_v10 = vmul.f32 %v11021_v51, %v11018_v2  ;;  %v3684_v58 = vrot.slane %v10989_v62, 1  ;;  %v11029_v62 = vld [vmem:[#allocation60_spill] sm:$0xff]  ;;  %vm11053_vm7 = vmmov %vm11046_vm9 }
 0x230   : > { %3776 = vmatpush.bf16.msrb.mxu3 %v10996_v18  ;;  %v3683_v51 = vsel %vm11026_vm1, %v3682_v57, %v3681_v36  ;;  %v8244_v12 = vmul.f32 %v11029_v62, %v11018_v2  ;;  %v5159_v57 = vld [vmem:[%s5366_s4 + $0x8] sm:$0xff]  ;;  %vm11073_vm1 = vmmov %vm11033_vm2 }
 0x231   : > { %3544 = vmatpush.bf16.msrb.mxu0 %v11011_v27  ;;  %3740 = vmatpush.bf16.msrb.mxu1 %v11012_v45  ;;  %11020 = vst [vmem:[#allocation69_spill] sm:$0xff] %v8226_v56  ;;  %v11028_v45 = vld [vmem:[#allocation6_spill] sm:$0xff]  ;;  %v11034_v56 = vld [vmem:[#allocation117_spill] sm:$0xff] }
 0x232   : > { %3807 = vrot.lane.b32.xlu0 %v8213_v47, %s5217_s5  ;;  %3759 = vmatpush.bf16.msrb.mxu2 %v11017_v53  ;;  %11022 = vst [vmem:[#allocation18_spill] sm:$0xff] %v8230_v10  ;;  %v3697_v53 = vsel %vm11027_vm3, %v3696_v34, %v3695_v9  ;;  %v3492_v54 = vsel %vm11035_vm13, %v11034_v56, %v3491_v6  ;;  %v11037_v36 = vld [vmem:[#allocation65_spill] sm:$0xff]  ;;  %v11038_v9 = vld [vmem:[#allocation64_spill] sm:$0xff]  ;;  %v8283_v15 = vpop.permute.xlu2 %2875  ;;  %vm11077_vm13 = vmmov %vm11073_vm1 }
 0x233   : > { %3292 = vmatmul.bf16.vlgmr.msra.gmra.mxu0 %v11007_v46  ;;  %3311 = vmatmul.bf16.vlgmr.msra.gmra.mxu1 %v11007_v46  ;;  %v8210_v46 = vpop.permute.xlu0 %2679  ;;  %11030 = vst [vmem:[#allocation123_spill] sm:$0xff] %v8244_v12  ;;  %v2194_v34 = vmul.f32 %v5159_v57, %v2143_v17  ;;  %v2230_v19 = vmul.f32 %v11038_v9, %v2143_v17  ;;  %v8259_v2 = vld [vmem:[%s5366_s4 + $0x28] sm:$0xff]  ;;  %v11045_v12 = vld [vmem:[#allocation75_spill] sm:$0xff] }
 0x234   : > { %3507 = vmatmul.bf16.vlgmr.msra.gmra.mxu2 %v8170_v26  ;;  %3777 = vmatpush.bf16.msrb.mxu3 %v11001_v20  ;;  %11009 = vst [vmem:[#allocation17_spill] sm:$0xff] %v8210_v46  ;;  %v3493_v46 = vrot.slane %v7495_v30, 7  ;;  %v8247_v20 = vmul.f32 %v11019_v35, %v2179_v41  ;;  %v2392_v41 = vmul.f32 %v8259_v2, %v2340_v13  ;;  %v8266_v35 = vpop.permute.xlu1 %2873 }
 0x235   : > { %4095 = vmatpush.bf16.msra.mxu0 %v11023_v33  ;;  %4114 = vmatpush.bf16.msra.mxu1 %v11024_v39  ;;  %v11032_v39 = vld [vmem:[#allocation112_spill] sm:$0xff]  ;;  %11039 = vst [vmem:[#allocation4_spill] sm:$0xff] %v8259_v2  ;;  %v3699_v62 = vsel %vm11043_vm12, %v3698_v8, %v3697_v53  ;;  %v2246_v61 = vmul.f32 %v11045_v12, %v2143_v17  ;;  %v11049_v8 = vld [vmem:[#allocation15_spill] sm:$0xff]  ;;  %vm11244_vm12 = vmmov %vm11014_vm0 }
 0x236   : > { %4133 = vmatpush.bf16.msra.mxu2 %v11028_v45  ;;  %11031 = vst [vmem:[#allocation61_spill] sm:$0xff] %v8247_v20  ;;  %v3478_v10 = vsel %vm11033_vm2, %v11032_v39, %v3477_v1  ;;  %v2214_v45 = vmul.f32 %v11037_v36, %v2143_v17  ;;  %3827 = vrot.lane.b32.xlu1 %v8213_v47, %s5218_s6  ;;  %v11040_v1 = vld [vmem:[#allocation76_spill] sm:$0xff]  ;;  %v11044_v20 = vld [vmem:[#allocation7_spill] sm:$0xff]  ;;  %vm11076_vm2 = vmmov %vm11053_vm7 }
 0x237   : > { %v2416_v6 = vmul.f32 %v11040_v1, %v2340_v13  ;;  %11041 = vst [vmem:[#allocation5_spill] sm:$0xff] %v8266_v35  ;;  %v3480_v2 = vsel %vm10999_vm10, %v3479_v42, %v3478_v10  ;;  %v3494_v18 = vsel %vm11046_vm9, %v3493_v46, %v3492_v54  ;;  %v11047_v47 = vld [vmem:[#allocation8_spill] sm:$0xff]  ;;  %v8276_v1 = vmul.f32 %v5159_v57, %v2162_v40  ;;  %v8286_v17 = vld [vmem:[%s5366_s4 + $0xf8] sm:$0xff]  ;;  %vm11248_vm10 = vmmov %vm11027_vm3 }
 0x238   : > { %3778 = vmatpush.bf16.msrb.mxu3 %v11011_v27  ;;  %v11036_v27 = vld [vmem:[#allocation116_spill] sm:$0xff]  ;;  %v8279_v35 = vmul.f32 %v11037_v36, %v2162_v40  ;;  %11050 = vst [vmem:[#allocation113_spill] sm:$0xff] %v8283_v15  ;;  %v8290_v54 = vmul.f32 %v11038_v9, %v2162_v40  ;;  %v8293_v46 = vmul.f32 %v11045_v12, %v2162_v40  ;;  %v3715_v36 = vrot.slane %v10903_v63, 7  ;;  %v5161_v9 = vld [vmem:[%s5366_s4 + $0x10] sm:$0xff]  ;;  %v11057_v63 = vld [vmem:[#allocation73_spill] sm:$0xff] }
 0x239   : > { %3613 = vrot.lane.b32.xlu2 %v11036_v27, %s5219_s26  ;;  %v3685_v27 = vsel %vm11042_vm14, %v3684_v58, %v3683_v51  ;;  %4096 = vmatpush.bf16.msra.mxu0 %v11044_v20  ;;  %v2181_v58 = vpop.f32.mrf.mxu2  ;;  %v11048_v51 = vld [vmem:[#allocation121_spill] sm:$0xff]  ;;  %11051 = vst [vmem:[#allocation6_spill] sm:$0xff] %v8286_v17  ;;  %v3700_v10 = vsel %vm11053_vm7, %v10830_v0, %v3699_v62  ;;  %v3701_v0 = vrot.slane %v7463_v7, 7  ;;  %v11056_v7 = vld [vmem:[#allocation72_spill] sm:$0xff]  ;;  %vm11080_vm14 = vmmov %vm11076_vm2 }
 0x23a   : > { %4115 = vmatpush.bf16.msra.mxu1 %v11047_v47  ;;  %v2436_v53 = vmul.f32 %v11048_v51, %v2340_v13  ;;  %4134 = vmatpush.bf16.msra.mxu2 %v10957_v43  ;;  %v3686_v47 = vsel %vm11052_vm15, %v10987_v11, %v3685_v27  ;;  %v8305_v43 = vpack.c.b16 %v3494_v18, %v3480_v2  ;;  %v3716_v18 = vrot.slane %v10904_v32, 6  ;;  %v11098_v15 = vld [vmem:[#allocation52_spill] sm:$0xff]  ;;  %vm11254_vm9 = vmmov %vm11073_vm1 }
 0x23b   : > { %3526 = vmatmul.bf16.vlgmr.msra.gmra.mxu3 %v8170_v26  ;;  %v2456_v26 = vmul.f32 %v11049_v8, %v2340_v13  ;;  %3813 = vrot.lane.b32.xlu0 %v8286_v17, %s5217_s5  ;;  %v8301_v13 = vmul.f32 %v5159_v57, %v2181_v58  ;;  %v8308_v40 = vadd.f32 %v2392_v41, %v2194_v34  ;;  %v3702_v57 = vrot.slane %v10902_v14, 6  ;;  %vm11255_vm15 = vmmov %vm11014_vm0 }
 0x23c   : > { %4926 = vmatpush.bf16.msra.mxu3 %v11023_v33  ;;  %v8303_v33 = vpop.permute.xlu0 %2871  ;;  %v8310_v42 = vadd.f32 %v2416_v6, %v2214_v45  ;;  %v8321_v34 = vpack.c.b16 %v3700_v10, %v3686_v47  ;;  %v8324_v45 = vadd.f32 %v2436_v53, %v2230_v19  ;;  %v3710_v27 = vrot.slane %v7473_v21, 2  ;;  %vm11261_vm7 = vmmov %vm11076_vm2 }
 0x23d   : > { %11054 = vst [vmem:[#allocation60_spill] sm:$0xff] %v8303_v33  ;;  %4097 = vmatpush.bf16.msra.mxu0 %v10976_v38  ;;  %v3703_v19 = vsel %vm1938_vm6, %v3702_v57, %v3701_v0  ;;  %v3717_v62 = vsel %vm1938_vm6, %v3716_v18, %v3715_v36  ;;  %v3718_v58 = vrot.slane %v7485_v55, 5  ;;  %v3722_v55 = vrot.slane %v10924_v5, 3  ;;  %v11101_v33 = vld [vmem:[#allocation32_spill] sm:$0xff] }
 0x23e   : > { %4116 = vmatpush.bf16.msra.mxu1 %v10857_v52  ;;  %4135 = vmatpush.bf16.msra.mxu2 %v10973_v59  ;;  %v11055_v52 = vld [vmem:[#allocation118_spill] sm:$0xff]  ;;  %v3704_v59 = vrot.slane %v7467_v49, 5  ;;  %v3712_v47 = vrot.slane %v11032_v39, 1  ;;  %v3724_v0 = vrot.slane %v7491_v29, 2  ;;  %v11065_v29 = vld [vmem:[#allocation63_spill] sm:$0xff] }
 0x23f   : > { %3833 = vrot.lane.b32.xlu1 %v8286_v17, %s5218_s6 }
 0x240   : > { %v2146_v11 = vpop.f32.mrf.mxu0  ;;  %v2165_v12 = vpop.f32.mrf.mxu1  ;;  %4927 = vmatpush.bf16.msra.mxu3 %v11044_v20  ;;  %v8326_v20 = vadd.f32 %v2456_v26, %v2246_v61  ;;  %v3706_v26 = vrot.slane %v10994_v22, 4  ;;  %v3708_v61 = vrot.slane %v10922_v60, 3  ;;  %v4825_v60 = vld [vmem:[%s5366_s4 + $0xf0] sm:$0xff]  ;;  %v3705_v21 = vsel %vm1941_vm5, %v3704_v59, %v3703_v19  ;;  %v5162_v19 = vld [vmem:[%s5366_s4 + $0x18] sm:$0xff] }
 0x241   : > { %v8319_v2 = vmul.f32 %v5161_v9, %v2146_v11  ;;  %v8329_v41 = vmul.f32 %v11055_v52, %v2146_v11  ;;  %v8332_v14 = vmul.f32 %v11056_v7, %v2146_v11  ;;  %v8335_v6 = vmul.f32 %v11057_v63, %v2146_v11  ;;  %v8359_v22 = vpop.permute.xlu1 %2891  ;;  %3619 = vrot.lane.b32.xlu2 %v8063_v48, %s5219_s26  ;;  %v8375_v11 = vpop.permute.xlu2 %2893 }
 0x242   : > { %v8337_v32 = vmul.f32 %v5161_v9, %v2165_v12  ;;  %v8354_v53 = vmul.f32 %v11055_v52, %v2165_v12  ;;  %v8357_v49 = vmul.f32 %v11056_v7, %v2165_v12  ;;  %11058 = vst [vmem:[#allocation112_spill] sm:$0xff] %v8359_v22  ;;  %4098 = vmatpush.bf16.msra.mxu0 %v10983_v31  ;;  %v11063_v7 = vld [vmem:[#allocation45_spill] sm:$0xff] }
 0x243   : > { %3297 = vmatmul.bf16.gmra.mxu0 %v8128_v28  ;;  %3316 = vmatmul.bf16.gmra.mxu1 %v8128_v28  ;;  %v3720_v28 = vrot.slane %v7487_v24, 4  ;;  %v8368_v24 = vmul.f32 %v11057_v63, %v2165_v12  ;;  %v3719_v48 = vsel %vm1941_vm5, %v3718_v58, %v3717_v62  ;;  %11059 = vst [vmem:[#allocation117_spill] sm:$0xff] %v8375_v11  ;;  %v11099_v11 = vld [vmem:[#allocation30_spill] sm:$0xff] }
 0x244   : > { %3512 = vmatmul.bf16.gmra.mxu2 %v8305_v43  ;;  %4928 = vmatpush.bf16.msra.mxu3 %v10976_v38  ;;  %v3707_v38 = vsel %vm1944_vm11, %v3706_v26, %v3705_v21  ;;  %v8479_v22 = vmul.f32 %v11099_v11, %v11098_v15  ;;  %v11108_v15 = vld [vmem:[#allocation31_spill] sm:$0xff]  ;;  %v11109_v11 = vld [vmem:[#allocation62_spill] sm:$0xff] }
 0x245   : > { %3831 = vrot.lane.b32.xlu0 %v4825_v60, %s5218_s6  ;;  %4117 = vmatpush.bf16.msra.mxu1 %v10907_v44  ;;  %v3709_v5 = vsel %vm11014_vm0, %v3708_v61, %v3707_v38  ;;  %v3721_v12 = vsel %vm1944_vm11, %v3720_v28, %v3719_v48  ;;  %v3726_v44 = vrot.slane %v11034_v56, 1  ;;  %v11066_v56 = vld [vmem:[#allocation68_spill] sm:$0xff]  ;;  %v11067_v61 = vld [vmem:[#allocation70_spill] sm:$0xff]  ;;  %vm11262_vm0 = vmmov %vm11027_vm3 }
 0x246   : > { %4136 = vmatpush.bf16.msra.mxu2 %v10910_v16  ;;  %v3711_v18 = vsel %vm11061_vm8, %v3710_v27, %v3709_v5  ;;  %v3723_v52 = vsel %vm11062_vm4, %v3722_v55, %v3721_v12  ;;  %v11064_v16 = vld [vmem:[#allocation20_spill] sm:$0xff]  ;;  %4099 = vmatpush.bf16.msra.mxu0 %v10993_v23  ;;  %vm11267_vm8 = vmmov %vm11073_vm1 }
 0x247   : > { %v2184_v10 = vpop.f32.mrf.mxu2  ;;  %v8389_v63 = vmul.f32 %v11064_v16, %v11063_v7  ;;  %v3713_v55 = vsel %vm11073_vm1, %v3712_v47, %v3711_v18  ;;  %v3725_v38 = vsel %vm11027_vm3, %v3724_v0, %v3723_v52  ;;  %v11074_v48 = vld [vmem:[#allocation44_spill] sm:$0xff]  ;;  %3851 = vrot.lane.b32.xlu1 %v4825_v60, %s5219_s26  ;;  %v11079_v47 = vld [vmem:[#allocation21_spill] sm:$0xff]  ;;  %v11081_v0 = vld [vmem:[#allocation47_spill] sm:$0xff] }
 0x248   : > { %v8382_v57 = vmul.f32 %v5161_v9, %v2184_v10  ;;  %v2148_v36 = vpop.f32.mrf.mxu0  ;;  %v2167_v39 = vpop.f32.mrf.mxu1  ;;  %4929 = vmatpush.bf16.msra.mxu3 %v10983_v31  ;;  %v11075_v10 = vld [vmem:[#allocation19_spill] sm:$0xff]  ;;  %v3714_v12 = vsel %vm11076_vm2, %v11025_v50, %v3713_v55  ;;  %v11082_v50 = vld [vmem:[#allocation22_spill] sm:$0xff]  ;;  %v11089_v55 = vld [vmem:[#allocation25_spill] sm:$0xff] }
 0x249   : > { %v8392_v59 = vmul.f32 %v5162_v19, %v2148_v36  ;;  %v8395_v26 = vmul.f32 %v11065_v29, %v2148_v36  ;;  %v8398_v9 = vmul.f32 %v11066_v56, %v2148_v36  ;;  %v8401_v62 = vmul.f32 %v11067_v61, %v2148_v36  ;;  %v8403_v31 = vpop.permute.xlu0 %2877  ;;  %4118 = vmatpush.bf16.msra.mxu1 %v10995_v4  ;;  %v11078_v4 = vld [vmem:[#allocation46_spill] sm:$0xff]  ;;  %v11084_v52 = vld [vmem:[#allocation23_spill] sm:$0xff]  ;;  %vm11274_vm4 = vmmov %vm11076_vm2 }
 0x24a   : > { %11060 = vst [vmem:[#allocation116_spill] sm:$0xff] %v8382_v57  ;;  %v8406_v27 = vmul.f32 %v5162_v19, %v2167_v39  ;;  %v8409_v58 = vmul.f32 %v11065_v29, %v2167_v39  ;;  %v8412_v28 = vmul.f32 %v11066_v56, %v2167_v39  ;;  %v8415_v21 = vmul.f32 %v11067_v61, %v2167_v39  ;;  %v11085_v29 = vld [vmem:[#allocation28_spill] sm:$0xff]  ;;  %v11088_v61 = vld [vmem:[#allocation50_spill] sm:$0xff]  ;;  %v11152_v57 = vld [vmem:[#allocation129_spill] sm:$0xff] }
 0x24b   : > { %11068 = vst [vmem:[#allocation65_spill] sm:$0xff] %v8403_v31  ;;  %3531 = vmatmul.bf16.gmra.mxu3 %v8305_v43  ;;  %4137 = vmatpush.bf16.msra.mxu2 %v10915_v37  ;;  %v8424_v5 = vmul.f32 %v11075_v10, %v11074_v48  ;;  %v3727_v36 = vsel %vm11077_vm13, %v3726_v44, %v3725_v38  ;;  %v11083_v44 = vld [vmem:[#allocation48_spill] sm:$0xff]  ;;  %v8461_v48 = vld [vmem:[%s5366_s4 + $0x30] sm:$0xff]  ;;  %vm11292_vm1 = vmmov %vm11244_vm12 }
 0x24c   : > { %11069 = vst [vmem:[#allocation64_spill] sm:$0xff] %v8406_v27  ;;  %4930 = vmatpush.bf16.msra.mxu3 %v10993_v23  ;;  %v8433_v39 = vmul.f32 %v11079_v47, %v11078_v4  ;;  %v3728_v37 = vsel %vm11080_vm14, %v7495_v30, %v3727_v36  ;;  %3811 = vrot.lane.b32.xlu2 %v4825_v60, %s5217_s5  ;;  %v11086_v30 = vld [vmem:[#allocation49_spill] sm:$0xff]  ;;  %v11087_v60 = vld [vmem:[#allocation24_spill] sm:$0xff]  ;;  %v11090_v36 = vld [vmem:[#allocation11_spill] sm:$0xff] }
 0x24d   : > { %11070 = vst [vmem:[#allocation7_spill] sm:$0xff] %v8409_v58  ;;  %4100 = vmatpush.bf16.msra.mxu0 %v11000_v3  ;;  %v8441_v18 = vmul.f32 %v11082_v50, %v11081_v0  ;;  %v8445_v23 = vmul.f32 %v11084_v52, %v11083_v44  ;;  %v8447_v16 = vpack.c.b16 %v3728_v37, %v3714_v12  ;;  %v11091_v4 = vld [vmem:[#allocation114_spill] sm:$0xff]  ;;  %v11092_v37 = vld [vmem:[#allocation115_spill] sm:$0xff]  ;;  %v8467_v44 = vpop.permute.xlu1 %2897  ;;  %v11094_v52 = vld [vmem:[#allocation29_spill] sm:$0xff] }
 0x24e   : > { %11071 = vst [vmem:[#allocation75_spill] sm:$0xff] %v8412_v28  ;;  %v2343_v7 = vpop.f32.mrf.mxu3  ;;  %3849 = vrot.lane.b32.xlu0 %v8185_v25, %s5219_s26  ;;  %4119 = vmatpush.bf16.msra.mxu1 %v11085_v29  ;;  %v8454_v56 = vmul.f32 %v11087_v60, %v11086_v30  ;;  %v8458_v38 = vmul.f32 %v11089_v55, %v11088_v61  ;;  %v11096_v61 = vld [vmem:[#allocation51_spill] sm:$0xff]  ;;  %v11097_v55 = vld [vmem:[#allocation26_spill] sm:$0xff]  ;;  %vm11298_vm3 = vmmov %vm11262_vm0 }
 0x24f   : > { %11072 = vst [vmem:[#allocation8_spill] sm:$0xff] %v8415_v21  ;;  %v2393_v10 = vmul.f32 %v8461_v48, %v2343_v7  ;;  %v2417_v12 = vmul.f32 %v11090_v36, %v2343_v7  ;;  %v2437_v47 = vmul.f32 %v11091_v4, %v2343_v7  ;;  %v2457_v0 = vmul.f32 %v11092_v37, %v2343_v7  ;;  %v2186_v50 = vpop.f32.mrf.mxu2  ;;  %v11100_v7 = vld [vmem:[#allocation53_spill] sm:$0xff]  ;;  %v11121_v28 = vld [vmem:[#allocation34_spill] sm:$0xff]  ;;  %v11126_v58 = vld [vmem:[#allocation111_spill] sm:$0xff] }
 0x250   : > { %11093 = vst [vmem:[#allocation121_spill] sm:$0xff] %v8467_v44  ;;  %4138 = vmatpush.bf16.msra.mxu2 %v11094_v52  ;;  %v8470_v29 = vmul.f32 %v5162_v19, %v2186_v50  ;;  %v2357_v30 = vpop.f32.mrf.mxu0  ;;  %v2376_v60 = vpop.f32.mrf.mxu1  ;;  %4931 = vmatpush.bf16.msra.mxu3 %v11000_v3  ;;  %v8475_v31 = vmul.f32 %v11097_v55, %v11096_v61  ;;  %v11110_v55 = vld [vmem:[#allocation119_spill] sm:$0xff]  ;;  %v11111_v44 = vld [vmem:[#allocation120_spill] sm:$0xff]  ;;  %vm11299_vm13 = vmmov %vm11267_vm8 }
 0x251   : > { %v8483_v21 = vmul.f32 %v11101_v33, %v11100_v7  ;;  %v8486_v19 = vadd.f32 %v2393_v10, %v8319_v2  ;;  %v8489_v50 = vadd.f32 %v2417_v12, %v8329_v41  ;;  %v8492_v3 = vadd.f32 %v2437_v47, %v8332_v14  ;;  %v8497_v61 = vpop.permute.xlu2 %2911  ;;  %4101 = vmatpush.bf16.msra.mxu0 %v11108_v15  ;;  %v11112_v10 = vld [vmem:[#allocation109_spill] sm:$0xff]  ;;  %v11113_v41 = vld [vmem:[#allocation35_spill] sm:$0xff]  ;;  %v8506_v12 = vpop.permute.xlu0 %2895  ;;  %vm11300_vm14 = vmmov %vm11076_vm2 }
 0x252   : > { %11095 = vst [vmem:[#allocation15_spill] sm:$0xff] %v8470_v29  ;;  %v8495_v52 = vadd.f32 %v2457_v0, %v8335_v6  ;;  %v2463_v33 = vmul.f32 %v11109_v11, %v2357_v30  ;;  %v2471_v7 = vmul.f32 %v11110_v55, %v2357_v30  ;;  %v2479_v2 = vmul.f32 %v11111_v44, %v2357_v30  ;;  %v11115_v6 = vld [vmem:[#allocation74_spill] sm:$0xff]  ;;  %v8511_v47 = vld [vmem:[%s5366_s4 + $0x108] sm:$0xff]  ;;  %v11120_v44 = vld [vmem:[#allocation55_spill] sm:$0xff] }
 0x253   : > { %11102 = vst [vmem:[#allocation118_spill] sm:$0xff] %v8483_v21  ;;  %v2487_v29 = vmul.f32 %v11112_v10, %v2357_v30  ;;  %4120 = vmatpush.bf16.msra.mxu1 %v11113_v41  ;;  %v2495_v14 = vmul.f32 %v11109_v11, %v2376_v60  ;;  %3545 = vmatmul.bf16.vlgmr.msrb.gmra.mxu0 %v11115_v6  ;;  %v11117_v0 = vld [vmem:[#allocation54_spill] sm:$0xff]  ;;  %v11123_v10 = vld [vmem:[#allocation69_spill] sm:$0xff] }
 0x254   : > { %11103 = vst [vmem:[#allocation72_spill] sm:$0xff] %v8486_v19  ;;  %3741 = vmatmul.bf16.vlgmr.msrb.gmra.mxu1 %v8321_v34  ;;  %v8519_v30 = vmul.f32 %v11121_v28, %v11120_v44  ;;  %v8522_v41 = vadd.f32 %v2463_v33, %v11123_v10  ;;  %v11124_v60 = vld [vmem:[#allocation18_spill] sm:$0xff]  ;;  %3760 = vmatmul.bf16.vlgmr.msrb.gmra.mxu2 %v8321_v34  ;;  %v11129_v28 = vld [vmem:[#allocation36_spill] sm:$0xff]  ;;  %v11131_v44 = vld [vmem:[#allocation37_spill] sm:$0xff] }
 0x255   : > { %11104 = vst [vmem:[#allocation73_spill] sm:$0xff] %v8489_v50  ;;  %v8525_v11 = vadd.f32 %v2471_v7, %v11124_v60  ;;  %v8531_v27 = vadd.f32 %v2487_v29, %v11126_v58  ;;  %4932 = vmatpush.bf16.msra.mxu3 %v11108_v15  ;;  %4139 = vmatpush.bf16.msra.mxu2 %v11129_v28  ;;  %v8540_v33 = vld [vmem:[%s5366_s4 + $0x100] sm:$0xff]  ;;  %v11136_v15 = vld [vmem:[#allocation58_spill] sm:$0xff]  ;;  %v11140_v28 = vld [vmem:[#allocation43_spill] sm:$0xff] }
 0x256   : > { %11105 = vst [vmem:[#allocation45_spill] sm:$0xff] %v8492_v3  ;;  %v11130_v7 = vld [vmem:[#allocation56_spill] sm:$0xff]  ;;  %v2345_v29 = vpop.f32.mrf.mxu3  ;;  %4171 = vrot.lane.b32.xlu1 %v8511_v47, %s5217_s5  ;;  %3829 = vrot.lane.b32.xlu2 %v8185_v25, %s5218_s6  ;;  %v11145_v25 = vld [vmem:[#allocation14_spill] sm:$0xff] }
 0x257   : > { %11106 = vst [vmem:[#allocation20_spill] sm:$0xff] %v8495_v52  ;;  %v8544_v10 = vmul.f32 %v11131_v44, %v11130_v7  ;;  %v8565_v44 = vld [vmem:[%s5366_s4 + $0x38] sm:$0xff]  ;;  %v2458_v52 = vmul.f32 %v11145_v25, %v2345_v29  ;;  %v2572_v3 = vpop.f32.mrf.mxu2  ;;  %4169 = vrot.lane.b32.xlu0 %v8540_v33, %s5217_s5  ;;  %v11147_v7 = vld [vmem:[#allocation9_spill] sm:$0xff]  ;;  %v11149_v19 = vld [vmem:[#allocation40_spill] sm:$0xff] }
 0x258   : > { %11107 = vst [vmem:[#allocation63_spill] sm:$0xff] %v8497_v61  ;;  %v11118_v61 = vld [vmem:[#allocation33_spill] sm:$0xff]  ;;  %v2359_v50 = vpop.f32.mrf.mxu0  ;;  %4102 = vmatpush.bf16.msra.mxu0 %v11149_v19 }
 0x259   : > { %11114 = vst [vmem:[#allocation68_spill] sm:$0xff] %v8506_v12  ;;  %v8515_v55 = vmul.f32 %v11118_v61, %v11117_v0  ;;  %v11125_v12 = vld [vmem:[#allocation123_spill] sm:$0xff]  ;;  %v11127_v61 = vld [vmem:[#allocation61_spill] sm:$0xff]  ;;  %v8591_v17 = vadd.f32 %v2458_v52, %v8401_v62  ;;  %4933 = vmatpush.bf16.msra.mxu3 %v11149_v19  ;;  %v11156_v62 = vld [vmem:[#allocation4_spill] sm:$0xff] }
 0x25a   : > { %11116 = vst [vmem:[#allocation70_spill] sm:$0xff] %v8511_v47  ;;  %v8528_v6 = vadd.f32 %v2479_v2, %v11125_v12  ;;  %v8535_v0 = vadd.f32 %v2495_v14, %v11127_v61  ;;  %v11133_v2 = vld [vmem:[#allocation57_spill] sm:$0xff]  ;;  %v11134_v12 = vld [vmem:[#allocation38_spill] sm:$0xff]  ;;  %v11137_v14 = vld [vmem:[#allocation39_spill] sm:$0xff]  ;;  %v2464_v19 = vmul.f32 %v11156_v62, %v2359_v50 }
 0x25b   : > { %11119 = vst [vmem:[#allocation44_spill] sm:$0xff] %v8515_v55  ;;  %v8548_v58 = vmul.f32 %v11134_v12, %v11133_v2  ;;  %v8556_v60 = vmul.f32 %v11137_v14, %v11136_v15  ;;  %v11139_v61 = vld [vmem:[#allocation59_spill] sm:$0xff]  ;;  %v2394_v2 = vmul.f32 %v8565_v44, %v2345_v29  ;;  %v11143_v12 = vld [vmem:[#allocation122_spill] sm:$0xff]  ;;  %v8574_v15 = vld [vmem:[%s5366_s4 + $0x40] sm:$0xff]  ;;  %3779 = vmatmul.bf16.vlgmr.msrb.gmra.mxu3 %v8321_v34 }
 0x25c   : > { %11122 = vst [vmem:[#allocation19_spill] sm:$0xff] %v8519_v30  ;;  %v2418_v47 = vmul.f32 %v11143_v12, %v2345_v29  ;;  %v2625_v14 = vmul.f32 %v8574_v15, %v2572_v3  ;;  %v2378_v12 = vpop.f32.mrf.mxu1  ;;  %v11150_v30 = vld [vmem:[#allocation127_spill] sm:$0xff]  ;;  %v11151_v55 = vld [vmem:[#allocation128_spill] sm:$0xff] }
 0x25d   : > { %11128 = vst [vmem:[#allocation46_spill] sm:$0xff] %v8535_v0  ;;  %v8560_v0 = vmul.f32 %v11140_v28, %v11139_v61  ;;  %v11146_v61 = vld [vmem:[#allocation126_spill] sm:$0xff]  ;;  %v11157_v52 = vld [vmem:[#allocation76_spill] sm:$0xff] }
 0x25e   : > { %11132 = vst [vmem:[#allocation21_spill] sm:$0xff] %v8544_v10  ;;  %v2649_v28 = vmul.f32 %v11146_v61, %v2572_v3  ;;  %v8585_v25 = vadd.f32 %v2418_v47, %v8395_v26  ;;  %v8606_v47 = vpop.permute.xlu1 %2915  ;;  %4189 = vrot.lane.b32.xlu1 %v8540_v33, %s5218_s6 }
 0x25f   : > { %11135 = vst [vmem:[#allocation47_spill] sm:$0xff] %v8548_v58  ;;  %v11144_v58 = vld [vmem:[#allocation124_spill] sm:$0xff] }
 0x260   : > { %11138 = vst [vmem:[#allocation22_spill] sm:$0xff] %v8556_v60  ;;  %v2438_v10 = vmul.f32 %v11144_v58, %v2345_v29  ;;  %v11148_v60 = vld [vmem:[#allocation67_spill] sm:$0xff]  ;;  %v8582_v29 = vadd.f32 %v2394_v2, %v8392_v59  ;;  %v8598_v21 = vadd.f32 %v2649_v28, %v11151_v55  ;;  %v11153_v2 = vld [vmem:[#allocation130_spill] sm:$0xff]  ;;  %v2488_v55 = vmul.f32 %v11049_v8, %v2359_v50  ;;  %v11163_v28 = vld [vmem:[#allocation17_spill] sm:$0xff] }
 0x261   : > { %11141 = vst [vmem:[#allocation48_spill] sm:$0xff] %v8560_v0  ;;  %v2669_v0 = vmul.f32 %v11147_v7, %v2572_v3 }
 0x262   : > { %11142 = vst [vmem:[#allocation23_spill] sm:$0xff] %v8565_v44  ;;  %v2689_v44 = vmul.f32 %v11148_v60, %v2572_v3  ;;  %v8588_v58 = vadd.f32 %v2438_v10, %v8398_v9  ;;  %v8595_v3 = vadd.f32 %v2625_v14, %v11150_v30  ;;  %v11155_v9 = vld [vmem:[#allocation41_spill] sm:$0xff]  ;;  %v2472_v30 = vmul.f32 %v11157_v52, %v2359_v50  ;;  %v8614_v14 = vpop.permute.xlu2 %2917 }
 0x263   : > { %v8601_v59 = vadd.f32 %v2669_v0, %v11152_v57  ;;  %11154 = vst [vmem:[#allocation28_spill] sm:$0xff] %v8606_v47  ;;  %4121 = vmatpush.bf16.msra.mxu1 %v11155_v9  ;;  %v2480_v10 = vmul.f32 %v11048_v51, %v2359_v50  ;;  %v2496_v57 = vmul.f32 %v11156_v62, %v2378_v12  ;;  %v11159_v0 = vld [vmem:[#allocation42_spill] sm:$0xff]  ;;  %v8636_v12 = vpop.permute.xlu0 %2913  ;;  %v2591_v9 = vpop.f32.mrf.mxu3 }
 0x264   : > { %v8604_v26 = vadd.f32 %v2689_v44, %v11153_v2  ;;  %11158 = vst [vmem:[#allocation49_spill] sm:$0xff] %v8614_v14  ;;  %4140 = vmatpush.bf16.msra.mxu2 %v11159_v0  ;;  %v8625_v2 = vadd.f32 %v2464_v19, %v8276_v1  ;;  %v8628_v51 = vadd.f32 %v2472_v30, %v8279_v35  ;;  %v2574_v30 = vpop.f32.mrf.mxu2  ;;  %v11161_v0 = vld [vmem:[#allocation71_spill] sm:$0xff]  ;;  %v11162_v35 = vld [vmem:[#allocation12_spill] sm:$0xff]  ;;  %v2362_v44 = vpop.f32.mrf.mxu0 }
 0x265   : > { %v8631_v8 = vadd.f32 %v2480_v10, %v8290_v54  ;;  %v8634_v50 = vadd.f32 %v2488_v55, %v8293_v46  ;;  %v8639_v62 = vadd.f32 %v2496_v57, %v8301_v13  ;;  %v2697_v54 = vmul.f32 %v8574_v15, %v2591_v9  ;;  %v11160_v10 = vld [vmem:[#allocation27_spill] sm:$0xff]  ;;  %v8656_v55 = vld [vmem:[%s5366_s4 + $0x48] sm:$0xff]  ;;  %3550 = vmatmul.bf16.gmra.mxu0 %v8305_v43 }
 0x266   : > { %v2705_v46 = vmul.f32 %v11146_v61, %v2591_v9  ;;  %v2713_v52 = vmul.f32 %v11147_v7, %v2591_v9  ;;  %v2721_v13 = vmul.f32 %v11148_v60, %v2591_v9  ;;  %3847 = vrot.lane.b32.xlu2 %v11160_v10, %s5219_s26  ;;  %v2626_v57 = vmul.f32 %v8656_v55, %v2574_v30  ;;  %v2381_v61 = vpop.f32.mrf.mxu1 }
 0x267   : > { %v2650_v19 = vmul.f32 %v11161_v0, %v2574_v30  ;;  %v2670_v1 = vmul.f32 %v11162_v35, %v2574_v30  ;;  %v2690_v34 = vmul.f32 %v11163_v28, %v2574_v30  ;;  %v8663_v7 = vadd.f32 %v2697_v54, %v8522_v41  ;;  %3746 = vmatmul.bf16.gmra.mxu1 %v8447_v16 }
 0x268   : > { %v8666_v60 = vadd.f32 %v2705_v46, %v8525_v11  ;;  %v8669_v9 = vadd.f32 %v2713_v52, %v8528_v6  ;;  %v8672_v10 = vadd.f32 %v2721_v13, %v8531_v27  ;;  %v8675_v14 = vadd.f32 %v2626_v57, %v8308_v40  ;;  %v8691_v40 = vpop.permute.xlu1 %3107  ;;  %3765 = vmatmul.bf16.gmra.mxu2 %v8447_v16  ;;  %v11171_v46 = vld [vmem:[#allocation118_spill] sm:$0xff]  ;;  %v11172_v52 = vld [vmem:[#allocation44_spill] sm:$0xff]  ;;  %v11173_v13 = vld [vmem:[#allocation19_spill] sm:$0xff] }
 0x269   : > { %v8678_v47 = vadd.f32 %v2650_v19, %v8310_v42  ;;  %v8681_v30 = vadd.f32 %v2670_v1, %v8324_v45  ;;  %v8684_v41 = vadd.f32 %v2690_v34, %v8326_v20  ;;  %v2465_v11 = vmul.f32 %v8461_v48, %v2362_v44  ;;  %11166 = vst [vmem:[#allocation25_spill] sm:$0xff] %v8691_v40  ;;  %v11169_v19 = vld [vmem:[#allocation116_spill] sm:$0xff] }
 0x26a   : > { %v2473_v6 = vmul.f32 %v11090_v36, %v2362_v44  ;;  %v2481_v54 = vmul.f32 %v11091_v4, %v2362_v44  ;;  %v2489_v27 = vmul.f32 %v11092_v37, %v2362_v44  ;;  %v2497_v42 = vmul.f32 %v8461_v48, %v2381_v61  ;;  %v8717_v34 = vpop.permute.xlu2 %3109  ;;  %v11179_v20 = vld [vmem:[#allocation16_spill] sm:$0xff] }
 0x26b   : > { %11164 = vst [vmem:[#allocation24_spill] sm:$0xff] %v8681_v30  ;;  %v11167_v36 = vpack.c.bf16 %v8424_v5, %v8424_v5  ;;  %v8706_v43 = vadd.f32 %v2465_v11, %v8337_v32  ;;  %v2593_v1 = vpop.f32.mrf.mxu3  ;;  %v11184_v40 = vld [vmem:[#allocation72_spill] sm:$0xff]  ;;  %3784 = vmatmul.bf16.gmra.mxu3 %v8447_v16 }
 0x26c   : > { %11165 = vst [vmem:[#allocation50_spill] sm:$0xff] %v8684_v41  ;;  %v8709_v48 = vadd.f32 %v2473_v6, %v8354_v53  ;;  %v8712_v37 = vadd.f32 %v2481_v54, %v8357_v49  ;;  %v8715_v44 = vadd.f32 %v2489_v27, %v8368_v24  ;;  %v8720_v5 = vadd.f32 %v2497_v42, %v11169_v19  ;;  %v8732_v6 = vpop.permute.xlu0 %3105  ;;  %v2577_v54 = vpop.f32.mrf.mxu2  ;;  %v11175_v27 = vld [vmem:[#allocation6_spill] sm:$0xff]  ;;  %v11177_v19 = vld [vmem:[#allocation125_spill] sm:$0xff]  ;;  %v11199_v16 = vld [vmem:[#allocation64_spill] sm:$0xff] }
 0x26d   : > { %v8703_v4 = vunpack.c.l.b16 %v11167_v36  ;;  %11168 = vst [vmem:[#allocation11_spill] sm:$0xff] %v8717_v34  ;;  %v2698_v49 = vmul.f32 %v8656_v55, %v2593_v1  ;;  %v2706_v24 = vmul.f32 %v11161_v0, %v2593_v1  ;;  %v2714_v61 = vmul.f32 %v11162_v35, %v2593_v1  ;;  %v8737_v42 = vld [vmem:[%s5366_s4 + $0x50] sm:$0xff]  ;;  %v2364_v45 = vpop.f32.mrf.mxu0 }
 0x26e   : > { %11170 = vst [vmem:[#allocation114_spill] sm:$0xff] %v8720_v5  ;;  %v2722_v11 = vmul.f32 %v11163_v28, %v2593_v1  ;;  %3853 = vrot.lane.b32.xlu2 %v11175_v27, %s5219_s26  ;;  %v2627_v36 = vmul.f32 %v8737_v42, %v2577_v54  ;;  %v2651_v57 = vmul.f32 %v11177_v19, %v2577_v54  ;;  %v11178_v53 = vld [vmem:[#allocation66_spill] sm:$0xff]  ;;  %v2383_v35 = vpop.f32.mrf.mxu1  ;;  %v11186_v5 = vld [vmem:[#allocation73_spill] sm:$0xff] }
 0x26f   : > { %11174 = vst [vmem:[#allocation115_spill] sm:$0xff] %v8732_v6  ;;  %v2671_v32 = vmul.f32 %v11178_v53, %v2577_v54  ;;  %v2691_v0 = vmul.f32 %v11179_v20, %v2577_v54  ;;  %v8744_v28 = vadd.f32 %v2698_v49, %v8625_v2  ;;  %v8747_v1 = vadd.f32 %v2706_v24, %v8628_v51  ;;  %v11188_v54 = vld [vmem:[#allocation45_spill] sm:$0xff]  ;;  %v11190_v2 = vld [vmem:[#allocation20_spill] sm:$0xff]  ;;  %v11192_v51 = vld [vmem:[#allocation23_spill] sm:$0xff] }
 0x270   : > { %11176 = vst [vmem:[#allocation29_spill] sm:$0xff] %v8737_v42  ;;  %v8750_v27 = vadd.f32 %v2714_v61, %v8631_v8  ;;  %v8753_v34 = vadd.f32 %v2722_v11, %v8634_v50  ;;  %v8756_v6 = vadd.f32 %v2627_v36, %v11184_v40  ;;  %v8759_v41 = vadd.f32 %v2651_v57, %v11186_v5  ;;  %v11193_v24 = vld [vmem:[#allocation122_spill] sm:$0xff]  ;;  %v11194_v50 = vld [vmem:[#allocation124_spill] sm:$0xff]  ;;  %v11196_v5 = vld [vmem:[#allocation21_spill] sm:$0xff] }
 0x271   : > { %11180 = vst [vmem:[#allocation51_spill] sm:$0xff] %v8744_v28  ;;  %v8762_v30 = vadd.f32 %v2671_v32, %v11188_v54  ;;  %v8765_v49 = vadd.f32 %v2691_v0, %v11190_v2  ;;  %v2466_v8 = vmul.f32 %v11192_v51, %v2364_v45  ;;  %v2474_v61 = vmul.f32 %v11193_v24, %v2364_v45  ;;  %v11197_v32 = vld [vmem:[#allocation47_spill] sm:$0xff]  ;;  %v11198_v0 = vld [vmem:[#allocation22_spill] sm:$0xff] }
 0x272   : > { %11181 = vst [vmem:[#allocation26_spill] sm:$0xff] %v8747_v1  ;;  %v2482_v11 = vmul.f32 %v11194_v50, %v2364_v45  ;;  %v2498_v36 = vmul.f32 %v11192_v51, %v2383_v35  ;;  %v1738_v57 = vpack.c.bf16 %v11196_v5, %v11196_v5  ;;  %v8783_v35 = vpop.permute.xlu1 %3125  ;;  %v11204_v51 = vld [vmem:[#allocation15_spill] sm:$0xff]  ;;  %v11207_v2 = vpack.c.bf16 %v8389_v63, %v8389_v63 }
 0x273   : > { %11182 = vst [vmem:[#allocation52_spill] sm:$0xff] %v8750_v27  ;;  %v11206_v27 = vld [vmem:[#allocation48_spill] sm:$0xff] }
 0x274   : > { %11183 = vst [vmem:[#allocation30_spill] sm:$0xff] %v8753_v34  ;;  %v11195_v34 = vld [vmem:[#allocation14_spill] sm:$0xff]  ;;  %v8786_v5 = vadd.f32 %v2498_v36, %v11204_v51  ;;  %v1744_v54 = vpack.c.bf16 %v11206_v27, %v11206_v27  ;;  %v8804_v36 = vpop.permute.xlu2 %3127  ;;  %v2579_v27 = vpop.f32.mrf.mxu2  ;;  %v11211_v51 = vld [vmem:[#allocation13_spill] sm:$0xff] }
 0x275   : > { %11185 = vst [vmem:[#allocation53_spill] sm:$0xff] %v8756_v6  ;;  %v2490_v40 = vmul.f32 %v11195_v34, %v2364_v45  ;;  %v11202_v6 = vld [vmem:[#allocation8_spill] sm:$0xff]  ;;  %v2596_v34 = vpop.f32.mrf.mxu3  ;;  %v2610_v1 = vpop.f32.mrf.mxu0 }
 0x276   : > { %11187 = vst [vmem:[#allocation32_spill] sm:$0xff] %v8759_v41  ;;  %v11201_v41 = vld [vmem:[#allocation75_spill] sm:$0xff] }
 0x277   : > { %11189 = vst [vmem:[#allocation31_spill] sm:$0xff] %v8762_v30  ;;  %v11200_v30 = vld [vmem:[#allocation7_spill] sm:$0xff]  ;;  %v2486_v50 = vadd.f32 %v2482_v11, %v11201_v41  ;;  %v2494_v45 = vadd.f32 %v2490_v40, %v11202_v6  ;;  %v2699_v6 = vmul.f32 %v8737_v42, %v2596_v34  ;;  %v2715_v11 = vmul.f32 %v11178_v53, %v2596_v34  ;;  %v8825_v42 = vpop.permute.xlu0 %3111 }
 0x278   : > { %11191 = vst [vmem:[#allocation62_spill] sm:$0xff] %v8765_v49  ;;  %v2470_v49 = vadd.f32 %v2466_v8, %v11199_v16  ;;  %v2478_v24 = vadd.f32 %v2474_v61, %v11200_v30  ;;  %v8793_v8 = vunpack.c.l.b16 %v11207_v2  ;;  %v11208_v30 = vpack.c.bf16 %v8433_v39, %v8433_v39  ;;  %v8807_v16 = vld [vmem:[%s5366_s4 + $0x58] sm:$0xff]  ;;  %v11210_v2 = vld [vmem:[#allocation10_spill] sm:$0xff] }
 0x279   : > { %11203 = vst [vmem:[#allocation119_spill] sm:$0xff] %v8783_v35  ;;  %v2707_v61 = vmul.f32 %v11177_v19, %v2596_v34  ;;  %v2723_v40 = vmul.f32 %v11179_v20, %v2596_v34  ;;  %v2628_v63 = vmul.f32 %v8807_v16, %v2579_v27  ;;  %v2652_v39 = vmul.f32 %v11210_v2, %v2579_v27  ;;  %v11212_v35 = vld [vmem:[#allocation110_spill] sm:$0xff]  ;;  %v2806_v19 = vpop.f32.mrf.mxu1 }
 0x27a   : > { %11205 = vst [vmem:[#allocation120_spill] sm:$0xff] %v8786_v5  ;;  %v8798_v41 = vunpack.c.l.b16 %v11208_v30  ;;  %v2672_v30 = vmul.f32 %v11211_v51, %v2579_v27  ;;  %v2692_v5 = vmul.f32 %v11212_v35, %v2579_v27  ;;  %v8814_v53 = vadd.f32 %v2699_v6, %v8706_v43  ;;  %v8841_v6 = vld [vmem:[%s5366_s4 + $0x60] sm:$0xff] }
 0x27b   : > { %11209 = vst [vmem:[#allocation109_spill] sm:$0xff] %v8804_v36  ;;  %v8817_v20 = vadd.f32 %v2707_v61, %v8709_v48  ;;  %v8820_v34 = vadd.f32 %v2715_v11, %v8712_v37  ;;  %v8823_v36 = vadd.f32 %v2723_v40, %v8715_v44  ;;  %v8828_v28 = vadd.f32 %v2628_v63, %v8582_v29  ;;  %v11218_v61 = vld [vmem:[#allocation60_spill] sm:$0xff]  ;;  %v11220_v63 = vld [vmem:[#allocation63_spill] sm:$0xff] }
 0x27c   : > { %11213 = vst [vmem:[#allocation35_spill] sm:$0xff] %v8825_v42  ;;  %v8831_v27 = vadd.f32 %v2652_v39, %v8585_v25  ;;  %v8834_v43 = vadd.f32 %v2672_v30, %v8588_v58  ;;  %v8837_v48 = vadd.f32 %v2692_v5, %v8591_v17  ;;  %v2729_v37 = vmul.f32 %v8574_v15, %v2610_v1  ;;  %v11219_v40 = vld [vmem:[#allocation112_spill] sm:$0xff]  ;;  %v11224_v39 = vld [vmem:[#allocation46_spill] sm:$0xff] }
 0x27d   : > { %11214 = vst [vmem:[#allocation74_spill] sm:$0xff] %v8828_v28  ;;  %v2859_v44 = vmul.f32 %v8841_v6, %v2806_v19  ;;  %v2883_v11 = vmul.f32 %v11218_v61, %v2806_v19  ;;  %v2903_v29 = vmul.f32 %v11219_v40, %v2806_v19  ;;  %v2923_v42 = vmul.f32 %v11220_v63, %v2806_v19 }
 0x27e   : > { %11215 = vst [vmem:[#allocation54_spill] sm:$0xff] %v8831_v27  ;;  %v11221_v25 = vpack.c.bf16 %v8441_v18, %v8441_v18  ;;  %v11222_v17 = vpack.c.bf16 %v8445_v23, %v8445_v23  ;;  %v11223_v15 = vpack.c.bf16 %v8454_v56, %v8454_v56  ;;  %v8857_v30 = vadd.f32 %v2729_v37, %v11224_v39 }
 0x27f   : > { %11216 = vst [vmem:[#allocation33_spill] sm:$0xff] %v8834_v43  ;;  %v8863_v19 = vadd.f32 %v2883_v11, %v8598_v21  ;;  %v8866_v18 = vadd.f32 %v2903_v29, %v8601_v59  ;;  %v8869_v23 = vadd.f32 %v2923_v42, %v8604_v26  ;;  %v11229_v56 = vpack.c.bf16 %v8458_v38, %v8458_v38 }
 0x280   : > { %11217 = vst [vmem:[#allocation55_spill] sm:$0xff] %v8837_v48  ;;  %v3942_v58 = vunpack.c.l.b16 %v11221_v25  ;;  %v3943_v5 = vunpack.c.l.b16 %v11222_v17  ;;  %v3944_v1 = vunpack.c.l.b16 %v11223_v15  ;;  %v8860_v48 = vadd.f32 %v2859_v44, %v8595_v3  ;;  %v2598_v25 = vpop.f32.mrf.mxu3 }
 0x281   : > { %11226 = vst [vmem:[#allocation69_spill] sm:$0xff] %v8863_v19  ;;  %v3945_v17 = vunpack.c.l.b16 %v11229_v56  ;;  %v11230_v37 = vpack.c.bf16 %v8475_v31, %v8475_v31  ;;  %v11231_v3 = vpack.c.bf16 %v8479_v22, %v8479_v22  ;;  %v2700_v44 = vmul.f32 %v8807_v16, %v2598_v25 }
 0x282   : > { %11225 = vst [vmem:[#allocation34_spill] sm:$0xff] %v8860_v48  ;;  %v2708_v59 = vmul.f32 %v11210_v2, %v2598_v25  ;;  %v2716_v11 = vmul.f32 %v11211_v51, %v2598_v25  ;;  %v2724_v26 = vmul.f32 %v11212_v35, %v2598_v25  ;;  %v11232_v38 = vpack.c.bf16 %v11171_v46, %v11171_v46  ;;  %v8901_v25 = vpop.permute.xlu1 %3131  ;;  %v8903_v46 = vpop.permute.xlu2 %3145  ;;  %v11280_v48 = vld [vmem:[#allocation89_spill] sm:$0xff] }
 0x283   : > { %11227 = vst [vmem:[#allocation18_spill] sm:$0xff] %v8866_v18  ;;  %v3946_v15 = vunpack.c.l.b16 %v11230_v37  ;;  %v3947_v21 = vunpack.c.l.b16 %v11231_v3  ;;  %v11233_v31 = vpack.c.bf16 %v11172_v52, %v11172_v52  ;;  %v11234_v22 = vpack.c.bf16 %v11173_v13, %v11173_v13 }
 0x284   : > { %11228 = vst [vmem:[#allocation123_spill] sm:$0xff] %v8869_v23  ;;  %v3948_v42 = vunpack.c.l.b16 %v11232_v38  ;;  %v3951_v56 = vunpack.c.l.b16 %v1738_v57  ;;  %v8893_v37 = vadd.f32 %v2700_v44, %v2470_v49  ;;  %v8895_v2 = vadd.f32 %v2708_v59, %v2478_v24  ;;  %v8912_v44 = vpop.permute.xlu0 %3129 }
 0x285   : > { %v3949_v29 = vunpack.c.l.b16 %v11233_v31  ;;  %v3950_v39 = vunpack.c.l.b16 %v11234_v22  ;;  %v8897_v51 = vadd.f32 %v2716_v11, %v2486_v50  ;;  %v8899_v35 = vadd.f32 %v2724_v26, %v2494_v45  ;;  %11239 = vst [vmem:[#allocation37_spill] sm:$0xff] %v8901_v25 }
 0x286   : > { %11235 = vst [vmem:[#allocation111_spill] sm:$0xff] %v8893_v37  ;;  %v11241_v52 = vpack.c.bf16 %v11197_v32, %v11197_v32  ;;  %v11242_v13 = vpack.c.bf16 %v11198_v0, %v11198_v0  ;;  %v3954_v49 = vunpack.c.l.b16 %v1744_v54  ;;  %v4827_v24 = vunpack.i.l.s16 %v8703_v4 }
 0x287   : > { %11236 = vst [vmem:[#allocation61_spill] sm:$0xff] %v8895_v2  ;;  %v4828_v50 = vunpack.i.l.s16 %v8793_v8  ;;  %v4829_v45 = vunpack.i.l.s16 %v8798_v41  ;;  %v4830_v59 = vunpack.i.l.s16 %v3942_v58  ;;  %v4831_v11 = vunpack.i.l.s16 %v3943_v5 }
 0x288   : > { %11237 = vst [vmem:[#allocation36_spill] sm:$0xff] %v8897_v51  ;;  %v3952_v3 = vunpack.c.l.b16 %v11241_v52  ;;  %v3953_v57 = vunpack.c.l.b16 %v11242_v13  ;;  %v4832_v26 = vunpack.i.l.s16 %v3944_v1  ;;  %v4833_v38 = vunpack.i.l.s16 %v3945_v17  ;;  %v11285_v51 = vld [vmem:[#allocation108_spill] sm:$0xff] }
 0x289   : > { %11238 = vst [vmem:[#allocation56_spill] sm:$0xff] %v8899_v35  ;;  %v4834_v31 = vunpack.i.l.s16 %v3946_v15  ;;  %v4835_v32 = vunpack.i.l.s16 %v3947_v21  ;;  %v4836_v22 = vunpack.i.l.s16 %v3948_v42  ;;  %v4837_v52 = vunpack.i.l.s16 %v3949_v29  ;;  %v11283_v35 = vld [vmem:[#allocation107_spill] sm:$0xff] }
 0x28a   : > { %11240 = vst [vmem:[#allocation57_spill] sm:$0xff] %v8903_v46  ;;  %v4838_v25 = vunpack.i.l.s16 %v3950_v39  ;;  %v4839_v0 = vunpack.i.l.s16 %v3951_v56  ;;  %v4840_v13 = vunpack.i.l.s16 %v3952_v3  ;;  %v4841_v54 = vunpack.i.l.s16 %v3953_v57  ;;  %v8920_v57 = vpop.f32.mrf.mxu2  ;;  %v11281_v46 = vld [vmem:[#allocation106_spill] sm:$0xff] }
 0x28b   : > { %11243 = vst [vmem:[#allocation38_spill] sm:$0xff] %v8912_v44  ;;  %v4842_v23 = vunpack.i.l.s16 %v3954_v49  ;;  %v4035_v4 = vrot.slane %v4828_v50, 7  ;;  %v4037_v18 = vrot.slane %v4829_v45, 6  ;;  %v4039_v44 = vrot.slane %v4830_v59, 5  ;;  %v8922_v49 = vpop.f32.mrf.mxu3  ;;  %v8925_v50 = vld [vmem:[%s5366_s4 + $0x118] sm:$0xff]  ;;  %v11245_v59 = vld [vmem:[#allocation93_spill] sm:$0xff] }
 0x28c   : > { %v4041_v19 = vrot.slane %v4831_v11, 4  ;;  %v4043_v8 = vrot.slane %v4832_v26, 3  ;;  %v4045_v58 = vrot.slane %v4833_v38, 2  ;;  %v4047_v5 = vrot.slane %v4834_v31, 1  ;;  %4175 = vrot.lane.b32.xlu0 %v8925_v50, %s5217_s5  ;;  %v8935_v26 = vpop.f32.mrf.mxu0  ;;  %4195 = vrot.lane.b32.xlu1 %v8925_v50, %s5218_s6  ;;  %v11249_v31 = vld [vmem:[#allocation94_spill] sm:$0xff] }
 0x28d   : > { %v4036_v41 = vsel %vm1938_vm6, %v4035_v4, %v4827_v24  ;;  %v4049_v1 = vrot.slane %v4836_v22, 7  ;;  %v4051_v15 = vrot.slane %v4837_v52, 6  ;;  %v4053_v21 = vrot.slane %v4838_v25, 5  ;;  %v11246_v25 = vld [vmem:[#allocation77_spill] sm:$0xff]  ;;  %v11251_v22 = vld [vmem:[#allocation95_spill] sm:$0xff] }
 0x28e   : > { %v4038_v17 = vsel %vm1941_vm5, %v4037_v18, %v4036_v41  ;;  %v4055_v42 = vrot.slane %v4839_v0, 4  ;;  %v4057_v56 = vrot.slane %v4840_v13, 3  ;;  %v4059_v3 = vrot.slane %v4841_v54, 2  ;;  %v11252_v52 = vld [vmem:[#allocation79_spill] sm:$0xff]  ;;  %v8945_v13 = vpop.f32.mrf.mxu1  ;;  %v8947_v54 = vpop.permute.xlu2 %3151 }
 0x28f   : > { %v4040_v29 = vsel %vm1944_vm11, %v4039_v44, %v4038_v17  ;;  %v4050_v39 = vsel %vm1938_vm6, %v4049_v1, %v4835_v32  ;;  %v4061_v18 = vrot.slane %v4842_v23, 1  ;;  %v1682_v11 = vmul.f32 %v11246_v25, %v11245_v59  ;;  %v8931_v44 = vpop.permute.xlu1 %3149  ;;  %v11250_v23 = vld [vmem:[#allocation78_spill] sm:$0xff]  ;;  %11253 = vst [vmem:[#allocation39_spill] sm:$0xff] %v8947_v54  ;;  %v11256_v1 = vld [vmem:[#allocation96_spill] sm:$0xff] }
 0x290   : > { %v4042_v24 = vsel %vm11244_vm12, %v4041_v19, %v4040_v29  ;;  %v4052_v45 = vsel %vm1941_vm5, %v4051_v15, %v4050_v39  ;;  %11247 = vst [vmem:[#allocation58_spill] sm:$0xff] %v8931_v44  ;;  %v1684_v32 = vmul.f32 %v11250_v23, %v11249_v31  ;;  %v1686_v0 = vmul.f32 %v11252_v52, %v11251_v22  ;;  %v11257_v17 = vld [vmem:[#allocation80_spill] sm:$0xff]  ;;  %v11259_v29 = vld [vmem:[#allocation81_spill] sm:$0xff]  ;;  %v8955_v39 = vpop.permute.xlu0 %3147  ;;  %v11263_v25 = vld [vmem:[#allocation98_spill] sm:$0xff] }
 0x291   : > { %v4044_v38 = vsel %vm11248_vm10, %v4043_v8, %v4042_v24  ;;  %v4054_v19 = vsel %vm1944_vm11, %v4053_v21, %v4052_v45  ;;  %v1688_v15 = vmul.f32 %v11257_v17, %v11256_v1  ;;  %v11258_v8 = vld [vmem:[#allocation97_spill] sm:$0xff]  ;;  %11260 = vst [vmem:[#allocation59_spill] sm:$0xff] %v8955_v39  ;;  %v4861_v24 = vld [vmem:[%s5366_s4 + $0x110] sm:$0xff]  ;;  %v11265_v22 = vld [vmem:[#allocation99_spill] sm:$0xff]  ;;  %vm4269_vm12 = vcmask 261120  }
 0x292   : > { %v4046_v4 = vsel %vm11254_vm9, %v4045_v58, %v4044_v38  ;;  %v4056_v41 = vsel %vm11255_vm15, %v4055_v42, %v4054_v19  ;;  %v1690_v21 = vmul.f32 %v11259_v29, %v11258_v8  ;;  %v11264_v31 = vld [vmem:[#allocation82_spill] sm:$0xff]  ;;  %v11266_v58 = vld [vmem:[#allocation83_spill] sm:$0xff]  ;;  %4173 = vrot.lane.b32.xlu2 %v4861_v24, %s5217_s5  ;;  %v11268_v19 = vld [vmem:[#allocation100_spill] sm:$0xff]  ;;  %v1750_v2 = vpack.c.bf16 %v1686_v0, %v1686_v0 }
 0x293   : > { %v4048_v45 = vsel %vm11261_vm7, %v4047_v5, %v4046_v4  ;;  %v4058_v59 = vsel %vm11262_vm0, %v4057_v56, %v4056_v41  ;;  %v1692_v23 = vmul.f32 %v11264_v31, %v11263_v25  ;;  %v1694_v38 = vmul.f32 %v11266_v58, %v11265_v22  ;;  %v11269_v52 = vld [vmem:[#allocation84_spill] sm:$0xff]  ;;  %v11270_v17 = vld [vmem:[#allocation101_spill] sm:$0xff]  ;;  %v11272_v54 = vld [vmem:[#allocation102_spill] sm:$0xff] }
 0x294   : > { %v4060_v42 = vsel %vm11267_vm8, %v4059_v3, %v4058_v59  ;;  %v1696_v1 = vmul.f32 %v11269_v52, %v11268_v19  ;;  %v11271_v8 = vld [vmem:[#allocation85_spill] sm:$0xff]  ;;  %v11273_v5 = vld [vmem:[#allocation86_spill] sm:$0xff]  ;;  %v11275_v41 = vld [vmem:[#allocation103_spill] sm:$0xff]  ;;  %4193 = vrot.lane.b32.xlu0 %v4861_v24, %s5218_s6  ;;  %4213 = vrot.lane.b32.xlu1 %v4861_v24, %s5219_s26 }
 0x295   : > { %v1698_v29 = vmul.f32 %v11271_v8, %v11270_v17  ;;  %v1700_v4 = vmul.f32 %v11273_v5, %v11272_v54  ;;  %v4062_v56 = vsel %vm11274_vm4, %v4061_v18, %v4060_v42  ;;  %v11276_v25 = vld [vmem:[#allocation87_spill] sm:$0xff]  ;;  %v11277_v44 = vld [vmem:[#allocation104_spill] sm:$0xff]  ;;  %v11279_v39 = vld [vmem:[#allocation105_spill] sm:$0xff]  ;;  %v1746_v18 = vpack.c.bf16 %v1682_v11, %v1682_v11 }
 0x296   : > { %v1702_v31 = vmul.f32 %v11276_v25, %v11275_v41  ;;  %v11278_v22 = vld [vmem:[#allocation88_spill] sm:$0xff]  ;;  %v1706_v3 = vmul.f32 %v11280_v48, %v11279_v39  ;;  %v4091_v59 = vpack.c.b16 %v4062_v56, %v4048_v45  ;;  %v11282_v19 = vld [vmem:[#allocation90_spill] sm:$0xff]  ;;  %v11284_v17 = vld [vmem:[#allocation91_spill] sm:$0xff]  ;;  %v1748_v42 = vpack.c.bf16 %v1684_v32, %v1684_v32  ;;  %v8985_v25 = vpop.f32.mrf.mxu2  ;;  %v8993_v32 = vpop.f32.mrf.mxu1 }
 0x297   : > { %v1704_v58 = vmul.f32 %v11278_v22, %v11277_v44  ;;  %v1708_v52 = vmul.f32 %v11282_v19, %v11281_v46  ;;  %v1710_v8 = vmul.f32 %v11284_v17, %v11283_v35  ;;  %v11286_v54 = vld [vmem:[#allocation92_spill] sm:$0xff]  ;;  %v1752_v41 = vpack.c.bf16 %v1688_v15, %v1688_v15  ;;  %v8987_v44 = vpop.f32.mrf.mxu3  ;;  %v8989_v46 = vpop.permute.xlu1 %3341 }
 0x298   : > { %v1712_v5 = vmul.f32 %v11286_v54, %v11285_v51  ;;  %4103 = vmatmul.bf16.vlgmr.msra.gmra.mxu0 %v4091_v59  ;;  %v1754_v48 = vpack.c.bf16 %v1690_v21, %v1690_v21  ;;  %v1756_v39 = vpack.c.bf16 %v1692_v23, %v1692_v23  ;;  %v1758_v45 = vpack.c.bf16 %v1694_v38, %v1694_v38  ;;  %v8991_v22 = vpop.f32.mrf.mxu0  ;;  %v8995_v0 = vpop.permute.xlu2 %3343 }
 0x299   : > { %v1760_v56 = vpack.c.bf16 %v1696_v1, %v1696_v1  ;;  %11287 = vst [vmem:[#allocation43_spill] sm:$0xff] %v8989_v46  ;;  %v1762_v35 = vpack.c.bf16 %v1698_v29, %v1698_v29  ;;  %v1764_v19 = vpack.c.bf16 %v1700_v4, %v1700_v4  ;;  %v1766_v51 = vpack.c.bf16 %v1702_v31, %v1702_v31  ;;  %v8997_v23 = vpop.permute.xlu0 %3339 }
 0x29a   : > { %v1768_v11 = vpack.c.bf16 %v1704_v58, %v1704_v58  ;;  %4122 = vmatmul.bf16.vlgmr.msra.gmra.mxu1 %v4091_v59  ;;  %11288 = vst [vmem:[#allocation126_spill] sm:$0xff] %v8995_v0  ;;  %v1770_v15 = vpack.c.bf16 %v1706_v3, %v1706_v3  ;;  %v1772_v17 = vpack.c.bf16 %v1708_v52, %v1708_v52  ;;  %v3955_v38 = vunpack.c.l.b16 %v1746_v18  ;;  %v11290_v3 = vld [vmem:[#allocation70_spill] sm:$0xff] }
 0x29b   : > { %v1774_v54 = vpack.c.bf16 %v1710_v8, %v1710_v8  ;;  %v1776_v21 = vpack.c.bf16 %v1712_v5, %v1712_v5  ;;  %4141 = vmatmul.bf16.vlgmr.msra.gmra.mxu2 %v4091_v59  ;;  %11289 = vst [vmem:[#allocation9_spill] sm:$0xff] %v8997_v23  ;;  %v3956_v1 = vunpack.c.l.b16 %v1748_v42  ;;  %v3957_v46 = vunpack.c.l.b16 %v1750_v2  ;;  %4191 = vrot.lane.b32.xlu2 %v11290_v3, %s5218_s6 }
 0x29c   : > { %v3958_v37 = vunpack.c.l.b16 %v1752_v41  ;;  %v3959_v29 = vunpack.c.l.b16 %v1754_v48  ;;  %v3960_v4 = vunpack.c.l.b16 %v1756_v39  ;;  %v3961_v31 = vunpack.c.l.b16 %v1758_v45  ;;  %4211 = vrot.lane.b32.xlu0 %v11290_v3, %s5219_s26 }
 0x29d   : > { %v3962_v58 = vunpack.c.l.b16 %v1760_v56  ;;  %v3963_v52 = vunpack.c.l.b16 %v1762_v35  ;;  %v3964_v8 = vunpack.c.l.b16 %v1764_v19  ;;  %v3965_v59 = vunpack.c.l.b16 %v1766_v51 }
 0x29e   : > { %v3966_v5 = vunpack.c.l.b16 %v1768_v11  ;;  %v3967_v0 = vunpack.c.l.b16 %v1770_v15  ;;  %v3968_v18 = vunpack.c.l.b16 %v1772_v17  ;;  %v3969_v42 = vunpack.c.l.b16 %v1774_v54  ;;  %v9003_v24 = vpop.f32.mrf.mxu2  ;;  %v9011_v54 = vpop.f32.mrf.mxu1 }
 0x29f   : > { %v3970_v2 = vunpack.c.l.b16 %v1776_v21  ;;  %v4843_v41 = vunpack.i.l.s16 %v3955_v38  ;;  %v4844_v23 = vunpack.i.l.s16 %v3956_v1  ;;  %v4845_v43 = vunpack.i.l.s16 %v3957_v46  ;;  %v9005_v48 = vpop.f32.mrf.mxu3  ;;  %v9007_v35 = vpop.permute.xlu1 %3359 }
 0x2a0   : > { %v4846_v27 = vunpack.i.l.s16 %v3958_v37  ;;  %v4847_v39 = vunpack.i.l.s16 %v3959_v29  ;;  %v4848_v45 = vunpack.i.l.s16 %v3960_v4  ;;  %v4849_v56 = vunpack.i.l.s16 %v3961_v31  ;;  %11291 = vst [vmem:[#allocation67_spill] sm:$0xff] %v9007_v35  ;;  %v9009_v19 = vpop.f32.mrf.mxu0  ;;  %v9013_v46 = vpop.permute.xlu2 %3361 }
 0x2a1   : > { %v4850_v28 = vunpack.i.l.s16 %v3962_v58  ;;  %v4851_v51 = vunpack.i.l.s16 %v3963_v52  ;;  %v4852_v11 = vunpack.i.l.s16 %v3964_v8  ;;  %v4853_v15 = vunpack.i.l.s16 %v3965_v59  ;;  %v9015_v29 = vpop.permute.xlu0 %3345 }
 0x2a2   : > { %v4854_v17 = vunpack.i.l.s16 %v3966_v5  ;;  %v4855_v37 = vunpack.i.l.s16 %v3967_v0  ;;  %v4856_v21 = vunpack.i.l.s16 %v3968_v18  ;;  %v4857_v38 = vunpack.i.l.s16 %v3969_v42 }
 0x2a3   : > { %v4858_v1 = vunpack.i.l.s16 %v3970_v2  ;;  %v4063_v4 = vrot.slane %v4844_v23, 7  ;;  %v4065_v31 = vrot.slane %v4845_v43, 6  ;;  %v4067_v58 = vrot.slane %v4846_v27, 5  ;;  %4209 = vrot.lane.b32.xlu2 %v8540_v33, %s5219_s26 }
 0x2a4   : > { %v4069_v35 = vrot.slane %v4847_v39, 4  ;;  %v4071_v52 = vrot.slane %v4848_v45, 3  ;;  %v4073_v8 = vrot.slane %v4849_v56, 2  ;;  %v4075_v59 = vrot.slane %v4850_v28, 1 }
 0x2a5   : > { %v4077_v5 = vrot.slane %v4852_v11, 7  ;;  %v4064_v0 = vsel %vm1938_vm6, %v4063_v4, %v4843_v41  ;;  %v4079_v18 = vrot.slane %v4853_v15, 6  ;;  %v4081_v42 = vrot.slane %v4854_v17, 5 }
 0x2a6   : > { %v4083_v2 = vrot.slane %v4855_v37, 4  ;;  %v4066_v23 = vsel %vm1941_vm5, %v4065_v31, %v4064_v0  ;;  %v4085_v43 = vrot.slane %v4856_v21, 3  ;;  %v4087_v39 = vrot.slane %v4857_v38, 2  ;;  %v9028_v33 = vpop.f32.mrf.mxu2  ;;  %v9049_v31 = vpop.f32.mrf.mxu1 }
 0x2a7   : > { %v4078_v27 = vsel %vm1938_vm6, %v4077_v5, %v4851_v51  ;;  %v4068_v3 = vsel %vm1944_vm11, %v4067_v58, %v4066_v23  ;;  %v4089_v28 = vrot.slane %v4858_v1, 1  ;;  %v2931_v56 = vmul.f32 %v8841_v6, %v8920_v57  ;;  %v9030_v41 = vpop.f32.mrf.mxu3  ;;  %v9038_v37 = vpop.permute.xlu1 %3365  ;;  %vm11294_vm6 = vmmov %vm11262_vm0 }
 0x2a8   : > { %v4080_v45 = vsel %vm1941_vm5, %v4079_v18, %v4078_v27  ;;  %v4070_v11 = vsel %vm11292_vm1, %v4069_v35, %v4068_v3  ;;  %v2939_v51 = vmul.f32 %v11218_v61, %v8920_v57  ;;  %v2947_v17 = vmul.f32 %v11219_v40, %v8920_v57  ;;  %11293 = vst [vmem:[#allocation40_spill] sm:$0xff] %v9038_v37  ;;  %v9040_v21 = vpop.f32.mrf.mxu0  ;;  %vm11295_vm5 = vmmov %vm11292_vm1  ;;  %v9051_v61 = vpop.permute.xlu2 %3379  ;;  %v11304_v3 = vld [vmem:[#allocation50_spill] sm:$0xff] }
 0x2a9   : > { %v4082_v15 = vsel %vm1944_vm11, %v4081_v42, %v4080_v45  ;;  %v4072_v38 = vsel %vm11294_vm6, %v4071_v52, %v4070_v11  ;;  %v9045_v4 = vadd.f32 %v2931_v56, %v8663_v7  ;;  %v2955_v35 = vmul.f32 %v11220_v63, %v8920_v57  ;;  %11296 = vst [vmem:[#allocation127_spill] sm:$0xff] %v9051_v61  ;;  %vm11297_vm11 = vmmov %vm11267_vm8  ;;  %v9061_v0 = vpop.permute.xlu0 %3363  ;;  %v5170_v42 = vld [vmem:[%s5366_s4 + $0x68] sm:$0xff] }
 0x2aa   : > { %v4084_v1 = vsel %vm11295_vm5, %v4083_v2, %v4082_v15  ;;  %v4074_v40 = vsel %vm11297_vm11, %v4073_v8, %v4072_v38  ;;  %v9056_v5 = vadd.f32 %v2939_v51, %v8666_v60  ;;  %v9059_v52 = vadd.f32 %v2947_v17, %v8669_v9  ;;  %v11301_v2 = vld [vmem:[#allocation5_spill] sm:$0xff] }
 0x2ab   : > { %v4086_v58 = vsel %vm11298_vm3, %v4085_v43, %v4084_v1  ;;  %v4076_v7 = vsel %vm11076_vm2, %v4075_v59, %v4074_v40  ;;  %v9066_v57 = vadd.f32 %v2955_v35, %v8672_v10  ;;  %v2963_v8 = vmul.f32 %v8841_v6, %v8922_v49  ;;  %4215 = vrot.lane.b32.xlu2 %v8925_v50, %s5219_s26  ;;  %v11302_v6 = vld [vmem:[#allocation117_spill] sm:$0xff]  ;;  %v11308_v35 = vld [vmem:[#allocation26_spill] sm:$0xff] }
 0x2ac   : > { %v4088_v63 = vsel %vm11299_vm13, %v4087_v39, %v4086_v58  ;;  %v2730_v60 = vmul.f32 %v8656_v55, %v8935_v26  ;;  %v2860_v9 = vmul.f32 %v5170_v42, %v8945_v13  ;;  %v2884_v23 = vmul.f32 %v11301_v2, %v8945_v13  ;;  %v11303_v39 = vld [vmem:[#allocation24_spill] sm:$0xff]  ;;  %v11307_v51 = vld [vmem:[#allocation29_spill] sm:$0xff] }
 0x2ad   : > { %v4090_v18 = vsel %vm11300_vm14, %v4089_v28, %v4088_v63  ;;  %v9080_v10 = vadd.f32 %v2963_v8, %v8857_v30  ;;  %v2904_v49 = vmul.f32 %v11302_v6, %v8945_v13  ;;  %v2924_v27 = vmul.f32 %v8636_v12, %v8945_v13  ;;  %v11306_v28 = vld [vmem:[#allocation51_spill] sm:$0xff]  ;;  %v11309_v58 = vld [vmem:[#allocation52_spill] sm:$0xff]  ;;  %v5171_v63 = vld [vmem:[%s5366_s4 + $0x70] sm:$0xff] }
 0x2ae   : > { %v4092_v59 = vpack.c.b16 %v4090_v18, %v4076_v7  ;;  %v2734_v55 = vadd.f32 %v2730_v60, %v8639_v62  ;;  %v9088_v26 = vadd.f32 %v2860_v9, %v8675_v14  ;;  %v9091_v43 = vadd.f32 %v2884_v23, %v8678_v47  ;;  %v9104_v62 = vpop.f32.mrf.mxu2  ;;  %v11312_v18 = vld [vmem:[#allocation30_spill] sm:$0xff]  ;;  %v11314_v23 = vld [vmem:[#allocation68_spill] sm:$0xff] }
 0x2af   : > { %v2932_v50 = vmul.f32 %v5170_v42, %v8985_v25  ;;  %v9095_v30 = vadd.f32 %v2904_v49, %v11303_v39  ;;  %v9098_v45 = vadd.f32 %v2924_v27, %v11304_v3  ;;  %v2940_v13 = vmul.f32 %v11301_v2, %v8985_v25  ;;  %v9106_v47 = vpop.f32.mrf.mxu3  ;;  %v9116_v38 = vpop.permute.xlu1 %3383  ;;  %v11313_v9 = vld [vmem:[#allocation114_spill] sm:$0xff]  ;;  %v11315_v27 = vld [vmem:[#allocation53_spill] sm:$0xff]  ;;  %v11317_v3 = vld [vmem:[#allocation28_spill] sm:$0xff] }
 0x2b0   : > { %4108 = vmatmul.bf16.vlgmr.msra.gmra.mxu3 %v4092_v59  ;;  %v2948_v14 = vmul.f32 %v11302_v6, %v8985_v25  ;;  %11305 = vst [vmem:[#allocation128_spill] sm:$0xff] %v9106_v47  ;;  %v2956_v11 = vmul.f32 %v8636_v12, %v8985_v25  ;;  %v2964_v15 = vmul.f32 %v5170_v42, %v8987_v44  ;;  %v9118_v1 = vpop.f32.mrf.mxu0  ;;  %v11310_v12 = vld [vmem:[#allocation113_spill] sm:$0xff]  ;;  %v9130_v44 = vpop.f32.mrf.mxu1 }
 0x2b1   : > { %v9109_v56 = vadd.f32 %v2932_v50, %v11306_v28  ;;  %v2731_v17 = vmul.f32 %v11307_v51, %v8991_v22  ;;  %4127 = vmatmul.bf16.gmra.mxu1 %v4092_v59  ;;  %v9121_v40 = vadd.f32 %v2940_v13, %v11308_v35  ;;  %v2861_v8 = vmul.f32 %v5171_v63, %v8993_v32  ;;  %v9132_v22 = vpop.permute.xlu2 %3385  ;;  %v9142_v49 = vpop.permute.xlu0 %3381 }
 0x2b2   : > { %v9124_v7 = vadd.f32 %v2948_v14, %v11309_v58  ;;  %v2885_v25 = vmul.f32 %v11310_v12, %v8993_v32  ;;  %4146 = vmatmul.bf16.gmra.mxu2 %v4092_v59  ;;  %11311 = vst [vmem:[#allocation129_spill] sm:$0xff] %v9132_v22  ;;  %v9135_v60 = vadd.f32 %v2956_v11, %v11312_v18  ;;  %v11316_v59 = vld [vmem:[#allocation32_spill] sm:$0xff]  ;;  %v11318_v14 = vld [vmem:[#allocation31_spill] sm:$0xff] }
 0x2b3   : > { %v9137_v42 = vadd.f32 %v2964_v15, %v2734_v55  ;;  %v2735_v2 = vadd.f32 %v2731_v17, %v11313_v9  ;;  %v2905_v6 = vmul.f32 %v11314_v23, %v8993_v32  ;;  %v9145_v50 = vadd.f32 %v2861_v8, %v11315_v27  ;;  %v11319_v17 = vld [vmem:[#allocation62_spill] sm:$0xff] }
 0x2b4   : > { %v9148_v39 = vadd.f32 %v2885_v25, %v11316_v59  ;;  %v2925_v13 = vmul.f32 %v11317_v3, %v8993_v32  ;;  %v2933_v55 = vmul.f32 %v5171_v63, %v9003_v24  ;;  %v2941_v11 = vmul.f32 %v11310_v12, %v9003_v24  ;;  %v11324_v27 = vld [vmem:[#allocation74_spill] sm:$0xff]  ;;  %v11325_v59 = vld [vmem:[#allocation49_spill] sm:$0xff] }
 0x2b5   : > { %v9154_v28 = vadd.f32 %v2905_v6, %v11318_v14  ;;  %v2949_v15 = vmul.f32 %v11314_v23, %v9003_v24  ;;  %v2957_v51 = vmul.f32 %v11317_v3, %v9003_v24  ;;  %v2965_v32 = vmul.f32 %v5171_v63, %v9005_v48  ;;  %v5172_v24 = vld [vmem:[%s5366_s4 + $0x78] sm:$0xff]  ;;  %v11321_v48 = vld [vmem:[#allocation65_spill] sm:$0xff] }
 0x2b6   : > { %v9163_v35 = vadd.f32 %v2925_v13, %v11319_v17  ;;  %v9166_v58 = vadd.f32 %v2933_v55, %v8814_v53  ;;  %v2732_v8 = vmul.f32 %v8807_v16, %v9009_v19  ;;  %v9172_v25 = vadd.f32 %v2941_v11, %v8817_v20  ;;  %v11320_v53 = vld [vmem:[#allocation120_spill] sm:$0xff]  ;;  %v11322_v16 = vld [vmem:[#allocation121_spill] sm:$0xff]  ;;  %v9189_v19 = vpop.f32.mrf.mxu2  ;;  %v11327_v11 = vld [vmem:[#allocation54_spill] sm:$0xff] }
 0x2b7   : > { %v9175_v12 = vadd.f32 %v2949_v15, %v8820_v34  ;;  %v9178_v18 = vadd.f32 %v2957_v51, %v8823_v36  ;;  %v2862_v9 = vmul.f32 %v5172_v24, %v9011_v54  ;;  %v9182_v23 = vadd.f32 %v2965_v32, %v2735_v2  ;;  %v9191_v34 = vpop.f32.mrf.mxu3  ;;  %v9201_v55 = vpop.permute.xlu1 %3575  ;;  %v11328_v51 = vld [vmem:[#allocation33_spill] sm:$0xff] }
 0x2b8   : > { %v2736_v6 = vadd.f32 %v2732_v8, %v11320_v53  ;;  %v2886_v63 = vmul.f32 %v11321_v48, %v9011_v54  ;;  %v2906_v20 = vmul.f32 %v11322_v16, %v9011_v54  ;;  %11323 = vst [vmem:[#allocation130_spill] sm:$0xff] %v9191_v34  ;;  %v2926_v3 = vmul.f32 %v11325_v59, %v9011_v54  ;;  %v9203_v14 = vpop.f32.mrf.mxu0  ;;  %v9215_v8 = vpop.f32.mrf.mxu1  ;;  %v11330_v53 = vld [vmem:[#allocation55_spill] sm:$0xff] }
 0x2b9   : > { %v9194_v36 = vadd.f32 %v2862_v9, %v11324_v27  ;;  %v2934_v2 = vmul.f32 %v5172_v24, %v9028_v33  ;;  %v2942_v13 = vmul.f32 %v11321_v48, %v9028_v33  ;;  %11326 = vst [vmem:[#allocation41_spill] sm:$0xff] %v9201_v55  ;;  %v2950_v32 = vmul.f32 %v11322_v16, %v9028_v33  ;;  %v9217_v9 = vpop.permute.xlu2 %3577  ;;  %v11331_v27 = vld [vmem:[#allocation111_spill] sm:$0xff]  ;;  %v11334_v16 = vld [vmem:[#allocation36_spill] sm:$0xff] }
 0x2ba   : > { %v9206_v15 = vadd.f32 %v2886_v63, %v11327_v11  ;;  %v9209_v17 = vadd.f32 %v2906_v20, %v11328_v51  ;;  %v2958_v54 = vmul.f32 %v11325_v59, %v9028_v33  ;;  %11329 = vst [vmem:[#allocation4_spill] sm:$0xff] %v9217_v9  ;;  %v9220_v48 = vadd.f32 %v2926_v3, %v11330_v53  ;;  %v11332_v63 = vld [vmem:[#allocation61_spill] sm:$0xff]  ;;  %v9229_v51 = vpop.permute.xlu0 %3573  ;;  %v11335_v33 = vld [vmem:[#allocation56_spill] sm:$0xff]  ;;  %v11337_v53 = vld [vmem:[#allocation115_spill] sm:$0xff] }
 0x2bb   : > { %v9223_v55 = vadd.f32 %v2934_v2, %v11331_v27  ;;  %v9226_v11 = vadd.f32 %v2942_v13, %v11332_v63  ;;  %v2966_v20 = vmul.f32 %v5172_v24, %v9030_v41  ;;  %11333 = vst [vmem:[#allocation76_spill] sm:$0xff] %v9229_v51  ;;  %v9232_v61 = vadd.f32 %v2950_v32, %v11334_v16  ;;  %v5173_v9 = vld [vmem:[%s5366_s4 + $0x80] sm:$0xff]  ;;  %v11339_v13 = vld [vmem:[#allocation119_spill] sm:$0xff]  ;;  %v11340_v41 = vld [vmem:[#allocation57_spill] sm:$0xff] }
 0x2bc   : > { %v9235_v59 = vadd.f32 %v2958_v54, %v11335_v33  ;;  %v3093_v3 = vmul.f32 %v5173_v9, %v9040_v21  ;;  %v3117_v2 = vmul.f32 %v11337_v53, %v9040_v21  ;;  %v3137_v63 = vmul.f32 %v11339_v13, %v9040_v21  ;;  %v11341_v16 = vld [vmem:[#allocation34_spill] sm:$0xff]  ;;  %v11343_v54 = vld [vmem:[#allocation69_spill] sm:$0xff] }
 0x2bd   : > { %v9241_v27 = vadd.f32 %v2966_v20, %v2736_v6  ;;  %v3157_v24 = vmul.f32 %v11340_v41, %v9040_v21  ;;  %v3165_v32 = vmul.f32 %v5173_v9, %v9049_v31  ;;  %v3173_v22 = vmul.f32 %v11337_v53, %v9049_v31  ;;  %v11344_v20 = vld [vmem:[#allocation18_spill] sm:$0xff] }
 0x2be   : > { %11336 = vst [vmem:[#allocation42_spill] sm:$0xff] %v9235_v59  ;;  %v9249_v51 = vadd.f32 %v3093_v3, %v11341_v16  ;;  %v3121_v33 = vadd.f32 %v3117_v2, %v11343_v54  ;;  %v3181_v6 = vmul.f32 %v11339_v13, %v9049_v31  ;;  %v3141_v37 = vadd.f32 %v3137_v63, %v11344_v20  ;;  %v3083_v13 = vpop.f32.mrf.mxu2 }
 0x2bf   : > { %11338 = vst [vmem:[#allocation27_spill] sm:$0xff] %v9241_v27  ;;  %v11345_v27 = vld [vmem:[#allocation123_spill] sm:$0xff]  ;;  %v9261_v21 = vadd.f32 %v3165_v32, %v9045_v4  ;;  %v3189_v3 = vmul.f32 %v11340_v41, %v9049_v31  ;;  %v9266_v2 = vadd.f32 %v3173_v22, %v9056_v5  ;;  %v3197_v16 = vmul.f32 %v5173_v9, %v9104_v62  ;;  %v9272_v54 = vpop.f32.mrf.mxu3  ;;  %v11348_v4 = vld [vmem:[#allocation9_spill] sm:$0xff] }
 0x2c0   : > { %11342 = vst [vmem:[#allocation71_spill] sm:$0xff] %v9249_v51  ;;  %v9258_v59 = vadd.f32 %v3157_v24, %v11345_v27  ;;  %v9269_v53 = vadd.f32 %v3181_v6, %v9059_v52  ;;  %v3351_v63 = vmul.f32 %v11348_v4, %v9106_v47  ;;  %v11349_v24 = vld [vmem:[#allocation67_spill] sm:$0xff]  ;;  %v9281_v41 = vpop.f32.mrf.mxu0  ;;  %v5174_v52 = vld [vmem:[%s5366_s4 + $0x88] sm:$0xff]  ;;  %v9290_v32 = vpop.f32.mrf.mxu1 }
 0x2c1   : > { %11347 = vst [vmem:[#allocation17_spill] sm:$0xff] %v9261_v21  ;;  %v9275_v27 = vadd.f32 %v3189_v3, %v9066_v57  ;;  %v3371_v31 = vmul.f32 %v11349_v24, %v9106_v47  ;;  %v9284_v5 = vadd.f32 %v3197_v16, %v9080_v10  ;;  %v3094_v62 = vmul.f32 %v5174_v52, %v9118_v1  ;;  %v11351_v22 = vld [vmem:[#allocation25_spill] sm:$0xff]  ;;  %v9292_v57 = vpop.permute.xlu2 %3595  ;;  %v11355_v10 = vld [vmem:[#allocation59_spill] sm:$0xff]  ;;  %v9302_v51 = vpop.permute.xlu1 %3593 }
 0x2c2   : > { %11346 = vst [vmem:[#allocation12_spill] sm:$0xff] %v9258_v59  ;;  %v3118_v9 = vmul.f32 %v11351_v22, %v9118_v1  ;;  %v9294_v6 = vadd.f32 %v3351_v63, %v3121_v33  ;;  %v11354_v3 = vld [vmem:[#allocation109_spill] sm:$0xff]  ;;  %v3158_v16 = vmul.f32 %v11355_v10, %v9118_v1  ;;  %v9304_v59 = vpop.permute.xlu0 %3579  ;;  %v3166_v33 = vmul.f32 %v5174_v52, %v9130_v44 }
 0x2c3   : > { %11350 = vst [vmem:[#allocation116_spill] sm:$0xff] %v9284_v5  ;;  %v9296_v20 = vadd.f32 %v3371_v31, %v3141_v37  ;;  %v3138_v21 = vmul.f32 %v11354_v3, %v9118_v1  ;;  %v9307_v47 = vadd.f32 %v3094_v62, %v9088_v26  ;;  %v3174_v37 = vmul.f32 %v11351_v22, %v9130_v44 }
 0x2c4   : > { %11352 = vst [vmem:[#allocation118_spill] sm:$0xff] %v9294_v6  ;;  %v3122_v5 = vadd.f32 %v3118_v9, %v9091_v43  ;;  %v9315_v31 = vadd.f32 %v3158_v16, %v9098_v45  ;;  %v3182_v1 = vmul.f32 %v11354_v3, %v9130_v44  ;;  %v3190_v26 = vmul.f32 %v11355_v10, %v9130_v44  ;;  %v11360_v45 = vld [vmem:[#allocation43_spill] sm:$0xff] }
 0x2c5   : > { %11353 = vst [vmem:[#allocation44_spill] sm:$0xff] %v9296_v20  ;;  %v3142_v63 = vadd.f32 %v3138_v21, %v9095_v30  ;;  %v9322_v62 = vadd.f32 %v3166_v33, %v9109_v56  ;;  %v9325_v43 = vadd.f32 %v3174_v37, %v9121_v40  ;;  %v3198_v9 = vmul.f32 %v5174_v52, %v9189_v19  ;;  %v5175_v19 = vld [vmem:[%s5366_s4 + $0x90] sm:$0xff]  ;;  %v11362_v16 = vld [vmem:[#allocation11_spill] sm:$0xff] }
 0x2c6   : > { %11356 = vst [vmem:[#allocation19_spill] sm:$0xff] %v9302_v51  ;;  %v9329_v22 = vadd.f32 %v3182_v1, %v9124_v7  ;;  %v9332_v30 = vadd.f32 %v3190_v26, %v9135_v60  ;;  %v3352_v21 = vmul.f32 %v11360_v45, %v9191_v34  ;;  %v3372_v44 = vmul.f32 %v9013_v46, %v9191_v34  ;;  %v3085_v52 = vpop.f32.mrf.mxu2 }
 0x2c7   : > { %11357 = vst [vmem:[#allocation6_spill] sm:$0xff] %v9307_v47  ;;  %v9339_v56 = vadd.f32 %v3198_v9, %v9137_v42  ;;  %v9343_v40 = vmul.f32 %v9142_v49, %v9191_v34  ;;  %v3095_v7 = vmul.f32 %v5175_v19, %v9203_v14  ;;  %v9347_v3 = vpop.f32.mrf.mxu3  ;;  %v3119_v33 = vmul.f32 %v11362_v16, %v9203_v14  ;;  %v11363_v42 = vld [vmem:[#allocation38_spill] sm:$0xff] }
 0x2c8   : > { %11358 = vst [vmem:[#allocation125_spill] sm:$0xff] %v9315_v31  ;;  %v9349_v60 = vadd.f32 %v3352_v21, %v3122_v5  ;;  %v9351_v10 = vadd.f32 %v3372_v44, %v3142_v63  ;;  %v3139_v37 = vmul.f32 %v11363_v42, %v9203_v14  ;;  %v9357_v1 = vpop.f32.mrf.mxu0  ;;  %v11365_v9 = vld [vmem:[#allocation58_spill] sm:$0xff]  ;;  %v3167_v6 = vmul.f32 %v5175_v19, %v9215_v8  ;;  %v3312_v63 = vpop.f32.mrf.mxu1 }
 0x2c9   : > { %11359 = vst [vmem:[#allocation66_spill] sm:$0xff] %v9322_v62  ;;  %v3099_v26 = vadd.f32 %v3095_v7, %v9145_v50  ;;  %v3159_v20 = vmul.f32 %v11365_v9, %v9203_v14  ;;  %v3175_v5 = vmul.f32 %v11362_v16, %v9215_v8  ;;  %v9365_v21 = vpop.permute.xlu2 %3613  ;;  %v3123_v44 = vadd.f32 %v3119_v33, %v9148_v39 }
 0x2ca   : > { %11361 = vst [vmem:[#allocation16_spill] sm:$0xff] %v9343_v40  ;;  %v3143_v62 = vadd.f32 %v3139_v37, %v9154_v28  ;;  %v3183_v47 = vmul.f32 %v11363_v42, %v9215_v8  ;;  %v3191_v50 = vmul.f32 %v11365_v9, %v9215_v8  ;;  %v9373_v14 = vpop.permute.xlu0 %3597  ;;  %v9377_v16 = vadd.f32 %v3167_v6, %v9166_v58  ;;  %v9389_v42 = vld [vmem:[%s5366_s4 + $0xb0] sm:$0xff]  ;;  %v9395_v58 = vpop.permute.xlu1 %3599  ;;  %v11368_v37 = vld [vmem:[#allocation35_spill] sm:$0xff] }
 0x2cb   : > { %11364 = vst [vmem:[#allocation72_spill] sm:$0xff] %v9357_v1  ;;  %v3163_v7 = vadd.f32 %v3159_v20, %v9163_v35  ;;  %v9380_v34 = vadd.f32 %v3175_v5, %v9172_v25  ;;  %v3199_v39 = vmul.f32 %v5175_v19, %v3083_v13  ;;  %v3329_v8 = vmul.f32 %v9389_v42, %v9272_v54  ;;  %v11367_v35 = vld [vmem:[#allocation126_spill] sm:$0xff]  ;;  %v11369_v5 = vld [vmem:[#allocation37_spill] sm:$0xff] }
 0x2cc   : > { %11366 = vst [vmem:[#allocation73_spill] sm:$0xff] %v9365_v21  ;;  %v9383_v28 = vadd.f32 %v3183_v47, %v9175_v12  ;;  %v9386_v33 = vadd.f32 %v3191_v50, %v9178_v18  ;;  %v3353_v20 = vmul.f32 %v11367_v35, %v9272_v54  ;;  %v3373_v47 = vmul.f32 %v9061_v0, %v9272_v54  ;;  %v5177_v18 = vld [vmem:[%s5366_s4 + $0x98] sm:$0xff] }
 0x2cd   : > { %v9398_v25 = vadd.f32 %v3199_v39, %v9182_v23  ;;  %v3393_v12 = vmul.f32 %v9116_v38, %v9272_v54  ;;  %v3096_v13 = vmul.f32 %v5177_v18, %v9281_v41  ;;  %v9406_v6 = vadd.f32 %v3329_v8, %v3099_v26  ;;  %v11371_v54 = vld [vmem:[#allocation39_spill] sm:$0xff] }
 0x2ce   : > { %v9408_v19 = vadd.f32 %v3353_v20, %v3123_v44  ;;  %v3120_v9 = vmul.f32 %v11368_v37, %v9281_v41  ;;  %v3140_v23 = vmul.f32 %v11369_v5, %v9281_v41  ;;  %v9414_v50 = vadd.f32 %v3373_v47, %v3143_v62  ;;  %v9421_v26 = vpop.f32.mrf.mxu2 }
 0x2cf   : > { %v9416_v39 = vadd.f32 %v3393_v12, %v3163_v7  ;;  %v3100_v21 = vadd.f32 %v3096_v13, %v9194_v36  ;;  %v3160_v40 = vmul.f32 %v11371_v54, %v9281_v41  ;;  %11372 = vst [vmem:[#allocation20_spill] sm:$0xff] %v9421_v26  ;;  %v9423_v44 = vpop.f32.mrf.mxu3  ;;  %v3168_v31 = vmul.f32 %v5177_v18, %v9290_v32  ;;  %v11377_v26 = vld [vmem:[#allocation129_spill] sm:$0xff] }
 0x2d0   : > { %v3124_v8 = vadd.f32 %v3120_v9, %v9206_v15  ;;  %v3144_v20 = vadd.f32 %v3140_v23, %v9209_v17  ;;  %v3176_v62 = vmul.f32 %v11368_v37, %v9290_v32  ;;  %v9430_v7 = vpop.f32.mrf.mxu0  ;;  %v3184_v41 = vmul.f32 %v11369_v5, %v9290_v32  ;;  %v3314_v13 = vpop.f32.mrf.mxu1  ;;  %v9446_v37 = vld [vmem:[%s5366_s4 + $0xb8] sm:$0xff] }
 0x2d1   : > { %11370 = vst [vmem:[#allocation45_spill] sm:$0xff] %v9416_v39  ;;  %v3164_v36 = vadd.f32 %v3160_v40, %v9220_v48  ;;  %v3192_v47 = vmul.f32 %v11371_v54, %v9290_v32  ;;  %v3200_v12 = vmul.f32 %v5177_v18, %v3085_v52  ;;  %v9437_v15 = vpop.permute.xlu2 %3619  ;;  %v9440_v17 = vadd.f32 %v3168_v31, %v9223_v55  ;;  %v11374_v18 = vld [vmem:[#allocation42_spill] sm:$0xff]  ;;  %v11375_v55 = vld [vmem:[#allocation27_spill] sm:$0xff] }
 0x2d2   : > { %11373 = vst [vmem:[#allocation23_spill] sm:$0xff] %v9437_v15  ;;  %v9443_v9 = vadd.f32 %v3176_v62, %v9226_v11  ;;  %v3330_v48 = vmul.f32 %v9446_v37, %v9347_v3  ;;  %v3354_v40 = vmul.f32 %v9015_v29, %v9347_v3  ;;  %v3616_v32 = vpop.permute.xlu0 %3615  ;;  %v9453_v52 = vadd.f32 %v3184_v41, %v9232_v61  ;;  %v11376_v11 = vld [vmem:[#allocation40_spill] sm:$0xff] }
 0x2d3   : > { %v9456_v5 = vadd.f32 %v3192_v47, %v11374_v18  ;;  %v9459_v31 = vadd.f32 %v3200_v12, %v11375_v55  ;;  %v3374_v23 = vmul.f32 %v11376_v11, %v9347_v3  ;;  %v3394_v39 = vmul.f32 %v11377_v26, %v9347_v3  ;;  %v11378_v47 = vld [vmem:[#allocation127_spill] sm:$0xff]  ;;  %v11379_v55 = vld [vmem:[#allocation116_spill] sm:$0xff] }
 0x2d4   : > { %v9463_v54 = vadd.f32 %v3330_v48, %v3100_v21  ;;  %v9465_v62 = vadd.f32 %v3354_v40, %v3124_v8  ;;  %v3407_v61 = vmul.f32 %v11348_v4, %v9357_v1  ;;  %v3415_v41 = vmul.f32 %v11349_v24, %v9357_v1  ;;  %v9480_v21 = vld [vmem:[%s5366_s4 + $0xa0] sm:$0xff]  ;;  %v3618_v48 = vpop.permute.xlu1 %3617 }
 0x2d5   : > { %v9469_v15 = vadd.f32 %v3374_v23, %v3144_v20  ;;  %v3423_v12 = vmul.f32 %v11378_v47, %v9357_v1  ;;  %v9477_v18 = vadd.f32 %v3394_v39, %v3164_v36  ;;  %v3431_v8 = vmul.f32 %v9480_v21, %v3312_v63  ;;  %v11381_v23 = vld [vmem:[#allocation76_spill] sm:$0xff] }
 0x2d6   : > { %v3411_v3 = vadd.f32 %v3407_v61, %v9266_v2  ;;  %v3419_v20 = vadd.f32 %v3415_v41, %v9269_v53  ;;  %v9488_v4 = vpop.f32.mrf.mxu2  ;;  %v3641_v63 = vmul.f32 %v11381_v23, %v9423_v44  ;;  %v3649_v2 = vmul.f32 %v9302_v51, %v9423_v44  ;;  %v9515_v51 = vld [vmem:[%s5366_s4 + $0xa8] sm:$0xff] }
 0x2d7   : > { %v9486_v40 = vadd.f32 %v3423_v12, %v9275_v27  ;;  %v9490_v24 = vpop.f32.mrf.mxu3  ;;  %v9493_v39 = vadd.f32 %v3431_v8, %v11379_v55  ;;  %v3408_v53 = vmul.f32 %v11360_v45, %v9430_v7  ;;  %v3416_v8 = vmul.f32 %v9013_v46, %v9430_v7 }
 0x2d8   : > { %v3298_v36 = vpop.f32.mrf.mxu0  ;;  %v3317_v27 = vpop.f32.mrf.mxu1  ;;  %v9505_v12 = vadd.f32 %v3641_v63, %v3411_v3  ;;  %v9507_v1 = vadd.f32 %v3649_v2, %v3419_v20  ;;  %v3432_v23 = vmul.f32 %v9515_v51, %v3314_v13  ;;  %v3606_v20 = vmul.f32 %v9292_v57, %v9488_v4 }
 0x2d9   : > { %11380 = vst [vmem:[#allocation122_spill] sm:$0xff] %v9493_v39  ;;  %v9499_v61 = vpop.permute.xlu2 %3811  ;;  %v3412_v55 = vadd.f32 %v3408_v53, %v9325_v43  ;;  %v3424_v39 = vmul.f32 %v9142_v49, %v9430_v7  ;;  %v3420_v45 = vadd.f32 %v3416_v8, %v9329_v22  ;;  %v9530_v49 = vmul.f32 %v3616_v32, %v9488_v4 }
 0x2da   : > { %v9503_v41 = vpop.permute.xlu0 %3807  ;;  %11383 = vst [vmem:[#allocation14_spill] sm:$0xff] %v9505_v12  ;;  %v9527_v46 = vadd.f32 %v3432_v23, %v9339_v56  ;;  %v9536_v22 = vadd.f32 %v3606_v20, %v9351_v10  ;;  %v9545_v56 = vmul.f32 %v3616_v32, %v9490_v24  ;;  %v3409_v10 = vmul.f32 %v11367_v35, %v3298_v36 }
 0x2db   : > { %11382 = vst [vmem:[#allocation124_spill] sm:$0xff] %v9503_v41  ;;  %v11384_v41 = vld [vmem:[#allocation41_spill] sm:$0xff]  ;;  %v9524_v63 = vadd.f32 %v3424_v39, %v9332_v30  ;;  %v3650_v30 = vmul.f32 %v9292_v57, %v9490_v24  ;;  %v3417_v8 = vmul.f32 %v9061_v0, %v3298_v36  ;;  %v3433_v32 = vmul.f32 %v9389_v42, %v3317_v27 }
 0x2dc   : > { %v3586_v3 = vmul.f32 %v11384_v41, %v9488_v4  ;;  %11385 = vst [vmem:[#allocation21_spill] sm:$0xff] %v9527_v46  ;;  %v3642_v13 = vmul.f32 %v11384_v41, %v9490_v24  ;;  %v9547_v39 = vpop.permute.xlu1 %3809  ;;  %v3425_v41 = vmul.f32 %v9116_v38, %v3298_v36  ;;  %v9564_v46 = vld [vmem:[%s5366_s4 + $0xd0] sm:$0xff]  ;;  %v3413_v35 = vadd.f32 %v3409_v10, %v9380_v34 }
 0x2dd   : > { %v9557_v20 = vadd.f32 %v3650_v30, %v3420_v45  ;;  %11388 = vst [vmem:[#allocation64_spill] sm:$0xff] %v9564_v46  ;;  %v3421_v0 = vadd.f32 %v3417_v8, %v9383_v28 }
 0x2de   : > { %v9533_v43 = vadd.f32 %v3586_v3, %v9349_v60  ;;  %v3513_v2 = vpop.f32.mrf.mxu2  ;;  %v3401_v60 = vmul.f32 %v9389_v42, %v3298_v36  ;;  %v9550_v23 = vadd.f32 %v3642_v13, %v3412_v55  ;;  %v3429_v38 = vadd.f32 %v3425_v41, %v9386_v33  ;;  %v11389_v36 = vld [vmem:[#allocation4_spill] sm:$0xff] }
 0x2df   : > { %v9540_v53 = vpop.f32.mrf.mxu3  ;;  %v3563_v55 = vmul.f32 %v9564_v46, %v3513_v2  ;;  %v3587_v12 = vmul.f32 %v11389_v36, %v3513_v2  ;;  %v3607_v27 = vmul.f32 %v9373_v14, %v3513_v2  ;;  %v3627_v30 = vmul.f32 %v3618_v48, %v3513_v2  ;;  %v11430_v46 = vld [vmem:[#allocation20_spill] sm:$0xff] }
 0x2e0   : > { %11386 = vst [vmem:[#allocation47_spill] sm:$0xff] %v9540_v53  ;;  %v9560_v57 = vadd.f32 %v3401_v60, %v9377_v16  ;;  %v3300_v13 = vpop.f32.mrf.mxu0  ;;  %v9574_v16 = vadd.f32 %v3433_v32, %v9398_v25  ;;  %v3319_v60 = vpop.f32.mrf.mxu1  ;;  %v3643_v28 = vmul.f32 %v11389_v36, %v9540_v53  ;;  %v3651_v33 = vmul.f32 %v9373_v14, %v9540_v53  ;;  %v11399_v36 = vld [vmem:[#allocation128_spill] sm:$0xff] }
 0x2e1   : > { %v9555_v3 = vpop.permute.xlu2 %3829  ;;  %v9577_v42 = vadd.f32 %v3563_v55, %v9406_v6  ;;  %v9581_v34 = vadd.f32 %v3587_v12, %v9408_v19  ;;  %v9588_v25 = vadd.f32 %v3607_v27, %v9414_v50  ;;  %v3659_v6 = vmul.f32 %v3618_v48, %v9540_v53  ;;  %v11432_v53 = vld [vmem:[#allocation19_spill] sm:$0xff] }
 0x2e2   : > { %11387 = vst [vmem:[#allocation22_spill] sm:$0xff] %v9560_v57  ;;  %v9571_v45 = vpop.permute.xlu0 %3813  ;;  %v3402_v10 = vmul.f32 %v9446_v37, %v3300_v13  ;;  %v3410_v2 = vmul.f32 %v9015_v29, %v3300_v13  ;;  %v9593_v8 = vadd.f32 %v3643_v28, %v3413_v35  ;;  %v9595_v19 = vadd.f32 %v3651_v33, %v3421_v0  ;;  %v9610_v0 = vld [vmem:[%s5366_s4 + $0xd8] sm:$0xff]  ;;  %v5183_v57 = vld [vmem:[%s5366_s4 + $0xc0] sm:$0xff] }
 0x2e3   : > { %11390 = vst [vmem:[#allocation7_spill] sm:$0xff] %v9574_v16  ;;  %v3418_v12 = vmul.f32 %v11376_v11, %v3300_v13  ;;  %v9598_v32 = vadd.f32 %v3659_v6, %v3429_v38  ;;  %v3426_v48 = vmul.f32 %v11377_v26, %v3300_v13  ;;  %v3434_v35 = vmul.f32 %v9446_v37, %v3319_v60  ;;  %v11400_v13 = vld [vmem:[#allocation23_spill] sm:$0xff] }
 0x2e4   : > { %11391 = vst [vmem:[#allocation75_spill] sm:$0xff] %v9577_v42  ;;  %v9601_v14 = vadd.f32 %v3402_v10, %v9440_v17  ;;  %v3414_v50 = vadd.f32 %v3410_v2, %v9443_v9  ;;  %v3391_v17 = vmul.f32 %v11378_v47, %v11399_v36  ;;  %v9616_v27 = vpop.permute.xlu1 %3827 }
 0x2e5   : > { %11392 = vst [vmem:[#allocation8_spill] sm:$0xff] %v9588_v25  ;;  %v3422_v29 = vadd.f32 %v3418_v12, %v9453_v52  ;;  %v3430_v9 = vadd.f32 %v3426_v48, %v9456_v5  ;;  %v9622_v52 = vadd.f32 %v3434_v35, %v9459_v31  ;;  %v11409_v35 = vld [vmem:[#allocation125_spill] sm:$0xff]  ;;  %v11422_v25 = vld [vmem:[#allocation130_spill] sm:$0xff] }
 0x2e6   : > { %11393 = vst [vmem:[#allocation15_spill] sm:$0xff] %v9593_v8  ;;  %v3515_v41 = vpop.f32.mrf.mxu2 }
 0x2e7   : > { %11394 = vst [vmem:[#allocation48_spill] sm:$0xff] %v9595_v19  ;;  %v9605_v55 = vpop.f32.mrf.mxu3  ;;  %v3564_v11 = vmul.f32 %v9610_v0, %v3515_v41  ;;  %v3588_v38 = vmul.f32 %v9304_v59, %v3515_v41  ;;  %v3608_v26 = vmul.f32 %v9395_v58, %v3515_v41  ;;  %v3628_v28 = vmul.f32 %v11400_v13, %v3515_v41  ;;  %v11408_v41 = vld [vmem:[#allocation12_spill] sm:$0xff] }
 0x2e8   : > { %11395 = vst [vmem:[#allocation10_spill] sm:$0xff] %v9598_v32  ;;  %v3644_v47 = vmul.f32 %v9304_v59, %v9605_v55  ;;  %v3652_v6 = vmul.f32 %v9395_v58, %v9605_v55  ;;  %v3660_v31 = vmul.f32 %v11400_v13, %v9605_v55  ;;  %v3546_v10 = vpop.f32.mrf.mxu0  ;;  %v3742_v59 = vpop.f32.mrf.mxu1  ;;  %v3395_v48 = vadd.f32 %v3391_v17, %v11408_v41  ;;  %v11435_v32 = vld [vmem:[#allocation124_spill] sm:$0xff] }
 0x2e9   : > { %11396 = vst [vmem:[#allocation13_spill] sm:$0xff] %v9601_v14  ;;  %v9625_v37 = vadd.f32 %v3564_v11, %v9463_v54  ;;  %v9628_v60 = vadd.f32 %v3588_v38, %v9465_v62  ;;  %v9632_v33 = vpop.permute.xlu2 %3847  ;;  %v9635_v5 = vadd.f32 %v3608_v26, %v9469_v15  ;;  %v11410_v11 = vld [vmem:[#allocation16_spill] sm:$0xff]  ;;  %v11411_v38 = vld [vmem:[#allocation73_spill] sm:$0xff]  ;;  %v9670_v17 = vadd.f32 %v9545_v56, %v9524_v63 }
 0x2ea   : > { %11397 = vst [vmem:[#allocation110_spill] sm:$0xff] %v9605_v55  ;;  %v9641_v54 = vadd.f32 %v3644_v47, %v3414_v50  ;;  %v9643_v2 = vpop.permute.xlu0 %3831  ;;  %v9645_v62 = vadd.f32 %v3652_v6, %v3422_v29  ;;  %v9647_v12 = vadd.f32 %v3660_v31, %v3430_v9  ;;  %v3396_v58 = vadd.f32 %v11410_v11, %v11409_v35  ;;  %v11415_v35 = vld [vmem:[#allocation45_spill] sm:$0xff]  ;;  %v11427_v55 = vld [vmem:[#allocation71_spill] sm:$0xff] }
 0x2eb   : > { %11398 = vst [vmem:[#allocation60_spill] sm:$0xff] %v9610_v0  ;;  %v3657_v26 = vmul.f32 %v11411_v38, %v9423_v44  ;;  %v9685_v11 = vadd.f32 %v3627_v30, %v11415_v35  ;;  %v3327_v35 = vmul.f32 %v9480_v21, %v11399_v36  ;;  %v3328_v14 = vmul.f32 %v9515_v51, %v11422_v25 }
 0x2ec   : > { %11401 = vst [vmem:[#allocation112_spill] sm:$0xff] %v9622_v52  ;;  %v9657_v50 = vadd.f32 %v9530_v49, %v3396_v58  ;;  %v9659_v13 = vpop.permute.xlu1 %3833  ;;  %v9704_v52 = vadd.f32 %v3628_v28, %v9477_v18 }
 0x2ed   : > { %11402 = vst [vmem:[#allocation63_spill] sm:$0xff] %v9625_v37  ;;  %v9662_v29 = vadd.f32 %v3657_v26, %v9486_v40  ;;  %v3331_v36 = vadd.f32 %v3327_v35, %v11427_v55  ;;  %v11431_v55 = vld [vmem:[#allocation76_spill] sm:$0xff] }
 0x2ee   : > { %11403 = vst [vmem:[#allocation46_spill] sm:$0xff] %v9628_v60  ;;  %v9650_v15 = vpop.f32.mrf.mxu2  ;;  %v3585_v35 = vmul.f32 %v11431_v55, %v11430_v46 }
 0x2ef   : > { %11404 = vst [vmem:[#allocation93_spill] sm:$0xff] %v9635_v5  ;;  %v3780_v18 = vpop.f32.mrf.mxu3 }
 0x2f0   : > { %11405 = vst [vmem:[#allocation77_spill] sm:$0xff] %v9641_v54  ;;  %v9666_v47 = vpop.f32.mrf.mxu0  ;;  %v9676_v41 = vpop.f32.mrf.mxu1  ;;  %v3633_v54 = vmul.f32 %v5183_v57, %v9423_v44  ;;  %v11434_v44 = vld [vmem:[#allocation66_spill] sm:$0xff] }
 0x2f1   : > { %11406 = vst [vmem:[#allocation94_spill] sm:$0xff] %v9645_v62  ;;  %v9664_v9 = vpop.permute.xlu2 %3853  ;;  %v3840_v25 = vmul.f32 %v9555_v3, %v9676_v41  ;;  %v5185_v62 = vld [vmem:[%s5366_s4 + $0xe0] sm:$0xff] }
 0x2f2   : > { %11407 = vst [vmem:[#allocation78_spill] sm:$0xff] %v9647_v12  ;;  %v9672_v6 = vpop.permute.xlu0 %3849  ;;  %v3625_v12 = vmul.f32 %v11411_v38, %v11430_v46 }
 0x2f3   : > { %11412 = vst [vmem:[#allocation95_spill] sm:$0xff] %v9657_v50  ;;  %v9751_v55 = vadd.f32 %v3840_v25, %v9536_v22  ;;  %v11438_v25 = vld [vmem:[#allocation122_spill] sm:$0xff] }
 0x2f4   : > { %11413 = vst [vmem:[#allocation79_spill] sm:$0xff] %v9672_v6  ;;  %v9682_v40 = vpop.permute.xlu1 %3851  ;;  %v3629_v5 = vadd.f32 %v3625_v12, %v3395_v48 }
 0x2f5   : > { %11414 = vst [vmem:[#allocation96_spill] sm:$0xff] %v9682_v40 }
 0x2f6   : > { %v9674_v31 = vpop.f32.mrf.mxu2  ;;  %11416 = vst [vmem:[#allocation80_spill] sm:$0xff] %v9685_v11  ;;  %v11423_v11 = vld [vmem:[#allocation72_spill] sm:$0xff] }
 0x2f7   : > { %v9680_v49 = vmul.f32 %v9672_v6, %v9674_v31  ;;  %v3399_v42 = vmul.f32 %v9480_v21, %v11423_v11  ;;  %v11428_v21 = vld [vmem:[#allocation6_spill] sm:$0xff]  ;;  %11433 = vst [vmem:[#allocation101_spill] sm:$0xff] %v9751_v55  ;;  %v3876_v12 = vmul.f32 %v9547_v39, %v9674_v31 }
 0x2f8   : > { %v9699_v50 = vpop.f32.mrf.mxu0  ;;  %v9701_v37 = vpop.f32.mrf.mxu1  ;;  %v3332_v11 = vadd.f32 %v3328_v14, %v11428_v21  ;;  %v5184_v14 = vld [vmem:[%s5366_s4 + $0xc8] sm:$0xff]  ;;  %v3665_v21 = vmul.f32 %v5183_v57, %v3546_v10 }
 0x2f9   : > { %v9687_v58 = vpop.permute.xlu2 %4173  ;;  %11420 = vst [vmem:[#allocation82_spill] sm:$0xff] %v9699_v50 }
 0x2fa   : > { %11417 = vst [vmem:[#allocation97_spill] sm:$0xff] %v9687_v58  ;;  %v3820_v58 = vmul.f32 %v9547_v39, %v9676_v41  ;;  %v3669_v55 = vadd.f32 %v3665_v21, %v11438_v25 }
 0x2fc   : > { %v9720_v28 = vpop.permute.xlu1 %4171 }
 0x2fd   : > { %11425 = vst [vmem:[#allocation100_spill] sm:$0xff] %v9720_v28  ;;  %v3561_v28 = vmul.f32 %v5183_v57, %v11430_v46  ;;  %v11436_v57 = vld [vmem:[#allocation118_spill] sm:$0xff] }
 0x2fe   : > { %v9689_v26 = vpop.f32.mrf.mxu2  ;;  %v3589_v10 = vadd.f32 %v3585_v35, %v11436_v57  ;;  %v4170_v35 = vpop.permute.xlu0 %4169  ;;  %v5186_v57 = vld [vmem:[%s5366_s4 + $0xe8] sm:$0xff] }
 0x2ff   : > { %v9693_v63 = vmul.f32 %v9499_v61, %v9689_v26  ;;  %v9697_v56 = vmul.f32 %v9682_v40, %v9689_v26 }
 0x300   : > { %v9722_v0 = vpop.f32.mrf.mxu0  ;;  %v9729_v40 = vpop.f32.mrf.mxu1 }
 0x301   : > { %11418 = vst [vmem:[#allocation81_spill] sm:$0xff] %v9693_v63  ;;  %v9718_v16 = vpop.permute.xlu2 %4191  ;;  %v11437_v63 = vld [vmem:[#allocation44_spill] sm:$0xff] }
 0x302   : > { %11419 = vst [vmem:[#allocation98_spill] sm:$0xff] %v9697_v56  ;;  %v3795_v56 = vmul.f32 %v5185_v62, %v3742_v59 }
 0x303   : > { %11424 = vst [vmem:[#allocation83_spill] sm:$0xff] %v9718_v16  ;;  %v11429_v16 = vld [vmem:[#allocation17_spill] sm:$0xff] }
 0x304   : > { %11426 = vst [vmem:[#allocation84_spill] sm:$0xff] %v9722_v0  ;;  %v3403_v50 = vadd.f32 %v3399_v42, %v11429_v16  ;;  %v3400_v0 = vmul.f32 %v9515_v51, %v9430_v7  ;;  %v3562_v16 = vmul.f32 %v5184_v14, %v9488_v4  ;;  %v3634_v42 = vmul.f32 %v5184_v14, %v9490_v24  ;;  %v4190_v48 = vpop.permute.xlu1 %4189 }
 0x305   : > { %v3859_v51 = vmul.f32 %v9632_v33, %v3742_v59  ;;  %v3867_v7 = vmul.f32 %v5185_v62, %v9650_v15  ;;  %v3819_v4 = vmul.f32 %v11435_v32, %v3742_v59  ;;  %v3839_v24 = vmul.f32 %v9616_v27, %v3742_v59 }
 0x306   : > { %v9706_v30 = vpop.f32.mrf.mxu2  ;;  %v3404_v38 = vadd.f32 %v3400_v0, %v11434_v44  ;;  %v3637_v19 = vadd.f32 %v3633_v54, %v3403_v50  ;;  %v3566_v60 = vadd.f32 %v3562_v16, %v3332_v11  ;;  %v3899_v59 = vmul.f32 %v5185_v62, %v3780_v18  ;;  %v9764_v44 = vpop.f32.mrf.mxu3 }
 0x307   : > { %v9712_v6 = vmul.f32 %v9664_v9, %v9706_v30  ;;  %v3868_v54 = vmul.f32 %v5186_v57, %v9674_v31  ;;  %v3884_v62 = vmul.f32 %v9555_v3, %v9674_v31  ;;  %v3821_v18 = vmul.f32 %v9499_v61, %v9701_v37 }
 0x308   : > { %v3638_v22 = vadd.f32 %v3634_v42, %v3404_v38  ;;  %v3871_v0 = vadd.f32 %v3867_v7, %v3637_v19  ;;  %v3883_v7 = vmul.f32 %v9616_v27, %v9650_v15  ;;  %v3903_v3 = vadd.f32 %v3899_v59, %v3669_v55 }
 0x309   : > { %11421 = vst [vmem:[#allocation99_spill] sm:$0xff] %v9712_v6  ;;  %v3605_v6 = vmul.f32 %v11432_v53, %v11430_v46  ;;  %v9754_v53 = vadd.f32 %v3820_v58, %v9533_v43  ;;  %v3565_v46 = vadd.f32 %v3561_v28, %v3331_v36  ;;  %v4210_v58 = vpop.permute.xlu2 %4209  ;;  %v3863_v28 = vadd.f32 %v3859_v51, %v3629_v5 }
 0x30a   : > { %v3875_v36 = vmul.f32 %v11435_v32, %v9650_v15  ;;  %v3666_v61 = vmul.f32 %v5184_v14, %v9666_v47  ;;  %v3796_v31 = vmul.f32 %v5186_v57, %v9676_v41  ;;  %v3872_v47 = vadd.f32 %v3868_v54, %v3638_v22  ;;  %v11439_v54 = vld [vmem:[#allocation14_spill] sm:$0xff] }
 0x30b   : > { %v3609_v8 = vadd.f32 %v3605_v6, %v11437_v63  ;;  %v3799_v43 = vadd.f32 %v3795_v56, %v3565_v46  ;;  %v3823_v63 = vadd.f32 %v3819_v4, %v3589_v10  ;;  %v5187_v56 = vld [vmem:[%s5366_s4 + $0x100] sm:$0xff]  ;;  %v3891_v46 = vmul.f32 %v9632_v33, %v9650_v15 }
 0x30c   : > { %v9781_v4 = vadd.f32 %v9680_v49, %v9670_v17  ;;  %v9796_v33 = vadd.f32 %v3821_v18, %v9581_v34  ;;  %v9799_v15 = vadd.f32 %v3884_v62, %v9557_v20  ;;  %v3862_v17 = vmul.f32 %v9664_v9, %v9729_v40  ;;  %v5188_v9 = vld [vmem:[%s5366_s4 + $0x108] sm:$0xff]  ;;  %v11444_v62 = vld [vmem:[#allocation15_spill] sm:$0xff] }
 0x30d   : > { %v3843_v6 = vadd.f32 %v3839_v24, %v3609_v8  ;;  %v9804_v14 = vadd.f32 %v3876_v12, %v9550_v23  ;;  %v3885_v55 = vmul.f32 %v9643_v2, %v9689_v26  ;;  %v3822_v24 = vmul.f32 %v9571_v45, %v9729_v40  ;;  %v11445_v18 = vld [vmem:[#allocation81_spill] sm:$0xff] }
 0x30e   : > { %v3895_v34 = vadd.f32 %v3891_v46, %v9662_v29  ;;  %v3785_v22 = vpop.f32.mrf.mxu3  ;;  %v3842_v59 = vmul.f32 %v9659_v13, %v9729_v40  ;;  %v3879_v12 = vadd.f32 %v3875_v36, %v11439_v54  ;;  %v11441_v36 = vld [vmem:[#allocation46_spill] sm:$0xff]  ;;  %v9857_v46 = vpop.permute.xlu1 %4195 }
 0x315   : > { %v4104_v50 = vpop.f32.mrf.mxu0 }
 0x316   : > { %v4157_v5 = vmul.f32 %v5187_v56, %v4104_v50  ;;  %v4181_v19 = vmul.f32 %v4170_v35, %v4104_v50  ;;  %v4201_v11 = vmul.f32 %v4190_v48, %v4104_v50  ;;  %v4221_v32 = vmul.f32 %v4210_v58, %v4104_v50 }
 0x317   : > { %v4123_v16 = vpop.f32.mrf.mxu1 }
 0x318   : > { %v4229_v42 = vmul.f32 %v5187_v56, %v4123_v16  ;;  %v4161_v39 = vadd.f32 %v4157_v5, %v3799_v43  ;;  %v4225_v21 = vadd.f32 %v4221_v32, %v3863_v28  ;;  %v4205_v51 = vadd.f32 %v4201_v11, %v3843_v6  ;;  %v11440_v5 = vld [vmem:[#allocation21_spill] sm:$0xff] }
 0x319   : > { %v4185_v8 = vadd.f32 %v4181_v19, %v3823_v63  ;;  %v4253_v27 = vmul.f32 %v4210_v58, %v4123_v16  ;;  %v4245_v49 = vmul.f32 %v4190_v48, %v4123_v16  ;;  %v4237_v10 = vmul.f32 %v4170_v35, %v4123_v16 }
 0x31a   : > { %v4233_v38 = vadd.f32 %v4229_v42, %v3871_v0  ;;  %4270 = vst.msk [vmem:[%s9786_s12] sm:$0xff] %vm4269_vm12, %v4161_v39  ;;  %4299 = vrot.lane.b32.xlu1 %v4205_v51, %s5218_s6  ;;  %4320 = vrot.lane.b32.xlu2 %v4225_v21, %s5217_s5  ;;  %v3800_v58 = vadd.f32 %v3796_v31, %v3566_v60  ;;  %v11446_v39 = vld [vmem:[#allocation10_spill] sm:$0xff]  ;;  %v11449_v31 = vld [vmem:[#allocation77_spill] sm:$0xff] }
 0x31b   : > { %4278 = vrot.lane.b32.xlu0 %v4185_v8, %s5219_s26  ;;  %v3887_v0 = vadd.f32 %v3883_v7, %v9507_v1  ;;  %v4257_v35 = vadd.f32 %v4253_v27, %v3895_v34  ;;  %v9823_v6 = vadd.f32 %v3862_v17, %v9704_v52  ;;  %v3900_v63 = vmul.f32 %v5186_v57, %v9764_v44  ;;  %v9835_v52 = vpop.permute.xlu0 %4175  ;;  %v11442_v57 = vld [vmem:[#allocation93_spill] sm:$0xff]  ;;  %v11447_v21 = vld [vmem:[#allocation98_spill] sm:$0xff]  ;;  %v11451_v17 = vld [vmem:[#allocation99_spill] sm:$0xff]  ;;  %v3787_v34 = vpop.f32.mrf.mxu3 }
 0x31c   : > { %4875 = vst.msk [vmem:[%s9786_s12 + $0x80] sm:$0xff] %vm4269_vm12, %v4233_v38  ;;  %v4241_v1 = vadd.f32 %v4237_v10, %v3879_v12  ;;  %v3670_v19 = vadd.f32 %v3666_v61, %v11440_v5  ;;  %v3878_v11 = vmul.f32 %v9571_v45, %v9706_v30  ;;  %v3886_v16 = vmul.f32 %v9659_v13, %v9706_v30  ;;  %v11443_v13 = vld [vmem:[#allocation48_spill] sm:$0xff] }
 0x31d   : > { %v9811_v20 = vpop.f32.mrf.mxu0  ;;  %v4249_v60 = vadd.f32 %v4245_v49, %v3887_v0  ;;  %v9841_v44 = vadd.f32 %v3822_v24, %v11441_v36  ;;  %v9844_v45 = vadd.f32 %v3842_v59, %v11442_v57  ;;  %v9847_v32 = vadd.f32 %v3885_v55, %v11443_v13  ;;  %v11452_v55 = vld [vmem:[#allocation47_spill] sm:$0xff]  ;;  %v11453_v24 = vld [vmem:[#allocation64_spill] sm:$0xff]  ;;  %v11455_v0 = vld [vmem:[#allocation82_spill] sm:$0xff] }
 0x31e   : > { %v4142_v25 = vpop.f32.mrf.mxu2  ;;  %v4158_v28 = vmul.f32 %v5188_v9, %v9811_v20  ;;  %v3881_v42 = vadd.f32 %v11445_v18, %v11444_v62  ;;  %v9855_v51 = vadd.f32 %v11447_v21, %v11446_v39  ;;  %v3904_v8 = vadd.f32 %v3900_v63, %v3670_v19  ;;  %v11456_v12 = vld [vmem:[#allocation96_spill] sm:$0xff]  ;;  %v11457_v63 = vld [vmem:[#allocation97_spill] sm:$0xff]  ;;  %v11460_v62 = vld [vmem:[#allocation7_spill] sm:$0xff] }
 0x31f   : > { %v4261_v43 = vmul.f32 %v5187_v56, %v4142_v25  ;;  %v9815_v23 = vpop.f32.mrf.mxu1  ;;  %v9863_v27 = vadd.f32 %v3878_v11, %v11449_v31  ;;  %v3635_v10 = vmul.f32 %v11453_v24, %v11452_v55  ;;  %v3667_v59 = vmul.f32 %v11453_v24, %v11455_v0  ;;  %v11459_v5 = vld [vmem:[#allocation60_spill] sm:$0xff]  ;;  %v11461_v39 = vld [vmem:[#allocation75_spill] sm:$0xff] }
 0x320   : > { %v4230_v29 = vmul.f32 %v5188_v9, %v9815_v23  ;;  %v4162_v50 = vadd.f32 %v4158_v28, %v3800_v58  ;;  %v3841_v11 = vmul.f32 %v9643_v2, %v9701_v37  ;;  %v11464_v55 = vld [vmem:[#allocation84_spill] sm:$0xff] }
 0x321   : > { %v4265_v48 = vadd.f32 %v4261_v43, %v3903_v3  ;;  %v11448_v3 = vld [vmem:[#allocation94_spill] sm:$0xff]  ;;  %v3671_v18 = vadd.f32 %v3667_v59, %v11460_v62  ;;  %v3668_v24 = vmul.f32 %v11459_v5, %v11464_v55 }
 0x322   : > { %v4234_v56 = vadd.f32 %v4230_v29, %v3872_v47  ;;  %4367 = vrot.lane.b32.xlu1 %v4249_v60, %s5218_s6  ;;  %4388 = vrot.lane.b32.xlu2 %v4257_v35, %s5217_s5  ;;  %4271 = vst.msk [vmem:[%s9786_s12 + $0x8] sm:$0xff] %vm4269_vm12, %v4162_v50  ;;  %v9860_v61 = vadd.f32 %v3886_v16, %v11448_v3  ;;  %v11450_v47 = vld [vmem:[#allocation78_spill] sm:$0xff]  ;;  %v9893_v16 = vpop.permute.xlu1 %4213  ;;  %v11462_v3 = vld [vmem:[#allocation80_spill] sm:$0xff] }
 0x323   : > { %4891 = vst.msk [vmem:[%s9786_s12 + $0x100] sm:$0xff] %vm4269_vm12, %v4265_v48  ;;  %4346 = vrot.lane.b32.xlu0 %v4241_v1, %s5219_s26  ;;  %v9867_v49 = vadd.f32 %v11451_v17, %v11450_v47  ;;  %v5189_v43 = vld [vmem:[%s5366_s4 + $0xf0] sm:$0xff]  ;;  %v9879_v29 = vpop.permute.xlu0 %4193  ;;  %v3861_v48 = vmul.f32 %v11456_v12, %v9701_v37 }
 0x324   : > { %4876 = vst.msk [vmem:[%s9786_s12 + $0x88] sm:$0xff] %vm4269_vm12, %v4234_v56  ;;  %v3869_v58 = vmul.f32 %v5189_v43, %v9689_v26  ;;  %v3797_v35 = vmul.f32 %v5189_v43, %v9701_v37  ;;  %v5190_v26 = vld [vmem:[%s5366_s4 + $0x110] sm:$0xff]  ;;  %v3901_v13 = vmul.f32 %v5189_v43, %v3785_v22 }
 0x325   : > { %v11458_v1 = vld [vmem:[#allocation110_spill] sm:$0xff]  ;;  %v3865_v31 = vadd.f32 %v3861_v48, %v11462_v3  ;;  %v5192_v48 = vld [vmem:[%s5366_s4 + $0x118] sm:$0xff] }
 0x326   : > { %v4144_v7 = vpop.f32.mrf.mxu2  ;;  %v3636_v19 = vmul.f32 %v11459_v5, %v11458_v1  ;;  %v3801_v21 = vadd.f32 %v3797_v35, %v11461_v39  ;;  %v3905_v43 = vadd.f32 %v3901_v13, %v3671_v18  ;;  %v11469_v13 = vld [vmem:[#allocation112_spill] sm:$0xff] }
 0x327   : > { %v4262_v38 = vmul.f32 %v5188_v9, %v4144_v7  ;;  %v11454_v9 = vld [vmem:[#allocation22_spill] sm:$0xff]  ;;  %v3672_v62 = vadd.f32 %v3668_v24, %v11469_v13 }
 0x328   : > { %v3639_v28 = vadd.f32 %v3635_v10, %v11454_v9 }
 0x329   : > { %v4266_v25 = vadd.f32 %v4262_v38, %v3904_v8  ;;  %v5191_v8 = vld [vmem:[%s5366_s4 + $0xf8] sm:$0xff] }
 0x32a   : > { %v3873_v50 = vadd.f32 %v3869_v58, %v3639_v28  ;;  %v3870_v7 = vmul.f32 %v5191_v8, %v9706_v30  ;;  %v11465_v30 = vld [vmem:[#allocation8_spill] sm:$0xff]  ;;  %v3902_v1 = vmul.f32 %v5191_v8, %v3787_v34 }
 0x32b   : > { %4892 = vst.msk [vmem:[%s9786_s12 + $0x108] sm:$0xff] %vm4269_vm12, %v4266_v25  ;;  %v3845_v10 = vadd.f32 %v3841_v11, %v11465_v30 }
 0x32e   : > { %v9881_v54 = vpop.f32.mrf.mxu1 }
 0x32f   : > { %v4231_v60 = vmul.f32 %v5190_v26, %v9881_v54  ;;  %v4239_v56 = vmul.f32 %v11457_v63, %v9881_v54 }
 0x331   : > { %v4235_v36 = vadd.f32 %v4231_v60, %v3873_v50  ;;  %v9895_v57 = vadd.f32 %v4239_v56, %v3881_v42  ;;  %v11463_v42 = vld [vmem:[#allocation13_spill] sm:$0xff]  ;;  %v3798_v60 = vmul.f32 %v5191_v8, %v9729_v40  ;;  %v11468_v40 = vld [vmem:[#allocation83_spill] sm:$0xff] }
 0x332   : > { %v3640_v17 = vadd.f32 %v3636_v19, %v11463_v42  ;;  %v11467_v19 = vld [vmem:[#allocation100_spill] sm:$0xff]  ;;  %v11471_v8 = vld [vmem:[#allocation95_spill] sm:$0xff]  ;;  %v4246_v55 = vmul.f32 %v11468_v40, %v9815_v23 }
 0x333   : > { %v4109_v38 = vpop.f32.mrf.mxu3  ;;  %4877 = vst.msk [vmem:[%s9786_s12 + $0x90] sm:$0xff] %vm4269_vm12, %v4235_v36  ;;  %v4182_v11 = vmul.f32 %v11467_v19, %v9811_v20  ;;  %v4202_v36 = vmul.f32 %v11468_v40, %v9811_v20 }
 0x334   : > { %v4159_v47 = vmul.f32 %v5190_v26, %v4109_v38  ;;  %v4183_v37 = vmul.f32 %v11457_v63, %v4109_v38  ;;  %v4203_v2 = vmul.f32 %v9879_v29, %v4109_v38  ;;  %v4223_v22 = vmul.f32 %v9893_v16, %v4109_v38  ;;  %v4212_v63 = vpop.permute.xlu0 %4211 }
 0x335   : > { %v4147_v25 = vpop.f32.mrf.mxu2  ;;  %v3874_v12 = vadd.f32 %v3870_v7, %v3640_v17  ;;  %v4222_v18 = vmul.f32 %v4212_v63, %v9811_v20  ;;  %v3906_v38 = vadd.f32 %v3902_v1, %v3672_v62  ;;  %v4238_v17 = vmul.f32 %v11467_v19, %v9815_v23  ;;  %v4518_v62 = vld [vmem:[%s9786_s12] sm:$0xff] (%p5270_p5) }
 0x336   : > { %v4163_v58 = vadd.f32 %v4159_v47, %v3801_v21  ;;  %v4227_v9 = vadd.f32 %v4223_v22, %v3865_v31  ;;  %v4187_v28 = vadd.f32 %v4183_v37, %v9796_v33  ;;  %v9912_v0 = vpop.f32.mrf.mxu1  ;;  %v4207_v59 = vadd.f32 %v4203_v2, %v3845_v10  ;;  %v11466_v33 = vld [vmem:[#allocation79_spill] sm:$0xff]  ;;  %v11472_v47 = vld [vmem:[#allocation101_spill] sm:$0xff]  ;;  %v4216_v10 = vpop.permute.xlu2 %4215 }
 0x337   : > { %v4263_v35 = vmul.f32 %v5190_v26, %v4147_v25  ;;  %v4232_v50 = vmul.f32 %v5192_v48, %v9912_v0  ;;  %v3860_v56 = vmul.f32 %v11466_v33, %v9676_v41  ;;  %v11470_v41 = vld [vmem:[#allocation63_spill] sm:$0xff]  ;;  %v4206_v37 = vadd.f32 %v4202_v36, %v11472_v47 }
 0x338   : > { %4272 = vst.msk [vmem:[%s9786_s12 + $0x10] sm:$0xff] %vm4269_vm12, %v4163_v58  ;;  %4324 = vrot.lane.b32.xlu1 %v4227_v9, %s5217_s5  ;;  %4282 = vrot.lane.b32.xlu2 %v4187_v28, %s5219_s26  ;;  %v3802_v34 = vadd.f32 %v3798_v60, %v11470_v41  ;;  %v4186_v2 = vadd.f32 %v4182_v11, %v9754_v53 }
 0x339   : > { %4303 = vrot.lane.b32.xlu0 %v4207_v59, %s5218_s6  ;;  %v4267_v26 = vadd.f32 %v4263_v35, %v3905_v43  ;;  %v4236_v5 = vadd.f32 %v4232_v50, %v3874_v12  ;;  %v3864_v7 = vadd.f32 %v3860_v56, %v11471_v8  ;;  %v4250_v24 = vadd.f32 %v4246_v55, %v9799_v15 }
 0x33a   : > { %v4242_v30 = vadd.f32 %v4238_v17, %v9804_v14  ;;  %v4247_v9 = vmul.f32 %v9879_v29, %v9881_v54  ;;  %v4240_v59 = vmul.f32 %v9835_v52, %v9912_v0  ;;  %v4552_v17 = vld [vmem:[%s9786_s12 + $0x88] sm:$0xff] (%p5270_p5)  ;;  %v4554_v55 = vld [vmem:[%s9786_s12 + $0x90] sm:$0xff] (%p5270_p5) }
 0x33b   : > { %v4111_v39 = vpop.f32.mrf.mxu3  ;;  %4893 = vst.msk [vmem:[%s9786_s12 + $0x110] sm:$0xff] %vm4269_vm12, %v4267_v26  ;;  %v4226_v20 = vadd.f32 %v4222_v18, %v3864_v7  ;;  %v4520_v18 = vld [vmem:[%s9786_s12 + $0x8] sm:$0xff] (%p5270_p5) }
 0x33c   : > { %v4160_v21 = vmul.f32 %v5192_v48, %v4111_v39  ;;  %4878 = vst.msk [vmem:[%s9786_s12 + $0x98] sm:$0xff] %vm4269_vm12, %v4236_v5  ;;  %v4184_v53 = vmul.f32 %v9835_v52, %v4111_v39  ;;  %v4204_v43 = vmul.f32 %v9857_v46, %v4111_v39  ;;  %v4224_v58 = vmul.f32 %v4216_v10, %v4111_v39 }
 0x33d   : > { %v4149_v3 = vpop.f32.mrf.mxu2  ;;  %v4251_v14 = vadd.f32 %v4247_v9, %v9847_v32  ;;  %v4256_v52 = vmul.f32 %v4216_v10, %v9912_v0  ;;  %v4254_v32 = vmul.f32 %v4212_v63, %v9815_v23 }
 0x33e   : > { %v4164_v31 = vadd.f32 %v4160_v21, %v3802_v34  ;;  %v4264_v22 = vmul.f32 %v5192_v48, %v4149_v3  ;;  %v4188_v25 = vadd.f32 %v4184_v53, %v9841_v44  ;;  %v4228_v28 = vadd.f32 %v4224_v58, %v9823_v6 }
 0x33f   : > { %v4208_v15 = vadd.f32 %v4204_v43, %v9844_v45  ;;  %v4248_v44 = vmul.f32 %v9857_v46, %v9912_v0  ;;  %v4244_v6 = vadd.f32 %v4240_v59, %v9863_v27  ;;  %v4255_v45 = vmul.f32 %v9893_v16, %v9881_v54  ;;  %v4522_v39 = vld [vmem:[%s9786_s12 + $0x10] sm:$0xff] (%p5270_p5) }
 0x340   : > { %4273 = vst.msk [vmem:[%s9786_s12 + $0x18] sm:$0xff] %vm4269_vm12, %v4164_v31  ;;  %4301 = vrot.lane.b32.xlu2 %v4206_v37, %s5218_s6  ;;  %4280 = vrot.lane.b32.xlu1 %v4186_v2, %s5219_s26  ;;  %v4268_v42 = vadd.f32 %v4264_v22, %v3906_v38  ;;  %v4260_v46 = vadd.f32 %v4256_v52, %v9867_v49 }
 0x341   : > { %4322 = vrot.lane.b32.xlu0 %v4226_v20, %s5217_s5  ;;  %v4252_v29 = vadd.f32 %v4248_v44, %v9860_v61  ;;  %v4259_v61 = vadd.f32 %v4255_v45, %v9855_v51  ;;  %v4258_v27 = vadd.f32 %v4254_v32, %v9781_v4 }
 0x342   : > { %4894 = vst.msk [vmem:[%s9786_s12 + $0x118] sm:$0xff] %vm4269_vm12, %v4268_v42  ;;  %v4550_v42 = vld [vmem:[%s9786_s12 + $0x80] sm:$0xff] (%p5270_p5)  ;;  %v4586_v45 = vld [vmem:[%s9786_s12 + $0x110] sm:$0xff] (%p5270_p5) }
 0x343   : > { %v4556_v53 = vld [vmem:[%s9786_s12 + $0x98] sm:$0xff] (%p5270_p5) }
 0x347   : > { %v4524_v41 = vld [vmem:[%s9786_s12 + $0x18] sm:$0xff] (%p5270_p5) }
 0x348   : > { %4369 = vrot.lane.b32.xlu2 %v4250_v24, %s5218_s6  ;;  %4348 = vrot.lane.b32.xlu1 %v4242_v30, %s5219_s26 }
 0x349   : > { %4284 = vrot.lane.b32.xlu0 %v4188_v25, %s5219_s26  ;;  %v4588_v52 = vld [vmem:[%s9786_s12 + $0x118] sm:$0xff] (%p5270_p5) }
 0x350   : > { %4326 = vrot.lane.b32.xlu2 %v4228_v28, %s5217_s5  ;;  %4305 = vrot.lane.b32.xlu1 %v4208_v15, %s5218_s6 }
 0x351   : > { %4371 = vrot.lane.b32.xlu0 %v4251_v14, %s5218_s6 }
 0x358   : > { %4350 = vrot.lane.b32.xlu2 %v9895_v57, %s5219_s26  ;;  %4373 = vrot.lane.b32.xlu1 %v4252_v29, %s5218_s6  ;;  %v4582_v29 = vld [vmem:[%s9786_s12 + $0x100] sm:$0xff] (%p5270_p5) }
 0x359   : > { %4352 = vrot.lane.b32.xlu0 %v4244_v6, %s5219_s26  ;;  %v4584_v6 = vld [vmem:[%s9786_s12 + $0x108] sm:$0xff] (%p5270_p5) }
 0x360   : > { %4394 = vrot.lane.b32.xlu2 %v4260_v46, %s5217_s5  ;;  %4392 = vrot.lane.b32.xlu1 %v4259_v61, %s5217_s5 }
 0x361   : > { %4390 = vrot.lane.b32.xlu0 %v4258_v27, %s5217_s5  ;;  %s10039_s5 = scalar_lea.vmem (%p5270_p5), %s10126_s3, %s5363_s30 }
 0x362   : > { %4519 = vst [vmem:[%s10039_s5] sm:$0xff] (%p5270_p5), %v4518_v62 }
 0x363   : > { %4521 = vst [vmem:[%s10039_s5 + $0x8] sm:$0xff] (%p5270_p5), %v4520_v18 }
 0x364   : > { %4523 = vst [vmem:[%s10039_s5 + $0x10] sm:$0xff] (%p5270_p5), %v4522_v39 }
 0x365   : > { %4525 = vst [vmem:[%s10039_s5 + $0x18] sm:$0xff] (%p5270_p5), %v4524_v41 }
 0x366   : > { %4551 = vst [vmem:[%s10039_s5 + $0x200] sm:$0xff] (%p5270_p5), %v4550_v42 }
 0x367   : > { %4553 = vst [vmem:[%s10039_s5 + $0x208] sm:$0xff] (%p5270_p5), %v4552_v17 }
 0x368   : > { %4555 = vst [vmem:[%s10039_s5 + $0x210] sm:$0xff] (%p5270_p5), %v4554_v55 }
 0x369   : > { %4557 = vst [vmem:[%s10039_s5 + $0x218] sm:$0xff] (%p5270_p5), %v4556_v53 }
 0x36a   : > { %4583 = vst [vmem:[%s10039_s5 + $0x400] sm:$0xff] (%p5270_p5), %v4582_v29 }
 0x36b   : > { %4585 = vst [vmem:[%s10039_s5 + $0x408] sm:$0xff] (%p5270_p5), %v4584_v6 }
 0x36c   : > { %4587 = vst [vmem:[%s10039_s5 + $0x410] sm:$0xff] (%p5270_p5), %v4586_v45 }
 0x36d   : > { %4589 = vst [vmem:[%s10039_s5 + $0x418] sm:$0xff] (%p5270_p5), %v4588_v52 }
 0x374   : > { %v4321_v54 = vpop.permute.xlu2 %4320 }
 0x375   : > { %4871 = vst.msk [vmem:[%s9786_s12 + $0x60] sm:$0xff] %vm4269_vm12, %v4321_v54 }
 0x37c   : > { %v4389_v23 = vpop.permute.xlu2 %4388  ;;  %v4542_v37 = vld [vmem:[%s9786_s12 + $0x60] sm:$0xff] (%p5270_p5) }
 0x37d   : > { %4887 = vst.msk [vmem:[%s9786_s12 + $0xe0] sm:$0xff] %vm4269_vm12, %v4389_v23 }
 0x37e   : > { %4543 = vst [vmem:[%s10039_s5 + $0x180] sm:$0xff] (%p5270_p5), %v4542_v37 }
 0x384   : > { %v4574_v15 = vld [vmem:[%s9786_s12 + $0xe0] sm:$0xff] (%p5270_p5) }
 0x385   : > { %4575 = vst [vmem:[%s10039_s5 + $0x380] sm:$0xff] (%p5270_p5), %v4574_v15 }
 0x38c   : > { %v4300_v49 = vpop.permute.xlu1 %4299 }
 0x38d   : > { %4867 = vst.msk [vmem:[%s9786_s12 + $0x40] sm:$0xff] %vm4269_vm12, %v4300_v49  ;;  %v4279_v4 = vpop.permute.xlu0 %4278 }
 0x38e   : > { %4863 = vst.msk [vmem:[%s9786_s12 + $0x20] sm:$0xff] %vm4269_vm12, %v4279_v4 }
 0x392   : > { %v4283_v51 = vpop.permute.xlu2 %4282 }
 0x393   : > { %4865 = vst.msk [vmem:[%s9786_s12 + $0x30] sm:$0xff] %vm4269_vm12, %v4283_v51 }
 0x394   : > { %v4368_v16 = vpop.permute.xlu1 %4367  ;;  %v4534_v38 = vld [vmem:[%s9786_s12 + $0x40] sm:$0xff] (%p5270_p5) }
 0x395   : > { %4883 = vst.msk [vmem:[%s9786_s12 + $0xc0] sm:$0xff] %vm4269_vm12, %v4368_v16  ;;  %v4347_v57 = vpop.permute.xlu0 %4346  ;;  %v4526_v34 = vld [vmem:[%s9786_s12 + $0x20] sm:$0xff] (%p5270_p5) }
 0x396   : > { %4879 = vst.msk [vmem:[%s9786_s12 + $0xa0] sm:$0xff] %vm4269_vm12, %v4347_v57 }
 0x397   : > { %4527 = vst [vmem:[%s10039_s5 + $0x80] sm:$0xff] (%p5270_p5), %v4526_v34 }
 0x398   : > { %4535 = vst [vmem:[%s10039_s5 + $0x100] sm:$0xff] (%p5270_p5), %v4534_v38 }
 0x39a   : > { %v4302_v0 = vpop.permute.xlu2 %4301  ;;  %v4530_v8 = vld [vmem:[%s9786_s12 + $0x30] sm:$0xff] (%p5270_p5) }
 0x39b   : > { %4868 = vst.msk [vmem:[%s9786_s12 + $0x48] sm:$0xff] %vm4269_vm12, %v4302_v0 }
 0x39c   : > { %4531 = vst [vmem:[%s10039_s5 + $0x90] sm:$0xff] (%p5270_p5), %v4530_v8  ;;  %v4566_v43 = vld [vmem:[%s9786_s12 + $0xc0] sm:$0xff] (%p5270_p5) }
 0x39d   : > { %v4558_v24 = vld [vmem:[%s9786_s12 + $0xa0] sm:$0xff] (%p5270_p5)  ;;  %4567 = vst [vmem:[%s10039_s5 + $0x300] sm:$0xff] (%p5270_p5), %v4566_v43 }
 0x39e   : > { %4559 = vst [vmem:[%s10039_s5 + $0x280] sm:$0xff] (%p5270_p5), %v4558_v24 }
 0x3a2   : > { %v4370_v35 = vpop.permute.xlu2 %4369  ;;  %v4536_v3 = vld [vmem:[%s9786_s12 + $0x48] sm:$0xff] (%p5270_p5) }
 0x3a3   : > { %4884 = vst.msk [vmem:[%s9786_s12 + $0xc8] sm:$0xff] %vm4269_vm12, %v4370_v35 }
 0x3a4   : > { %4537 = vst [vmem:[%s10039_s5 + $0x108] sm:$0xff] (%p5270_p5), %v4536_v3 }
 0x3aa   : > { %v4325_v12 = vpop.permute.xlu1 %4324  ;;  %v4327_v48 = vpop.permute.xlu2 %4326  ;;  %v4568_v58 = vld [vmem:[%s9786_s12 + $0xc8] sm:$0xff] (%p5270_p5) }
 0x3ab   : > { %4873 = vst.msk [vmem:[%s9786_s12 + $0x70] sm:$0xff] %vm4269_vm12, %v4325_v12  ;;  %v4304_v50 = vpop.permute.xlu0 %4303 }
 0x3ac   : > { %4874 = vst.msk [vmem:[%s9786_s12 + $0x78] sm:$0xff] %vm4269_vm12, %v4327_v48 }
 0x3ad   : > { %4869 = vst.msk [vmem:[%s9786_s12 + $0x50] sm:$0xff] %vm4269_vm12, %v4304_v50 }
 0x3ae   : > { %4569 = vst [vmem:[%s10039_s5 + $0x308] sm:$0xff] (%p5270_p5), %v4568_v58 }
 0x3b2   : > { %v4351_v60 = vpop.permute.xlu2 %4350  ;;  %v4281_v63 = vpop.permute.xlu1 %4280  ;;  %v4546_v22 = vld [vmem:[%s9786_s12 + $0x70] sm:$0xff] (%p5270_p5) }
 0x3b3   : > { %4881 = vst.msk [vmem:[%s9786_s12 + $0xb0] sm:$0xff] %vm4269_vm12, %v4351_v60  ;;  %v4323_v33 = vpop.permute.xlu0 %4322  ;;  %v4548_v20 = vld [vmem:[%s9786_s12 + $0x78] sm:$0xff] (%p5270_p5) }
 0x3b4   : > { %4864 = vst.msk [vmem:[%s9786_s12 + $0x28] sm:$0xff] %vm4269_vm12, %v4281_v63  ;;  %v4538_v31 = vld [vmem:[%s9786_s12 + $0x50] sm:$0xff] (%p5270_p5) }
 0x3b5   : > { %4872 = vst.msk [vmem:[%s9786_s12 + $0x68] sm:$0xff] %vm4269_vm12, %v4323_v33 }
 0x3b6   : > { %4539 = vst [vmem:[%s10039_s5 + $0x110] sm:$0xff] (%p5270_p5), %v4538_v31 }
 0x3b7   : > { %4547 = vst [vmem:[%s10039_s5 + $0x190] sm:$0xff] (%p5270_p5), %v4546_v22 }
 0x3b8   : > { %4549 = vst [vmem:[%s10039_s5 + $0x198] sm:$0xff] (%p5270_p5), %v4548_v20 }
 0x3ba   : > { %v4395_v56 = vpop.permute.xlu2 %4394  ;;  %v4349_v1 = vpop.permute.xlu1 %4348  ;;  %v4562_v10 = vld [vmem:[%s9786_s12 + $0xb0] sm:$0xff] (%p5270_p5) }
 0x3bb   : > { %4890 = vst.msk [vmem:[%s9786_s12 + $0xf8] sm:$0xff] %vm4269_vm12, %v4395_v56  ;;  %v4285_v26 = vpop.permute.xlu0 %4284  ;;  %v4528_v21 = vld [vmem:[%s9786_s12 + $0x28] sm:$0xff] (%p5270_p5) }
 0x3bc   : > { %4880 = vst.msk [vmem:[%s9786_s12 + $0xa8] sm:$0xff] %vm4269_vm12, %v4349_v1  ;;  %v4544_v2 = vld [vmem:[%s9786_s12 + $0x68] sm:$0xff] (%p5270_p5) }
 0x3bd   : > { %4866 = vst.msk [vmem:[%s9786_s12 + $0x38] sm:$0xff] %vm4269_vm12, %v4285_v26 }
 0x3be   : > { %4529 = vst [vmem:[%s10039_s5 + $0x88] sm:$0xff] (%p5270_p5), %v4528_v21 }
 0x3bf   : > { %4545 = vst [vmem:[%s10039_s5 + $0x188] sm:$0xff] (%p5270_p5), %v4544_v2 }
 0x3c0   : > { %4563 = vst [vmem:[%s10039_s5 + $0x290] sm:$0xff] (%p5270_p5), %v4562_v10 }
 0x3c2   : > { %v4306_v5 = vpop.permute.xlu1 %4305  ;;  %v4580_v59 = vld [vmem:[%s9786_s12 + $0xf8] sm:$0xff] (%p5270_p5) }
 0x3c3   : > { %4870 = vst.msk [vmem:[%s9786_s12 + $0x58] sm:$0xff] %vm4269_vm12, %v4306_v5  ;;  %v4372_v19 = vpop.permute.xlu0 %4371  ;;  %v4560_v30 = vld [vmem:[%s9786_s12 + $0xa8] sm:$0xff] (%p5270_p5) }
 0x3c4   : > { %4885 = vst.msk [vmem:[%s9786_s12 + $0xd0] sm:$0xff] %vm4269_vm12, %v4372_v19  ;;  %v4532_v7 = vld [vmem:[%s9786_s12 + $0x38] sm:$0xff] (%p5270_p5) }
 0x3c5   : > { %4533 = vst [vmem:[%s10039_s5 + $0x98] sm:$0xff] (%p5270_p5), %v4532_v7 }
 0x3c6   : > { %4561 = vst [vmem:[%s10039_s5 + $0x288] sm:$0xff] (%p5270_p5), %v4560_v30 }
 0x3c7   : > { %4581 = vst [vmem:[%s10039_s5 + $0x398] sm:$0xff] (%p5270_p5), %v4580_v59 }
 0x3ca   : > { %v4374_v11 = vpop.permute.xlu1 %4373  ;;  %v4540_v47 = vld [vmem:[%s9786_s12 + $0x58] sm:$0xff] (%p5270_p5) }
 0x3cb   : > { %4886 = vst.msk [vmem:[%s9786_s12 + $0xd8] sm:$0xff] %vm4269_vm12, %v4374_v11  ;;  %v4353_v40 = vpop.permute.xlu0 %4352  ;;  %v4570_v9 = vld [vmem:[%s9786_s12 + $0xd0] sm:$0xff] (%p5270_p5) }
 0x3cc   : > { %4882 = vst.msk [vmem:[%s9786_s12 + $0xb8] sm:$0xff] %vm4269_vm12, %v4353_v40 }
 0x3cd   : > { %4541 = vst [vmem:[%s10039_s5 + $0x118] sm:$0xff] (%p5270_p5), %v4540_v47 }
 0x3ce   : > { %4571 = vst [vmem:[%s10039_s5 + $0x310] sm:$0xff] (%p5270_p5), %v4570_v9 }
 0x3d0   : > { %4416 = sbr.rel (!%p5270_p5) target bundleno = 989 (0x3dd), region = 74 }
 0x3d2   : > { %v4393_v36 = vpop.permute.xlu1 %4392  ;;  %v4572_v28 = vld [vmem:[%s9786_s12 + $0xd8] sm:$0xff] (%p5270_p5) }
 0x3d3   : > { %4889 = vst.msk [vmem:[%s9786_s12 + $0xf0] sm:$0xff] %vm4269_vm12, %v4393_v36  ;;  %v4391_v13 = vpop.permute.xlu0 %4390  ;;  %v4564_v25 = vld [vmem:[%s9786_s12 + $0xb8] sm:$0xff] (%p5270_p5) }
 0x3d4   : > { %4888 = vst.msk [vmem:[%s9786_s12 + $0xe8] sm:$0xff] %vm4269_vm12, %v4391_v13 }
 0x3d5   : > { %4565 = vst [vmem:[%s10039_s5 + $0x298] sm:$0xff] %v4564_v25 }
 0x3d6   : > { %4573 = vst [vmem:[%s10039_s5 + $0x318] sm:$0xff] %v4572_v28 }
 0x3da   : > { %v4578_v44 = vld [vmem:[%s9786_s12 + $0xf0] sm:$0xff] }
 0x3db   : > { %v4576_v14 = vld [vmem:[%s9786_s12 + $0xe8] sm:$0xff]  ;;  %4579 = vst [vmem:[%s10039_s5 + $0x390] sm:$0xff] %v4578_v44 }
 0x3dc   : > { %4577 = vst [vmem:[%s10039_s5 + $0x388] sm:$0xff] %v4576_v14 }
 0x3dd PF: > { %p10_p11 = scmp.ge.s32.totalorder %s5257_s16, 6   ;;  %s11473_s12 = smov %s5211_s13 }
 0x3de   : > { %s11474_s13 = smov %s5268_s19  ;;  %s11475_s14 = smov %s5257_s16 }
 0x3df   :  { %12 = sbr.rel (!%p10_p11) target bundleno = 2 (0x2), region = 162 }

</bundles_post_ra>
